<compile_context>
chip_gen: v7x
topology: tpu7x:2x2x1
jax: 0.10.0
libtpu: 0.0.40
codegen_flags: <defaults>
</compile_context>

<pallas_src>
import jax
import jax.numpy as jnp
from jax.experimental import pallas as pl
from jax.experimental.pallas import tpu as pltpu


_CONV_CHANNELS = [(1, 4), (4, 8), (8, 16), (16, 32)]
_BN_EPS = 1e-5


# --------------------------- the fused Pallas kernel ------------------------ #

def _custom_net_kernel(x_ref,
                       a1_ref, b1_ref, l1_ref, r1_ref, t1_ref,
                       a2_ref, b2_ref, l2_ref, r2_ref, t2_ref,
                       a3_ref, b3_ref, l3_ref, r3_ref, t3_ref,
                       a4_ref, b4_ref, l4_ref, r4_ref,
                       fw1_ref, fb1_ref, fw2_ref, fb2_ref,
                       o_ref):
    """Whole CustomNet forward for one image; all intermediates stay in VMEM."""

    def conv_relu_pool(inp, a_ref, b_ref, l_ref, r_ref, w_out):
        # Conv2d(k=3, valid): contraction over (ci, dy) is one MXU matmul per
        # kernel column dx; the dx shift is a static lane-offset slice of the
        # (small) input matrix.
        y = jnp.dot(a_ref[0], inp[:, 0:w_out],
                    preferred_element_type=jnp.float32)
        y = y + jnp.dot(a_ref[1], inp[:, 1:1 + w_out],
                        preferred_element_type=jnp.float32)
        y = y + jnp.dot(a_ref[2], inp[:, 2:2 + w_out],
                        preferred_element_type=jnp.float32)
        y = jnp.maximum(y + b_ref[...], 0.0)          # bias + ReLU (VPU)
        # AvgPool2d(2, stride=2): row pooling (0.25 and BN scale folded into
        # l_ref) then column pooling, both on the MXU.
        p = jnp.dot(l_ref[...], y, preferred_element_type=jnp.float32)
        return jnp.dot(p, r_ref[...], preferred_element_type=jnp.float32)

    x = x_ref[0]                                                   # (96, 96)
    p1 = conv_relu_pool(x, a1_ref, b1_ref, l1_ref, r1_ref, 94) + t1_ref[...]   # (188, 47)
    p2 = conv_relu_pool(p1, a2_ref, b2_ref, l2_ref, r2_ref, 45) + t2_ref[...]  # (176, 22)
    p3 = conv_relu_pool(p2, a3_ref, b3_ref, l3_ref, r3_ref, 20) + t3_ref[...]  # (160, 10)
    p4 = conv_relu_pool(p3, a4_ref, b4_ref, l4_ref, r4_ref, 8)                 # (128, 4)

    # ---- fc: Linear(512, 256) + ReLU + Linear(256, 28), two matmuls ----
    # p4[c*4 + h, w] is feature (c, h, w); stack the 4 W-columns into a
    # (512, 1) column ordered (w, c, h).  fw1_ref was repacked in the wrapper
    # to match, reproducing PyTorch's x.view(N, -1) (C, H, W) flatten order.
    p4col = jnp.concatenate(
        [p4[:, 0:1], p4[:, 1:2], p4[:, 2:3], p4[:, 3:4]], axis=0)              # (512, 1)
    h = jnp.dot(fw1_ref[...], p4col, preferred_element_type=jnp.float32) + fb1_ref[...]
    h = jnp.maximum(h, 0.0)                                                    # (256, 1)
    logits = jnp.dot(fw2_ref[...], h, preferred_element_type=jnp.float32) + fb2_ref[...]
    o_ref[0] = logits                                                          # (28, 1)


# -------------------- wrapper-side structured constant builders -------------- #

def _expand_conv(w, h_in):
    """Expand (Cout, Cin, 3, 3) conv weights for the (C*H, W) row layout.

    Returns A with shape (3, Cout*Hout, Cin*Hin) such that
      A[dx, co*Hout + h, ci*Hin + y] = w[co, ci, y - h, dx]   for 0 <= y-h < 3
    so that  sum_dx A[dx] @ In[:, dx:dx+Wout]  is the valid 3x3 convolution.
    """
    c_out, c_in, _, _ = w.shape
    h_out = h_in - 2
    h = jnp.arange(h_out)
    y = jnp.arange(h_in)
    d = y[None, :] - h[:, None]                    # (h_out, h_in) == dy
    valid = (d >= 0) & (d < 3)
    dc = jnp.clip(d, 0, 2)
    g = w[:, :, dc, :]                             # (c_out, c_in, h_out, h_in, 3)
    g = jnp.where(valid[None, None, :, :, None], g, 0.0)
    return jnp.transpose(g, (4, 0, 2, 1, 3)).reshape(3, c_out * h_out, c_in * h_in)


def _pool_left(c, h_conv, scale_c):
    """(c*Hp, c*h_conv) row-pooling matrix; 0.25 and BN scale are folded in."""
    hp = h_conv // 2
    r = jnp.arange(c * hp)
    s = jnp.arange(c * h_conv)
    rc, ri = r // hp, r % hp
    sc, sh = s // h_conv, s % h_conv
    m = ((rc[:, None] == sc[None, :])
         & ((sh[None, :] // 2) == ri[:, None])
         & (sh[None, :] < 2 * hp))                 # floor(H/2) like AvgPool2d
    return m.astype(jnp.float32) * (0.25 * scale_c)[rc][:, None]


def _pool_right(w_conv):
    """(w_conv, Wp) 0/1 column-pooling matrix (floor(W/2) outputs)."""
    wp = w_conv // 2
    w = jnp.arange(w_conv)
    j = jnp.arange(wp)
    m = ((w[:, None] // 2) == j[None, :]) & (w[:, None] < 2 * wp)
    return m.astype(jnp.float32)


# ------------------------------- parameters --------------------------------- #

def init_params(key):
    params = {"conv": [], "bn": [], "fc": None}
    keys = jax.random.split(key, 12)
    ki = iter(keys)
    for idx, (cin, cout) in enumerate(_CONV_CHANNELS):
        w = 0.1 * jax.random.normal(next(ki), (cout, cin, 3, 3), jnp.float32)
        b = 0.05 * jax.random.normal(next(ki), (cout,), jnp.float32)
        params["conv"].append((w, b))
        if idx < 3:
            # BatchNorm2d only follows the first three conv blocks.
            # Fresh init: gamma=1, beta=0, running_mean=0, running_var=1.
            gamma = jnp.ones((cout,), jnp.float32)
            beta = jnp.zeros((cout,), jnp.float32)
            rmean = jnp.zeros((cout,), jnp.float32)
            rvar = jnp.ones((cout,), jnp.float32)
            scale = gamma / jnp.sqrt(rvar + _BN_EPS)
            shift = beta - rmean * scale
            params["bn"].append((scale, shift))
    # fc1 weight rows follow PyTorch flatten order (c, h, w) of the (32,4,4) map.
    w1 = 0.05 * jax.random.normal(next(ki), (512, 256), jnp.float32)
    b1 = 0.05 * jax.random.normal(next(ki), (256,), jnp.float32)
    w2 = 0.05 * jax.random.normal(next(ki), (256, 28), jnp.float32)
    b2 = 0.05 * jax.random.normal(next(ki), (28,), jnp.float32)
    params["fc"] = (w1, b1, w2, b2)
    return params


# ------------------------------ full forward -------------------------------- #

@jax.jit
def custom_net_forward(x_nchw, params):
    """Forward pass of CustomNet. x_nchw: (N, 1, 96, 96) float32 -> (N, 28)."""
    (w1, b1), (w2, b2), (w3, b3), (w4, b4) = params["conv"]
    (s1, t1), (s2, t2), (s3, t3) = params["bn"]
    fw1, fb1, fw2, fb2 = params["fc"]

    n = x_nchw.shape[0]
    x = x_nchw[:, 0, :, :]                         # (N, 96, 96), C_in == 1

    # --- structured constant operands (tiny XLA work, shared by all images) ---
    a1 = _expand_conv(w1, 96)                      # (3, 376,  96)
    a2 = _expand_conv(w2, 47)                      # (3, 360, 188)
    a3 = _expand_conv(w3, 22)                      # (3, 320, 176)
    a4 = _expand_conv(w4, 10)                      # (3, 256, 160)

    b1r = jnp.repeat(b1, 94)[:, None]              # (376, 1) conv bias per row
    b2r = jnp.repeat(b2, 45)[:, None]              # (360, 1)
    b3r = jnp.repeat(b3, 20)[:, None]              # (320, 1)
    b4r = jnp.repeat(b4, 8)[:, None]               # (256, 1)

    l1 = _pool_left(4, 94, s1);  r1 = _pool_right(94)    # (188,376), (94,47)
    l2 = _pool_left(8, 45, s2);  r2 = _pool_right(45)    # (176,360), (45,22)
    l3 = _pool_left(16, 20, s3); r3 = _pool_right(20)    # (160,320), (20,10)
    l4 = _pool_left(32, 8, jnp.ones((32,), jnp.float32))
    r4 = _pool_right(8)                                  # (128,256), (8,4)

    t1r = jnp.repeat(t1, 47)[:, None]              # (188, 1) BN shift per row
    t2r = jnp.repeat(t2, 22)[:, None]              # (176, 1)
    t3r = jnp.repeat(t3, 10)[:, None]              # (160, 1)

    # FC repack: kernel builds the feature column in (w, c, h) order.
    fw1t = jnp.transpose(fw1.reshape(32, 4, 4, 256), (3, 2, 0, 1)).reshape(256, 512)
    fb1c = fb1[:, None]                            # (256, 1)
    fw2t = fw2.T                                   # (28, 256)
    fb2c = fb2[:, None]                            # (28, 1)

    consts = [a1, b1r, l1, r1, t1r,
              a2, b2r, l2, r2, t2r,
              a3, b3r, l3, r3, t3r,
              a4, b4r, l4, r4,
              fw1t, fb1c, fw2t, fb2c]

    def _const_spec(arr):
        # Full-array block, same block for every grid step (fetched once).
        return pl.BlockSpec(arr.shape, lambda i, _nd=arr.ndim: (0,) * _nd)

    out = pl.pallas_call(
        _custom_net_kernel,
        out_shape=jax.ShapeDtypeStruct((n, 28, 1), jnp.float32),
        grid=(n,),
        in_specs=[pl.BlockSpec((1, 96, 96), lambda i: (i, 0, 0))]
                 + [_const_spec(c) for c in consts],
        out_specs=pl.BlockSpec((1, 28, 1), lambda i: (i, 0, 0)),
        compiler_params=pltpu.CompilerParams(
            dimension_semantics=("parallel",),
            vmem_limit_bytes=28 * 1024 * 1024,
        ),
    )(x, *consts)

    return out[:, :, 0]                            # (N, 28)


if __name__ == "__main__":
    key = jax.random.PRNGKey(0)
    kx, kp = jax.random.split(key)
    # Input size 96x96 is implied by the module: after 4x(conv3 valid + pool2)
    # the feature map is 32 x 4 x 4 = 512, matching nn.Linear(512, 256).
    x = jax.random.normal(kx, (2, 1, 96, 96), jnp.float32)   # NCHW like PyTorch
    params = init_params(kp)

    out = jax.block_until_ready(custom_net_forward(x, params))
    assert out.shape == (2, 28), out.shape
    assert out.dtype == jnp.float32
    assert bool(jnp.all(jnp.isfinite(out)))
    print("KERNEL_OK")
</pallas_src>

<mosaic_0001>
module attributes {stable_mosaic.version = 11 : i64} {
  func.func @_custom_net_kernel(%arg0: i32, %arg1: memref<1x96x96xf32, #tpu.memory_space<vmem>>, %arg2: memref<3x376x96xf32, #tpu.memory_space<vmem>>, %arg3: memref<376x1xf32, #tpu.memory_space<vmem>>, %arg4: memref<188x376xf32, #tpu.memory_space<vmem>>, %arg5: memref<94x47xf32, #tpu.memory_space<vmem>>, %arg6: memref<188x1xf32, #tpu.memory_space<vmem>>, %arg7: memref<3x360x188xf32, #tpu.memory_space<vmem>>, %arg8: memref<360x1xf32, #tpu.memory_space<vmem>>, %arg9: memref<176x360xf32, #tpu.memory_space<vmem>>, %arg10: memref<45x22xf32, #tpu.memory_space<vmem>>, %arg11: memref<176x1xf32, #tpu.memory_space<vmem>>, %arg12: memref<3x320x176xf32, #tpu.memory_space<vmem>>, %arg13: memref<320x1xf32, #tpu.memory_space<vmem>>, %arg14: memref<160x320xf32, #tpu.memory_space<vmem>>, %arg15: memref<20x10xf32, #tpu.memory_space<vmem>>, %arg16: memref<160x1xf32, #tpu.memory_space<vmem>>, %arg17: memref<3x256x160xf32, #tpu.memory_space<vmem>>, %arg18: memref<256x1xf32, #tpu.memory_space<vmem>>, %arg19: memref<128x256xf32, #tpu.memory_space<vmem>>, %arg20: memref<8x4xf32, #tpu.memory_space<vmem>>, %arg21: memref<256x512xf32, #tpu.memory_space<vmem>>, %arg22: memref<256x1xf32, #tpu.memory_space<vmem>>, %arg23: memref<28x256xf32, #tpu.memory_space<vmem>>, %arg24: memref<28x1xf32, #tpu.memory_space<vmem>>, %arg25: memref<1x28x1xf32, #tpu.memory_space<vmem>>) attributes {dimension_semantics = [#tpu.dimension_semantics<parallel>], iteration_bounds = array<i64: 2>, scalar_prefetch = 0 : i64, scratch_operands = 0 : i64, tpu.core_type = #tpu.core_type<tc>, window_params = [{transform_indices = @transform_0, window_bounds = array<i64: 1, 96, 96>}, {pipeline_mode = #tpu.pipeline_mode<synchronous>, transform_indices = @transform_1, window_bounds = array<i64: 3, 376, 96>}, {pipeline_mode = #tpu.pipeline_mode<synchronous>, transform_indices = @transform_2, window_bounds = array<i64: 376, 1>}, {pipeline_mode = #tpu.pipeline_mode<synchronous>, transform_indices = @transform_3, window_bounds = array<i64: 188, 376>}, {pipeline_mode = #tpu.pipeline_mode<synchronous>, transform_indices = @transform_4, window_bounds = array<i64: 94, 47>}, {pipeline_mode = #tpu.pipeline_mode<synchronous>, transform_indices = @transform_5, window_bounds = array<i64: 188, 1>}, {pipeline_mode = #tpu.pipeline_mode<synchronous>, transform_indices = @transform_6, window_bounds = array<i64: 3, 360, 188>}, {pipeline_mode = #tpu.pipeline_mode<synchronous>, transform_indices = @transform_7, window_bounds = array<i64: 360, 1>}, {pipeline_mode = #tpu.pipeline_mode<synchronous>, transform_indices = @transform_8, window_bounds = array<i64: 176, 360>}, {pipeline_mode = #tpu.pipeline_mode<synchronous>, transform_indices = @transform_9, window_bounds = array<i64: 45, 22>}, {pipeline_mode = #tpu.pipeline_mode<synchronous>, transform_indices = @transform_10, window_bounds = array<i64: 176, 1>}, {pipeline_mode = #tpu.pipeline_mode<synchronous>, transform_indices = @transform_11, window_bounds = array<i64: 3, 320, 176>}, {pipeline_mode = #tpu.pipeline_mode<synchronous>, transform_indices = @transform_12, window_bounds = array<i64: 320, 1>}, {pipeline_mode = #tpu.pipeline_mode<synchronous>, transform_indices = @transform_13, window_bounds = array<i64: 160, 320>}, {pipeline_mode = #tpu.pipeline_mode<synchronous>, transform_indices = @transform_14, window_bounds = array<i64: 20, 10>}, {pipeline_mode = #tpu.pipeline_mode<synchronous>, transform_indices = @transform_15, window_bounds = array<i64: 160, 1>}, {pipeline_mode = #tpu.pipeline_mode<synchronous>, transform_indices = @transform_16, window_bounds = array<i64: 3, 256, 160>}, {pipeline_mode = #tpu.pipeline_mode<synchronous>, transform_indices = @transform_17, window_bounds = array<i64: 256, 1>}, {pipeline_mode = #tpu.pipeline_mode<synchronous>, transform_indices = @transform_18, window_bounds = array<i64: 128, 256>}, {pipeline_mode = #tpu.pipeline_mode<synchronous>, transform_indices = @transform_19, window_bounds = array<i64: 8, 4>}, {pipeline_mode = #tpu.pipeline_mode<synchronous>, transform_indices = @transform_20, window_bounds = array<i64: 256, 512>}, {pipeline_mode = #tpu.pipeline_mode<synchronous>, transform_indices = @transform_21, window_bounds = array<i64: 256, 1>}, {pipeline_mode = #tpu.pipeline_mode<synchronous>, transform_indices = @transform_22, window_bounds = array<i64: 28, 256>}, {pipeline_mode = #tpu.pipeline_mode<synchronous>, transform_indices = @transform_23, window_bounds = array<i64: 28, 1>}, {transform_indices = @transform_24, window_bounds = array<i64: 1, 28, 1>}]} {
    %c0 = arith.constant 0 : index
    %c0_0 = arith.constant 0 : index
    %c0_1 = arith.constant 0 : index
    %0 = vector.load %arg1[%c0, %c0_0, %c0_1] : memref<1x96x96xf32, #tpu.memory_space<vmem>>, vector<1x96x96xf32>
    %1 = vector.shape_cast %0 : vector<1x96x96xf32> to vector<96x96xf32>
    %c0_2 = arith.constant 0 : index
    %c0_3 = arith.constant 0 : index
    %c0_4 = arith.constant 0 : index
    %2 = vector.load %arg2[%c0_2, %c0_3, %c0_4] : memref<3x376x96xf32, #tpu.memory_space<vmem>>, vector<1x376x96xf32>
    %3 = vector.shape_cast %2 : vector<1x376x96xf32> to vector<376x96xf32>
    %4 = vector.extract_strided_slice %1 {offsets = [0, 0], sizes = [96, 94], strides = [1, 1]} : vector<96x96xf32> to vector<96x94xf32>
    %cst = arith.constant dense<0.000000e+00> : vector<376x94xf32>
    %5 = tpu.matmul %3, %4, %cst {dimension_numbers = #tpu.dot_dimension_numbers<[1], [0], [0], [1], [0, 0, 1, 1], [], []>} : vector<376x96xf32>, vector<96x94xf32>, vector<376x94xf32> -> vector<376x94xf32>
    %c1 = arith.constant 1 : index
    %c0_5 = arith.constant 0 : index
    %c0_6 = arith.constant 0 : index
    %6 = vector.load %arg2[%c1, %c0_5, %c0_6] : memref<3x376x96xf32, #tpu.memory_space<vmem>>, vector<1x376x96xf32>
    %7 = vector.shape_cast %6 : vector<1x376x96xf32> to vector<376x96xf32>
    %8 = vector.extract_strided_slice %1 {offsets = [0, 1], sizes = [96, 94], strides = [1, 1]} : vector<96x96xf32> to vector<96x94xf32>
    %cst_7 = arith.constant dense<0.000000e+00> : vector<376x94xf32>
    %9 = tpu.matmul %7, %8, %cst_7 {dimension_numbers = #tpu.dot_dimension_numbers<[1], [0], [0], [1], [0, 0, 1, 1], [], []>} : vector<376x96xf32>, vector<96x94xf32>, vector<376x94xf32> -> vector<376x94xf32>
    %10 = arith.addf %5, %9 : vector<376x94xf32>
    %c2 = arith.constant 2 : index
    %c0_8 = arith.constant 0 : index
    %c0_9 = arith.constant 0 : index
    %11 = vector.load %arg2[%c2, %c0_8, %c0_9] : memref<3x376x96xf32, #tpu.memory_space<vmem>>, vector<1x376x96xf32>
    %12 = vector.shape_cast %11 : vector<1x376x96xf32> to vector<376x96xf32>
    %13 = vector.extract_strided_slice %1 {offsets = [0, 2], sizes = [96, 94], strides = [1, 1]} : vector<96x96xf32> to vector<96x94xf32>
    %cst_10 = arith.constant dense<0.000000e+00> : vector<376x94xf32>
    %14 = tpu.matmul %12, %13, %cst_10 {dimension_numbers = #tpu.dot_dimension_numbers<[1], [0], [0], [1], [0, 0, 1, 1], [], []>} : vector<376x96xf32>, vector<96x94xf32>, vector<376x94xf32> -> vector<376x94xf32>
    %15 = arith.addf %10, %14 : vector<376x94xf32>
    %c0_11 = arith.constant 0 : index
    %c0_12 = arith.constant 0 : index
    %16 = vector.load %arg3[%c0_11, %c0_12] : memref<376x1xf32, #tpu.memory_space<vmem>>, vector<376x1xf32>
    %17 = vector.broadcast %16 : vector<376x1xf32> to vector<376x94xf32>
    %18 = arith.addf %15, %17 : vector<376x94xf32>
    %cst_13 = arith.constant 0.000000e+00 : f32
    %19 = vector.broadcast %cst_13 : f32 to vector<376x94xf32>
    %20 = arith.maximumf %18, %19 : vector<376x94xf32>
    %c0_14 = arith.constant 0 : index
    %c0_15 = arith.constant 0 : index
    %21 = vector.load %arg4[%c0_14, %c0_15] : memref<188x376xf32, #tpu.memory_space<vmem>>, vector<188x376xf32>
    %cst_16 = arith.constant dense<0.000000e+00> : vector<188x94xf32>
    %22 = tpu.matmul %21, %20, %cst_16 {dimension_numbers = #tpu.dot_dimension_numbers<[1], [0], [0], [1], [0, 0, 1, 1], [], []>} : vector<188x376xf32>, vector<376x94xf32>, vector<188x94xf32> -> vector<188x94xf32>
    %c0_17 = arith.constant 0 : index
    %c0_18 = arith.constant 0 : index
    %23 = vector.load %arg5[%c0_17, %c0_18] : memref<94x47xf32, #tpu.memory_space<vmem>>, vector<94x47xf32>
    %cst_19 = arith.constant dense<0.000000e+00> : vector<188x47xf32>
    %24 = tpu.matmul %22, %23, %cst_19 {dimension_numbers = #tpu.dot_dimension_numbers<[1], [0], [0], [1], [0, 0, 1, 1], [], []>} : vector<188x94xf32>, vector<94x47xf32>, vector<188x47xf32> -> vector<188x47xf32>
    %c0_20 = arith.constant 0 : index
    %c0_21 = arith.constant 0 : index
    %25 = vector.load %arg6[%c0_20, %c0_21] : memref<188x1xf32, #tpu.memory_space<vmem>>, vector<188x1xf32>
    %26 = vector.broadcast %25 : vector<188x1xf32> to vector<188x47xf32>
    %27 = arith.addf %24, %26 : vector<188x47xf32>
    %c0_22 = arith.constant 0 : index
    %c0_23 = arith.constant 0 : index
    %c0_24 = arith.constant 0 : index
    %28 = vector.load %arg7[%c0_22, %c0_23, %c0_24] : memref<3x360x188xf32, #tpu.memory_space<vmem>>, vector<1x360x188xf32>
    %29 = vector.shape_cast %28 : vector<1x360x188xf32> to vector<360x188xf32>
    %30 = vector.extract_strided_slice %27 {offsets = [0, 0], sizes = [188, 45], strides = [1, 1]} : vector<188x47xf32> to vector<188x45xf32>
    %cst_25 = arith.constant dense<0.000000e+00> : vector<360x45xf32>
    %31 = tpu.matmul %29, %30, %cst_25 {dimension_numbers = #tpu.dot_dimension_numbers<[1], [0], [0], [1], [0, 0, 1, 1], [], []>} : vector<360x188xf32>, vector<188x45xf32>, vector<360x45xf32> -> vector<360x45xf32>
    %c1_26 = arith.constant 1 : index
    %c0_27 = arith.constant 0 : index
    %c0_28 = arith.constant 0 : index
    %32 = vector.load %arg7[%c1_26, %c0_27, %c0_28] : memref<3x360x188xf32, #tpu.memory_space<vmem>>, vector<1x360x188xf32>
    %33 = vector.shape_cast %32 : vector<1x360x188xf32> to vector<360x188xf32>
    %34 = vector.extract_strided_slice %27 {offsets = [0, 1], sizes = [188, 45], strides = [1, 1]} : vector<188x47xf32> to vector<188x45xf32>
    %cst_29 = arith.constant dense<0.000000e+00> : vector<360x45xf32>
    %35 = tpu.matmul %33, %34, %cst_29 {dimension_numbers = #tpu.dot_dimension_numbers<[1], [0], [0], [1], [0, 0, 1, 1], [], []>} : vector<360x188xf32>, vector<188x45xf32>, vector<360x45xf32> -> vector<360x45xf32>
    %36 = arith.addf %31, %35 : vector<360x45xf32>
    %c2_30 = arith.constant 2 : index
    %c0_31 = arith.constant 0 : index
    %c0_32 = arith.constant 0 : index
    %37 = vector.load %arg7[%c2_30, %c0_31, %c0_32] : memref<3x360x188xf32, #tpu.memory_space<vmem>>, vector<1x360x188xf32>
    %38 = vector.shape_cast %37 : vector<1x360x188xf32> to vector<360x188xf32>
    %39 = vector.extract_strided_slice %27 {offsets = [0, 2], sizes = [188, 45], strides = [1, 1]} : vector<188x47xf32> to vector<188x45xf32>
    %cst_33 = arith.constant dense<0.000000e+00> : vector<360x45xf32>
    %40 = tpu.matmul %38, %39, %cst_33 {dimension_numbers = #tpu.dot_dimension_numbers<[1], [0], [0], [1], [0, 0, 1, 1], [], []>} : vector<360x188xf32>, vector<188x45xf32>, vector<360x45xf32> -> vector<360x45xf32>
    %41 = arith.addf %36, %40 : vector<360x45xf32>
    %c0_34 = arith.constant 0 : index
    %c0_35 = arith.constant 0 : index
    %42 = vector.load %arg8[%c0_34, %c0_35] : memref<360x1xf32, #tpu.memory_space<vmem>>, vector<360x1xf32>
    %43 = vector.broadcast %42 : vector<360x1xf32> to vector<360x45xf32>
    %44 = arith.addf %41, %43 : vector<360x45xf32>
    %cst_36 = arith.constant 0.000000e+00 : f32
    %45 = vector.broadcast %cst_36 : f32 to vector<360x45xf32>
    %46 = arith.maximumf %44, %45 : vector<360x45xf32>
    %c0_37 = arith.constant 0 : index
    %c0_38 = arith.constant 0 : index
    %47 = vector.load %arg9[%c0_37, %c0_38] : memref<176x360xf32, #tpu.memory_space<vmem>>, vector<176x360xf32>
    %cst_39 = arith.constant dense<0.000000e+00> : vector<176x45xf32>
    %48 = tpu.matmul %47, %46, %cst_39 {dimension_numbers = #tpu.dot_dimension_numbers<[1], [0], [0], [1], [0, 0, 1, 1], [], []>} : vector<176x360xf32>, vector<360x45xf32>, vector<176x45xf32> -> vector<176x45xf32>
    %c0_40 = arith.constant 0 : index
    %c0_41 = arith.constant 0 : index
    %49 = vector.load %arg10[%c0_40, %c0_41] : memref<45x22xf32, #tpu.memory_space<vmem>>, vector<45x22xf32>
    %cst_42 = arith.constant dense<0.000000e+00> : vector<176x22xf32>
    %50 = tpu.matmul %48, %49, %cst_42 {dimension_numbers = #tpu.dot_dimension_numbers<[1], [0], [0], [1], [0, 0, 1, 1], [], []>} : vector<176x45xf32>, vector<45x22xf32>, vector<176x22xf32> -> vector<176x22xf32>
    %c0_43 = arith.constant 0 : index
    %c0_44 = arith.constant 0 : index
    %51 = vector.load %arg11[%c0_43, %c0_44] : memref<176x1xf32, #tpu.memory_space<vmem>>, vector<176x1xf32>
    %52 = vector.broadcast %51 : vector<176x1xf32> to vector<176x22xf32>
    %53 = arith.addf %50, %52 : vector<176x22xf32>
    %c0_45 = arith.constant 0 : index
    %c0_46 = arith.constant 0 : index
    %c0_47 = arith.constant 0 : index
    %54 = vector.load %arg12[%c0_45, %c0_46, %c0_47] : memref<3x320x176xf32, #tpu.memory_space<vmem>>, vector<1x320x176xf32>
    %55 = vector.shape_cast %54 : vector<1x320x176xf32> to vector<320x176xf32>
    %56 = vector.extract_strided_slice %53 {offsets = [0, 0], sizes = [176, 20], strides = [1, 1]} : vector<176x22xf32> to vector<176x20xf32>
    %cst_48 = arith.constant dense<0.000000e+00> : vector<320x20xf32>
    %57 = tpu.matmul %55, %56, %cst_48 {dimension_numbers = #tpu.dot_dimension_numbers<[1], [0], [0], [1], [0, 0, 1, 1], [], []>} : vector<320x176xf32>, vector<176x20xf32>, vector<320x20xf32> -> vector<320x20xf32>
    %c1_49 = arith.constant 1 : index
    %c0_50 = arith.constant 0 : index
    %c0_51 = arith.constant 0 : index
    %58 = vector.load %arg12[%c1_49, %c0_50, %c0_51] : memref<3x320x176xf32, #tpu.memory_space<vmem>>, vector<1x320x176xf32>
    %59 = vector.shape_cast %58 : vector<1x320x176xf32> to vector<320x176xf32>
    %60 = vector.extract_strided_slice %53 {offsets = [0, 1], sizes = [176, 20], strides = [1, 1]} : vector<176x22xf32> to vector<176x20xf32>
    %cst_52 = arith.constant dense<0.000000e+00> : vector<320x20xf32>
    %61 = tpu.matmul %59, %60, %cst_52 {dimension_numbers = #tpu.dot_dimension_numbers<[1], [0], [0], [1], [0, 0, 1, 1], [], []>} : vector<320x176xf32>, vector<176x20xf32>, vector<320x20xf32> -> vector<320x20xf32>
    %62 = arith.addf %57, %61 : vector<320x20xf32>
    %c2_53 = arith.constant 2 : index
    %c0_54 = arith.constant 0 : index
    %c0_55 = arith.constant 0 : index
    %63 = vector.load %arg12[%c2_53, %c0_54, %c0_55] : memref<3x320x176xf32, #tpu.memory_space<vmem>>, vector<1x320x176xf32>
    %64 = vector.shape_cast %63 : vector<1x320x176xf32> to vector<320x176xf32>
    %65 = vector.extract_strided_slice %53 {offsets = [0, 2], sizes = [176, 20], strides = [1, 1]} : vector<176x22xf32> to vector<176x20xf32>
    %cst_56 = arith.constant dense<0.000000e+00> : vector<320x20xf32>
    %66 = tpu.matmul %64, %65, %cst_56 {dimension_numbers = #tpu.dot_dimension_numbers<[1], [0], [0], [1], [0, 0, 1, 1], [], []>} : vector<320x176xf32>, vector<176x20xf32>, vector<320x20xf32> -> vector<320x20xf32>
    %67 = arith.addf %62, %66 : vector<320x20xf32>
    %c0_57 = arith.constant 0 : index
    %c0_58 = arith.constant 0 : index
    %68 = vector.load %arg13[%c0_57, %c0_58] : memref<320x1xf32, #tpu.memory_space<vmem>>, vector<320x1xf32>
    %69 = vector.broadcast %68 : vector<320x1xf32> to vector<320x20xf32>
    %70 = arith.addf %67, %69 : vector<320x20xf32>
    %cst_59 = arith.constant 0.000000e+00 : f32
    %71 = vector.broadcast %cst_59 : f32 to vector<320x20xf32>
    %72 = arith.maximumf %70, %71 : vector<320x20xf32>
    %c0_60 = arith.constant 0 : index
    %c0_61 = arith.constant 0 : index
    %73 = vector.load %arg14[%c0_60, %c0_61] : memref<160x320xf32, #tpu.memory_space<vmem>>, vector<160x320xf32>
    %cst_62 = arith.constant dense<0.000000e+00> : vector<160x20xf32>
    %74 = tpu.matmul %73, %72, %cst_62 {dimension_numbers = #tpu.dot_dimension_numbers<[1], [0], [0], [1], [0, 0, 1, 1], [], []>} : vector<160x320xf32>, vector<320x20xf32>, vector<160x20xf32> -> vector<160x20xf32>
    %c0_63 = arith.constant 0 : index
    %c0_64 = arith.constant 0 : index
    %75 = vector.load %arg15[%c0_63, %c0_64] : memref<20x10xf32, #tpu.memory_space<vmem>>, vector<20x10xf32>
    %cst_65 = arith.constant dense<0.000000e+00> : vector<160x10xf32>
    %76 = tpu.matmul %74, %75, %cst_65 {dimension_numbers = #tpu.dot_dimension_numbers<[1], [0], [0], [1], [0, 0, 1, 1], [], []>} : vector<160x20xf32>, vector<20x10xf32>, vector<160x10xf32> -> vector<160x10xf32>
    %c0_66 = arith.constant 0 : index
    %c0_67 = arith.constant 0 : index
    %77 = vector.load %arg16[%c0_66, %c0_67] : memref<160x1xf32, #tpu.memory_space<vmem>>, vector<160x1xf32>
    %78 = vector.broadcast %77 : vector<160x1xf32> to vector<160x10xf32>
    %79 = arith.addf %76, %78 : vector<160x10xf32>
    %c0_68 = arith.constant 0 : index
    %c0_69 = arith.constant 0 : index
    %c0_70 = arith.constant 0 : index
    %80 = vector.load %arg17[%c0_68, %c0_69, %c0_70] : memref<3x256x160xf32, #tpu.memory_space<vmem>>, vector<1x256x160xf32>
    %81 = vector.shape_cast %80 : vector<1x256x160xf32> to vector<256x160xf32>
    %82 = vector.extract_strided_slice %79 {offsets = [0, 0], sizes = [160, 8], strides = [1, 1]} : vector<160x10xf32> to vector<160x8xf32>
    %cst_71 = arith.constant dense<0.000000e+00> : vector<256x8xf32>
    %83 = tpu.matmul %81, %82, %cst_71 {dimension_numbers = #tpu.dot_dimension_numbers<[1], [0], [0], [1], [0, 0, 1, 1], [], []>} : vector<256x160xf32>, vector<160x8xf32>, vector<256x8xf32> -> vector<256x8xf32>
    %c1_72 = arith.constant 1 : index
    %c0_73 = arith.constant 0 : index
    %c0_74 = arith.constant 0 : index
    %84 = vector.load %arg17[%c1_72, %c0_73, %c0_74] : memref<3x256x160xf32, #tpu.memory_space<vmem>>, vector<1x256x160xf32>
    %85 = vector.shape_cast %84 : vector<1x256x160xf32> to vector<256x160xf32>
    %86 = vector.extract_strided_slice %79 {offsets = [0, 1], sizes = [160, 8], strides = [1, 1]} : vector<160x10xf32> to vector<160x8xf32>
    %cst_75 = arith.constant dense<0.000000e+00> : vector<256x8xf32>
    %87 = tpu.matmul %85, %86, %cst_75 {dimension_numbers = #tpu.dot_dimension_numbers<[1], [0], [0], [1], [0, 0, 1, 1], [], []>} : vector<256x160xf32>, vector<160x8xf32>, vector<256x8xf32> -> vector<256x8xf32>
    %88 = arith.addf %83, %87 : vector<256x8xf32>
    %c2_76 = arith.constant 2 : index
    %c0_77 = arith.constant 0 : index
    %c0_78 = arith.constant 0 : index
    %89 = vector.load %arg17[%c2_76, %c0_77, %c0_78] : memref<3x256x160xf32, #tpu.memory_space<vmem>>, vector<1x256x160xf32>
    %90 = vector.shape_cast %89 : vector<1x256x160xf32> to vector<256x160xf32>
    %91 = vector.extract_strided_slice %79 {offsets = [0, 2], sizes = [160, 8], strides = [1, 1]} : vector<160x10xf32> to vector<160x8xf32>
    %cst_79 = arith.constant dense<0.000000e+00> : vector<256x8xf32>
    %92 = tpu.matmul %90, %91, %cst_79 {dimension_numbers = #tpu.dot_dimension_numbers<[1], [0], [0], [1], [0, 0, 1, 1], [], []>} : vector<256x160xf32>, vector<160x8xf32>, vector<256x8xf32> -> vector<256x8xf32>
    %93 = arith.addf %88, %92 : vector<256x8xf32>
    %c0_80 = arith.constant 0 : index
    %c0_81 = arith.constant 0 : index
    %94 = vector.load %arg18[%c0_80, %c0_81] : memref<256x1xf32, #tpu.memory_space<vmem>>, vector<256x1xf32>
    %95 = vector.broadcast %94 : vector<256x1xf32> to vector<256x8xf32>
    %96 = arith.addf %93, %95 : vector<256x8xf32>
    %cst_82 = arith.constant 0.000000e+00 : f32
    %97 = vector.broadcast %cst_82 : f32 to vector<256x8xf32>
    %98 = arith.maximumf %96, %97 : vector<256x8xf32>
    %c0_83 = arith.constant 0 : index
    %c0_84 = arith.constant 0 : index
    %99 = vector.load %arg19[%c0_83, %c0_84] : memref<128x256xf32, #tpu.memory_space<vmem>>, vector<128x256xf32>
    %cst_85 = arith.constant dense<0.000000e+00> : vector<128x8xf32>
    %100 = tpu.matmul %99, %98, %cst_85 {dimension_numbers = #tpu.dot_dimension_numbers<[1], [0], [0], [1], [0, 0, 1, 1], [], []>} : vector<128x256xf32>, vector<256x8xf32>, vector<128x8xf32> -> vector<128x8xf32>
    %c0_86 = arith.constant 0 : index
    %c0_87 = arith.constant 0 : index
    %101 = vector.load %arg20[%c0_86, %c0_87] : memref<8x4xf32, #tpu.memory_space<vmem>>, vector<8x4xf32>
    %cst_88 = arith.constant dense<0.000000e+00> : vector<128x4xf32>
    %102 = tpu.matmul %100, %101, %cst_88 {dimension_numbers = #tpu.dot_dimension_numbers<[1], [0], [0], [1], [0, 0, 1, 1], [], []>} : vector<128x8xf32>, vector<8x4xf32>, vector<128x4xf32> -> vector<128x4xf32>
    %103 = vector.extract_strided_slice %102 {offsets = [0, 0], sizes = [128, 1], strides = [1, 1]} : vector<128x4xf32> to vector<128x1xf32>
    %104 = vector.extract_strided_slice %102 {offsets = [0, 1], sizes = [128, 1], strides = [1, 1]} : vector<128x4xf32> to vector<128x1xf32>
    %105 = vector.extract_strided_slice %102 {offsets = [0, 2], sizes = [128, 1], strides = [1, 1]} : vector<128x4xf32> to vector<128x1xf32>
    %106 = vector.extract_strided_slice %102 {offsets = [0, 3], sizes = [128, 1], strides = [1, 1]} : vector<128x4xf32> to vector<128x1xf32>
    %107 = tpu.concatenate %103, %104, %105, %106 in 0 : vector<128x1xf32>, vector<128x1xf32>, vector<128x1xf32>, vector<128x1xf32> -> vector<512x1xf32>
    %c0_89 = arith.constant 0 : index
    %c0_90 = arith.constant 0 : index
    %108 = vector.load %arg21[%c0_89, %c0_90] : memref<256x512xf32, #tpu.memory_space<vmem>>, vector<256x512xf32>
    %cst_91 = arith.constant dense<0.000000e+00> : vector<256x1xf32>
    %109 = tpu.matmul %108, %107, %cst_91 {dimension_numbers = #tpu.dot_dimension_numbers<[1], [0], [0], [1], [0, 0, 1, 1], [], []>} : vector<256x512xf32>, vector<512x1xf32>, vector<256x1xf32> -> vector<256x1xf32>
    %c0_92 = arith.constant 0 : index
    %c0_93 = arith.constant 0 : index
    %110 = vector.load %arg22[%c0_92, %c0_93] : memref<256x1xf32, #tpu.memory_space<vmem>>, vector<256x1xf32>
    %111 = arith.addf %109, %110 : vector<256x1xf32>
    %cst_94 = arith.constant 0.000000e+00 : f32
    %112 = vector.broadcast %cst_94 : f32 to vector<256x1xf32>
    %113 = arith.maximumf %111, %112 : vector<256x1xf32>
    %c0_95 = arith.constant 0 : index
    %c0_96 = arith.constant 0 : index
    %114 = vector.load %arg23[%c0_95, %c0_96] : memref<28x256xf32, #tpu.memory_space<vmem>>, vector<28x256xf32>
    %cst_97 = arith.constant dense<0.000000e+00> : vector<28x1xf32>
    %115 = tpu.matmul %114, %113, %cst_97 {dimension_numbers = #tpu.dot_dimension_numbers<[1], [0], [0], [1], [0, 0, 1, 1], [], []>} : vector<28x256xf32>, vector<256x1xf32>, vector<28x1xf32> -> vector<28x1xf32>
    %c0_98 = arith.constant 0 : index
    %c0_99 = arith.constant 0 : index
    %116 = vector.load %arg24[%c0_98, %c0_99] : memref<28x1xf32, #tpu.memory_space<vmem>>, vector<28x1xf32>
    %117 = arith.addf %115, %116 : vector<28x1xf32>
    %c0_100 = arith.constant 0 : index
    %c0_101 = arith.constant 0 : index
    %c0_102 = arith.constant 0 : index
    %118 = vector.load %arg25[%c0_100, %c0_101, %c0_102] : memref<1x28x1xf32, #tpu.memory_space<vmem>>, vector<1x28x1xf32>
    %119 = vector.shape_cast %118 : vector<1x28x1xf32> to vector<28x1xf32>
    %120 = vector.shape_cast %117 : vector<28x1xf32> to vector<1x28x1xf32>
    tpu.vector_store %arg25[%c0_100, %c0_101, %c0_102], %120 {strides = array<i32>} : memref<1x28x1xf32, #tpu.memory_space<vmem>>, vector<1x28x1xf32>,
    return
  }
  func.func @transform_0(%arg0: i32) -> (i32, i32, i32) {
    %c0_i32 = arith.constant 0 : i32
    %c0_i32_0 = arith.constant 0 : i32
    %c0_i32_1 = arith.constant 0 : i32
    return %arg0, %c0_i32, %c0_i32_0 : i32, i32, i32
  }
  func.func @transform_1(%arg0: i32) -> (i32, i32, i32) {
    %c0_i32 = arith.constant 0 : i32
    %c0_i32_0 = arith.constant 0 : i32
    %c0_i32_1 = arith.constant 0 : i32
    %c0_i32_2 = arith.constant 0 : i32
    return %c0_i32, %c0_i32_0, %c0_i32_1 : i32, i32, i32
  }
  func.func @transform_2(%arg0: i32) -> (i32, i32) {
    %c0_i32 = arith.constant 0 : i32
    %c0_i32_0 = arith.constant 0 : i32
    %c0_i32_1 = arith.constant 0 : i32
    return %c0_i32, %c0_i32_0 : i32, i32
  }
  func.func @transform_3(%arg0: i32) -> (i32, i32) {
    %c0_i32 = arith.constant 0 : i32
    %c0_i32_0 = arith.constant 0 : i32
    %c0_i32_1 = arith.constant 0 : i32
    return %c0_i32, %c0_i32_0 : i32, i32
  }
  func.func @transform_4(%arg0: i32) -> (i32, i32) {
    %c0_i32 = arith.constant 0 : i32
    %c0_i32_0 = arith.constant 0 : i32
    %c0_i32_1 = arith.constant 0 : i32
    return %c0_i32, %c0_i32_0 : i32, i32
  }
  func.func @transform_5(%arg0: i32) -> (i32, i32) {
    %c0_i32 = arith.constant 0 : i32
    %c0_i32_0 = arith.constant 0 : i32
    %c0_i32_1 = arith.constant 0 : i32
    return %c0_i32, %c0_i32_0 : i32, i32
  }
  func.func @transform_6(%arg0: i32) -> (i32, i32, i32) {
    %c0_i32 = arith.constant 0 : i32
    %c0_i32_0 = arith.constant 0 : i32
    %c0_i32_1 = arith.constant 0 : i32
    %c0_i32_2 = arith.constant 0 : i32
    return %c0_i32, %c0_i32_0, %c0_i32_1 : i32, i32, i32
  }
  func.func @transform_7(%arg0: i32) -> (i32, i32) {
    %c0_i32 = arith.constant 0 : i32
    %c0_i32_0 = arith.constant 0 : i32
    %c0_i32_1 = arith.constant 0 : i32
    return %c0_i32, %c0_i32_0 : i32, i32
  }
  func.func @transform_8(%arg0: i32) -> (i32, i32) {
    %c0_i32 = arith.constant 0 : i32
    %c0_i32_0 = arith.constant 0 : i32
    %c0_i32_1 = arith.constant 0 : i32
    return %c0_i32, %c0_i32_0 : i32, i32
  }
  func.func @transform_9(%arg0: i32) -> (i32, i32) {
    %c0_i32 = arith.constant 0 : i32
    %c0_i32_0 = arith.constant 0 : i32
    %c0_i32_1 = arith.constant 0 : i32
    return %c0_i32, %c0_i32_0 : i32, i32
  }
  func.func @transform_10(%arg0: i32) -> (i32, i32) {
    %c0_i32 = arith.constant 0 : i32
    %c0_i32_0 = arith.constant 0 : i32
    %c0_i32_1 = arith.constant 0 : i32
    return %c0_i32, %c0_i32_0 : i32, i32
  }
  func.func @transform_11(%arg0: i32) -> (i32, i32, i32) {
    %c0_i32 = arith.constant 0 : i32
    %c0_i32_0 = arith.constant 0 : i32
    %c0_i32_1 = arith.constant 0 : i32
    %c0_i32_2 = arith.constant 0 : i32
    return %c0_i32, %c0_i32_0, %c0_i32_1 : i32, i32, i32
  }
  func.func @transform_12(%arg0: i32) -> (i32, i32) {
    %c0_i32 = arith.constant 0 : i32
    %c0_i32_0 = arith.constant 0 : i32
    %c0_i32_1 = arith.constant 0 : i32
    return %c0_i32, %c0_i32_0 : i32, i32
  }
  func.func @transform_13(%arg0: i32) -> (i32, i32) {
    %c0_i32 = arith.constant 0 : i32
    %c0_i32_0 = arith.constant 0 : i32
    %c0_i32_1 = arith.constant 0 : i32
    return %c0_i32, %c0_i32_0 : i32, i32
  }
  func.func @transform_14(%arg0: i32) -> (i32, i32) {
    %c0_i32 = arith.constant 0 : i32
    %c0_i32_0 = arith.constant 0 : i32
    %c0_i32_1 = arith.constant 0 : i32
    return %c0_i32, %c0_i32_0 : i32, i32
  }
  func.func @transform_15(%arg0: i32) -> (i32, i32) {
    %c0_i32 = arith.constant 0 : i32
    %c0_i32_0 = arith.constant 0 : i32
    %c0_i32_1 = arith.constant 0 : i32
    return %c0_i32, %c0_i32_0 : i32, i32
  }
  func.func @transform_16(%arg0: i32) -> (i32, i32, i32) {
    %c0_i32 = arith.constant 0 : i32
    %c0_i32_0 = arith.constant 0 : i32
    %c0_i32_1 = arith.constant 0 : i32
    %c0_i32_2 = arith.constant 0 : i32
    return %c0_i32, %c0_i32_0, %c0_i32_1 : i32, i32, i32
  }
  func.func @transform_17(%arg0: i32) -> (i32, i32) {
    %c0_i32 = arith.constant 0 : i32
    %c0_i32_0 = arith.constant 0 : i32
    %c0_i32_1 = arith.constant 0 : i32
    return %c0_i32, %c0_i32_0 : i32, i32
  }
  func.func @transform_18(%arg0: i32) -> (i32, i32) {
    %c0_i32 = arith.constant 0 : i32
    %c0_i32_0 = arith.constant 0 : i32
    %c0_i32_1 = arith.constant 0 : i32
    return %c0_i32, %c0_i32_0 : i32, i32
  }
  func.func @transform_19(%arg0: i32) -> (i32, i32) {
    %c0_i32 = arith.constant 0 : i32
    %c0_i32_0 = arith.constant 0 : i32
    %c0_i32_1 = arith.constant 0 : i32
    return %c0_i32, %c0_i32_0 : i32, i32
  }
  func.func @transform_20(%arg0: i32) -> (i32, i32) {
    %c0_i32 = arith.constant 0 : i32
    %c0_i32_0 = arith.constant 0 : i32
    %c0_i32_1 = arith.constant 0 : i32
    return %c0_i32, %c0_i32_0 : i32, i32
  }
  func.func @transform_21(%arg0: i32) -> (i32, i32) {
    %c0_i32 = arith.constant 0 : i32
    %c0_i32_0 = arith.constant 0 : i32
    %c0_i32_1 = arith.constant 0 : i32
    return %c0_i32, %c0_i32_0 : i32, i32
  }
  func.func @transform_22(%arg0: i32) -> (i32, i32) {
    %c0_i32 = arith.constant 0 : i32
    %c0_i32_0 = arith.constant 0 : i32
    %c0_i32_1 = arith.constant 0 : i32
    return %c0_i32, %c0_i32_0 : i32, i32
  }
  func.func @transform_23(%arg0: i32) -> (i32, i32) {
    %c0_i32 = arith.constant 0 : i32
    %c0_i32_0 = arith.constant 0 : i32
    %c0_i32_1 = arith.constant 0 : i32
    return %c0_i32, %c0_i32_0 : i32, i32
  }
  func.func @transform_24(%arg0: i32) -> (i32, i32, i32) {
    %c0_i32 = arith.constant 0 : i32
    %c0_i32_0 = arith.constant 0 : i32
    %c0_i32_1 = arith.constant 0 : i32
    return %arg0, %c0_i32, %c0_i32_0 : i32, i32, i32
  }
}

</mosaic_0001>

<bundles_post_ra>
// kernel: mul.20
= control target key start
LH: loop header
LB: loop body
LE: loop exit
PB: predicated region body
PF: predicated region fallthrough
CT: control target
= control target key end

     0   :  { %s20_s0 = inlined_call_operand.<no memory space> [shape: f32[], index: 0, kind: input, shape index: {}]   ;;  %s21_s1 = inlined_call_operand.vmem [shape: f32[32], index: 1, kind: output, shape index: {}]  }
   0x1   :  { %v2_v0 = vstv %s20_s0 }
   0x2   :  { %3 = vst [vmem:[%s21_s1] sm:$0x1] %v2_v0 }

// kernel: custom_net_forward.1
= control target key start
LH: loop header
LB: loop body
LE: loop exit
PB: predicated region body
PF: predicated region fallthrough
CT: control target
= control target key end

     0   :  { %s23409_s0 = inlined_call_operand.vmem [shape: f32[2,96,96], index: 0, kind: input, shape index: {}]   ;;  %s23410_s1 = inlined_call_operand.vmem [shape: f32[3,376,96], index: 1, kind: input, shape index: {}]   ;;  %s23411_s2 = inlined_call_operand.vmem [shape: f32[376,1], index: 2, kind: input, shape index: {}]   ;;  %s23412_s3 = inlined_call_operand.vmem [shape: f32[188,376], index: 3, kind: input, shape index: {}]   ;;  %s23413_s4 = inlined_call_operand.vmem [shape: f32[94,47], index: 4, kind: input, shape index: {}]   ;;  %s23414_s5 = inlined_call_operand.vmem [shape: f32[188,1], index: 5, kind: input, shape index: {}]   ;;  %s23415_s6 = inlined_call_operand.vmem [shape: f32[3,360,188], index: 6, kind: input, shape index: {}]   ;;  %s23416_s7 = inlined_call_operand.vmem [shape: f32[360,1], index: 7, kind: input, shape index: {}]   ;;  %s23417_s8 = inlined_call_operand.vmem [shape: f32[176,360], index: 8, kind: input, shape index: {}]   ;;  %s23418_s9 = inlined_call_operand.vmem [shape: f32[45,22], index: 9, kind: input, shape index: {}]   ;;  %s23419_s10 = inlined_call_operand.vmem [shape: f32[176,1], index: 10, kind: input, shape index: {}]   ;;  %s23420_s11 = inlined_call_operand.vmem [shape: f32[3,320,176], index: 11, kind: input, shape index: {}]   ;;  %s23421_s12 = inlined_call_operand.vmem [shape: f32[320,1], index: 12, kind: input, shape index: {}]   ;;  %s23422_s13 = inlined_call_operand.vmem [shape: f32[160,320], index: 13, kind: input, shape index: {}]   ;;  %s23423_s14 = inlined_call_operand.vmem [shape: f32[20,10], index: 14, kind: input, shape index: {}]   ;;  %s23424_s15 = inlined_call_operand.vmem [shape: f32[160,1], index: 15, kind: input, shape index: {}]   ;;  %s23425_s16 = inlined_call_operand.vmem [shape: f32[3,256,160], index: 16, kind: input, shape index: {}]   ;;  %s23426_s17 = inlined_call_operand.vmem [shape: f32[256,1], index: 17, kind: input, shape index: {}]   ;;  %s23427_s18 = inlined_call_operand.vmem [shape: f32[128,256], index: 18, kind: input, shape index: {}]   ;;  %s23428_s19 = inlined_call_operand.vmem [shape: f32[8,4], index: 19, kind: input, shape index: {}]   ;;  %s23429_s20 = inlined_call_operand.vmem [shape: f32[256,512], index: 20, kind: input, shape index: {}]   ;;  %s23430_s21 = inlined_call_operand.vmem [shape: f32[256,1], index: 21, kind: input, shape index: {}]   ;;  %s23431_s22 = inlined_call_operand.vmem [shape: f32[28,256], index: 22, kind: input, shape index: {}]   ;;  %s23432_s23 = inlined_call_operand.vmem [shape: f32[28,1], index: 23, kind: input, shape index: {}]   ;;  %s23433_s24 = inlined_call_operand.vmem [shape: f32[2,28,1], index: 24, kind: output, shape index: {}]  }
   0x1   :  { %23455 = sst [smem:[#allocation25_spill]] %s23409_s0 }
   0x2   :  { %23456 = sst [smem:[#allocation26_spill]] %s23410_s1 }
   0x3   :  { %23457 = sst [smem:[#allocation27_spill]] %s23411_s2 }
   0x4   :  { %23458 = sst [smem:[#allocation28_spill]] %s23412_s3 }
   0x5   :  { %23459 = sst [smem:[#allocation29_spill]] %s23413_s4 }
   0x6   :  { %23460 = sst [smem:[#allocation30_spill]] %s23414_s5  ;;  %s16390_s5 = smov 0  }
   0x7   :  { %23461 = sst [smem:[#allocation31_spill]] %s23415_s6 }
   0x8   :  { %23462 = sst [smem:[#allocation32_spill]] %s23416_s7 }
   0x9   :  { %23463 = sst [smem:[#allocation33_spill]] %s23417_s8 }
   0xa LB: > { %s12283_s26 = sadd.s32 4294967295, %s16255_s5   ;;  %p12287_p0 = scmp.ge.s32.totalorder %s16255_s5, 1  ;;  %s16255_s5 = sphi %s16390_s5, %s34_s5  }
   0xb   : > { %p662_p1 = scmp.lt.s32.totalorder %s16255_s5, 3 }
   0xd   : > { %p663_p2 = pnand %p12287_p0, %p662_p1 }
   0xf   : > { %666 = sbr.rel (%p663_p2) target bundleno = 5534 (0x159e), region = 116 }
  0x16   : > { %p728_p3 = scmp.lt.s32.totalorder %s12283_s26, 1  ;;  %v23442_v0 = vmov 0.0|0.0   ;;  %s23464_s2 = sld [smem:[#allocation25_spill]]  ;;  %vm16260_vm0 = vmmov 0   ;;  %v16261_v21 = vmov 0.0   ;;  %vm893_vm1 = vcmask 785408  }
  0x17   : > { %14842 = vmatprep.subr.bf16.mxu0 %v23442_v0  ;;  %15612 = vmatprep.subr.bf16.mxu1 %v23442_v0  ;;  %s23446_s0 = smov 127   ;;  %s23444_s7 = smov 126   ;;  %vm2796_vm2 = vcmask 982016   ;;  %vm3468_vm3 = vcmask 1045504   ;;  %vm16263_vm4 = vmmov 1   ;;  %vm3395_vm6 = vcmask 769024  }
  0x18   : > { %s23525_s26 = smov (!%p728_p3, %s12283_s26), 1  ;;  %14072 = vmatprep.mubr.msk.f32.mxu1 %vm16260_vm0, %v16261_v21  ;;  %14033 = vmatprep.mubr.msk.f32.mxu0 %vm16260_vm0, %v16261_v21  ;;  %s23465_s25 = sld [smem:[#allocation26_spill]]  ;;  %vm14993_vm5 = vmpackc.low %vm3468_vm3, %vm16263_vm4  ;;  %vm3933_vm7 = vcmask 490496   ;;  %vm4069_vm8 = vcmask 1043456   ;;  %vm5849_vm10 = vcmask 850944   ;;  %vm6471_vm11 = vcmask 1044480  }
  0x19   : > { %s15720_s27 = smul.u32 96, %s23525_s26  ;;  %s23466_s30 = sld [smem:[#allocation27_spill]]  ;;  %vm18243_vm9 = vmpackc.low %vm4069_vm8, %vm16263_vm4  ;;  %vm6404_vm13 = vcmask 367616   ;;  %vm6899_vm14 = vcmask 392192   ;;  %vm8622_vm15 = vcmask 523264   ;;  %vm12222_vm3 = vcmask 7168  }
  0x1a   : > { %s23467_s6 = sld [smem:[#allocation30_spill]]  ;;  %s23491_s3 = sld [smem:[#allocation28_spill]]  ;;  %vm15190_vm12 = vmpackc.low %vm6471_vm11, %vm16263_vm4  ;;  %vm12226_vm4 = vcmask 3072  }
  0x1b   : > { %s23516_s8 = sld [smem:[#allocation29_spill]]  ;;  %s23517_s28 = smov 127  }
  0x1c   : > { %s732_s29 = scalar_lea.vmem %s23464_s2, %s15720_s27  ;;  %s23521_s1 = smov 126  }
  0x1d   : > { %v16406_v1 = vld [vmem:[%s732_s29] sm:$0xff]  ;;  %v16408_v2 = vld [vmem:[%s732_s29 + $0x8] sm:$0xff]  ;;  %v16410_v3 = vld [vmem:[%s732_s29 + $0x10] sm:$0xff]  ;;  %s23523_s2 = sld [smem:[#allocation33_spill]] }
  0x1e   : > { %v15737_v4 = vpack.i.bf16 %v16408_v2, %v16406_v1  ;;  %v14861_v5 = vpack.c.bf16 %v16408_v2, %v16406_v1  ;;  %v16416_v6 = vld [vmem:[%s732_s29 + $0x18] sm:$0xff]  ;;  %v16418_v7 = vld [vmem:[%s732_s29 + $0x20] sm:$0xff]  ;;  %v16420_v8 = vld [vmem:[%s732_s29 + $0x28] sm:$0xff] }
  0x1f   : > { %v15747_v9 = vpack.i.bf16 %v16420_v8, %v16418_v7  ;;  %v14867_v10 = vpack.c.bf16 %v16420_v8, %v16418_v7  ;;  %v16426_v11 = vld [vmem:[%s732_s29 + $0x30] sm:$0xff]  ;;  %v16428_v12 = vld [vmem:[%s732_s29 + $0x38] sm:$0xff]  ;;  %v15742_v13 = vpack.i.bf16 %v16416_v6, %v16410_v3  ;;  %v16436_v15 = vld [vmem:[%s732_s29 + $0x40] sm:$0xff]  ;;  %v14864_v61 = vpack.c.bf16 %v16416_v6, %v16410_v3 }
  0x20   : > { %15738 = vrot.lane.b32.xlu0 %v15737_v4, %s23446_s0  ;;  %v15752_v14 = vpack.i.bf16 %v16428_v12, %v16426_v11  ;;  %v16438_v16 = vld [vmem:[%s732_s29 + $0x48] sm:$0xff]  ;;  %v16440_v17 = vld [vmem:[%s732_s29 + $0x50] sm:$0xff]  ;;  %v16442_v18 = vld [vmem:[%s732_s29 + $0x58] sm:$0xff] }
  0x21   : > { %15748 = vrot.lane.b32.xlu1 %v15747_v9, %s23446_s0  ;;  %v15757_v19 = vpack.i.bf16 %v16438_v16, %v16436_v15  ;;  %v15762_v20 = vpack.i.bf16 %v16442_v18, %v16440_v17  ;;  %v12304_v50 = vld [vmem:[%s23465_s25 + $0x1e0] sm:$0xff]  ;;  %v12291_v51 = vld [vmem:[%s23465_s25 + $0x178] sm:$0xff]  ;;  %v12305_v56 = vld [vmem:[%s23465_s25 + $0x1e8] sm:$0xff] }
  0x22   : > { %v12292_v57 = vld [vmem:[%s23465_s25 + $0x180] sm:$0xff]  ;;  %v12306_v63 = vld [vmem:[%s23465_s25 + $0x1f0] sm:$0xff]  ;;  %v12293_v1 = vld [vmem:[%s23465_s25 + $0x188] sm:$0xff] }
  0x23   : > { %v12307_v6 = vld [vmem:[%s23465_s25 + $0x1f8] sm:$0xff]  ;;  %v12308_v7 = vld [vmem:[%s23465_s25 + $0x200] sm:$0xff] }
  0x24   : > { %15743 = vrot.lane.b32.xlu0 %v15742_v13, %s23446_s0  ;;  %v12295_v8 = vld [vmem:[%s23465_s25 + $0x198] sm:$0xff] }
  0x25   : > { %15753 = vrot.lane.b32.xlu1 %v15752_v14, %s23446_s0 }
  0x28   : > { %15758 = vrot.lane.b32.xlu0 %v15757_v19, %s23446_s0 }
  0x29   : > { %15763 = vrot.lane.b32.xlu1 %v15762_v20, %s23446_s0 }
  0x2c   : > { %15768 = vrot.lane.b32.xlu0 %v15737_v4, %s23444_s7 }
  0x2d   : > { %15773 = vrot.lane.b32.xlu1 %v15742_v13, %s23444_s7 }
  0x30   : > { %15778 = vrot.lane.b32.xlu0 %v15747_v9, %s23444_s7  ;;  %v12294_v9 = vld [vmem:[%s23465_s25 + $0x190] sm:$0xff] }
  0x31   : > { %15783 = vrot.lane.b32.xlu1 %v15752_v14, %s23444_s7 }
  0x34   : > { %15788 = vrot.lane.b32.xlu0 %v15757_v19, %s23444_s7 }
  0x35   : > { %15793 = vrot.lane.b32.xlu1 %v15762_v20, %s23444_s7  ;;  %v14870_v20 = vpack.c.bf16 %v16428_v12, %v16426_v11  ;;  %s23518_s7 = sld [smem:[#allocation31_spill]] }
  0x92   : > { %v15739_v22 = vpop.permute.xlu0 %15738 }
  0x93   : > { %v15741_v23 = vunpack.i.h.bf16 %v15739_v22  ;;  %v15740_v24 = vunpack.i.l.bf16 %v15739_v22  ;;  %v15749_v25 = vpop.permute.xlu1 %15748 }
  0x94   : > { %v15751_v30 = vunpack.i.h.bf16 %v15749_v25  ;;  %v15750_v31 = vunpack.i.l.bf16 %v15749_v25  ;;  %v14876_v25 = vpack.c.bf16 %v16442_v18, %v16440_v17  ;;  %v12297_v17 = vld [vmem:[%s23465_s25 + $0x1a8] sm:$0xff]  ;;  %v16262_v18 = vmov 0  }
  0x95   : > { %v14843_v26 = vpack.c.bf16 %v15741_v23, %v15740_v24  ;;  %v14873_v23 = vpack.c.bf16 %v16438_v16, %v16436_v15  ;;  %v12309_v24 = vld [vmem:[%s23465_s25 + $0x208] sm:$0xff]  ;;  %v12296_v15 = vld [vmem:[%s23465_s25 + $0x1a0] sm:$0xff]  ;;  %15798 = vset.pattern.permute.xlu1 %v16262_v18  ;;  %15797 = vset.pattern.permute.xlu0 %v16262_v18  ;;  %v2379_v18 = vld [vmem:[%s23466_s30 + $0xf8] sm:$0xff] }
  0x96   : > { %v15744_v27 = vpop.permute.xlu0 %15743  ;;  %v14849_v36 = vpack.c.bf16 %v15751_v30, %v15750_v31  ;;  %v12298_v30 = vld [vmem:[%s23465_s25 + $0x1b0] sm:$0xff] }
  0x97   : > { %v15746_v28 = vunpack.i.h.bf16 %v15744_v27  ;;  %v15745_v29 = vunpack.i.l.bf16 %v15744_v27  ;;  %14844 = vmatpush3.bf16.msra.mxu0 %v14843_v26  ;;  %15618 = vmatpush3.bf16.msra.mxu1 %v14843_v26  ;;  %v15754_v32 = vpop.permute.xlu1 %15753  ;;  %v12310_v26 = vld [vmem:[%s23465_s25 + $0x210] sm:$0xff]  ;;  %v2349_v27 = vld [vmem:[%s23466_s30 + $0x8] sm:$0xff] }
  0x98   : > { %14845 = vmatprep.subr.bf16.mxu0 %v23442_v0  ;;  %15613 = vmatprep.subr.bf16.mxu1 %v23442_v0  ;;  %v15756_v34 = vunpack.i.h.bf16 %v15754_v32  ;;  %v15755_v35 = vunpack.i.l.bf16 %v15754_v32  ;;  %v2350_v31 = vld [vmem:[%s23466_s30 + $0x10] sm:$0xff]  ;;  %v2351_v32 = vld [vmem:[%s23466_s30 + $0x18] sm:$0xff] }
  0x99   : > { %v14846_v33 = vpack.c.bf16 %v15746_v28, %v15745_v29  ;;  %v2348_v28 = vld [vmem:[%s23466_s30] sm:$0xff]  ;;  %v12311_v29 = vld [vmem:[%s23465_s25 + $0x218] sm:$0xff]  ;;  %2402 = vperm.xlu1 %15798, %v2349_v27   ;;  %v12326_v27 = vld [vmem:[%s23465_s25 + $0x290] sm:$0xff] }
  0x9a   : > { %v15759_v37 = vpop.permute.xlu0 %15758  ;;  %v14852_v40 = vpack.c.bf16 %v15756_v34, %v15755_v35  ;;  %2397 = vperm.xlu0 %15797, %v2348_v28   ;;  %v12299_v34 = vld [vmem:[%s23465_s25 + $0x1b8] sm:$0xff]  ;;  %v2352_v35 = vld [vmem:[%s23466_s30 + $0x20] sm:$0xff] }
  0x9b   : > { %14847 = vmatpush3.bf16.msra.mxu0 %v14846_v33  ;;  %15619 = vmatpush3.bf16.msra.mxu1 %v14846_v33  ;;  %v15761_v38 = vunpack.i.h.bf16 %v15759_v37  ;;  %v15760_v39 = vunpack.i.l.bf16 %v15759_v37  ;;  %v15764_v41 = vpop.permute.xlu1 %15763  ;;  %v12312_v33 = vld [vmem:[%s23465_s25 + $0x220] sm:$0xff]  ;;  %v12313_v37 = vld [vmem:[%s23465_s25 + $0x228] sm:$0xff]  ;;  %v12441_v28 = vld [vmem:[%s23465_s25 + $0x338] sm:$0xff] }
  0x9c   : > { %14848 = vmatprep.subr.bf16.mxu0 %v23442_v0  ;;  %15614 = vmatprep.subr.bf16.mxu1 %v23442_v0  ;;  %v15766_v42 = vunpack.i.h.bf16 %v15764_v41  ;;  %v15765_v43 = vunpack.i.l.bf16 %v15764_v41  ;;  %v12314_v41 = vld [vmem:[%s23465_s25 + $0x230] sm:$0xff] }
  0x9d   : > { %v14855_v44 = vpack.c.bf16 %v15761_v38, %v15760_v39  ;;  %2407 = vperm.xlu1 %15798, %v2350_v31   ;;  %v12300_v38 = vld [vmem:[%s23465_s25 + $0x1c0] sm:$0xff]  ;;  %v2354_v39 = vld [vmem:[%s23466_s30 + $0x30] sm:$0xff]  ;;  %v12327_v31 = vld [vmem:[%s23465_s25 + $0x298] sm:$0xff] }
  0x9e   : > { %v15769_v45 = vpop.permute.xlu0 %15768  ;;  %v14858_v46 = vpack.c.bf16 %v15766_v42, %v15765_v43  ;;  %2412 = vperm.xlu0 %15797, %v2351_v32   ;;  %v12301_v42 = vld [vmem:[%s23465_s25 + $0x1c8] sm:$0xff]  ;;  %v2356_v43 = vld [vmem:[%s23466_s30 + $0x40] sm:$0xff] }
  0x9f   : > { %14850 = vmatpush3.bf16.msra.mxu0 %v14849_v36  ;;  %15620 = vmatpush3.bf16.msra.mxu1 %v14849_v36  ;;  %v15771_v47 = vunpack.i.h.bf16 %v15769_v45  ;;  %v15770_v48 = vunpack.i.l.bf16 %v15769_v45  ;;  %v15774_v49 = vpop.permute.xlu1 %15773  ;;  %v2353_v36 = vld [vmem:[%s23466_s30 + $0x28] sm:$0xff]  ;;  %v12315_v45 = vld [vmem:[%s23465_s25 + $0x238] sm:$0xff]  ;;  %v12442_v32 = vld [vmem:[%s23465_s25 + $0x340] sm:$0xff] }
  0xa0   : > { %14851 = vmatprep.subr.bf16.mxu0 %v23442_v0  ;;  %15615 = vmatprep.subr.bf16.mxu1 %v23442_v0  ;;  %v15776_v53 = vunpack.i.h.bf16 %v15774_v49  ;;  %v15775_v54 = vunpack.i.l.bf16 %v15774_v49  ;;  %v12316_v49 = vld [vmem:[%s23465_s25 + $0x240] sm:$0xff] }
  0xa1   : > { %v14879_v52 = vpack.c.bf16 %v15771_v47, %v15770_v48  ;;  %2417 = vperm.xlu1 %15798, %v2352_v35   ;;  %v2358_v47 = vld [vmem:[%s23466_s30 + $0x50] sm:$0xff]  ;;  %v2359_v48 = vld [vmem:[%s23466_s30 + $0x58] sm:$0xff]  ;;  %v12328_v35 = vld [vmem:[%s23465_s25 + $0x2a0] sm:$0xff] }
  0xa2   : > { %v15779_v55 = vpop.permute.xlu0 %15778  ;;  %v14882_v58 = vpack.c.bf16 %v15776_v53, %v15775_v54  ;;  %2422 = vperm.xlu0 %15797, %v2353_v36   ;;  %v12317_v53 = vld [vmem:[%s23465_s25 + $0x248] sm:$0xff]  ;;  %v12432_v54 = vld [vmem:[%s23465_s25 + $0x2f0] sm:$0xff] }
  0xa3   : > { %14853 = vmatpush3.bf16.msra.mxu0 %v14852_v40  ;;  %15621 = vmatpush3.bf16.msra.mxu1 %v14852_v40  ;;  %v15781_v59 = vunpack.i.h.bf16 %v15779_v55  ;;  %v15780_v60 = vunpack.i.l.bf16 %v15779_v55  ;;  %v15784_v62 = vpop.permute.xlu1 %15783  ;;  %v2355_v40 = vld [vmem:[%s23466_s30 + $0x38] sm:$0xff]  ;;  %v2362_v55 = vld [vmem:[%s23466_s30 + $0x70] sm:$0xff]  ;;  %v12443_v36 = vld [vmem:[%s23465_s25 + $0x348] sm:$0xff] }
  0xa4   : > { %14854 = vmatprep.subr.bf16.mxu0 %v23442_v0  ;;  %15616 = vmatprep.subr.bf16.mxu1 %v23442_v0  ;;  %v15786_v3 = vunpack.i.h.bf16 %v15784_v62  ;;  %v15785_v4 = vunpack.i.l.bf16 %v15784_v62  ;;  %v12434_v62 = vld [vmem:[%s23465_s25 + $0x300] sm:$0xff] }
  0xa5   : > { %v14885_v2 = vpack.c.bf16 %v15781_v59, %v15780_v60  ;;  %2427 = vperm.xlu1 %15798, %v2354_v39   ;;  %v2364_v59 = vld [vmem:[%s23466_s30 + $0x80] sm:$0xff]  ;;  %v2365_v60 = vld [vmem:[%s23466_s30 + $0x88] sm:$0xff] }
  0xa6   : > { %v14888_v13 = vpack.c.bf16 %v15786_v3, %v15785_v4  ;;  %2432 = vperm.xlu0 %15797, %v2355_v40   ;;  %v12435_v3 = vld [vmem:[%s23465_s25 + $0x308] sm:$0xff]  ;;  %v2368_v4 = vld [vmem:[%s23466_s30 + $0xa0] sm:$0xff]  ;;  %v12444_v40 = vld [vmem:[%s23465_s25 + $0x350] sm:$0xff] }
  0xa7   : > { %14856 = vmatpush3.bf16.msra.mxu0 %v14855_v44  ;;  %15622 = vmatpush3.bf16.msra.mxu1 %v14855_v44  ;;  %v15794_v22 = vpop.permute.xlu1 %15793  ;;  %v2357_v44 = vld [vmem:[%s23466_s30 + $0x48] sm:$0xff] }
  0xa8   : > { %14857 = vmatprep.subr.bf16.mxu0 %v23442_v0  ;;  %15617 = vmatprep.subr.bf16.mxu1 %v23442_v0  ;;  %v15796_v11 = vunpack.i.h.bf16 %v15794_v22  ;;  %v15795_v12 = vunpack.i.l.bf16 %v15794_v22  ;;  %v2372_v22 = vld [vmem:[%s23466_s30 + $0xc0] sm:$0xff]  ;;  %v12329_v39 = vld [vmem:[%s23465_s25 + $0x2a8] sm:$0xff] }
  0xa9   : > { %2437 = vperm.xlu1 %15798, %v2356_v43   ;;  %v12330_v43 = vld [vmem:[%s23465_s25 + $0x2b0] sm:$0xff] }
  0xaa   : > { %v14894_v16 = vpack.c.bf16 %v15796_v11, %v15795_v12  ;;  %2442 = vperm.xlu0 %15797, %v2357_v44   ;;  %v2374_v11 = vld [vmem:[%s23466_s30 + $0xd0] sm:$0xff]  ;;  %v2375_v12 = vld [vmem:[%s23466_s30 + $0xd8] sm:$0xff] }
  0xab   : > { %14859 = vmatpush3.bf16.msra.mxu0 %v14858_v46  ;;  %15623 = vmatpush3.bf16.msra.mxu1 %v14858_v46  ;;  %v12302_v46 = vld [vmem:[%s23465_s25 + $0x1d0] sm:$0xff]  ;;  %v12445_v44 = vld [vmem:[%s23465_s25 + $0x358] sm:$0xff] }
  0xac   : > { %14860 = vmatprep.subr.bf16.mxu1 %v23442_v0  ;;  %14878 = vmatprep.subr.bf16.mxu0 %v23442_v0 }
  0xad   : > { %2447 = vperm.xlu1 %15798, %v2358_v47   ;;  %v12331_v47 = vld [vmem:[%s23465_s25 + $0x2b8] sm:$0xff] }
  0xae   : > { %14073 = vmatmul.mubr.msk.f32.vlgmr.msra.gmra.mrb[0].mxu1 %vm893_vm1, %v12304_v50  ;;  %14034 = vmatmul.mubr.msk.f32.vlgmr.msra.gmra.mrb[0].mxu0 %vm893_vm1, %v12291_v51  ;;  %v12303_v50 = vld [vmem:[%s23465_s25 + $0x1d8] sm:$0xff]  ;;  %v2360_v51 = vld [vmem:[%s23466_s30 + $0x60] sm:$0xff] }
  0xaf   : > { %14075 = vmatprep.mubr.msk.f32.mxu1 %vm16260_vm0, %v16261_v21  ;;  %14036 = vmatprep.mubr.msk.f32.mxu0 %vm16260_vm0, %v16261_v21 }
  0xb0   : > { %14862 = vmatpush3.bf16.msra.mxu1 %v14861_v5  ;;  %14880 = vmatpush3.bf16.msra.mxu0 %v14879_v52  ;;  %v15789_v5 = vpop.permute.xlu0 %15788  ;;  %v2361_v52 = vld [vmem:[%s23466_s30 + $0x68] sm:$0xff] }
  0xb1   : > { %14863 = vmatprep.subr.bf16.mxu1 %v23442_v0  ;;  %14881 = vmatprep.subr.bf16.mxu0 %v23442_v0  ;;  %v15791_v14 = vunpack.i.h.bf16 %v15789_v5  ;;  %v15790_v19 = vunpack.i.l.bf16 %v15789_v5  ;;  %v2369_v5 = vld [vmem:[%s23466_s30 + $0xa8] sm:$0xff] }
  0xb2   : > { %14076 = vmatmul.mubr.msk.f32.gmra.mrb[2].mxu1 %vm893_vm1, %v12305_v56  ;;  %14037 = vmatmul.mubr.msk.f32.gmra.mrb[2].mxu0 %vm893_vm1, %v12292_v57  ;;  %v2363_v56 = vld [vmem:[%s23466_s30 + $0x78] sm:$0xff]  ;;  %v12318_v57 = vld [vmem:[%s23465_s25 + $0x250] sm:$0xff] }
  0xb3   : > { %14078 = vmatprep.mubr.msk.f32.mxu1 %vm16260_vm0, %v16261_v21  ;;  %14039 = vmatprep.mubr.msk.f32.mxu0 %vm16260_vm0, %v16261_v21 }
  0xb4   : > { %14865 = vmatpush3.bf16.msra.mxu1 %v14864_v61  ;;  %14883 = vmatpush3.bf16.msra.mxu0 %v14882_v58  ;;  %v12433_v58 = vld [vmem:[%s23465_s25 + $0x2f8] sm:$0xff] }
  0xb5   : > { %14866 = vmatprep.subr.bf16.mxu1 %v23442_v0  ;;  %14884 = vmatprep.subr.bf16.mxu0 %v23442_v0  ;;  %v12319_v61 = vld [vmem:[%s23465_s25 + $0x258] sm:$0xff] }
  0xb6   : > { %14079 = vmatmul.mubr.msk.f32.gmra.mrb[4].mxu1 %vm893_vm1, %v12306_v63  ;;  %14040 = vmatmul.mubr.msk.f32.gmra.mrb[4].mxu0 %vm893_vm1, %v12293_v1  ;;  %v2366_v63 = vld [vmem:[%s23466_s30 + $0x90] sm:$0xff]  ;;  %v2367_v1 = vld [vmem:[%s23466_s30 + $0x98] sm:$0xff] }
  0xb7   : > { %14081 = vmatprep.mubr.msk.f32.mxu1 %vm16260_vm0, %v16261_v21  ;;  %14042 = vmatprep.mubr.msk.f32.mxu0 %vm16260_vm0, %v16261_v21 }
  0xb8   : > { %14868 = vmatpush3.bf16.msra.mxu1 %v14867_v10  ;;  %14886 = vmatpush3.bf16.msra.mxu0 %v14885_v2  ;;  %v14891_v10 = vpack.c.bf16 %v15791_v14, %v15790_v19  ;;  %v12320_v2 = vld [vmem:[%s23465_s25 + $0x260] sm:$0xff]  ;;  %v2371_v14 = vld [vmem:[%s23466_s30 + $0xb8] sm:$0xff]  ;;  %v12322_v19 = vld [vmem:[%s23465_s25 + $0x270] sm:$0xff] }
  0xb9   : > { %14869 = vmatprep.subr.bf16.mxu1 %v23442_v0  ;;  %14887 = vmatprep.subr.bf16.mxu0 %v23442_v0 }
  0xba   : > { %14082 = vmatmul.mubr.msk.f32.gmra.mrb[6].mxu1 %vm893_vm1, %v12307_v6  ;;  %14043 = vmatmul.mubr.msk.f32.gmra.mrb[6].mxu0 %vm893_vm1, %v12294_v9  ;;  %v12321_v6 = vld [vmem:[%s23465_s25 + $0x268] sm:$0xff]  ;;  %v12436_v9 = vld [vmem:[%s23465_s25 + $0x310] sm:$0xff] }
  0xbb   : > { %14084 = vmatprep.mubr.msk.f32.mxu1 %vm16260_vm0, %v16261_v21  ;;  %14045 = vmatprep.mubr.msk.f32.mxu0 %vm16260_vm0, %v16261_v21 }
  0xbc   : > { %14871 = vmatpush3.bf16.msra.mxu1 %v14870_v20  ;;  %14889 = vmatpush3.bf16.msra.mxu0 %v14888_v13  ;;  %v2370_v13 = vld [vmem:[%s23466_s30 + $0xb0] sm:$0xff]  ;;  %v12437_v20 = vld [vmem:[%s23465_s25 + $0x318] sm:$0xff] }
  0xbd   : > { %14872 = vmatprep.subr.bf16.mxu1 %v23442_v0  ;;  %14890 = vmatprep.subr.bf16.mxu0 %v23442_v0 }
  0xbe   : > { %14085 = vmatmul.mubr.msk.f32.gmra.mrb[8].mxu1 %vm893_vm1, %v12308_v7  ;;  %14046 = vmatmul.mubr.msk.f32.gmra.mrb[8].mxu0 %vm893_vm1, %v12295_v8  ;;  %v2373_v7 = vld [vmem:[%s23466_s30 + $0xc8] sm:$0xff]  ;;  %v12323_v8 = vld [vmem:[%s23465_s25 + $0x278] sm:$0xff] }
  0xbf   : > { %14087 = vmatprep.mubr.msk.f32.mxu1 %vm16260_vm0, %v16261_v21  ;;  %14048 = vmatprep.mubr.msk.f32.mxu0 %vm16260_vm0, %v16261_v21 }
  0xc0   : > { %14874 = vmatpush3.bf16.msra.mxu1 %v14873_v23  ;;  %14892 = vmatpush3.bf16.msra.mxu0 %v14891_v10  ;;  %v12438_v10 = vld [vmem:[%s23465_s25 + $0x320] sm:$0xff] }
  0xc1   : > { %14875 = vmatprep.subr.bf16.mxu1 %v23442_v0  ;;  %14893 = vmatprep.subr.bf16.mxu0 %v23442_v0  ;;  %v12324_v23 = vld [vmem:[%s23465_s25 + $0x280] sm:$0xff] }
  0xc2   : > { %14088 = vmatmul.mubr.msk.f32.gmra.mrb[10].mxu1 %vm893_vm1, %v12309_v24  ;;  %14049 = vmatmul.mubr.msk.f32.gmra.mrb[10].mxu0 %vm893_vm1, %v12296_v15  ;;  %v12439_v24 = vld [vmem:[%s23465_s25 + $0x328] sm:$0xff]  ;;  %v2376_v15 = vld [vmem:[%s23466_s30 + $0xe0] sm:$0xff] }
  0xc3   : > { %14090 = vmatprep.mubr.msk.f32.mxu1 %vm16260_vm0, %v16261_v21  ;;  %14051 = vmatprep.mubr.msk.f32.mxu0 %vm16260_vm0, %v16261_v21 }
  0xc4   : > { %14877 = vmatpush3.bf16.msra.mxu1 %v14876_v25  ;;  %14895 = vmatpush3.bf16.msra.mxu0 %v14894_v16  ;;  %v2377_v16 = vld [vmem:[%s23466_s30 + $0xe8] sm:$0xff] }
  0xc5   : > { %14896 = vmatprep.subr.bf16.mxu1 %v23442_v0  ;;  %14998 = vmatprep.subr.bf16.mxu0 %v23442_v0  ;;  %v12325_v25 = vld [vmem:[%s23465_s25 + $0x288] sm:$0xff] }
  0xc6   : > { %14091 = vmatmul.mubr.msk.f32.gmra.mrb[12].mxu1 %vm893_vm1, %v12310_v26  ;;  %14052 = vmatmul.mubr.msk.f32.gmra.mrb[12].mxu0 %vm893_vm1, %v12297_v17  ;;  %v12440_v26 = vld [vmem:[%s23465_s25 + $0x330] sm:$0xff] }
  0xc7   : > { %14093 = vmatprep.mubr.msk.f32.mxu1 %vm16260_vm0, %v16261_v21  ;;  %14054 = vmatprep.mubr.msk.f32.mxu0 %vm16260_vm0, %v16261_v21  ;;  %v2378_v17 = vld [vmem:[%s23466_s30 + $0xf0] sm:$0xff] }
  0xc8   : > { %2452 = vperm.xlu0 %15797, %v2359_v48   ;;  %2457 = vperm.xlu1 %15798, %v2360_v51   ;;  %v12446_v48 = vld [vmem:[%s23465_s25 + $0x360] sm:$0xff] }
  0xc9   : > { %v12332_v51 = vld [vmem:[%s23465_s25 + $0x2c0] sm:$0xff] }
  0xca   : > { %14094 = vmatmul.mubr.msk.f32.gmra.mrb[14].mxu1 %vm893_vm1, %v12311_v29  ;;  %14055 = vmatmul.mubr.msk.f32.gmra.mrb[14].mxu0 %vm893_vm1, %v12298_v30  ;;  %v2380_v29 = vld [vmem:[%s23466_s30 + $0x100] sm:$0xff]  ;;  %v2381_v30 = vld [vmem:[%s23466_s30 + $0x108] sm:$0xff] }
  0xcb   : > { %14096 = vmatprep.mubr.msk.f32.mxu1 %vm16260_vm0, %v16261_v21  ;;  %14057 = vmatprep.mubr.msk.f32.mxu0 %vm16260_vm0, %v16261_v21 }
  0xcc   : > { %2462 = vperm.xlu0 %15797, %v2361_v52   ;;  %2467 = vperm.xlu1 %15798, %v2362_v55   ;;  %v12447_v52 = vld [vmem:[%s23465_s25 + $0x368] sm:$0xff] }
  0xcd   : > { %v12333_v55 = vld [vmem:[%s23465_s25 + $0x2c8] sm:$0xff] }
  0xce   : > { %14097 = vmatmul.mubr.msk.f32.gmra.mrb[16].mxu1 %vm893_vm1, %v12312_v33  ;;  %14058 = vmatmul.mubr.msk.f32.gmra.mrb[16].mxu0 %vm893_vm1, %v12299_v34  ;;  %v2382_v33 = vld [vmem:[%s23466_s30 + $0x110] sm:$0xff]  ;;  %v2383_v34 = vld [vmem:[%s23466_s30 + $0x118] sm:$0xff] }
  0xcf   : > { %14099 = vmatprep.mubr.msk.f32.mxu1 %vm16260_vm0, %v16261_v21  ;;  %14060 = vmatprep.mubr.msk.f32.mxu0 %vm16260_vm0, %v16261_v21 }
  0xd0   : > { %2472 = vperm.xlu0 %15797, %v2363_v56   ;;  %2477 = vperm.xlu1 %15798, %v2364_v59   ;;  %v12448_v56 = vld [vmem:[%s23465_s25 + $0x370] sm:$0xff] }
  0xd1   : > { %v12334_v59 = vld [vmem:[%s23465_s25 + $0x2d0] sm:$0xff] }
  0xd2   : > { %14100 = vmatmul.mubr.msk.f32.gmra.mrb[18].mxu1 %vm893_vm1, %v12313_v37  ;;  %14061 = vmatmul.mubr.msk.f32.gmra.mrb[18].mxu0 %vm893_vm1, %v12300_v38  ;;  %v2384_v37 = vld [vmem:[%s23466_s30 + $0x120] sm:$0xff]  ;;  %v2385_v38 = vld [vmem:[%s23466_s30 + $0x128] sm:$0xff] }
  0xd3   : > { %14102 = vmatprep.mubr.msk.f32.mxu1 %vm16260_vm0, %v16261_v21  ;;  %14063 = vmatprep.mubr.msk.f32.mxu0 %vm16260_vm0, %v16261_v21 }
  0xd4   : > { %2482 = vperm.xlu0 %15797, %v2365_v60   ;;  %2487 = vperm.xlu1 %15798, %v2366_v63   ;;  %v12449_v60 = vld [vmem:[%s23465_s25 + $0x378] sm:$0xff] }
  0xd5   : > { %v12335_v63 = vld [vmem:[%s23465_s25 + $0x2d8] sm:$0xff] }
  0xd6   : > { %14103 = vmatmul.mubr.msk.f32.gmra.mrb[20].mxu1 %vm893_vm1, %v12314_v41  ;;  %14064 = vmatmul.mubr.msk.f32.gmra.mrb[20].mxu0 %vm893_vm1, %v12301_v42  ;;  %v2386_v41 = vld [vmem:[%s23466_s30 + $0x130] sm:$0xff]  ;;  %v2387_v42 = vld [vmem:[%s23466_s30 + $0x138] sm:$0xff] }
  0xd7   : > { %14105 = vmatprep.mubr.msk.f32.mxu1 %vm16260_vm0, %v16261_v21  ;;  %14066 = vmatprep.mubr.msk.f32.mxu0 %vm16260_vm0, %v16261_v21 }
  0xd8   : > { %2492 = vperm.xlu0 %15797, %v2367_v1   ;;  %2497 = vperm.xlu1 %15798, %v2368_v4   ;;  %v12450_v1 = vld [vmem:[%s23465_s25 + $0x380] sm:$0xff] }
  0xd9   : > { %v12336_v4 = vld [vmem:[%s23465_s25 + $0x2e0] sm:$0xff] }
  0xda   : > { %14106 = vmatmul.mubr.msk.f32.gmra.mrb[22].mxu1 %vm893_vm1, %v12315_v45  ;;  %14067 = vmatmul.mubr.msk.f32.gmra.mrb[22].mxu0 %vm893_vm1, %v12302_v46  ;;  %v2388_v45 = vld [vmem:[%s23466_s30 + $0x140] sm:$0xff]  ;;  %v2389_v46 = vld [vmem:[%s23466_s30 + $0x148] sm:$0xff] }
  0xdb   : > { %14108 = vmatprep.mubr.msk.f32.mxu1 %vm16260_vm0, %v16261_v21  ;;  %14069 = vmatprep.mubr.msk.f32.mxu0 %vm16260_vm0, %v16261_v21 }
  0xdc   : > { %2502 = vperm.xlu0 %15797, %v2369_v5   ;;  %2507 = vperm.xlu1 %15798, %v2370_v13   ;;  %v12451_v5 = vld [vmem:[%s23465_s25 + $0x388] sm:$0xff] }
  0xdd   : > { %v12337_v13 = vld [vmem:[%s23465_s25 + $0x2e8] sm:$0xff] }
  0xde   : > { %14109 = vmatmul.mubr.msk.f32.gmra.mrb[24].mxu1 %vm893_vm1, %v12316_v49  ;;  %14070 = vmatmul.mubr.msk.f32.gmra.mrb[24].mxu0 %vm893_vm1, %v12303_v50  ;;  %v2390_v49 = vld [vmem:[%s23466_s30 + $0x150] sm:$0xff]  ;;  %v2391_v50 = vld [vmem:[%s23466_s30 + $0x158] sm:$0xff] }
  0xdf   : > { %14111 = vmatprep.mubr.msk.f32.mxu1 %vm16260_vm0, %v16261_v21  ;;  %14363 = vmatprep.mubr.msk.f32.mxu0 %vm16260_vm0, %v16261_v21 }
  0xe0   : > { %2512 = vperm.xlu0 %15797, %v2371_v14   ;;  %2517 = vperm.xlu1 %15798, %v2372_v22   ;;  %v12452_v14 = vld [vmem:[%s23465_s25 + $0x390] sm:$0xff]  ;;  %v750_v22 = vld [vmem:[%s23465_s25] sm:$0xff] }
  0xe2   : > { %14112 = vmatmul.mubr.msk.f32.gmra.mrb[26].mxu1 %vm893_vm1, %v12317_v53  ;;  %14364 = vmatmul.mubr.msk.f32.vlgmr.msra.gmra.mrb[26].mxu0 %vm893_vm1, %v12432_v54  ;;  %v2392_v53 = vld [vmem:[%s23466_s30 + $0x160] sm:$0xff]  ;;  %v2393_v54 = vld [vmem:[%s23466_s30 + $0x168] sm:$0xff] }
  0xe3   : > { %14114 = vmatprep.mubr.msk.f32.mxu1 %vm16260_vm0, %v16261_v21  ;;  %14366 = vmatprep.mubr.msk.f32.mxu0 %vm16260_vm0, %v16261_v21 }
  0xe4   : > { %2522 = vperm.xlu0 %15797, %v2373_v7   ;;  %2527 = vperm.xlu1 %15798, %v2374_v11   ;;  %v12453_v7 = vld [vmem:[%s23465_s25 + $0x398] sm:$0xff]  ;;  %v751_v11 = vld [vmem:[%s23465_s25 + $0x8] sm:$0xff] }
  0xe6   : > { %14115 = vmatmul.mubr.msk.f32.gmra.mrb[28].mxu1 %vm893_vm1, %v12318_v57  ;;  %14367 = vmatmul.mubr.msk.f32.gmra.mrb[28].mxu0 %vm893_vm1, %v12433_v58  ;;  %v2394_v57 = vld [vmem:[%s23466_s30 + $0x170] sm:$0xff]  ;;  %v3251_v58 = vld [vmem:[%s23467_s6] sm:$0xff] }
  0xe7   : > { %14117 = vmatprep.mubr.msk.f32.mxu1 %vm16260_vm0, %v16261_v21  ;;  %14369 = vmatprep.mubr.msk.f32.mxu0 %vm16260_vm0, %v16261_v21 }
  0xe8   : > { %2532 = vperm.xlu0 %15797, %v2375_v12   ;;  %2537 = vperm.xlu1 %15798, %v2376_v15   ;;  %v12454_v12 = vld [vmem:[%s23465_s25 + $0x3a0] sm:$0xff]  ;;  %v752_v15 = vld [vmem:[%s23465_s25 + $0x10] sm:$0xff] }
  0xea   : > { %14118 = vmatmul.mubr.msk.f32.gmra.mrb[30].mxu1 %vm893_vm1, %v12319_v61  ;;  %14370 = vmatmul.mubr.msk.f32.gmra.mrb[30].mxu0 %vm893_vm1, %v12434_v62  ;;  %v3252_v61 = vld [vmem:[%s23467_s6 + $0x8] sm:$0xff]  ;;  %v3253_v62 = vld [vmem:[%s23467_s6 + $0x10] sm:$0xff] }
  0xeb   : > { %14120 = vmatprep.mubr.msk.f32.mxu1 %vm16260_vm0, %v16261_v21  ;;  %14372 = vmatprep.mubr.msk.f32.mxu0 %vm16260_vm0, %v16261_v21 }
  0xec   : > { %2542 = vperm.xlu0 %15797, %v2377_v16   ;;  %2547 = vperm.xlu1 %15798, %v2378_v17   ;;  %v12455_v16 = vld [vmem:[%s23465_s25 + $0x3a8] sm:$0xff]  ;;  %v753_v17 = vld [vmem:[%s23465_s25 + $0x18] sm:$0xff] }
  0xee   : > { %14121 = vmatmul.mubr.msk.f32.gmra.mrb[32].mxu1 %vm893_vm1, %v12320_v2  ;;  %14373 = vmatmul.mubr.msk.f32.gmra.mrb[32].mxu0 %vm893_vm1, %v12435_v3  ;;  %v3254_v2 = vld [vmem:[%s23467_s6 + $0x18] sm:$0xff]  ;;  %v3255_v3 = vld [vmem:[%s23467_s6 + $0x20] sm:$0xff] }
  0xef   : > { %14123 = vmatprep.mubr.msk.f32.mxu1 %vm16260_vm0, %v16261_v21  ;;  %14375 = vmatprep.mubr.msk.f32.mxu0 %vm16260_vm0, %v16261_v21 }
  0xf0   : > { %2552 = vperm.xlu0 %15797, %v2379_v18   ;;  %2557 = vperm.xlu1 %15798, %v2380_v29   ;;  %v12456_v18 = vld [vmem:[%s23465_s25 + $0x3b0] sm:$0xff]  ;;  %v754_v29 = vld [vmem:[%s23465_s25 + $0x20] sm:$0xff] }
  0xf2   : > { %14124 = vmatmul.mubr.msk.f32.gmra.mrb[34].mxu1 %vm893_vm1, %v12321_v6  ;;  %14376 = vmatmul.mubr.msk.f32.gmra.mrb[34].mxu0 %vm893_vm1, %v12436_v9  ;;  %v3256_v6 = vld [vmem:[%s23467_s6 + $0x28] sm:$0xff]  ;;  %v3257_v9 = vld [vmem:[%s23467_s6 + $0x30] sm:$0xff] }
  0xf3   : > { %14126 = vmatprep.mubr.msk.f32.mxu1 %vm16260_vm0, %v16261_v21  ;;  %14378 = vmatprep.mubr.msk.f32.mxu0 %vm16260_vm0, %v16261_v21 }
  0xf4   : > { %2562 = vperm.xlu0 %15797, %v2381_v30   ;;  %2567 = vperm.xlu1 %15798, %v2382_v33   ;;  %v12457_v30 = vld [vmem:[%s23465_s25 + $0x3b8] sm:$0xff]  ;;  %v755_v33 = vld [vmem:[%s23465_s25 + $0x28] sm:$0xff] }
  0xf6   : > { %14127 = vmatmul.mubr.msk.f32.gmra.mrb[36].mxu1 %vm893_vm1, %v12322_v19  ;;  %14379 = vmatmul.mubr.msk.f32.gmra.mrb[36].mxu0 %vm893_vm1, %v12437_v20  ;;  %v3258_v19 = vld [vmem:[%s23467_s6 + $0x38] sm:$0xff]  ;;  %v3259_v20 = vld [vmem:[%s23467_s6 + $0x40] sm:$0xff] }
  0xf7   : > { %14129 = vmatprep.mubr.msk.f32.mxu1 %vm16260_vm0, %v16261_v21  ;;  %14381 = vmatprep.mubr.msk.f32.mxu0 %vm16260_vm0, %v16261_v21 }
  0xf8   : > { %2572 = vperm.xlu0 %15797, %v2383_v34   ;;  %2577 = vperm.xlu1 %15798, %v2384_v37   ;;  %v12458_v34 = vld [vmem:[%s23465_s25 + $0x3c0] sm:$0xff]  ;;  %v756_v37 = vld [vmem:[%s23465_s25 + $0x30] sm:$0xff] }
  0xfa   : > { %14130 = vmatmul.mubr.msk.f32.gmra.mrb[38].mxu1 %vm893_vm1, %v12323_v8  ;;  %14382 = vmatmul.mubr.msk.f32.gmra.mrb[38].mxu0 %vm893_vm1, %v12438_v10  ;;  %v3260_v8 = vld [vmem:[%s23467_s6 + $0x48] sm:$0xff]  ;;  %v3261_v10 = vld [vmem:[%s23467_s6 + $0x50] sm:$0xff] }
  0xfb   : > { %14132 = vmatprep.mubr.msk.f32.mxu1 %vm16260_vm0, %v16261_v21  ;;  %14384 = vmatprep.mubr.msk.f32.mxu0 %vm16260_vm0, %v16261_v21 }
  0xfc   : > { %2582 = vperm.xlu0 %15797, %v2385_v38   ;;  %2587 = vperm.xlu1 %15798, %v2386_v41   ;;  %v12459_v38 = vld [vmem:[%s23465_s25 + $0x3c8] sm:$0xff]  ;;  %v757_v41 = vld [vmem:[%s23465_s25 + $0x38] sm:$0xff] }
  0xfe   : > { %14133 = vmatmul.mubr.msk.f32.gmra.mrb[40].mxu1 %vm893_vm1, %v12324_v23  ;;  %14385 = vmatmul.mubr.msk.f32.gmra.mrb[40].mxu0 %vm893_vm1, %v12439_v24  ;;  %v3262_v23 = vld [vmem:[%s23467_s6 + $0x58] sm:$0xff]  ;;  %v3263_v24 = vld [vmem:[%s23467_s6 + $0x60] sm:$0xff] }
  0xff   : > { %14135 = vmatprep.mubr.msk.f32.mxu1 %vm16260_vm0, %v16261_v21  ;;  %14387 = vmatprep.mubr.msk.f32.mxu0 %vm16260_vm0, %v16261_v21 }
 0x100   : > { %2592 = vperm.xlu0 %15797, %v2387_v42   ;;  %2597 = vperm.xlu1 %15798, %v2388_v45   ;;  %v12460_v42 = vld [vmem:[%s23465_s25 + $0x3d0] sm:$0xff]  ;;  %v12461_v45 = vld [vmem:[%s23465_s25 + $0x3d8] sm:$0xff] }
 0x102   : > { %14136 = vmatmul.mubr.msk.f32.gmra.mrb[42].mxu1 %vm893_vm1, %v12325_v25  ;;  %14388 = vmatmul.mubr.msk.f32.gmra.mrb[42].mxu0 %vm893_vm1, %v12440_v26  ;;  %v3264_v25 = vld [vmem:[%s23467_s6 + $0x68] sm:$0xff]  ;;  %v3265_v26 = vld [vmem:[%s23467_s6 + $0x70] sm:$0xff] }
 0x103   : > { %14138 = vmatprep.mubr.msk.f32.mxu1 %vm16260_vm0, %v16261_v21  ;;  %14390 = vmatprep.mubr.msk.f32.mxu0 %vm16260_vm0, %v16261_v21 }
 0x104   : > { %2602 = vperm.xlu0 %15797, %v2389_v46   ;;  %2607 = vperm.xlu1 %15798, %v2390_v49   ;;  %v759_v46 = vld [vmem:[%s23465_s25 + $0x48] sm:$0xff] }
 0x105   : > { %v12463_v49 = vld [vmem:[%s23465_s25 + $0x3e8] sm:$0xff] }
 0x106   : > { %14139 = vmatmul.mubr.msk.f32.gmra.mrb[44].mxu1 %vm893_vm1, %v12326_v27  ;;  %14391 = vmatmul.mubr.msk.f32.gmra.mrb[44].mxu0 %vm893_vm1, %v12441_v28  ;;  %v3266_v27 = vld [vmem:[%s23467_s6 + $0x78] sm:$0xff]  ;;  %v3267_v28 = vld [vmem:[%s23467_s6 + $0x80] sm:$0xff] }
 0x107   : > { %14141 = vmatprep.mubr.msk.f32.mxu1 %vm16260_vm0, %v16261_v21  ;;  %14393 = vmatprep.mubr.msk.f32.mxu0 %vm16260_vm0, %v16261_v21 }
 0x108   : > { %2612 = vperm.xlu0 %15797, %v2391_v50   ;;  %2617 = vperm.xlu1 %15798, %v2392_v53   ;;  %v761_v50 = vld [vmem:[%s23465_s25 + $0x58] sm:$0xff] }
 0x109   : > { %v12465_v53 = vld [vmem:[%s23465_s25 + $0x3f8] sm:$0xff] }
 0x10a   : > { %14142 = vmatmul.mubr.msk.f32.gmra.mrb[46].mxu1 %vm893_vm1, %v12327_v31  ;;  %14394 = vmatmul.mubr.msk.f32.gmra.mrb[46].mxu0 %vm893_vm1, %v12442_v32  ;;  %v3268_v31 = vld [vmem:[%s23467_s6 + $0x88] sm:$0xff]  ;;  %v3269_v32 = vld [vmem:[%s23467_s6 + $0x90] sm:$0xff] }
 0x10b   : > { %14144 = vmatprep.mubr.msk.f32.mxu1 %vm16260_vm0, %v16261_v21  ;;  %14396 = vmatprep.mubr.msk.f32.mxu0 %vm16260_vm0, %v16261_v21 }
 0x10c   : > { %2622 = vperm.xlu0 %15797, %v2393_v54   ;;  %2627 = vperm.xlu1 %15798, %v2394_v57   ;;  %v763_v54 = vld [vmem:[%s23465_s25 + $0x68] sm:$0xff] }
 0x10d   : > { %v12467_v57 = vld [vmem:[%s23465_s25 + $0x408] sm:$0xff] }
 0x10e   : > { %14145 = vmatmul.mubr.msk.f32.gmra.mrb[48].mxu1 %vm893_vm1, %v12328_v35  ;;  %14397 = vmatmul.mubr.msk.f32.gmra.mrb[48].mxu0 %vm893_vm1, %v12443_v36  ;;  %v3270_v35 = vld [vmem:[%s23467_s6 + $0x98] sm:$0xff]  ;;  %v3271_v36 = vld [vmem:[%s23467_s6 + $0xa0] sm:$0xff] }
 0x10f   : > { %14147 = vmatprep.mubr.msk.f32.mxu1 %vm16260_vm0, %v16261_v21  ;;  %14399 = vmatprep.mubr.msk.f32.mxu0 %vm16260_vm0, %v16261_v21 }
 0x110   : > { %3277 = vperm.xlu0 %15797, %v3251_v58   ;;  %3282 = vperm.xlu1 %15798, %v3252_v61   ;;  %v765_v58 = vld [vmem:[%s23465_s25 + $0x78] sm:$0xff] }
 0x111   : > { %v12469_v61 = vld [vmem:[%s23465_s25 + $0x418] sm:$0xff] }
 0x112   : > { %14148 = vmatmul.mubr.msk.f32.gmra.mrb[50].mxu1 %vm893_vm1, %v12329_v39  ;;  %14400 = vmatmul.mubr.msk.f32.gmra.mrb[50].mxu0 %vm893_vm1, %v12444_v40  ;;  %v3272_v39 = vld [vmem:[%s23467_s6 + $0xa8] sm:$0xff]  ;;  %v3273_v40 = vld [vmem:[%s23467_s6 + $0xb0] sm:$0xff] }
 0x113   : > { %14150 = vmatprep.mubr.msk.f32.mxu1 %vm16260_vm0, %v16261_v21  ;;  %14402 = vmatprep.mubr.msk.f32.mxu0 %vm16260_vm0, %v16261_v21 }
 0x114   : > { %3287 = vperm.xlu0 %15797, %v3253_v62   ;;  %3292 = vperm.xlu1 %15798, %v3254_v2   ;;  %v767_v62 = vld [vmem:[%s23465_s25 + $0x88] sm:$0xff] }
 0x115   : > { %v12471_v2 = vld [vmem:[%s23465_s25 + $0x428] sm:$0xff] }
 0x116   : > { %14151 = vmatmul.mubr.msk.f32.gmra.mrb[52].mxu1 %vm893_vm1, %v12330_v43  ;;  %14403 = vmatmul.mubr.msk.f32.gmra.mrb[52].mxu0 %vm893_vm1, %v12445_v44  ;;  %v3274_v43 = vld [vmem:[%s23467_s6 + $0xb8] sm:$0xf]  ;;  %v758_v44 = vld [vmem:[%s23465_s25 + $0x40] sm:$0xff]  ;;  %s23522_s6 = sld [smem:[#allocation32_spill]] }
 0x117   : > { %14153 = vmatprep.mubr.msk.f32.mxu1 %vm16260_vm0, %v16261_v21  ;;  %14405 = vmatprep.mubr.msk.f32.mxu0 %vm16260_vm0, %v16261_v21 }
 0x118   : > { %3297 = vperm.xlu0 %15797, %v3255_v3   ;;  %3302 = vperm.xlu1 %15798, %v3256_v6   ;;  %v769_v3 = vld [vmem:[%s23465_s25 + $0x98] sm:$0xff] }
 0x11a   : > { %14154 = vmatmul.mubr.msk.f32.gmra.mrb[54].mxu1 %vm893_vm1, %v12331_v47  ;;  %14406 = vmatmul.mubr.msk.f32.gmra.mrb[54].mxu0 %vm893_vm1, %v12446_v48  ;;  %v12462_v47 = vld [vmem:[%s23465_s25 + $0x3e0] sm:$0xff]  ;;  %v760_v48 = vld [vmem:[%s23465_s25 + $0x50] sm:$0xff] }
 0x11b   : > { %14156 = vmatprep.mubr.msk.f32.mxu1 %vm16260_vm0, %v16261_v21  ;;  %14408 = vmatprep.mubr.msk.f32.mxu0 %vm16260_vm0, %v16261_v21 }
 0x11c   : > { %3307 = vperm.xlu0 %15797, %v3257_v9   ;;  %3312 = vperm.xlu1 %15798, %v3258_v19   ;;  %v12473_v19 = vld [vmem:[%s23465_s25 + $0x438] sm:$0xff] }
 0x11e   : > { %14157 = vmatmul.mubr.msk.f32.gmra.mrb[56].mxu1 %vm893_vm1, %v12332_v51  ;;  %14409 = vmatmul.mubr.msk.f32.gmra.mrb[56].mxu0 %vm893_vm1, %v12447_v52  ;;  %v12464_v51 = vld [vmem:[%s23465_s25 + $0x3f0] sm:$0xff]  ;;  %v762_v52 = vld [vmem:[%s23465_s25 + $0x60] sm:$0xff] }
 0x11f   : > { %14159 = vmatprep.mubr.msk.f32.mxu1 %vm16260_vm0, %v16261_v21  ;;  %14411 = vmatprep.mubr.msk.f32.mxu0 %vm16260_vm0, %v16261_v21 }
 0x120   : > { %3317 = vperm.xlu0 %15797, %v3259_v20   ;;  %3322 = vperm.xlu1 %15798, %v3260_v8  }
 0x122   : > { %14160 = vmatmul.mubr.msk.f32.gmra.mrb[58].mxu1 %vm893_vm1, %v12333_v55  ;;  %14412 = vmatmul.mubr.msk.f32.gmra.mrb[58].mxu0 %vm893_vm1, %v12448_v56  ;;  %v12466_v55 = vld [vmem:[%s23465_s25 + $0x400] sm:$0xff]  ;;  %v764_v56 = vld [vmem:[%s23465_s25 + $0x70] sm:$0xff] }
 0x123   : > { %14162 = vmatprep.mubr.msk.f32.mxu1 %vm16260_vm0, %v16261_v21  ;;  %14414 = vmatprep.mubr.msk.f32.mxu0 %vm16260_vm0, %v16261_v21 }
 0x124   : > { %3327 = vperm.xlu0 %15797, %v3261_v10   ;;  %3332 = vperm.xlu1 %15798, %v3262_v23   ;;  %v771_v10 = vld [vmem:[%s23465_s25 + $0xa8] sm:$0xff] }
 0x126   : > { %14163 = vmatmul.mubr.msk.f32.gmra.mrb[60].mxu1 %vm893_vm1, %v12334_v59  ;;  %14415 = vmatmul.mubr.msk.f32.gmra.mrb[60].mxu0 %vm893_vm1, %v12449_v60  ;;  %v12468_v59 = vld [vmem:[%s23465_s25 + $0x410] sm:$0xff]  ;;  %v766_v60 = vld [vmem:[%s23465_s25 + $0x80] sm:$0xff] }
 0x127   : > { %14165 = vmatprep.mubr.msk.f32.mxu1 %vm16260_vm0, %v16261_v21  ;;  %14417 = vmatprep.mubr.msk.f32.mxu0 %vm16260_vm0, %v16261_v21 }
 0x128   : > { %3337 = vperm.xlu0 %15797, %v3263_v24   ;;  %3342 = vperm.xlu1 %15798, %v3264_v25   ;;  %v12475_v25 = vld [vmem:[%s23465_s25 + $0x448] sm:$0xff] }
 0x12a   : > { %14166 = vmatmul.mubr.msk.f32.gmra.mrb[62].mxu1 %vm893_vm1, %v12335_v63  ;;  %14418 = vmatmul.mubr.msk.f32.gmra.mrb[62].mxu0 %vm893_vm1, %v12450_v1  ;;  %v12470_v63 = vld [vmem:[%s23465_s25 + $0x420] sm:$0xff]  ;;  %v768_v1 = vld [vmem:[%s23465_s25 + $0x90] sm:$0xff] }
 0x12b   : > { %14168 = vmatprep.mubr.msk.f32.mxu1 %vm16260_vm0, %v16261_v21  ;;  %14420 = vmatprep.mubr.msk.f32.mxu0 %vm16260_vm0, %v16261_v21 }
 0x12c   : > { %3347 = vperm.xlu0 %15797, %v3265_v26   ;;  %3352 = vperm.xlu1 %15798, %v3266_v27  }
 0x12e   : > { %14169 = vmatmul.mubr.msk.f32.gmra.mrb[64].mxu1 %vm893_vm1, %v12336_v4  ;;  %14421 = vmatmul.mubr.msk.f32.gmra.mrb[64].mxu0 %vm893_vm1, %v12451_v5  ;;  %v12472_v4 = vld [vmem:[%s23465_s25 + $0x430] sm:$0xff] }
 0x12f   : > { %14171 = vmatprep.mubr.msk.f32.mxu1 %vm16260_vm0, %v16261_v21  ;;  %14423 = vmatprep.mubr.msk.f32.mxu0 %vm16260_vm0, %v16261_v21 }
 0x130   : > { %3357 = vperm.xlu0 %15797, %v3267_v28   ;;  %3362 = vperm.xlu1 %15798, %v3268_v31   ;;  %v773_v28 = vld [vmem:[%s23465_s25 + $0xb8] sm:$0xff] }
 0x132   : > { %14172 = vmatmul.mubr.msk.f32.gmra.mrb[66].mxu1 %vm893_vm1, %v12337_v13  ;;  %14424 = vmatmul.mubr.msk.f32.gmra.mrb[66].mxu0 %vm893_vm1, %v12452_v14  ;;  %v770_v14 = vld [vmem:[%s23465_s25 + $0xa0] sm:$0xff] }
 0x133   : > { %14198 = vmatprep.mubr.msk.f32.mxu1 %vm16260_vm0, %v16261_v21  ;;  %14426 = vmatprep.mubr.msk.f32.mxu0 %vm16260_vm0, %v16261_v21 }
 0x134   : > { %3367 = vperm.xlu0 %15797, %v3269_v32   ;;  %3372 = vperm.xlu1 %15798, %v3270_v35   ;;  %v12477_v35 = vld [vmem:[%s23465_s25 + $0x458] sm:$0xff] }
 0x136   : > { %14199 = vmatmul.mubr.msk.f32.vlgmr.msra.gmra.mrb[68].mxu1 %vm893_vm1, %v750_v22  ;;  %14427 = vmatmul.mubr.msk.f32.gmra.mrb[68].mxu0 %vm893_vm1, %v12453_v7 }
 0x137   : > { %14201 = vmatprep.mubr.msk.f32.mxu1 %vm16260_vm0, %v16261_v21  ;;  %14429 = vmatprep.mubr.msk.f32.mxu0 %vm16260_vm0, %v16261_v21 }
 0x138   : > { %3377 = vperm.xlu0 %15797, %v3271_v36   ;;  %3382 = vperm.xlu1 %15798, %v3272_v39  }
 0x13a   : > { %14202 = vmatmul.mubr.msk.f32.gmra.mrb[70].mxu1 %vm893_vm1, %v751_v11  ;;  %14430 = vmatmul.mubr.msk.f32.gmra.mrb[70].mxu0 %vm893_vm1, %v12454_v12  ;;  %v12474_v11 = vld [vmem:[%s23465_s25 + $0x440] sm:$0xff] }
 0x13b   : > { %14204 = vmatprep.mubr.msk.f32.mxu1 %vm16260_vm0, %v16261_v21  ;;  %14432 = vmatprep.mubr.msk.f32.mxu0 %vm16260_vm0, %v16261_v21 }
 0x13c   : > { %3387 = vperm.xlu0 %15797, %v3273_v40   ;;  %3392 = vperm.xlu1 %15798, %v3274_v43   ;;  %v775_v40 = vld [vmem:[%s23465_s25 + $0xc8] sm:$0xff] }
 0x13e   : > { %14205 = vmatmul.mubr.msk.f32.gmra.mrb[72].mxu1 %vm893_vm1, %v752_v15  ;;  %14433 = vmatmul.mubr.msk.f32.gmra.mrb[72].mxu0 %vm893_vm1, %v12455_v16  ;;  %v772_v16 = vld [vmem:[%s23465_s25 + $0xb0] sm:$0xff] }
 0x13f   : > { %14207 = vmatprep.mubr.msk.f32.mxu1 %vm16260_vm0, %v16261_v21  ;;  %14435 = vmatprep.mubr.msk.f32.mxu0 %vm16260_vm0, %v16261_v21 }
 0x142   : > { %14208 = vmatmul.mubr.msk.f32.gmra.mrb[74].mxu1 %vm893_vm1, %v753_v17  ;;  %14436 = vmatmul.mubr.msk.f32.gmra.mrb[74].mxu0 %vm893_vm1, %v12456_v18 }
 0x143   : > { %14210 = vmatprep.mubr.msk.f32.mxu1 %vm16260_vm0, %v16261_v21  ;;  %14438 = vmatprep.mubr.msk.f32.mxu0 %vm16260_vm0, %v16261_v21 }
 0x146   : > { %14211 = vmatmul.mubr.msk.f32.gmra.mrb[76].mxu1 %vm893_vm1, %v754_v29  ;;  %14439 = vmatmul.mubr.msk.f32.gmra.mrb[76].mxu0 %vm893_vm1, %v12457_v30  ;;  %v12476_v29 = vld [vmem:[%s23465_s25 + $0x450] sm:$0xff] }
 0x147   : > { %14213 = vmatprep.mubr.msk.f32.mxu1 %vm16260_vm0, %v16261_v21  ;;  %14441 = vmatprep.mubr.msk.f32.mxu0 %vm16260_vm0, %v16261_v21 }
 0x14a   : > { %14214 = vmatmul.mubr.msk.f32.gmra.mrb[78].mxu1 %vm893_vm1, %v755_v33  ;;  %14442 = vmatmul.mubr.msk.f32.gmra.mrb[78].mxu0 %vm893_vm1, %v12458_v34  ;;  %v774_v34 = vld [vmem:[%s23465_s25 + $0xc0] sm:$0xff] }
 0x14b   : > { %14216 = vmatprep.mubr.msk.f32.mxu1 %vm16260_vm0, %v16261_v21  ;;  %14444 = vmatprep.mubr.msk.f32.mxu0 %vm16260_vm0, %v16261_v21 }
 0x14e   : > { %14217 = vmatmul.mubr.msk.f32.gmra.mrb[80].mxu1 %vm893_vm1, %v756_v37  ;;  %14445 = vmatmul.mubr.msk.f32.gmra.mrb[80].mxu0 %vm893_vm1, %v12459_v38 }
 0x14f   : > { %14219 = vmatprep.mubr.msk.f32.mxu1 %vm16260_vm0, %v16261_v21  ;;  %14447 = vmatprep.mubr.msk.f32.mxu0 %vm16260_vm0, %v16261_v21 }
 0x152   : > { %14220 = vmatmul.mubr.msk.f32.gmra.mrb[82].mxu1 %vm893_vm1, %v757_v41  ;;  %14448 = vmatmul.mubr.msk.f32.gmra.mrb[82].mxu0 %vm893_vm1, %v12460_v42  ;;  %v12478_v41 = vld [vmem:[%s23465_s25 + $0x460] sm:$0xff] }
 0x153   : > { %14222 = vmatprep.mubr.msk.f32.mxu1 %vm16260_vm0, %v16261_v21  ;;  %14450 = vmatprep.mubr.msk.f32.mxu0 %vm16260_vm0, %v16261_v21 }
 0x156   : > { %14223 = vmatmul.mubr.msk.f32.gmra.mrb[84].mxu1 %vm893_vm1, %v758_v44  ;;  %14451 = vmatmul.mubr.msk.f32.gmra.mrb[84].mxu0 %vm893_vm1, %v12461_v45 }
 0x157   : > { %14225 = vmatprep.mubr.msk.f32.mxu1 %vm16260_vm0, %v16261_v21  ;;  %14453 = vmatprep.mubr.msk.f32.mxu0 %vm16260_vm0, %v16261_v21 }
 0x15a   : > { %14226 = vmatmul.mubr.msk.f32.gmra.mrb[86].mxu1 %vm893_vm1, %v759_v46  ;;  %14454 = vmatmul.mubr.msk.f32.gmra.mrb[86].mxu0 %vm893_vm1, %v12462_v47  ;;  %v776_v46 = vld [vmem:[%s23465_s25 + $0xd0] sm:$0xff] }
 0x15b   : > { %14228 = vmatprep.mubr.msk.f32.mxu1 %vm16260_vm0, %v16261_v21  ;;  %14456 = vmatprep.mubr.msk.f32.mxu0 %vm16260_vm0, %v16261_v21 }
 0x15e   : > { %14229 = vmatmul.mubr.msk.f32.gmra.mrb[88].mxu1 %vm893_vm1, %v760_v48  ;;  %14457 = vmatmul.mubr.msk.f32.gmra.mrb[88].mxu0 %vm893_vm1, %v12463_v49 }
 0x15f   : > { %14231 = vmatprep.mubr.msk.f32.mxu1 %vm16260_vm0, %v16261_v21  ;;  %14459 = vmatprep.mubr.msk.f32.mxu0 %vm16260_vm0, %v16261_v21 }
 0x162   : > { %14232 = vmatmul.mubr.msk.f32.gmra.mrb[90].mxu1 %vm893_vm1, %v761_v50  ;;  %14460 = vmatmul.mubr.msk.f32.gmra.mrb[90].mxu0 %vm893_vm1, %v12464_v51  ;;  %v777_v51 = vld [vmem:[%s23465_s25 + $0xd8] sm:$0xff] }
 0x163   : > { %14234 = vmatprep.mubr.msk.f32.mxu1 %vm16260_vm0, %v16261_v21  ;;  %14462 = vmatprep.mubr.msk.f32.mxu0 %vm16260_vm0, %v16261_v21 }
 0x166   : > { %14235 = vmatmul.mubr.msk.f32.gmra.mrb[92].mxu1 %vm893_vm1, %v762_v52  ;;  %14463 = vmatmul.mubr.msk.f32.gmra.mrb[92].mxu0 %vm893_vm1, %v12465_v53 }
 0x167   : > { %14237 = vmatprep.mubr.msk.f32.mxu1 %vm16260_vm0, %v16261_v21  ;;  %14465 = vmatprep.mubr.msk.f32.mxu0 %vm16260_vm0, %v16261_v21 }
 0x16a   : > { %14238 = vmatmul.mubr.msk.f32.gmra.mrb[94].mxu1 %vm893_vm1, %v763_v54  ;;  %14466 = vmatmul.mubr.msk.f32.gmra.mrb[94].mxu0 %vm893_vm1, %v12466_v55 }
 0x16b   : > { %14240 = vmatprep.mubr.msk.f32.mxu1 %vm16260_vm0, %v16261_v21  ;;  %14468 = vmatprep.mubr.msk.f32.mxu0 %vm16260_vm0, %v16261_v21 }
 0x16e   : > { %14241 = vmatmul.mubr.msk.f32.gmra.mrb[96].mxu1 %vm893_vm1, %v764_v56  ;;  %14469 = vmatmul.mubr.msk.f32.gmra.mrb[96].mxu0 %vm893_vm1, %v12467_v57  ;;  %v778_v56 = vld [vmem:[%s23465_s25 + $0xe0] sm:$0xff] }
 0x16f   : > { %14243 = vmatprep.mubr.msk.f32.mxu1 %vm16260_vm0, %v16261_v21  ;;  %14471 = vmatprep.mubr.msk.f32.mxu0 %vm16260_vm0, %v16261_v21 }
 0x172   : > { %14244 = vmatmul.mubr.msk.f32.gmra.mrb[98].mxu1 %vm893_vm1, %v765_v58  ;;  %14472 = vmatmul.mubr.msk.f32.gmra.mrb[98].mxu0 %vm893_vm1, %v12468_v59 }
 0x173   : > { %14246 = vmatprep.mubr.msk.f32.mxu1 %vm16260_vm0, %v16261_v21  ;;  %14474 = vmatprep.mubr.msk.f32.mxu0 %vm16260_vm0, %v16261_v21 }
 0x176   : > { %14247 = vmatmul.mubr.msk.f32.gmra.mrb[100].mxu1 %vm893_vm1, %v766_v60  ;;  %14475 = vmatmul.mubr.msk.f32.gmra.mrb[100].mxu0 %vm893_vm1, %v12469_v61  ;;  %v779_v61 = vld [vmem:[%s23465_s25 + $0xe8] sm:$0xff] }
 0x177   : > { %14249 = vmatprep.mubr.msk.f32.mxu1 %vm16260_vm0, %v16261_v21  ;;  %14477 = vmatprep.mubr.msk.f32.mxu0 %vm16260_vm0, %v16261_v21 }
 0x17a   : > { %14250 = vmatmul.mubr.msk.f32.gmra.mrb[102].mxu1 %vm893_vm1, %v767_v62  ;;  %14478 = vmatmul.mubr.msk.f32.gmra.mrb[102].mxu0 %vm893_vm1, %v12470_v63 }
 0x17b   : > { %14252 = vmatprep.mubr.msk.f32.mxu1 %vm16260_vm0, %v16261_v21  ;;  %14480 = vmatprep.mubr.msk.f32.mxu0 %vm16260_vm0, %v16261_v21 }
 0x17e   : > { %14253 = vmatmul.mubr.msk.f32.gmra.mrb[104].mxu1 %vm893_vm1, %v768_v1  ;;  %14481 = vmatmul.mubr.msk.f32.gmra.mrb[104].mxu0 %vm893_vm1, %v12471_v2 }
 0x17f   : > { %14255 = vmatprep.mubr.msk.f32.mxu1 %vm16260_vm0, %v16261_v21  ;;  %14483 = vmatprep.mubr.msk.f32.mxu0 %vm16260_vm0, %v16261_v21 }
 0x181   : > { %v17355_v5 = vpop.f32.mrb[0].mxu1  ;;  %v17357_v6 = vpop.f32.mrb[0].mxu0 }
 0x182   : > { %v14074_v9 = vpop.f32.mrb[1].mxu1  ;;  %14256 = vmatmul.mubr.msk.f32.gmra.mrb[106].mxu1 %vm893_vm1, %v769_v3  ;;  %v14035_v13 = vpop.f32.mrb[1].mxu0  ;;  %14484 = vmatmul.mubr.msk.f32.gmra.mrb[106].mxu0 %vm893_vm1, %v12472_v4  ;;  %v780_v3 = vld [vmem:[%s23465_s25 + $0xf0] sm:$0xff] }
 0x183   : > { %14258 = vmatprep.mubr.msk.f32.mxu1 %vm16260_vm0, %v16261_v21  ;;  %14486 = vmatprep.mubr.msk.f32.mxu0 %vm16260_vm0, %v16261_v21 }
 0x185   : > { %v17371_v20 = vpop.f32.mrb[2].mxu1  ;;  %v17373_v22 = vpop.f32.mrb[2].mxu0 }
 0x186   : > { %v14077_v7 = vpop.f32.mrb[3].mxu1  ;;  %14259 = vmatmul.mubr.msk.f32.gmra.mrb[108].mxu1 %vm893_vm1, %v770_v14  ;;  %v14038_v8 = vpop.f32.mrb[3].mxu0  ;;  %14487 = vmatmul.mubr.msk.f32.gmra.mrb[108].mxu0 %vm893_vm1, %v12473_v19  ;;  %v781_v19 = vld [vmem:[%s23465_s25 + $0xf8] sm:$0xff] }
 0x187   : > { %14261 = vmatprep.mubr.msk.f32.mxu1 %vm16260_vm0, %v16261_v21  ;;  %14489 = vmatprep.mubr.msk.f32.mxu0 %vm16260_vm0, %v16261_v21 }
 0x189   : > { %v17387_v12 = vpop.f32.mrb[4].mxu1  ;;  %v17389_v23 = vpop.f32.mrb[4].mxu0 }
 0x18a   : > { %v14080_v24 = vpop.f32.mrb[5].mxu1  ;;  %14262 = vmatmul.mubr.msk.f32.gmra.mrb[110].mxu1 %vm893_vm1, %v771_v10  ;;  %v14041_v15 = vpop.f32.mrb[5].mxu0  ;;  %14490 = vmatmul.mubr.msk.f32.gmra.mrb[110].mxu0 %vm893_vm1, %v12474_v11 }
 0x18b   : > { %14264 = vmatprep.mubr.msk.f32.mxu1 %vm16260_vm0, %v16261_v21  ;;  %14492 = vmatprep.mubr.msk.f32.mxu0 %vm16260_vm0, %v16261_v21  ;;  %v782_v24 = vld [vmem:[%s23465_s25 + $0x100] sm:$0xff] }
 0x18d   : > { %v17403_v26 = vpop.f32.mrb[6].mxu1  ;;  %v17405_v17 = vpop.f32.mrb[6].mxu0 }
 0x18e   : > { %v14083_v18 = vpop.f32.mrb[7].mxu1  ;;  %14265 = vmatmul.mubr.msk.f32.gmra.mrb[112].mxu1 %vm893_vm1, %v772_v16  ;;  %v14044_v27 = vpop.f32.mrb[7].mxu0  ;;  %14493 = vmatmul.mubr.msk.f32.gmra.mrb[112].mxu0 %vm893_vm1, %v12475_v25 }
 0x18f   : > { %14267 = vmatprep.mubr.msk.f32.mxu1 %vm16260_vm0, %v16261_v21  ;;  %14495 = vmatprep.mubr.msk.f32.mxu0 %vm16260_vm0, %v16261_v21  ;;  %v783_v27 = vld [vmem:[%s23465_s25 + $0x108] sm:$0xff] }
 0x191   : > { %v17419_v30 = vpop.f32.mrb[8].mxu1  ;;  %v17421_v31 = vpop.f32.mrb[8].mxu0 }
 0x192   : > { %v14086_v32 = vpop.f32.mrb[9].mxu1  ;;  %14268 = vmatmul.mubr.msk.f32.gmra.mrb[114].mxu1 %vm893_vm1, %v773_v28  ;;  %v14047_v33 = vpop.f32.mrb[9].mxu0  ;;  %14496 = vmatmul.mubr.msk.f32.gmra.mrb[114].mxu0 %vm893_vm1, %v12476_v29 }
 0x193   : > { %14270 = vmatprep.mubr.msk.f32.mxu1 %vm16260_vm0, %v16261_v21  ;;  %14498 = vmatprep.mubr.msk.f32.mxu0 %vm16260_vm0, %v16261_v21 }
 0x195   : > { %v17435_v36 = vpop.f32.mrb[10].mxu1  ;;  %v17437_v37 = vpop.f32.mrb[10].mxu0 }
 0x196   : > { %v14089_v38 = vpop.f32.mrb[11].mxu1  ;;  %14271 = vmatmul.mubr.msk.f32.gmra.mrb[116].mxu1 %vm893_vm1, %v774_v34  ;;  %v14050_v39 = vpop.f32.mrb[11].mxu0  ;;  %14499 = vmatmul.mubr.msk.f32.gmra.mrb[116].mxu0 %vm893_vm1, %v12477_v35  ;;  %v784_v34 = vld [vmem:[%s23465_s25 + $0x110] sm:$0xff] }
 0x197   : > { %14273 = vmatprep.mubr.msk.f32.mxu1 %vm16260_vm0, %v16261_v21  ;;  %14501 = vmatprep.mubr.msk.f32.mxu0 %vm16260_vm0, %v16261_v21 }
 0x199   : > { %v17451_v42 = vpop.f32.mrb[12].mxu1  ;;  %v17453_v43 = vpop.f32.mrb[12].mxu0 }
 0x19a   : > { %v14092_v44 = vpop.f32.mrb[13].mxu1  ;;  %14274 = vmatmul.mubr.msk.f32.gmra.mrb[118].mxu1 %vm893_vm1, %v775_v40  ;;  %v14053_v45 = vpop.f32.mrb[13].mxu0  ;;  %14502 = vmatmul.mubr.msk.f32.gmra.mrb[118].mxu0 %vm893_vm1, %v12478_v41  ;;  %v785_v41 = vld [vmem:[%s23465_s25 + $0x118] sm:$0xff] }
 0x19b   : > { %14276 = vmatprep.mubr.msk.f32.mxu1 %vm16260_vm0, %v16261_v21 }
 0x19d   : > { %v17462_v47 = vpop.f32.mrb[14].mxu1  ;;  %v17464_v48 = vpop.f32.mrb[14].mxu0 }
 0x19e   : > { %v14095_v49 = vpop.f32.mrb[15].mxu1  ;;  %14277 = vmatmul.mubr.msk.f32.gmra.mrb[120].mxu1 %vm893_vm1, %v776_v46  ;;  %v14056_v50 = vpop.f32.mrb[15].mxu0 }
 0x19f   : > { %14279 = vmatprep.mubr.msk.f32.mxu1 %vm16260_vm0, %v16261_v21  ;;  %v786_v50 = vld [vmem:[%s23465_s25 + $0x120] sm:$0xff] }
 0x1a1   : > { %v17472_v52 = vpop.f32.mrb[16].mxu1  ;;  %v17474_v53 = vpop.f32.mrb[16].mxu0 }
 0x1a2   : > { %v14098_v54 = vpop.f32.mrb[17].mxu1  ;;  %14280 = vmatmul.mubr.msk.f32.gmra.mrb[122].mxu1 %vm893_vm1, %v777_v51  ;;  %v14059_v55 = vpop.f32.mrb[17].mxu0 }
 0x1a3   : > { %14282 = vmatprep.mubr.msk.f32.mxu1 %vm16260_vm0, %v16261_v21 }
 0x1a5   : > { %v17482_v57 = vpop.f32.mrb[18].mxu1  ;;  %v17484_v58 = vpop.f32.mrb[18].mxu0 }
 0x1a6   : > { %v14101_v59 = vpop.f32.mrb[19].mxu1  ;;  %14283 = vmatmul.mubr.msk.f32.gmra.mrb[124].mxu1 %vm893_vm1, %v778_v56  ;;  %v14062_v60 = vpop.f32.mrb[19].mxu0 }
 0x1a7   : > { %14285 = vmatprep.mubr.msk.f32.mxu1 %vm16260_vm0, %v16261_v21  ;;  %v787_v59 = vld [vmem:[%s23465_s25 + $0x128] sm:$0xff] }
 0x1a9   : > { %v17492_v62 = vpop.f32.mrb[20].mxu1  ;;  %v17494_v63 = vpop.f32.mrb[20].mxu0 }
 0x1aa   : > { %v14104_v1 = vpop.f32.mrb[21].mxu1  ;;  %14286 = vmatmul.mubr.msk.f32.gmra.mrb[126].mxu1 %vm893_vm1, %v779_v61  ;;  %v14065_v2 = vpop.f32.mrb[21].mxu0 }
 0x1ab   : > { %14288 = vmatprep.mubr.msk.f32.mxu1 %vm16260_vm0, %v16261_v21 }
 0x1ad   : > { %v17502_v4 = vpop.f32.mrb[22].mxu1  ;;  %v17504_v9 = vpop.f32.mrb[22].mxu0 }
 0x1ae   : > { %23468 = vst [vmem:[#allocation2_spill] sm:$0xff] %v17502_v4  ;;  %v14107_v13 = vpop.f32.mrb[23].mxu1  ;;  %14289 = vmatmul.mubr.msk.f32.gmra.mrb[128].mxu1 %vm893_vm1, %v780_v3  ;;  %v14068_v14 = vpop.f32.mrb[23].mxu0  ;;  %v788_v3 = vld [vmem:[%s23465_s25 + $0x130] sm:$0xff] }
 0x1af   : > { %14291 = vmatprep.mubr.msk.f32.mxu1 %vm16260_vm0, %v16261_v21 }
 0x1b1   : > { %v17512_v7 = vpop.f32.mrb[24].mxu1  ;;  %v17514_v8 = vpop.f32.mrb[24].mxu0 }
 0x1b2   : > { %23469 = vst [vmem:[#allocation3_spill] sm:$0xff] %v17512_v7  ;;  %v14110_v10 = vpop.f32.mrb[25].mxu1  ;;  %14292 = vmatmul.mubr.msk.f32.gmra.mrb[130].mxu1 %vm893_vm1, %v781_v19  ;;  %v14071_v11 = vpop.f32.mrb[25].mxu0 }
 0x1b3   : > { %14294 = vmatprep.mubr.msk.f32.mxu1 %vm16260_vm0, %v16261_v21  ;;  %v789_v11 = vld [vmem:[%s23465_s25 + $0x138] sm:$0xff] }
 0x1b5   : > { %v17522_v15 = vpop.f32.mrb[26].mxu1  ;;  %v17524_v16 = vpop.f32.mrb[26].mxu0 }
 0x1b6   : > { %23470 = vst [vmem:[#allocation4_spill] sm:$0xff] %v17522_v15  ;;  %v14113_v25 = vpop.f32.mrb[27].mxu1  ;;  %14295 = vmatmul.mubr.msk.f32.gmra.mrb[132].mxu1 %vm893_vm1, %v782_v24  ;;  %v14365_v18 = vpop.f32.mrb[27].mxu0 }
 0x1b7   : > { %14297 = vmatprep.mubr.msk.f32.mxu1 %vm16260_vm0, %v16261_v21 }
 0x1b9   : > { %v17532_v28 = vpop.f32.mrb[28].mxu1  ;;  %v17534_v29 = vpop.f32.mrb[28].mxu0 }
 0x1ba   : > { %23471 = vst [vmem:[#allocation5_spill] sm:$0xff] %v17532_v28  ;;  %v14116_v32 = vpop.f32.mrb[29].mxu1  ;;  %14298 = vmatmul.mubr.msk.f32.gmra.mrb[134].mxu1 %vm893_vm1, %v783_v27  ;;  %v14368_v33 = vpop.f32.mrb[29].mxu0 }
 0x1bb   : > { %14300 = vmatprep.mubr.msk.f32.mxu1 %vm16260_vm0, %v16261_v21  ;;  %v790_v32 = vld [vmem:[%s23465_s25 + $0x140] sm:$0xff] }
 0x1bd   : > { %v17542_v35 = vpop.f32.mrb[30].mxu1  ;;  %v17544_v38 = vpop.f32.mrb[30].mxu0 }
 0x1be   : > { %23472 = vst [vmem:[#allocation6_spill] sm:$0xff] %v17542_v35  ;;  %v14119_v39 = vpop.f32.mrb[31].mxu1  ;;  %14301 = vmatmul.mubr.msk.f32.gmra.mrb[136].mxu1 %vm893_vm1, %v784_v34  ;;  %v14371_v40 = vpop.f32.mrb[31].mxu0 }
 0x1bf   : > { %14303 = vmatprep.mubr.msk.f32.mxu1 %vm16260_vm0, %v16261_v21  ;;  %v2403_v35 = vpop.permute.xlu1 %2402 }
 0x1c1   : > { %v17552_v44 = vpop.f32.mrb[32].mxu1  ;;  %v17554_v45 = vpop.f32.mrb[32].mxu0 }
 0x1c2   : > { %23473 = vst [vmem:[#allocation7_spill] sm:$0xff] %v17552_v44  ;;  %v14122_v46 = vpop.f32.mrb[33].mxu1  ;;  %14304 = vmatmul.mubr.msk.f32.gmra.mrb[138].mxu1 %vm893_vm1, %v785_v41  ;;  %v14374_v49 = vpop.f32.mrb[33].mxu0  ;;  %v791_v41 = vld [vmem:[%s23465_s25 + $0x148] sm:$0xff] }
 0x1c3   : > { %14306 = vmatprep.mubr.msk.f32.mxu1 %vm16260_vm0, %v16261_v21  ;;  %v2398_v44 = vpop.permute.xlu0 %2397  ;;  %v2408_v7 = vpop.permute.xlu1 %2407 }
 0x1c5   : > { %v17562_v51 = vpop.f32.mrb[34].mxu1  ;;  %v17564_v54 = vpop.f32.mrb[34].mxu0 }
 0x1c6   : > { %23474 = vst [vmem:[#allocation8_spill] sm:$0xff] %v17562_v51  ;;  %v14125_v55 = vpop.f32.mrb[35].mxu1  ;;  %14307 = vmatmul.mubr.msk.f32.gmra.mrb[140].mxu1 %vm893_vm1, %v786_v50  ;;  %v14377_v56 = vpop.f32.mrb[35].mxu0 }
 0x1c7   : > { %14309 = vmatprep.mubr.msk.f32.mxu1 %vm16260_vm0, %v16261_v21  ;;  %v792_v56 = vld [vmem:[%s23465_s25 + $0x150] sm:$0xff]  ;;  %v2413_v4 = vpop.permute.xlu0 %2412 }
 0x1c9   : > { %v17572_v60 = vpop.f32.mrb[36].mxu1  ;;  %v17574_v61 = vpop.f32.mrb[36].mxu0 }
 0x1ca   : > { %23475 = vst [vmem:[#allocation9_spill] sm:$0xff] %v17572_v60  ;;  %v14128_v1 = vpop.f32.mrb[37].mxu1  ;;  %14310 = vmatmul.mubr.msk.f32.gmra.mrb[142].mxu1 %vm893_vm1, %v787_v59  ;;  %v14380_v2 = vpop.f32.mrb[37].mxu0 }
 0x1cb   : > { %14312 = vmatprep.mubr.msk.f32.mxu1 %vm16260_vm0, %v16261_v21 }
 0x1cd   : > { %v17582_v13 = vpop.f32.mrb[38].mxu1  ;;  %v17584_v14 = vpop.f32.mrb[38].mxu0 }
 0x1ce   : > { %23476 = vst [vmem:[#allocation10_spill] sm:$0xff] %v17582_v13  ;;  %v14131_v19 = vpop.f32.mrb[39].mxu1  ;;  %14313 = vmatmul.mubr.msk.f32.gmra.mrb[144].mxu1 %vm893_vm1, %v788_v3  ;;  %v14383_v10 = vpop.f32.mrb[39].mxu0 }
 0x1cf   : > { %14315 = vmatprep.mubr.msk.f32.mxu1 %vm16260_vm0, %v16261_v21  ;;  %v793_v19 = vld [vmem:[%s23465_s25 + $0x158] sm:$0xff] }
 0x1d1   : > { %v17592_v24 = vpop.f32.mrb[40].mxu1  ;;  %v17594_v25 = vpop.f32.mrb[40].mxu0 }
 0x1d2   : > { %23477 = vst [vmem:[#allocation11_spill] sm:$0xff] %v17592_v24  ;;  %v14134_v18 = vpop.f32.mrb[41].mxu1  ;;  %14316 = vmatmul.mubr.msk.f32.gmra.mrb[146].mxu1 %vm893_vm1, %v789_v11  ;;  %v14386_v27 = vpop.f32.mrb[41].mxu0 }
 0x1d3   : > { %14318 = vmatprep.mubr.msk.f32.mxu1 %vm16260_vm0, %v16261_v21 }
 0x1d5   : > { %v17602_v33 = vpop.f32.mrb[42].mxu1  ;;  %v17604_v34 = vpop.f32.mrb[42].mxu0 }
 0x1d6   : > { %23478 = vst [vmem:[#allocation12_spill] sm:$0xff] %v17602_v33  ;;  %v14137_v39 = vpop.f32.mrb[43].mxu1  ;;  %14319 = vmatmul.mubr.msk.f32.gmra.mrb[148].mxu1 %vm893_vm1, %v790_v32  ;;  %v14389_v40 = vpop.f32.mrb[43].mxu0  ;;  %v794_v32 = vld [vmem:[%s23465_s25 + $0x160] sm:$0xff] }
 0x1d7   : > { %14321 = vmatprep.mubr.msk.f32.mxu1 %vm16260_vm0, %v16261_v21 }
 0x1d9   : > { %v17612_v46 = vpop.f32.mrb[44].mxu1  ;;  %v17614_v49 = vpop.f32.mrb[44].mxu0 }
 0x1da   : > { %23479 = vst [vmem:[#allocation13_spill] sm:$0xff] %v17612_v46  ;;  %v14140_v50 = vpop.f32.mrb[45].mxu1  ;;  %14322 = vmatmul.mubr.msk.f32.gmra.mrb[150].mxu1 %vm893_vm1, %v791_v41  ;;  %v14392_v55 = vpop.f32.mrb[45].mxu0 }
 0x1db   : > { %14324 = vmatprep.mubr.msk.f32.mxu1 %vm16260_vm0, %v16261_v21  ;;  %v795_v55 = vld [vmem:[%s23465_s25 + $0x168] sm:$0xff] }
 0x1dd   : > { %v17622_v59 = vpop.f32.mrb[46].mxu1  ;;  %v17624_v1 = vpop.f32.mrb[46].mxu0 }
 0x1de   : > { %23480 = vst [vmem:[#allocation14_spill] sm:$0xff] %v17622_v59  ;;  %v14143_v2 = vpop.f32.mrb[47].mxu1  ;;  %14325 = vmatmul.mubr.msk.f32.gmra.mrb[152].mxu1 %vm893_vm1, %v792_v56  ;;  %v14395_v3 = vpop.f32.mrb[47].mxu0 }
 0x1df   : > { %14327 = vmatprep.mubr.msk.f32.mxu1 %vm16260_vm0, %v16261_v21 }
 0x1e1   : > { %v17632_v10 = vpop.f32.mrb[48].mxu1  ;;  %v17634_v11 = vpop.f32.mrb[48].mxu0 }
 0x1e2   : > { %23481 = vst [vmem:[#allocation15_spill] sm:$0xff] %v17632_v10  ;;  %v14146_v18 = vpop.f32.mrb[49].mxu1  ;;  %14328 = vmatmul.mubr.msk.f32.gmra.mrb[154].mxu1 %vm893_vm1, %v793_v19  ;;  %v14398_v27 = vpop.f32.mrb[49].mxu0 }
 0x1e3   : > { %14330 = vmatprep.mubr.msk.f32.mxu1 %vm16260_vm0, %v16261_v21  ;;  %v796_v18 = vld [vmem:[%s23465_s25 + $0x170] sm:$0xff]  ;;  %s13501_s25 = sshll.u32 %s23525_s26, 5 }
 0x1e4   : > { %s737_s30 = scalar_lea.vmem %s23433_s24, %s13501_s25 }
 0x1e5   : > { %v17642_v39 = vpop.f32.mrb[50].mxu1  ;;  %v17644_v40 = vpop.f32.mrb[50].mxu0 }
 0x1e6   : > { %23482 = vst [vmem:[#allocation16_spill] sm:$0xff] %v17642_v39  ;;  %v14149_v41 = vpop.f32.mrb[51].mxu1  ;;  %14331 = vmatmul.mubr.msk.f32.gmra.mrb[156].mxu1 %vm893_vm1, %v794_v32  ;;  %v14401_v50 = vpop.f32.mrb[51].mxu0 }
 0x1e7   : > { %14333 = vmatprep.mubr.msk.f32.mxu1 %vm16260_vm0, %v16261_v21 }
 0x1e9   : > { %v17652_v56 = vpop.f32.mrb[52].mxu1  ;;  %v17654_v2 = vpop.f32.mrb[52].mxu0 }
 0x1ea   : > { %23483 = vst [vmem:[#allocation17_spill] sm:$0xff] %v17652_v56  ;;  %v14152_v3 = vpop.f32.mrb[53].mxu1  ;;  %14334 = vmatmul.mubr.msk.f32.gmra.mrb[158].mxu1 %vm893_vm1, %v795_v55  ;;  %v14404_v19 = vpop.f32.mrb[53].mxu0 }
 0x1eb   : > { %14336 = vmatprep.mubr.msk.f32.mxu1 %vm16260_vm0, %v16261_v21  ;;  %vm9136_vm0 = vcmask 162816  }
 0x1ed   : > { %v17662_v27 = vpop.f32.mrb[54].mxu1  ;;  %v17664_v32 = vpop.f32.mrb[54].mxu0 }
 0x1ee   : > { %23484 = vst [vmem:[#allocation18_spill] sm:$0xff] %v17662_v27  ;;  %v14155_v41 = vpop.f32.mrb[55].mxu1  ;;  %14337 = vmatmul.mubr.msk.f32.gmra.mrb[160].mxu1 %vm893_vm1, %v796_v18  ;;  %v14407_v50 = vpop.f32.mrb[55].mxu0  ;;  %vm9574_vm1 = vcmask 261120  }
 0x1f1   : > { %v17667_v0 = vpop.f32.mrb[56].mxu1  ;;  %v17669_v3 = vpop.f32.mrb[56].mxu0 }
 0x1f2   : > { %23485 = vst [vmem:[#allocation19_spill] sm:$0xff] %v17667_v0  ;;  %v14158_v55 = vpop.f32.mrb[57].mxu1  ;;  %v14410_v19 = vpop.f32.mrb[57].mxu0 }
 0x1f5   : > { %v17671_v56 = vpop.f32.mrb[58].mxu1  ;;  %v17673_v21 = vpop.f32.mrb[58].mxu0 }
 0x1f6   : > { %23486 = vst [vmem:[#allocation20_spill] sm:$0xff] %v17671_v56  ;;  %v14161_v39 = vpop.f32.mrb[59].mxu1  ;;  %v14413_v10 = vpop.f32.mrb[59].mxu0 }
 0x1f9   : > { %v17675_v59 = vpop.f32.mrb[60].mxu1  ;;  %v17677_v27 = vpop.f32.mrb[60].mxu0 }
 0x1fa   : > { %23487 = vst [vmem:[#allocation21_spill] sm:$0xff] %v17675_v59  ;;  %v14164_v41 = vpop.f32.mrb[61].mxu1  ;;  %v14416_v46 = vpop.f32.mrb[61].mxu0 }
 0x1fd   : > { %v17679_v18 = vpop.f32.mrb[62].mxu1  ;;  %v17681_v50 = vpop.f32.mrb[62].mxu0 }
 0x1fe   : > { %23488 = vst [vmem:[#allocation22_spill] sm:$0xff] %v17679_v18  ;;  %v14167_v0 = vpop.f32.mrb[63].mxu1  ;;  %v14419_v33 = vpop.f32.mrb[63].mxu0 }
 0x201   : > { %v17683_v55 = vpop.f32.mrb[64].mxu1  ;;  %v17685_v19 = vpop.f32.mrb[64].mxu0 }
 0x202   : > { %23489 = vst [vmem:[#allocation23_spill] sm:$0xff] %v17683_v55  ;;  %v14170_v56 = vpop.f32.mrb[65].mxu1  ;;  %v14422_v24 = vpop.f32.mrb[65].mxu0 }
 0x205   : > { %v17687_v39 = vpop.f32.mrb[66].mxu1  ;;  %v17689_v10 = vpop.f32.mrb[66].mxu0 }
 0x206   : > { %23490 = vst [vmem:[#allocation24_spill] sm:$0xff] %v17687_v39  ;;  %v14173_v59 = vpop.f32.mrb[67].mxu1  ;;  %v14425_v13 = vpop.f32.mrb[67].mxu0 }
 0x209   : > { %v1542_v41 = vpop.f32.mrb[68].mxu1  ;;  %v17691_v46 = vpop.f32.mrb[68].mxu0 }
 0x20a   : > { %v1543_v18 = vadd.f32 %v1542_v41, %v17357_v6  ;;  %v14200_v60 = vpop.f32.mrb[69].mxu1  ;;  %v14428_v0 = vpop.f32.mrb[69].mxu0  ;;  %v2725_v6 = vld [vmem:[%s23491_s3 + $0x8] sm:$0xff] }
 0x20b   : > { %2933 = vmatprep.mubr.f32.mxu1 %v2725_v6 }
 0x20c   : > { %v2301_v33 = vadd.f32 %v17524_v16, %v1543_v18 }
 0x20d   : > { %v1547_v55 = vpop.f32.mrb[70].mxu1  ;;  %v17695_v51 = vpop.f32.mrb[70].mxu0 }
 0x20e   : > { %v1548_v24 = vadd.f32 %v1547_v55, %v17373_v22  ;;  %v14203_v56 = vpop.f32.mrb[71].mxu1  ;;  %v14431_v39 = vpop.f32.mrb[71].mxu0  ;;  %v2630_v59 = vadd.f32 %v2398_v44, %v2301_v33 }
 0x210   : > { %v2302_v13 = vadd.f32 %v17534_v29, %v1548_v24  ;;  %v2677_v22 = vmax.f32 %v2630_v59, 0.0 }
 0x211   : > { %v1552_v28 = vpop.f32.mrb[72].mxu1  ;;  %v17699_v15 = vpop.f32.mrb[72].mxu0 }
 0x212   : > { %v2631_v16 = vadd.f32 %v2403_v35, %v2302_v13  ;;  %v1553_v60 = vadd.f32 %v1552_v28, %v17389_v23  ;;  %v14206_v18 = vpop.f32.mrb[73].mxu1  ;;  %v14434_v41 = vpop.f32.mrb[73].mxu0  ;;  %v23492_v13 = vmov 0.0|0.0  }
 0x214   : > { %v2678_v55 = vmax.f32 %v2631_v16, 0.0  ;;  %v2303_v39 = vadd.f32 %v17544_v38, %v1553_v60 }
 0x215   : > { %v1557_v44 = vpop.f32.mrb[74].mxu1  ;;  %v17706_v0 = vpop.f32.mrb[74].mxu0 }
 0x216   : > { %v1558_v29 = vadd.f32 %v1557_v44, %v17405_v17  ;;  %v14209_v33 = vpop.f32.mrb[75].mxu1  ;;  %v14897_v24 = vpack.c.bf16 %v2678_v55, %v2677_v22  ;;  %v14437_v56 = vpop.f32.mrb[75].mxu0  ;;  %v2632_v35 = vadd.f32 %v2408_v7, %v2303_v39 }
 0x217   : > { %v2423_v33 = vpop.permute.xlu0 %2422 }
 0x218   : > { %v2304_v23 = vadd.f32 %v17554_v45, %v1558_v29  ;;  %14898 = vmatpush1.bf16.msra.mxu1 %v14897_v24  ;;  %v2679_v17 = vmax.f32 %v2632_v35, 0.0  ;;  %v2418_v29 = vpop.permute.xlu1 %2417 }
 0x219   : > { %v1562_v28 = vpop.f32.mrb[76].mxu1  ;;  %14899 = vmatprep.subr.bf16.mxu1 %v23492_v13  ;;  %v17711_v59 = vpop.f32.mrb[76].mxu0 }
 0x21a   : > { %v2633_v38 = vadd.f32 %v2413_v4, %v2304_v23  ;;  %v1563_v6 = vadd.f32 %v1562_v28, %v17421_v31  ;;  %v14212_v16 = vpop.f32.mrb[77].mxu1  ;;  %v14440_v60 = vpop.f32.mrb[77].mxu0 }
 0x21c   : > { %v2680_v18 = vmax.f32 %v2633_v38, 0.0  ;;  %v2305_v41 = vadd.f32 %v17564_v54, %v1563_v6 }
 0x21d   : > { %v1567_v22 = vpop.f32.mrb[78].mxu1  ;;  %v17715_v55 = vpop.f32.mrb[78].mxu0 }
 0x21e   : > { %v1568_v7 = vadd.f32 %v1567_v22, %v17437_v37  ;;  %v14215_v45 = vpop.f32.mrb[79].mxu1  ;;  %v14900_v39 = vpack.c.bf16 %v2680_v18, %v2679_v17  ;;  %v14443_v44 = vpop.f32.mrb[79].mxu0  ;;  %v2634_v24 = vadd.f32 %v2418_v29, %v2305_v41 }
 0x21f   : > { %v2428_v22 = vpop.permute.xlu1 %2427 }
 0x220   : > { %v2306_v4 = vadd.f32 %v17574_v61, %v1568_v7  ;;  %14901 = vmatpush1.bf16.msra.mxu1 %v14900_v39  ;;  %v2681_v37 = vmax.f32 %v2634_v24, 0.0  ;;  %v2433_v7 = vpop.permute.xlu0 %2432 }
 0x221   : > { %v1572_v31 = vpop.f32.mrb[80].mxu1  ;;  %14902 = vmatprep.subr.bf16.mxu1 %v23492_v13  ;;  %v17720_v56 = vpop.f32.mrb[80].mxu0 }
 0x222   : > { %v2635_v54 = vadd.f32 %v2423_v33, %v2306_v4  ;;  %v1573_v35 = vadd.f32 %v1572_v31, %v17453_v43  ;;  %v14218_v23 = vpop.f32.mrb[81].mxu1  ;;  %v14446_v28 = vpop.f32.mrb[81].mxu0 }
 0x224   : > { %v2682_v38 = vmax.f32 %v2635_v54, 0.0  ;;  %v2307_v6 = vadd.f32 %v17584_v14, %v1573_v35 }
 0x225   : > { %v1577_v16 = vpop.f32.mrb[82].mxu1  ;;  %v17724_v60 = vpop.f32.mrb[82].mxu0 }
 0x226   : > { %v1578_v61 = vadd.f32 %v1577_v16, %v17464_v48  ;;  %v14221_v17 = vpop.f32.mrb[83].mxu1  ;;  %v14903_v18 = vpack.c.bf16 %v2682_v38, %v2681_v37  ;;  %v14449_v41 = vpop.f32.mrb[83].mxu0  ;;  %v2636_v45 = vadd.f32 %v2428_v22, %v2307_v6 }
 0x227   : > { %v2438_v38 = vpop.permute.xlu1 %2437  ;;  %v2443_v6 = vpop.permute.xlu0 %2442 }
 0x228   : > { %v2308_v39 = vadd.f32 %v17594_v25, %v1578_v61  ;;  %14904 = vmatpush1.bf16.msra.mxu1 %v14903_v18  ;;  %v2683_v48 = vmax.f32 %v2636_v45, 0.0 }
 0x229   : > { %v1582_v43 = vpop.f32.mrb[84].mxu1  ;;  %14905 = vmatprep.subr.bf16.mxu1 %v23492_v13  ;;  %v17729_v44 = vpop.f32.mrb[84].mxu0 }
 0x22a   : > { %v2637_v14 = vadd.f32 %v2433_v7, %v2308_v39  ;;  %v1583_v29 = vadd.f32 %v1582_v43, %v17474_v53  ;;  %v14224_v33 = vpop.f32.mrb[85].mxu1  ;;  %v14452_v24 = vpop.f32.mrb[85].mxu0 }
 0x22b   : > { %v2448_v24 = vpop.permute.xlu1 %2447 }
 0x22c   : > { %v2684_v4 = vmax.f32 %v2637_v14, 0.0  ;;  %v2309_v31 = vadd.f32 %v17604_v34, %v1583_v29 }
 0x22d   : > { %v1587_v54 = vpop.f32.mrb[86].mxu1  ;;  %v17733_v35 = vpop.f32.mrb[86].mxu0 }
 0x22e   : > { %v1588_v25 = vadd.f32 %v1587_v54, %v17484_v58  ;;  %v14227_v23 = vpop.f32.mrb[87].mxu1  ;;  %v14906_v28 = vpack.c.bf16 %v2684_v4, %v2683_v48  ;;  %v14455_v37 = vpop.f32.mrb[87].mxu0  ;;  %v2638_v16 = vadd.f32 %v2438_v38, %v2309_v31 }
 0x22f   : > { %v2453_v48 = vpop.permute.xlu0 %2452 }
 0x230   : > { %v2310_v61 = vadd.f32 %v17614_v49, %v1588_v25  ;;  %14907 = vmatpush1.bf16.msra.mxu1 %v14906_v28  ;;  %v2685_v58 = vmax.f32 %v2638_v16, 0.0 }
 0x231   : > { %v1592_v53 = vpop.f32.mrb[88].mxu1  ;;  %14908 = vmatprep.subr.bf16.mxu1 %v23492_v13  ;;  %v17738_v17 = vpop.f32.mrb[88].mxu0 }
 0x232   : > { %v2639_v34 = vadd.f32 %v2443_v6, %v2310_v61  ;;  %v1593_v18 = vadd.f32 %v1592_v53, %v17494_v63  ;;  %v14230_v41 = vpop.f32.mrb[89].mxu1  ;;  %v14458_v22 = vpop.f32.mrb[89].mxu0 }
 0x233   : > { %v2463_v41 = vpop.permute.xlu0 %2462 }
 0x234   : > { %v2686_v7 = vmax.f32 %v2639_v34, 0.0  ;;  %v2311_v45 = vadd.f32 %v17624_v1, %v1593_v18  ;;  %v2458_v18 = vpop.permute.xlu1 %2457 }
 0x235   : > { %v1597_v39 = vpop.f32.mrb[90].mxu1  ;;  %v17742_v43 = vpop.f32.mrb[90].mxu0 }
 0x236   : > { %v1598_v49 = vadd.f32 %v1597_v39, %v17504_v9  ;;  %v14233_v14 = vpop.f32.mrb[91].mxu1  ;;  %v14909_v29 = vpack.c.bf16 %v2686_v7, %v2685_v58  ;;  %v14461_v33 = vpop.f32.mrb[91].mxu0  ;;  %v2640_v4 = vadd.f32 %v2448_v24, %v2311_v45 }
 0x238   : > { %v2312_v31 = vadd.f32 %v17634_v11, %v1598_v49  ;;  %14910 = vmatpush1.bf16.msra.mxu1 %v14909_v29  ;;  %v2687_v9 = vmax.f32 %v2640_v4, 0.0 }
 0x239   : > { %v1602_v63 = vpop.f32.mrb[92].mxu1  ;;  %14911 = vmatprep.subr.bf16.mxu1 %v23492_v13  ;;  %v17747_v54 = vpop.f32.mrb[92].mxu0 }
 0x23a   : > { %v2641_v1 = vadd.f32 %v2453_v48, %v2312_v31  ;;  %v1603_v25 = vadd.f32 %v1602_v63, %v17514_v8  ;;  %v14236_v23 = vpop.f32.mrb[93].mxu1  ;;  %v14464_v28 = vpop.f32.mrb[93].mxu0 }
 0x23b   : > { %v2468_v63 = vpop.permute.xlu1 %2467 }
 0x23c   : > { %v2688_v37 = vmax.f32 %v2641_v1, 0.0  ;;  %v2313_v38 = vadd.f32 %v17644_v40, %v1603_v25  ;;  %v2473_v1 = vpop.permute.xlu0 %2472 }
 0x23d   : > { %v1607_v6 = vpop.f32.mrb[94].mxu1  ;;  %v17751_v16 = vpop.f32.mrb[94].mxu0 }
 0x23e   : > { %v1608_v11 = vadd.f32 %v1607_v6, %v17355_v5  ;;  %v14239_v61 = vpop.f32.mrb[95].mxu1  ;;  %v14912_v53 = vpack.c.bf16 %v2688_v37, %v2687_v9  ;;  %v14467_v34 = vpop.f32.mrb[95].mxu0  ;;  %v2642_v22 = vadd.f32 %v2458_v18, %v2313_v38 }
 0x240   : > { %v2314_v58 = vadd.f32 %v17654_v2, %v1608_v11  ;;  %14913 = vmatpush1.bf16.msra.mxu1 %v14912_v53  ;;  %v2689_v5 = vmax.f32 %v2642_v22, 0.0  ;;  %v2478_v22 = vpop.permute.xlu1 %2477 }
 0x241   : > { %v1612_v8 = vpop.f32.mrb[96].mxu1  ;;  %14914 = vmatprep.subr.bf16.mxu1 %v23492_v13  ;;  %v17756_v7 = vpop.f32.mrb[96].mxu0 }
 0x242   : > { %v2643_v40 = vadd.f32 %v2463_v41, %v2314_v58  ;;  %v1613_v45 = vadd.f32 %v1612_v8, %v17371_v20  ;;  %v14242_v39 = vpop.f32.mrb[97].mxu1  ;;  %v14470_v49 = vpop.f32.mrb[97].mxu0 }
 0x243   : > { %v2483_v58 = vpop.permute.xlu0 %2482 }
 0x244   : > { %v2690_v14 = vmax.f32 %v2643_v40, 0.0  ;;  %v2315_v29 = vadd.f32 %v17664_v32, %v1613_v45 }
 0x245   : > { %v1617_v33 = vpop.f32.mrb[98].mxu1  ;;  %v17760_v24 = vpop.f32.mrb[98].mxu0 }
 0x246   : > { %v1618_v2 = vadd.f32 %v1617_v33, %v17387_v12  ;;  %v14245_v48 = vpop.f32.mrb[99].mxu1  ;;  %v14915_v4 = vpack.c.bf16 %v2690_v14, %v2689_v5  ;;  %v14473_v31 = vpop.f32.mrb[99].mxu0  ;;  %v2644_v25 = vadd.f32 %v2468_v63, %v2315_v29 }
 0x247   : > { %v2488_v63 = vpop.permute.xlu1 %2487 }
 0x248   : > { %v2316_v23 = vadd.f32 %v17669_v3, %v1618_v2  ;;  %14916 = vmatpush1.bf16.msra.mxu1 %v14915_v4  ;;  %v2691_v12 = vmax.f32 %v2644_v25, 0.0 }
 0x249   : > { %v1622_v20 = vpop.f32.mrb[100].mxu1  ;;  %14917 = vmatprep.subr.bf16.mxu1 %v23492_v13  ;;  %v17765_v28 = vpop.f32.mrb[100].mxu0 }
 0x24a   : > { %v2645_v32 = vadd.f32 %v2473_v1, %v2316_v23  ;;  %v1623_v9 = vadd.f32 %v1622_v20, %v17403_v26  ;;  %v14248_v37 = vpop.f32.mrb[101].mxu1  ;;  %v14476_v38 = vpop.f32.mrb[101].mxu0 }
 0x24b   : > { %v2493_v1 = vpop.permute.xlu0 %2492 }
 0x24c   : > { %v2692_v6 = vmax.f32 %v2645_v32, 0.0  ;;  %v2317_v11 = vadd.f32 %v17673_v21, %v1623_v9 }
 0x24d   : > { %v1627_v61 = vpop.f32.mrb[102].mxu1  ;;  %v17769_v53 = vpop.f32.mrb[102].mxu0 }
 0x24e   : > { %v1628_v3 = vadd.f32 %v1627_v61, %v17419_v30  ;;  %v14251_v34 = vpop.f32.mrb[103].mxu1  ;;  %v14918_v18 = vpack.c.bf16 %v2692_v6, %v2691_v12  ;;  %v14479_v41 = vpop.f32.mrb[103].mxu0  ;;  %v2646_v8 = vadd.f32 %v2478_v22, %v2317_v11 }
 0x24f   : > { %v2503_v41 = vpop.permute.xlu0 %2502 }
 0x250   : > { %v2318_v40 = vadd.f32 %v17677_v27, %v1628_v3  ;;  %14919 = vmatpush1.bf16.msra.mxu1 %v14918_v18  ;;  %v2693_v30 = vmax.f32 %v2646_v8, 0.0  ;;  %v2498_v18 = vpop.permute.xlu1 %2497 }
 0x251   : > { %v1632_v26 = vpop.f32.mrb[104].mxu1  ;;  %14920 = vmatprep.subr.bf16.mxu1 %v23492_v13  ;;  %v17774_v45 = vpop.f32.mrb[104].mxu0 }
 0x252   : > { %v2647_v21 = vadd.f32 %v2483_v58, %v2318_v40  ;;  %v1633_v39 = vadd.f32 %v1632_v26, %v17435_v36  ;;  %v14254_v49 = vpop.f32.mrb[105].mxu1  ;;  %v14482_v5 = vpop.f32.mrb[105].mxu0 }
 0x254   : > { %v2694_v14 = vmax.f32 %v2647_v21, 0.0  ;;  %v2319_v29 = vadd.f32 %v17681_v50, %v1633_v39 }
 0x255   : > { %v1637_v33 = vpop.f32.mrb[106].mxu1  ;;  %v17778_v2 = vpop.f32.mrb[106].mxu0 }
 0x256   : > { %v1638_v27 = vadd.f32 %v1637_v33, %v17451_v42  ;;  %v14257_v48 = vpop.f32.mrb[107].mxu1  ;;  %v14921_v4 = vpack.c.bf16 %v2694_v14, %v2693_v30  ;;  %v14485_v31 = vpop.f32.mrb[107].mxu0  ;;  %v2648_v25 = vadd.f32 %v2488_v63, %v2319_v29 }
 0x257   : > { %v2513_v48 = vpop.permute.xlu0 %2512 }
 0x258   : > { %v2320_v23 = vadd.f32 %v17685_v19, %v1638_v27  ;;  %14922 = vmatpush1.bf16.msra.mxu1 %v14921_v4  ;;  %v2695_v42 = vmax.f32 %v2648_v25, 0.0  ;;  %v2508_v27 = vpop.permute.xlu1 %2507 }
 0x259   : > { %v1642_v36 = vpop.f32.mrb[108].mxu1  ;;  %14923 = vmatprep.subr.bf16.mxu1 %v23492_v13  ;;  %v17783_v20 = vpop.f32.mrb[108].mxu0 }
 0x25a   : > { %v2649_v50 = vadd.f32 %v2493_v1, %v2320_v23  ;;  %v1643_v32 = vadd.f32 %v1642_v36, %v17462_v47  ;;  %v14260_v9 = vpop.f32.mrb[109].mxu1  ;;  %v14488_v37 = vpop.f32.mrb[109].mxu0  ;;  %v23493_v1 = vld [vmem:[#allocation2_spill] sm:$0xff] }
 0x25c   : > { %v2696_v38 = vmax.f32 %v2649_v50, 0.0  ;;  %v2321_v12 = vadd.f32 %v17689_v10, %v1643_v32 }
 0x25d   : > { %v1647_v6 = vpop.f32.mrb[110].mxu1  ;;  %v17787_v11 = vpop.f32.mrb[110].mxu0 }
 0x25e   : > { %v1648_v19 = vadd.f32 %v1647_v6, %v17472_v52  ;;  %v14263_v61 = vpop.f32.mrb[111].mxu1  ;;  %v14924_v3 = vpack.c.bf16 %v2696_v38, %v2695_v42  ;;  %v14491_v34 = vpop.f32.mrb[111].mxu0  ;;  %v2650_v22 = vadd.f32 %v2498_v18, %v2321_v12  ;;  %v23494_v42 = vld [vmem:[#allocation3_spill] sm:$0xff] }
 0x25f   : > { %v2523_v34 = vpop.permute.xlu0 %2522 }
 0x260   : > { %v2322_v58 = vadd.f32 %v17691_v46, %v1648_v19  ;;  %14925 = vmatpush1.bf16.msra.mxu1 %v14924_v3  ;;  %v2697_v52 = vmax.f32 %v2650_v22, 0.0  ;;  %v2518_v19 = vpop.permute.xlu1 %2517  ;;  %v23495_v22 = vld [vmem:[#allocation4_spill] sm:$0xff] }
 0x261   : > { %v1652_v47 = vpop.f32.mrb[112].mxu1  ;;  %14926 = vmatprep.subr.bf16.mxu1 %v23492_v13  ;;  %v17792_v8 = vpop.f32.mrb[112].mxu0 }
 0x262   : > { %v2651_v10 = vadd.f32 %v2503_v41, %v2322_v58  ;;  %v1653_v40 = vadd.f32 %v1652_v47, %v17482_v57  ;;  %v14266_v26 = vpop.f32.mrb[113].mxu1  ;;  %v14494_v21 = vpop.f32.mrb[113].mxu0 }
 0x263   : > { %v23496_v21 = vld [vmem:[#allocation5_spill] sm:$0xff] }
 0x264   : > { %v2698_v39 = vmax.f32 %v2651_v10, 0.0  ;;  %v2323_v49 = vadd.f32 %v17695_v51, %v1653_v40 }
 0x265   : > { %v1657_v5 = vpop.f32.mrb[114].mxu1  ;;  %v17796_v30 = vpop.f32.mrb[114].mxu0 }
 0x266   : > { %v1658_v46 = vadd.f32 %v1657_v5, %v17492_v62  ;;  %v14269_v14 = vpop.f32.mrb[115].mxu1  ;;  %v14927_v29 = vpack.c.bf16 %v2698_v39, %v2697_v52  ;;  %v14497_v33 = vpop.f32.mrb[115].mxu0  ;;  %v2652_v4 = vadd.f32 %v2508_v27, %v2323_v49  ;;  %v23497_v27 = vld [vmem:[#allocation6_spill] sm:$0xff] }
 0x267   : > { %v2528_v5 = vpop.permute.xlu1 %2527  ;;  %v2533_v14 = vpop.permute.xlu0 %2532 }
 0x268   : > { %v2324_v31 = vadd.f32 %v17699_v15, %v1658_v46  ;;  %14928 = vmatpush1.bf16.msra.mxu1 %v14927_v29  ;;  %v2699_v62 = vmax.f32 %v2652_v4, 0.0 }
 0x269   : > { %v1662_v57 = vpop.f32.mrb[116].mxu1  ;;  %14929 = vmatprep.subr.bf16.mxu1 %v23492_v13  ;;  %v17801_v63 = vpop.f32.mrb[116].mxu0 }
 0x26a   : > { %v2653_v51 = vadd.f32 %v2513_v48, %v2324_v31  ;;  %v1663_v25 = vadd.f32 %v1662_v57, %v23493_v1  ;;  %v14272_v23 = vpop.f32.mrb[117].mxu1  ;;  %v14500_v36 = vpop.f32.mrb[117].mxu0  ;;  %v23498_v1 = vld [vmem:[#allocation7_spill] sm:$0xff] }
 0x26c   : > { %v2700_v50 = vmax.f32 %v2653_v51, 0.0  ;;  %v2325_v32 = vadd.f32 %v17706_v0, %v1663_v25 }
 0x26d   : > { %v1667_v9 = vpop.f32.mrb[118].mxu1  ;;  %v17805_v37 = vpop.f32.mrb[118].mxu0 }
 0x26e   : > { %v1668_v15 = vadd.f32 %v1667_v9, %v23494_v42  ;;  %v14275_v38 = vpop.f32.mrb[119].mxu1  ;;  %v14930_v12 = vpack.c.bf16 %v2700_v50, %v2699_v62  ;;  %v14503_v6 = vpop.f32.mrb[119].mxu0  ;;  %v2654_v61 = vadd.f32 %v2518_v19, %v2325_v32 }
 0x26f   : > { %v2538_v62 = vpop.permute.xlu1 %2537  ;;  %v2543_v32 = vpop.permute.xlu0 %2542 }
 0x270   : > { %v2326_v3 = vadd.f32 %v17711_v59, %v1668_v15  ;;  %14931 = vmatpush1.bf16.msra.mxu1 %v14930_v12  ;;  %v2701_v47 = vmax.f32 %v2654_v61, 0.0  ;;  %v23499_v15 = vld [vmem:[#allocation8_spill] sm:$0xff] }
 0x271   : > { %v1672_v18 = vpop.f32.mrb[120].mxu1  ;;  %14932 = vmatprep.subr.bf16.mxu1 %v23492_v13 }
 0x272   : > { %v2655_v41 = vadd.f32 %v2523_v34, %v2326_v3  ;;  %v1673_v0 = vadd.f32 %v1672_v18, %v23495_v22  ;;  %v14278_v58 = vpop.f32.mrb[121].mxu1  ;;  %v23500_v3 = vld [vmem:[#allocation9_spill] sm:$0xff] }
 0x273   : > { %v2548_v22 = vpop.permute.xlu1 %2547  ;;  %v2553_v58 = vpop.permute.xlu0 %2552 }
 0x274   : > { %v2702_v10 = vmax.f32 %v2655_v41, 0.0  ;;  %v2327_v40 = vadd.f32 %v17715_v55, %v1673_v0 }
 0x275   : > { %v1677_v26 = vpop.f32.mrb[122].mxu1 }
 0x276   : > { %v1678_v52 = vadd.f32 %v1677_v26, %v23496_v21  ;;  %v14281_v39 = vpop.f32.mrb[123].mxu1  ;;  %v14933_v49 = vpack.c.bf16 %v2702_v10, %v2701_v47  ;;  %v2656_v59 = vadd.f32 %v2528_v5, %v2327_v40  ;;  %v23501_v40 = vld [vmem:[#allocation10_spill] sm:$0xff]  ;;  %v23502_v5 = vld [vmem:[#allocation11_spill] sm:$0xff] }
 0x278   : > { %v2328_v46 = vadd.f32 %v17720_v56, %v1678_v52  ;;  %14934 = vmatpush1.bf16.msra.mxu1 %v14933_v49  ;;  %v2703_v31 = vmax.f32 %v2656_v59, 0.0 }
 0x279   : > { %v1682_v29 = vpop.f32.mrb[124].mxu1  ;;  %14935 = vmatprep.subr.bf16.mxu1 %v23492_v13 }
 0x27a   : > { %v2657_v33 = vadd.f32 %v2533_v14, %v2328_v46  ;;  %v1683_v48 = vadd.f32 %v1682_v29, %v23497_v27  ;;  %v14284_v4 = vpop.f32.mrb[125].mxu1  ;;  %v2558_v29 = vpop.permute.xlu1 %2557  ;;  %v2724_v27 = vld [vmem:[%s23491_s3] sm:$0xff] }
 0x27c   : > { %v2704_v55 = vmax.f32 %v2657_v33, 0.0  ;;  %v2329_v57 = vadd.f32 %v17724_v60, %v1683_v48  ;;  %v2563_v48 = vpop.permute.xlu0 %2562 }
 0x27d   : > { %v1687_v51 = vpop.f32.mrb[126].mxu1 }
 0x27e   : > { %v1688_v25 = vadd.f32 %v1687_v51, %v23498_v1  ;;  %v14287_v23 = vpop.f32.mrb[127].mxu1  ;;  %v14936_v36 = vpack.c.bf16 %v2704_v55, %v2703_v31  ;;  %v2658_v56 = vadd.f32 %v2538_v62, %v2329_v57  ;;  %v23503_v55 = vld [vmem:[#allocation12_spill] sm:$0xff]  ;;  %v2731_v62 = vld [vmem:[%s23491_s3 + $0x38] sm:$0xff] }
 0x280   : > { %v2330_v50 = vadd.f32 %v17729_v44, %v1688_v25  ;;  %14937 = vmatpush1.bf16.msra.mxu1 %v14936_v36  ;;  %v2705_v6 = vmax.f32 %v2658_v56, 0.0  ;;  %v23504_v56 = vld [vmem:[#allocation13_spill] sm:$0xff] }
 0x281   : > { %v1692_v9 = vpop.f32.mrb[128].mxu1  ;;  %14938 = vmatprep.subr.bf16.mxu1 %v23492_v13 }
 0x282   : > { %v2659_v42 = vadd.f32 %v2543_v32, %v2330_v50  ;;  %v1693_v38 = vadd.f32 %v1692_v9, %v23499_v15  ;;  %v14290_v12 = vpop.f32.mrb[129].mxu1 }
 0x283   : > { %v2573_v12 = vpop.permute.xlu0 %2572 }
 0x284   : > { %v2706_v60 = vmax.f32 %v2659_v42, 0.0  ;;  %v2331_v19 = vadd.f32 %v17733_v35, %v1693_v38  ;;  %v2568_v42 = vpop.permute.xlu1 %2567  ;;  %v2730_v38 = vld [vmem:[%s23491_s3 + $0x30] sm:$0xff] }
 0x285   : > { %v1697_v61 = vpop.f32.mrb[130].mxu1 }
 0x286   : > { %v1698_v34 = vadd.f32 %v1697_v61, %v23500_v3  ;;  %v14293_v18 = vpop.f32.mrb[131].mxu1  ;;  %v14939_v41 = vpack.c.bf16 %v2706_v60, %v2705_v6  ;;  %v2660_v44 = vadd.f32 %v2548_v22, %v2331_v19  ;;  %v2734_v60 = vld [vmem:[%s23491_s3 + $0x50] sm:$0xff]  ;;  %v23505_v61 = vld [vmem:[#allocation14_spill] sm:$0xff] }
 0x287   : > { %v2733_v18 = vld [vmem:[%s23491_s3 + $0x48] sm:$0xff] }
 0x288   : > { %v2332_v0 = vadd.f32 %v17738_v17, %v1698_v34  ;;  %14940 = vmatpush1.bf16.msra.mxu1 %v14939_v41  ;;  %v2707_v52 = vmax.f32 %v2660_v44, 0.0 }
 0x289   : > { %v1702_v47 = vpop.f32.mrb[132].mxu1  ;;  %14941 = vmatprep.subr.bf16.mxu1 %v23492_v13 }
 0x28a   : > { %v2661_v10 = vadd.f32 %v2553_v58, %v2332_v0  ;;  %v1703_v26 = vadd.f32 %v1702_v47, %v23501_v40  ;;  %v14296_v21 = vpop.f32.mrb[133].mxu1  ;;  %v2737_v0 = vld [vmem:[%s23491_s3 + $0x68] sm:$0xff] }
 0x28b   : > { %v23506_v58 = vld [vmem:[#allocation15_spill] sm:$0xff] }
 0x28c   : > { %v2708_v35 = vmax.f32 %v2661_v10, 0.0  ;;  %v2333_v39 = vadd.f32 %v17742_v43, %v1703_v26  ;;  %v2728_v43 = vld [vmem:[%s23491_s3 + $0x20] sm:$0xff]  ;;  %v2578_v26 = vpop.permute.xlu1 %2577 }
 0x28d   : > { %v1707_v49 = vpop.f32.mrb[134].mxu1 }
 0x28e   : > { %v1708_v59 = vadd.f32 %v1707_v49, %v23502_v5  ;;  %v14299_v46 = vpop.f32.mrb[135].mxu1  ;;  %v14942_v14 = vpack.c.bf16 %v2708_v35, %v2707_v52  ;;  %v2662_v17 = vadd.f32 %v2558_v29, %v2333_v39  ;;  %v2736_v52 = vld [vmem:[%s23491_s3 + $0x60] sm:$0xff]  ;;  %v2583_v35 = vpop.permute.xlu0 %2582  ;;  %v2739_v29 = vld [vmem:[%s23491_s3 + $0x78] sm:$0xff] }
 0x28f   : > { %v2740_v49 = vld [vmem:[%s23491_s3 + $0x80] sm:$0xff] }
 0x290   : > { %v2334_v33 = vadd.f32 %v17747_v54, %v1708_v59  ;;  %14943 = vmatpush1.bf16.msra.mxu1 %v14942_v14  ;;  %v2727_v54 = vld [vmem:[%s23491_s3 + $0x18] sm:$0xff]  ;;  %v2709_v25 = vmax.f32 %v2662_v17, 0.0  ;;  %v23507_v59 = vld [vmem:[#allocation16_spill] sm:$0xff] }
 0x291   : > { %v1712_v4 = vpop.f32.mrb[136].mxu1 }
 0x292   : > { %v2663_v31 = vadd.f32 %v2563_v48, %v2334_v33  ;;  %v1713_v57 = vadd.f32 %v1712_v4, %v23503_v55  ;;  %v14302_v51 = vpop.f32.mrb[137].mxu1  ;;  %v2743_v48 = vld [vmem:[%s23491_s3 + $0x98] sm:$0xff] }
 0x293   : > { %2934 = vmatmul.mubr.f32.vlgmr.msra.gmra.mrb[162].mxu1 %v2724_v27  ;;  %v23508_v4 = vld [vmem:[#allocation17_spill] sm:$0xff] }
 0x294   : > { %v2335_v1 = vadd.f32 %v17751_v16, %v1713_v57  ;;  %2938 = vmatprep.mubr.f32.mxu1 %v2728_v43  ;;  %v2710_v23 = vmax.f32 %v2663_v31, 0.0  ;;  %v2588_v57 = vpop.permute.xlu1 %2587 }
 0x295   : > { %v1717_v36 = vpop.f32.mrb[138].mxu1 }
 0x296   : > { %v1718_v50 = vadd.f32 %v1717_v36, %v23504_v56  ;;  %v14305_v32 = vpop.f32.mrb[139].mxu1  ;;  %v14944_v9 = vpack.c.bf16 %v2710_v23, %v2709_v25  ;;  %v2664_v15 = vadd.f32 %v2568_v42, %v2335_v1  ;;  %v2742_v1 = vld [vmem:[%s23491_s3 + $0x90] sm:$0xff] }
 0x297   : > { %2939 = vmatmul.mubr.f32.gmra.mrb[164].mxu1 %v2727_v54  ;;  %v2593_v54 = vpop.permute.xlu0 %2592  ;;  %v2746_v23 = vld [vmem:[%s23491_s3 + $0xb0] sm:$0xff]  ;;  %v2745_v32 = vld [vmem:[%s23491_s3 + $0xa8] sm:$0xff] }
 0x298   : > { %v2336_v16 = vadd.f32 %v17756_v7, %v1718_v50  ;;  %14945 = vmatprep.subr.bf16.mxu1 %v14944_v9  ;;  %2943 = vmatprep.mubr.f32.mxu1 %v2731_v62  ;;  %v2711_v41 = vmax.f32 %v2664_v15, 0.0  ;;  %v23509_v62 = vld [vmem:[#allocation18_spill] sm:$0xff] }
 0x299   : > { %v1722_v6 = vpop.f32.mrb[140].mxu1  ;;  %14947 = vmatpush3.bf16.msra.mxu1 %v14944_v9 }
 0x29a   : > { %v2665_v19 = vadd.f32 %v2573_v12, %v2336_v16  ;;  %v1723_v3 = vadd.f32 %v1722_v6, %v23505_v61  ;;  %v14308_v34 = vpop.f32.mrb[141].mxu1  ;;  %v2749_v16 = vld [vmem:[%s23491_s3 + $0xc8] sm:$0xff] }
 0x29b   : > { %2944 = vmatmul.mubr.f32.gmra.mrb[166].mxu1 %v2730_v38  ;;  %v23510_v38 = vld [vmem:[#allocation19_spill] sm:$0xff]  ;;  %v2603_v34 = vpop.permute.xlu0 %2602 }
 0x29c   : > { %v2337_v7 = vadd.f32 %v17760_v24, %v1723_v3  ;;  %2948 = vmatprep.mubr.f32.mxu1 %v2734_v60  ;;  %v2712_v22 = vmax.f32 %v2665_v19, 0.0  ;;  %v2598_v19 = vpop.permute.xlu1 %2597  ;;  %v2748_v3 = vld [vmem:[%s23491_s3 + $0xc0] sm:$0xff] }
 0x29d   : > { %v1727_v44 = vpop.f32.mrb[142].mxu1 }
 0x29e   : > { %v1728_v47 = vadd.f32 %v1727_v44, %v23506_v58  ;;  %v14311_v10 = vpop.f32.mrb[143].mxu1  ;;  %v14948_v40 = vpack.c.bf16 %v2712_v22, %v2711_v41  ;;  %v2666_v21 = vadd.f32 %v2578_v26, %v2337_v7  ;;  %v23511_v22 = vld [vmem:[#allocation20_spill] sm:$0xff]  ;;  %v2751_v58 = vld [vmem:[%s23491_s3 + $0xd8] sm:$0xff] }
 0x29f   : > { %2949 = vmatmul.mubr.f32.gmra.mrb[168].mxu1 %v2733_v18  ;;  %v2752_v18 = vld [vmem:[%s23491_s3 + $0xe0] sm:$0xff]  ;;  %v2755_v26 = vld [vmem:[%s23491_s3 + $0xf8] sm:$0xff] }
 0x2a0   : > { %v2338_v24 = vadd.f32 %v17765_v28, %v1728_v47  ;;  %14949 = vmatprep.subr.bf16.mxu1 %v14948_v40  ;;  %2953 = vmatprep.mubr.f32.mxu1 %v2737_v0  ;;  %v2713_v17 = vmax.f32 %v2666_v21, 0.0  ;;  %v23512_v21 = vld [vmem:[#allocation21_spill] sm:$0xff] }
 0x2a1   : > { %v1732_v39 = vpop.f32.mrb[144].mxu1  ;;  %14951 = vmatpush3.bf16.msra.mxu1 %v14948_v40 }
 0x2a2   : > { %v2667_v5 = vadd.f32 %v2583_v35, %v2338_v24  ;;  %v1733_v46 = vadd.f32 %v1732_v39, %v23507_v59  ;;  %v14314_v14 = vpop.f32.mrb[145].mxu1  ;;  %v2608_v39 = vpop.permute.xlu1 %2607 }
 0x2a3   : > { %2954 = vmatmul.mubr.f32.gmra.mrb[170].mxu1 %v2736_v52  ;;  %v2613_v59 = vpop.permute.xlu0 %2612  ;;  %v2758_v14 = vld [vmem:[%s23491_s3 + $0x110] sm:$0xff] }
 0x2a4   : > { %v2339_v28 = vadd.f32 %v17769_v53, %v1733_v46  ;;  %2958 = vmatprep.mubr.f32.mxu1 %v2740_v49  ;;  %v2714_v33 = vmax.f32 %v2667_v5, 0.0  ;;  %v2754_v5 = vld [vmem:[%s23491_s3 + $0xf0] sm:$0xff] }
 0x2a5   : > { %v1737_v27 = vpop.f32.mrb[146].mxu1 }
 0x2a6   : > { %v1738_v43 = vadd.f32 %v1737_v27, %v23508_v4  ;;  %v14317_v31 = vpop.f32.mrb[147].mxu1  ;;  %v14952_v55 = vpack.c.bf16 %v2714_v33, %v2713_v17  ;;  %v2668_v51 = vadd.f32 %v2588_v57, %v2339_v28  ;;  %v2757_v27 = vld [vmem:[%s23491_s3 + $0x108] sm:$0xff] }
 0x2a7   : > { %2959 = vmatmul.mubr.f32.gmra.mrb[172].mxu1 %v2739_v29  ;;  %v23513_v29 = vld [vmem:[#allocation22_spill] sm:$0xff]  ;;  %v2761_v31 = vld [vmem:[%s23491_s3 + $0x128] sm:$0xff] }
 0x2a8   : > { %v2340_v53 = vadd.f32 %v17774_v45, %v1738_v43  ;;  %14953 = vmatprep.subr.bf16.mxu1 %v14952_v55  ;;  %2963 = vmatprep.mubr.f32.mxu1 %v2743_v48  ;;  %v2715_v9 = vmax.f32 %v2668_v51, 0.0 }
 0x2a9   : > { %v1742_v25 = vpop.f32.mrb[148].mxu1  ;;  %14955 = vmatpush3.bf16.msra.mxu1 %v14952_v55  ;;  %v23514_v55 = vld [vmem:[#allocation23_spill] sm:$0xff] }
 0x2aa   : > { %v2669_v36 = vadd.f32 %v2593_v54, %v2340_v53  ;;  %v1743_v56 = vadd.f32 %v1742_v25, %v23509_v62  ;;  %v14320_v50 = vpop.f32.mrb[149].mxu1  ;;  %v2760_v25 = vld [vmem:[%s23491_s3 + $0x120] sm:$0xff] }
 0x2ab   : > { %2964 = vmatmul.mubr.f32.gmra.mrb[174].mxu1 %v2742_v1  ;;  %v2618_v1 = vpop.permute.xlu1 %2617  ;;  %v2764_v62 = vld [vmem:[%s23491_s3 + $0x140] sm:$0xff]  ;;  %v23515_v50 = vld [vmem:[#allocation24_spill] sm:$0xff] }
 0x2ac   : > { %v2341_v45 = vadd.f32 %v17778_v2, %v1743_v56  ;;  %2968 = vmatprep.mubr.f32.mxu1 %v2746_v23  ;;  %v2716_v42 = vmax.f32 %v2669_v36, 0.0  ;;  %v2623_v23 = vpop.permute.xlu0 %2622 }
 0x2ad   : > { %v1747_v15 = vpop.f32.mrb[150].mxu1 }
 0x2ae   : > { %v1748_v12 = vadd.f32 %v1747_v15, %v23510_v38  ;;  %v14323_v6 = vpop.f32.mrb[151].mxu1  ;;  %v14956_v60 = vpack.c.bf16 %v2716_v42, %v2715_v9  ;;  %v2670_v61 = vadd.f32 %v2598_v19, %v2341_v45  ;;  %v2763_v9 = vld [vmem:[%s23491_s3 + $0x138] sm:$0xff]  ;;  %v2770_v19 = vld [vmem:[%s23491_s3 + $0x170] sm:$0xff] }
 0x2af   : > { %2969 = vmatmul.mubr.f32.gmra.mrb[176].mxu1 %v2745_v32  ;;  %v2767_v38 = vld [vmem:[%s23491_s3 + $0x158] sm:$0xff] }
 0x2b0   : > { %v2342_v2 = vadd.f32 %v17783_v20, %v1748_v12  ;;  %14957 = vmatprep.subr.bf16.mxu1 %v14956_v60  ;;  %2973 = vmatprep.mubr.f32.mxu1 %v2749_v16  ;;  %v2717_v47 = vmax.f32 %v2670_v61, 0.0  ;;  %v2628_v16 = vpop.permute.xlu1 %2627  ;;  %v2769_v61 = vld [vmem:[%s23491_s3 + $0x168] sm:$0xff] }
 0x2b1   : > { %v1752_v7 = vpop.f32.mrb[152].mxu1  ;;  %14959 = vmatpush3.bf16.msra.mxu1 %v14956_v60 }
 0x2b2   : > { %v2671_v41 = vadd.f32 %v2603_v34, %v2342_v2  ;;  %v1753_v44 = vadd.f32 %v1752_v7, %v23511_v22  ;;  %v14326_v0 = vpop.f32.mrb[153].mxu1  ;;  %v2773_v2 = vld [vmem:[%s23491_s3 + $0x188] sm:$0xff]  ;;  %v2776_v34 = vld [vmem:[%s23491_s3 + $0x1a0] sm:$0xff]  ;;  %v2775_v7 = vld [vmem:[%s23491_s3 + $0x198] sm:$0xff] }
 0x2b3   : > { %2974 = vmatmul.mubr.f32.gmra.mrb[178].mxu1 %v2748_v3  ;;  %v2772_v3 = vld [vmem:[%s23491_s3 + $0x180] sm:$0xff]  ;;  %v2782_v22 = vld [vmem:[%s23491_s3 + $0x1d0] sm:$0xff]  ;;  %v2785_v0 = vld [vmem:[%s23491_s3 + $0x1e8] sm:$0xff] }
 0x2b4   : > { %v2343_v20 = vadd.f32 %v17787_v11, %v1753_v44  ;;  %2978 = vmatprep.mubr.f32.mxu1 %v2752_v18  ;;  %v2718_v10 = vmax.f32 %v2671_v41, 0.0  ;;  %v2779_v18 = vld [vmem:[%s23491_s3 + $0x1b8] sm:$0xff]  ;;  %v2778_v41 = vld [vmem:[%s23491_s3 + $0x1b0] sm:$0xff]  ;;  %v2781_v44 = vld [vmem:[%s23491_s3 + $0x1c8] sm:$0xff] }
 0x2b5   : > { %v1757_v40 = vpop.f32.mrb[154].mxu1 }
 0x2b6   : > { %v1758_v24 = vadd.f32 %v1757_v40, %v23512_v21  ;;  %v14329_v52 = vpop.f32.mrb[155].mxu1  ;;  %v14960_v35 = vpack.c.bf16 %v2718_v10, %v2717_v47  ;;  %v2672_v49 = vadd.f32 %v2608_v39, %v2343_v20  ;;  %v2784_v20 = vld [vmem:[%s23491_s3 + $0x1e0] sm:$0xff]  ;;  %v2787_v47 = vld [vmem:[%s23491_s3 + $0x1f8] sm:$0xff]  ;;  %v2790_v40 = vld [vmem:[%s23491_s3 + $0x210] sm:$0xff] }
 0x2b7   : > { %2979 = vmatmul.mubr.f32.gmra.mrb[180].mxu1 %v2751_v58  ;;  %v2788_v58 = vld [vmem:[%s23491_s3 + $0x200] sm:$0xff]  ;;  %v2791_v10 = vld [vmem:[%s23491_s3 + $0x218] sm:$0xff]  ;;  %v2793_v21 = vld [vmem:[%s23491_s3 + $0x228] sm:$0xf] }
 0x2b8   : > { %v2344_v11 = vadd.f32 %v17792_v8, %v1758_v24  ;;  %14961 = vmatprep.subr.bf16.mxu1 %v14960_v35  ;;  %2983 = vmatprep.mubr.f32.mxu1 %v2755_v26  ;;  %v2719_v48 = vmax.f32 %v2672_v49, 0.0  ;;  %v2794_v26 = vld [vmem:[%s23491_s3 + $0x230] sm:$0xf]  ;;  %v2729_v52 = vld [vmem:[%s23491_s3 + $0x28] sm:$0xff]  ;;  %v2735_v39 = vld [vmem:[%s23491_s3 + $0x58] sm:$0xff] }
 0x2b9   : > { %v1762_v46 = vpop.f32.mrb[156].mxu1  ;;  %14963 = vmatpush3.bf16.msra.mxu1 %v14960_v35  ;;  %v2726_v24 = vld [vmem:[%s23491_s3 + $0x10] sm:$0xff]  ;;  %v2732_v35 = vld [vmem:[%s23491_s3 + $0x40] sm:$0xff] }
 0x2ba   : > { %v2673_v28 = vadd.f32 %v2613_v59, %v2344_v11  ;;  %v1763_v17 = vadd.f32 %v1762_v46, %v23513_v29  ;;  %v14332_v33 = vpop.f32.mrb[157].mxu1  ;;  %v2738_v49 = vld [vmem:[%s23491_s3 + $0x70] sm:$0xff]  ;;  %v2741_v11 = vld [vmem:[%s23491_s3 + $0x88] sm:$0xff]  ;;  %v2747_v59 = vld [vmem:[%s23491_s3 + $0xb8] sm:$0xff] }
 0x2bb   : > { %2984 = vmatmul.mubr.f32.gmra.mrb[182].mxu1 %v2754_v5  ;;  %v2744_v5 = vld [vmem:[%s23491_s3 + $0xa0] sm:$0xff]  ;;  %v2750_v46 = vld [vmem:[%s23491_s3 + $0xd0] sm:$0xff]  ;;  %v2759_v29 = vld [vmem:[%s23491_s3 + $0x118] sm:$0xff] }
 0x2bc   : > { %v2345_v8 = vadd.f32 %v17796_v30, %v1763_v17  ;;  %2988 = vmatprep.mubr.f32.mxu1 %v2758_v14  ;;  %v2720_v4 = vmax.f32 %v2673_v28, 0.0  ;;  %v2753_v14 = vld [vmem:[%s23491_s3 + $0xe8] sm:$0xff]  ;;  %v2756_v28 = vld [vmem:[%s23491_s3 + $0x100] sm:$0xff]  ;;  %v2762_v17 = vld [vmem:[%s23491_s3 + $0x130] sm:$0xff] }
 0x2bd   : > { %v1767_v43 = vpop.f32.mrb[158].mxu1  ;;  %v2765_v33 = vld [vmem:[%s23491_s3 + $0x148] sm:$0xff] }
 0x2be   : > { %v1768_v57 = vadd.f32 %v1767_v43, %v23514_v55  ;;  %v14335_v51 = vpop.f32.mrb[159].mxu1  ;;  %v14964_v53 = vpack.c.bf16 %v2720_v4, %v2719_v48  ;;  %v2674_v54 = vadd.f32 %v2618_v1, %v2345_v8  ;;  %v2768_v8 = vld [vmem:[%s23491_s3 + $0x160] sm:$0xff]  ;;  %v2774_v48 = vld [vmem:[%s23491_s3 + $0x190] sm:$0xff]  ;;  %v2777_v4 = vld [vmem:[%s23491_s3 + $0x1a8] sm:$0xff] }
 0x2bf   : > { %2989 = vmatmul.mubr.f32.gmra.mrb[184].mxu1 %v2757_v27  ;;  %v2771_v27 = vld [vmem:[%s23491_s3 + $0x178] sm:$0xff]  ;;  %v2780_v43 = vld [vmem:[%s23491_s3 + $0x1c0] sm:$0xff]  ;;  %v2786_v55 = vld [vmem:[%s23491_s3 + $0x1f0] sm:$0xff] }
 0x2c0   : > { %v2346_v30 = vadd.f32 %v17801_v63, %v1768_v57  ;;  %14965 = vmatprep.subr.bf16.mxu1 %v14964_v53  ;;  %2993 = vmatprep.mubr.f32.mxu1 %v2761_v31  ;;  %v2721_v42 = vmax.f32 %v2674_v54, 0.0  ;;  %v2783_v31 = vld [vmem:[%s23491_s3 + $0x1d8] sm:$0xff]  ;;  %v2789_v57 = vld [vmem:[%s23491_s3 + $0x208] sm:$0xff]  ;;  %v2792_v51 = vld [vmem:[%s23491_s3 + $0x220] sm:$0xff] }
 0x2c1   : > { %v1772_v36 = vpop.f32.mrb[160].mxu1  ;;  %14967 = vmatpush3.bf16.msra.mxu1 %v14964_v53  ;;  %v2795_v53 = vld [vmem:[%s23491_s3 + $0x238] sm:$0xf]  ;;  %v3239_v1 = vld [vmem:[%s23516_s8] sm:$0xff]  ;;  %v3240_v54 = vld [vmem:[%s23516_s8 + $0x8] sm:$0xff] }
 0x2c2   : > { %v2675_v56 = vadd.f32 %v2623_v23, %v2346_v30  ;;  %v1773_v45 = vadd.f32 %v1772_v36, %v23515_v50  ;;  %v14338_v32 = vpop.f32.mrb[161].mxu1  ;;  %v14972_v30 = vpack.c.bf16 %v3240_v54, %v3239_v1  ;;  %v3242_v23 = vld [vmem:[%s23516_s8 + $0x18] sm:$0xff] }
 0x2c3   : > { %2994 = vmatmul.mubr.f32.gmra.mrb[186].mxu1 %v2760_v25  ;;  %v3241_v25 = vld [vmem:[%s23516_s8 + $0x10] sm:$0xff]  ;;  %v3246_v32 = vld [vmem:[%s23516_s8 + $0x38] sm:$0xff] }
 0x2c4   : > { %v2347_v63 = vadd.f32 %v17805_v37, %v1773_v45  ;;  %2998 = vmatprep.mubr.f32.mxu1 %v2764_v62  ;;  %v2722_v15 = vmax.f32 %v2675_v56, 0.0  ;;  %v2766_v37 = vld [vmem:[%s23491_s3 + $0x150] sm:$0xff]  ;;  %v14976_v36 = vpack.c.bf16 %v3242_v23, %v3241_v25  ;;  %v3243_v62 = vld [vmem:[%s23516_s8 + $0x20] sm:$0xff]  ;;  %v3244_v56 = vld [vmem:[%s23516_s8 + $0x28] sm:$0xff] }
 0x2c5   : > { %v14980_v50 = vpack.c.bf16 %v3244_v56, %v3243_v62  ;;  %v3245_v45 = vld [vmem:[%s23516_s8 + $0x30] sm:$0xff] }
 0x2c6   : > { %v14968_v12 = vpack.c.bf16 %v2722_v15, %v2721_v42  ;;  %v2676_v6 = vadd.f32 %v2628_v16, %v2347_v63  ;;  %v14984_v63 = vpack.c.bf16 %v3246_v32, %v3245_v45  ;;  %v3248_v42 = vld [vmem:[%s23516_s8 + $0x48] sm:$0xff]  ;;  %v3249_v16 = vld [vmem:[%s23516_s8 + $0x50] sm:$0xff] }
 0x2c7   : > { %2999 = vmatmul.mubr.f32.gmra.mrb[188].mxu1 %v2763_v9  ;;  %v3247_v9 = vld [vmem:[%s23516_s8 + $0x40] sm:$0xff] }
 0x2c8   : > { %14969 = vmatprep.subr.bf16.mxu1 %v14968_v12  ;;  %3003 = vmatprep.mubr.f32.mxu1 %v2767_v38  ;;  %v2723_v60 = vmax.f32 %v2676_v6, 0.0  ;;  %v14988_v15 = vpack.c.bf16 %v3248_v42, %v3247_v9  ;;  %v3250_v38 = vld [vmem:[%s23516_s8 + $0x58] sm:$0x3f]  ;;  %s16264_s8 = smov 125  }
 0x2c9   : > { %14971 = vmatpush3.bf16.msra.mxu1 %v14968_v12  ;;  %v14992_v12 = vpack.c.bf16 %v3250_v38, %v3249_v16 }
 0x2ca   : > { %14532 = vmatprep.subr.mxu1 %v2723_v60 }
 0x2cb   : > { %3004 = vmatmul.mubr.f32.gmra.mrb[190].mxu1 %v2766_v37 }
 0x2cc   : > { %3008 = vmatprep.mubr.f32.mxu1 %v2770_v19 }
 0x2cd   : > { %14533 = vmatpush3.msra.mxu1 %v2723_v60 }
 0x2ce   : > { %14973 = vmatprep.subr.bf16.mxu1 %v14972_v30 }
 0x2cf   : > { %3009 = vmatmul.mubr.f32.gmra.mrb[192].mxu1 %v2769_v61 }
 0x2d0   : > { %3013 = vmatprep.mubr.f32.mxu1 %v2773_v2 }
 0x2d3   : > { %3014 = vmatmul.mubr.f32.gmra.mrb[194].mxu1 %v2772_v3 }
 0x2d4   : > { %3018 = vmatprep.mubr.f32.mxu1 %v2776_v34 }
 0x2d7   : > { %3019 = vmatmul.mubr.f32.gmra.mrb[196].mxu1 %v2775_v7 }
 0x2d8   : > { %3023 = vmatprep.mubr.f32.mxu1 %v2779_v18 }
 0x2db   : > { %3024 = vmatmul.mubr.f32.gmra.mrb[198].mxu1 %v2778_v41 }
 0x2dc   : > { %3028 = vmatprep.mubr.f32.mxu1 %v2782_v22 }
 0x2df   : > { %3029 = vmatmul.mubr.f32.gmra.mrb[200].mxu1 %v2781_v44 }
 0x2e0   : > { %3033 = vmatprep.mubr.f32.mxu1 %v2785_v0 }
 0x2e3   : > { %3034 = vmatmul.mubr.f32.gmra.mrb[202].mxu1 %v2784_v20 }
 0x2e4   : > { %3038 = vmatprep.mubr.f32.mxu1 %v2788_v58 }
 0x2e7   : > { %3039 = vmatmul.mubr.f32.gmra.mrb[204].mxu1 %v2787_v47 }
 0x2e8   : > { %3043 = vmatprep.mubr.f32.mxu1 %v2791_v10 }
 0x2eb   : > { %3044 = vmatmul.mubr.f32.gmra.mrb[206].mxu1 %v2790_v40 }
 0x2ec   : > { %3048 = vmatprep.mubr.f32.mxu1 %v2794_v26 }
 0x2ef   : > { %3049 = vmatmul.mubr.f32.gmra.mrb[208].mxu1 %v2793_v21 }
 0x2f0   : > { %14534 = vmatprep.mubr.msk.f32.mxu1 %vm2796_vm2, %v2726_v24 }
 0x2f3   : > { %14535 = vmatmul.mubr.msk.f32.vlgmr.msra.gmra.mrb[210].mxu1 %vm2796_vm2, %v2729_v52 }
 0x2f4   : > { %14537 = vmatprep.mubr.msk.f32.mxu1 %vm2796_vm2, %v2732_v35  ;;  %14975 = vmatpush3.bf16.msra.mxu1 %v14972_v30 }
 0x2f5   : > { %14977 = vmatprep.subr.bf16.mxu1 %v14976_v36 }
 0x2f7   : > { %14538 = vmatmul.mubr.msk.f32.gmra.mrb[212].mxu1 %vm2796_vm2, %v2735_v39 }
 0x2f8   : > { %14540 = vmatprep.mubr.msk.f32.mxu1 %vm2796_vm2, %v2738_v49  ;;  %14979 = vmatpush3.bf16.msra.mxu1 %v14976_v36 }
 0x2f9   : > { %14981 = vmatprep.subr.bf16.mxu1 %v14980_v50 }
 0x2fb   : > { %14541 = vmatmul.mubr.msk.f32.gmra.mrb[214].mxu1 %vm2796_vm2, %v2741_v11 }
 0x2fc   : > { %14543 = vmatprep.mubr.msk.f32.mxu1 %vm2796_vm2, %v2744_v5  ;;  %14983 = vmatpush3.bf16.msra.mxu1 %v14980_v50 }
 0x2fd   : > { %14985 = vmatprep.subr.bf16.mxu1 %v14984_v63 }
 0x2ff   : > { %14544 = vmatmul.mubr.msk.f32.gmra.mrb[216].mxu1 %vm2796_vm2, %v2747_v59 }
 0x300   : > { %14546 = vmatprep.mubr.msk.f32.mxu1 %vm2796_vm2, %v2750_v46  ;;  %14987 = vmatpush3.bf16.msra.mxu1 %v14984_v63 }
 0x301   : > { %14989 = vmatprep.subr.bf16.mxu1 %v14988_v15 }
 0x303   : > { %14547 = vmatmul.mubr.msk.f32.gmra.mrb[218].mxu1 %vm2796_vm2, %v2753_v14 }
 0x304   : > { %14549 = vmatprep.mubr.msk.f32.mxu1 %vm2796_vm2, %v2756_v28  ;;  %14991 = vmatpush3.bf16.msra.mxu1 %v14988_v15 }
 0x305   : > { %14994 = vmatprep.subr.msk.bf16.mxu1 %vm14993_vm5, %v14992_v12 }
 0x307   : > { %14550 = vmatmul.mubr.msk.f32.gmra.mrb[220].mxu1 %vm2796_vm2, %v2759_v29 }
 0x308   : > { %14552 = vmatprep.mubr.msk.f32.mxu1 %vm2796_vm2, %v2762_v17  ;;  %14997 = vmatpush3.bf16.msk.msra.mxu1 %vm14993_vm5, %v14992_v12 }
 0x309   : > { %15035 = vmatprep.subr.bf16.mxu1 %v23492_v13 }
 0x30b   : > { %14553 = vmatmul.mubr.msk.f32.gmra.mrb[222].mxu1 %vm2796_vm2, %v2765_v33 }
 0x30c   : > { %14555 = vmatprep.mubr.msk.f32.mxu1 %vm2796_vm2, %v2768_v8 }
 0x30f   : > { %14556 = vmatmul.mubr.msk.f32.gmra.mrb[224].mxu1 %vm2796_vm2, %v2771_v27 }
 0x310   : > { %14558 = vmatprep.mubr.msk.f32.mxu1 %vm2796_vm2, %v2774_v48 }
 0x313   : > { %14559 = vmatmul.mubr.msk.f32.gmra.mrb[226].mxu1 %vm2796_vm2, %v2777_v4 }
 0x314   : > { %14561 = vmatprep.mubr.msk.f32.mxu1 %vm2796_vm2, %v2780_v43 }
 0x317   : > { %14562 = vmatmul.mubr.msk.f32.gmra.mrb[228].mxu1 %vm2796_vm2, %v2783_v31 }
 0x318   : > { %14564 = vmatprep.mubr.msk.f32.mxu1 %vm2796_vm2, %v2786_v55 }
 0x31b   : > { %14565 = vmatmul.mubr.msk.f32.gmra.mrb[230].mxu1 %vm2796_vm2, %v2789_v57 }
 0x31c   : > { %14567 = vmatprep.mubr.msk.f32.mxu1 %vm2796_vm2, %v2792_v51 }
 0x31f   : > { %14568 = vmatmul.mubr.msk.f32.gmra.mrb[232].mxu1 %vm2796_vm2, %v2795_v53  ;;  %vm11129_vm2 = vcmask 64512  }
 0x366   : > { %v2935_v6 = vpop.f32.mrb[162].mxu1 }
 0x367   : > { %v2937_v60 = vpop.f32.mrb[163].mxu1 }
 0x36a   : > { %v2940_v37 = vpop.f32.mrb[164].mxu1 }
 0x36b   : > { %v2942_v19 = vpop.f32.mrb[165].mxu1 }
 0x36e   : > { %v2945_v61 = vpop.f32.mrb[166].mxu1 }
 0x36f   : > { %v2947_v2 = vpop.f32.mrb[167].mxu1 }
 0x372   : > { %v2950_v3 = vpop.f32.mrb[168].mxu1 }
 0x373   : > { %v2952_v34 = vpop.f32.mrb[169].mxu1 }
 0x376   : > { %v2955_v7 = vpop.f32.mrb[170].mxu1 }
 0x377   : > { %v2957_v18 = vpop.f32.mrb[171].mxu1 }
 0x37a   : > { %v2960_v41 = vpop.f32.mrb[172].mxu1 }
 0x37b   : > { %v2962_v22 = vpop.f32.mrb[173].mxu1 }
 0x37e   : > { %v2965_v44 = vpop.f32.mrb[174].mxu1 }
 0x37f   : > { %v2967_v0 = vpop.f32.mrb[175].mxu1 }
 0x382   : > { %v2970_v20 = vpop.f32.mrb[176].mxu1 }
 0x383   : > { %v2972_v58 = vpop.f32.mrb[177].mxu1 }
 0x386   : > { %v2975_v47 = vpop.f32.mrb[178].mxu1 }
 0x387   : > { %v2977_v10 = vpop.f32.mrb[179].mxu1 }
 0x38a   : > { %v2980_v40 = vpop.f32.mrb[180].mxu1 }
 0x38b   : > { %v2982_v26 = vpop.f32.mrb[181].mxu1 }
 0x38e   : > { %v2985_v21 = vpop.f32.mrb[182].mxu1 }
 0x38f   : > { %v2987_v24 = vpop.f32.mrb[183].mxu1 }
 0x392   : > { %v2990_v52 = vpop.f32.mrb[184].mxu1 }
 0x393   : > { %v2992_v35 = vpop.f32.mrb[185].mxu1 }
 0x396   : > { %v18130_v39 = vpop.f32.mrb[186].mxu1 }
 0x397   : > { %v2997_v49 = vpop.f32.mrb[187].mxu1 }
 0x39a   : > { %v3000_v11 = vpop.f32.mrb[188].mxu1 }
 0x39b   : > { %v3002_v5 = vpop.f32.mrb[189].mxu1 }
 0x39e   : > { %v18132_v59 = vpop.f32.mrb[190].mxu1 }
 0x39f   : > { %v3007_v46 = vpop.f32.mrb[191].mxu1 }
 0x3a2   : > { %v3010_v14 = vpop.f32.mrb[192].mxu1 }
 0x3a3   : > { %v3012_v28 = vpop.f32.mrb[193].mxu1 }
 0x3a6   : > { %v18134_v29 = vpop.f32.mrb[194].mxu1 }
 0x3a7   : > { %v3017_v17 = vpop.f32.mrb[195].mxu1 }
 0x3a8   : > { %v3283_v17 = vpop.permute.xlu1 %3282 }
 0x3aa   : > { %v18136_v33 = vpop.f32.mrb[196].mxu1 }
 0x3ab   : > { %v3022_v8 = vpop.f32.mrb[197].mxu1 }
 0x3ac   : > { %v3293_v8 = vpop.permute.xlu1 %3292 }
 0x3ae   : > { %v18138_v27 = vpop.f32.mrb[198].mxu1 }
 0x3af   : > { %v3027_v48 = vpop.f32.mrb[199].mxu1 }
 0x3b0   : > { %v3303_v48 = vpop.permute.xlu1 %3302 }
 0x3b2   : > { %v18140_v4 = vpop.f32.mrb[200].mxu1 }
 0x3b3   : > { %v3032_v43 = vpop.f32.mrb[201].mxu1 }
 0x3b4   : > { %v3313_v43 = vpop.permute.xlu1 %3312 }
 0x3b6   : > { %v18142_v31 = vpop.f32.mrb[202].mxu1 }
 0x3b7   : > { %v3037_v55 = vpop.f32.mrb[203].mxu1 }
 0x3ba   : > { %v18144_v57 = vpop.f32.mrb[204].mxu1 }
 0x3bb   : > { %v3042_v51 = vpop.f32.mrb[205].mxu1 }
 0x3be   : > { %v18146_v53 = vpop.f32.mrb[206].mxu1 }
 0x3bf   : > { %v3047_v1 = vpop.f32.mrb[207].mxu1 }
 0x3c0   : > { %v3323_v1 = vpop.permute.xlu1 %3322 }
 0x3c2   : > { %v18148_v54 = vpop.f32.mrb[208].mxu1 }
 0x3c3   : > { %v3052_v30 = vpop.f32.mrb[209].mxu1 }
 0x3c6   : > { %v14536_v25 = vpop.f32.mrb[210].mxu1 }
 0x3c7   : > { %v3126_v23 = vadd.f32 %v14536_v25, %v2940_v37  ;;  %v3120_v36 = vpop.f32.mrb[211].mxu1 }
 0x3c8   : > { %v3121_v62 = vadd.f32 %v3120_v36, %v2935_v6 }
 0x3ca   : > { %v14539_v56 = vpop.f32.mrb[212].mxu1  ;;  %14594 = vmatprep.mubr.msk.f32.mxu1 %vm3395_vm6, %v3121_v62 }
 0x3cb   : > { %v3136_v50 = vadd.f32 %v14539_v56, %v2950_v3  ;;  %v3130_v45 = vpop.f32.mrb[213].mxu1  ;;  %14595 = vmatmul.mubr.msk.f32.vlgmr.msra.gmra.mrb[234].mxu1 %vm3395_vm6, %v3126_v23 }
 0x3cc   : > { %v3131_v32 = vadd.f32 %v3130_v45, %v2945_v61 }
 0x3ce   : > { %v14542_v63 = vpop.f32.mrb[214].mxu1  ;;  %14597 = vmatprep.mubr.msk.f32.mxu1 %vm3395_vm6, %v3131_v32 }
 0x3cf   : > { %v3146_v9 = vadd.f32 %v14542_v63, %v2960_v41  ;;  %v3140_v42 = vpop.f32.mrb[215].mxu1  ;;  %14598 = vmatmul.mubr.msk.f32.gmra.mrb[236].mxu1 %vm3395_vm6, %v3136_v50  ;;  %v3333_v50 = vpop.permute.xlu1 %3332 }
 0x3d0   : > { %v3141_v15 = vadd.f32 %v3140_v42, %v2955_v7 }
 0x3d2   : > { %v14545_v16 = vpop.f32.mrb[216].mxu1  ;;  %14600 = vmatprep.mubr.msk.f32.mxu1 %vm3395_vm6, %v3141_v15 }
 0x3d3   : > { %v3156_v38 = vadd.f32 %v14545_v16, %v2970_v20  ;;  %v3150_v12 = vpop.f32.mrb[217].mxu1  ;;  %14601 = vmatmul.mubr.msk.f32.gmra.mrb[238].mxu1 %vm3395_vm6, %v3146_v9 }
 0x3d4   : > { %v3151_v6 = vadd.f32 %v3150_v12, %v2965_v44 }
 0x3d6   : > { %v14548_v60 = vpop.f32.mrb[218].mxu1  ;;  %14603 = vmatprep.mubr.msk.f32.mxu1 %vm3395_vm6, %v3151_v6 }
 0x3d7   : > { %v3166_v37 = vadd.f32 %v14548_v60, %v2980_v40  ;;  %v3160_v19 = vpop.f32.mrb[219].mxu1  ;;  %14604 = vmatmul.mubr.msk.f32.gmra.mrb[240].mxu1 %vm3395_vm6, %v3156_v38 }
 0x3d8   : > { %v3161_v61 = vadd.f32 %v3160_v19, %v2975_v47  ;;  %v3343_v19 = vpop.permute.xlu1 %3342 }
 0x3da   : > { %v14551_v2 = vpop.f32.mrb[220].mxu1  ;;  %14606 = vmatprep.mubr.msk.f32.mxu1 %vm3395_vm6, %v3161_v61 }
 0x3db   : > { %v3176_v3 = vadd.f32 %v14551_v2, %v2990_v52  ;;  %v3170_v34 = vpop.f32.mrb[221].mxu1  ;;  %14607 = vmatmul.mubr.msk.f32.gmra.mrb[242].mxu1 %vm3395_vm6, %v3166_v37 }
 0x3dc   : > { %v3171_v7 = vadd.f32 %v3170_v34, %v2985_v21 }
 0x3de   : > { %v14554_v18 = vpop.f32.mrb[222].mxu1  ;;  %14609 = vmatprep.mubr.msk.f32.mxu1 %vm3395_vm6, %v3171_v7 }
 0x3df   : > { %v3186_v41 = vadd.f32 %v14554_v18, %v3000_v11  ;;  %v3180_v22 = vpop.f32.mrb[223].mxu1  ;;  %14610 = vmatmul.mubr.msk.f32.gmra.mrb[244].mxu1 %vm3395_vm6, %v3176_v3 }
 0x3e0   : > { %v3181_v44 = vadd.f32 %v3180_v22, %v18130_v39 }
 0x3e2   : > { %v14557_v0 = vpop.f32.mrb[224].mxu1  ;;  %14612 = vmatprep.mubr.msk.f32.mxu1 %vm3395_vm6, %v3181_v44  ;;  %v3353_v44 = vpop.permute.xlu1 %3352 }
 0x3e3   : > { %v3196_v20 = vadd.f32 %v14557_v0, %v3010_v14  ;;  %v3190_v58 = vpop.f32.mrb[225].mxu1  ;;  %14613 = vmatmul.mubr.msk.f32.gmra.mrb[246].mxu1 %vm3395_vm6, %v3186_v41 }
 0x3e4   : > { %v3191_v47 = vadd.f32 %v3190_v58, %v18132_v59 }
 0x3e6   : > { %v14560_v10 = vpop.f32.mrb[226].mxu1  ;;  %14615 = vmatprep.mubr.msk.f32.mxu1 %vm3395_vm6, %v3191_v47 }
 0x3e7   : > { %v3206_v40 = vadd.f32 %v14560_v10, %v18136_v33  ;;  %v3200_v26 = vpop.f32.mrb[227].mxu1  ;;  %14616 = vmatmul.mubr.msk.f32.gmra.mrb[248].mxu1 %vm3395_vm6, %v3196_v20  ;;  %v3278_v33 = vpop.permute.xlu0 %3277 }
 0x3e8   : > { %v3201_v21 = vadd.f32 %v3200_v26, %v18134_v29 }
 0x3ea   : > { %v14563_v24 = vpop.f32.mrb[228].mxu1  ;;  %14618 = vmatprep.mubr.msk.f32.mxu1 %vm3395_vm6, %v3201_v21 }
 0x3eb   : > { %v3216_v52 = vadd.f32 %v14563_v24, %v18140_v4  ;;  %v3210_v35 = vpop.f32.mrb[229].mxu1  ;;  %14619 = vmatmul.mubr.msk.f32.gmra.mrb[250].mxu1 %vm3395_vm6, %v3206_v40 }
 0x3ec   : > { %v3211_v39 = vadd.f32 %v3210_v35, %v18138_v27  ;;  %v3288_v27 = vpop.permute.xlu0 %3287 }
 0x3ee   : > { %v14566_v49 = vpop.f32.mrb[230].mxu1  ;;  %14621 = vmatprep.mubr.msk.f32.mxu1 %vm3395_vm6, %v3211_v39 }
 0x3ef   : > { %v3226_v11 = vadd.f32 %v14566_v49, %v18144_v57  ;;  %v3220_v5 = vpop.f32.mrb[231].mxu1  ;;  %14622 = vmatmul.mubr.msk.f32.gmra.mrb[252].mxu1 %vm3395_vm6, %v3216_v52  ;;  %v3363_v49 = vpop.permute.xlu1 %3362 }
 0x3f0   : > { %v3221_v59 = vadd.f32 %v3220_v5, %v18142_v31  ;;  %v3298_v4 = vpop.permute.xlu0 %3297 }
 0x3f2   : > { %v14569_v46 = vpop.f32.mrb[232].mxu1  ;;  %14624 = vmatprep.mubr.msk.f32.mxu1 %vm3395_vm6, %v3221_v59 }
 0x3f3   : > { %v3236_v14 = vadd.f32 %v14569_v46, %v18148_v54  ;;  %v3230_v28 = vpop.f32.mrb[233].mxu1  ;;  %14625 = vmatmul.mubr.msk.f32.gmra.mrb[254].mxu1 %vm3395_vm6, %v3226_v11 }
 0x3f4   : > { %v3231_v29 = vadd.f32 %v3230_v28, %v18146_v53  ;;  %v3308_v31 = vpop.permute.xlu0 %3307 }
 0x3f6   : > { %14627 = vmatprep.mubr.msk.f32.mxu1 %vm3395_vm6, %v3231_v29 }
 0x3f7   : > { %14628 = vmatmul.mubr.msk.f32.gmra.mrb[0].mxu1 %vm3395_vm6, %v3236_v14 }
 0x3f8   : > { %v3318_v30 = vpop.permute.xlu0 %3317 }
 0x3fc   : > { %v3328_v9 = vpop.permute.xlu0 %3327 }
 0x400   : > { %v3338_v2 = vpop.permute.xlu0 %3337 }
 0x404   : > { %v3348_v47 = vpop.permute.xlu0 %3347 }
 0x408   : > { %v3358_v5 = vpop.permute.xlu0 %3357 }
 0x49e   : > { %v14596_v55 = vpop.f32.mrb[234].mxu1 }
 0x49f   : > { %v3544_v57 = vadd.f32 %v14596_v55, %v3283_v17  ;;  %v3538_v51 = vpop.f32.mrb[235].mxu1 }
 0x4a0   : > { %v3539_v54 = vadd.f32 %v3538_v51, %v3278_v33  ;;  %v3373_v33 = vpop.permute.xlu1 %3372 }
 0x4a2   : > { %v14599_v25 = vpop.f32.mrb[236].mxu1  ;;  %v18184_v53 = vpack.i.bf16 %v3544_v57, %v3539_v54  ;;  %v15036_v23 = vpack.c.bf16 %v3544_v57, %v3539_v54 }
 0x4a3   : > { %v3554_v36 = vadd.f32 %v14599_v25, %v3293_v8  ;;  %v3548_v62 = vpop.f32.mrb[237].mxu1 }
 0x4a4   : > { %v3549_v56 = vadd.f32 %v3548_v62, %v3288_v27  ;;  %15800 = vrot.lane.b32.xlu0 %v18184_v53, %s23517_s28  ;;  %15037 = vmatpush1.bf16.msra.mxu1 %v15036_v23  ;;  %v3383_v25 = vpop.permute.xlu1 %3382 }
 0x4a5   : > { %15038 = vmatprep.subr.bf16.mxu1 %v23492_v13 }
 0x4a6   : > { %v14602_v45 = vpop.f32.mrb[238].mxu1  ;;  %v18189_v32 = vpack.i.bf16 %v3554_v36, %v3549_v56  ;;  %v15039_v63 = vpack.c.bf16 %v3554_v36, %v3549_v56 }
 0x4a7   : > { %v3564_v42 = vadd.f32 %v14602_v45, %v3303_v48  ;;  %v3558_v15 = vpop.f32.mrb[239].mxu1 }
 0x4a8   : > { %v3559_v16 = vadd.f32 %v3558_v15, %v3298_v4  ;;  %15805 = vrot.lane.b32.xlu1 %v18189_v32, %s23517_s28  ;;  %15040 = vmatpush1.bf16.msra.mxu1 %v15039_v63  ;;  %v3368_v4 = vpop.permute.xlu0 %3367  ;;  %v3658_v15 = vld [vmem:[%s23518_s7 + $0x8] sm:$0xff] }
 0x4a9   : > { %15041 = vmatprep.subr.bf16.mxu1 %v23492_v13  ;;  %12712 = vmatprep.mubr.msk.f32.mxu1 %vm3933_vm7, %v3658_v15  ;;  %v3687_v15 = vld [vmem:[%s23518_s7 + $0xf0] sm:$0xff] }
 0x4aa   : > { %v14605_v38 = vpop.f32.mrb[240].mxu1  ;;  %v18194_v12 = vpack.i.bf16 %v3564_v42, %v3559_v16  ;;  %v15042_v6 = vpack.c.bf16 %v3564_v42, %v3559_v16  ;;  %v12576_v42 = vld [vmem:[%s23518_s7 + $0x2d8] sm:$0xff]  ;;  %v3393_v16 = vpop.permute.xlu1 %3392 }
 0x4ab   : > { %v3574_v60 = vadd.f32 %v14605_v38, %v3313_v43  ;;  %v3568_v37 = vpop.f32.mrb[241].mxu1  ;;  %12666 = vmatprep.mubr.msk.f32.mxu0 %vm3933_vm7, %v12576_v42  ;;  %v5443_v42 = vld [vmem:[%s23522_s6 + $0xa0] sm:$0xff] }
 0x4ac   : > { %v3569_v61 = vadd.f32 %v3568_v37, %v3308_v31  ;;  %15810 = vrot.lane.b32.xlu0 %v18194_v12, %s23517_s28  ;;  %15043 = vmatpush1.bf16.msra.mxu1 %v15042_v6  ;;  %v3378_v36 = vpop.permute.xlu0 %3377 }
 0x4ad   : > { %15044 = vmatprep.subr.bf16.mxu1 %v23492_v13 }
 0x4ae   : > { %v14608_v3 = vpop.f32.mrb[242].mxu1  ;;  %v18199_v34 = vpack.i.bf16 %v3574_v60, %v3569_v61  ;;  %v15045_v7 = vpack.c.bf16 %v3574_v60, %v3569_v61 }
 0x4af   : > { %v3584_v18 = vadd.f32 %v14608_v3, %v3323_v1  ;;  %v3578_v41 = vpop.f32.mrb[243].mxu1 }
 0x4b0   : > { %v3579_v22 = vadd.f32 %v3578_v41, %v3318_v30  ;;  %15815 = vrot.lane.b32.xlu1 %v18199_v34, %s23517_s28  ;;  %15046 = vmatpush1.bf16.msra.mxu1 %v15045_v7  ;;  %v3388_v37 = vpop.permute.xlu0 %3387  ;;  %v3657_v41 = vld [vmem:[%s23518_s7] sm:$0xff] }
 0x4b1   : > { %15047 = vmatprep.subr.bf16.mxu1 %v23492_v13 }
 0x4b2   : > { %v14611_v0 = vpop.f32.mrb[244].mxu1  ;;  %v18204_v20 = vpack.i.bf16 %v3584_v18, %v3579_v22  ;;  %v15048_v58 = vpack.c.bf16 %v3584_v18, %v3579_v22  ;;  %v3660_v22 = vld [vmem:[%s23518_s7 + $0x18] sm:$0xff]  ;;  %v3741_v18 = vld [vmem:[%s23518_s7 + $0x2a0] sm:$0xff] }
 0x4b3   : > { %v3594_v10 = vadd.f32 %v14611_v0, %v3333_v50  ;;  %v3588_v40 = vpop.f32.mrb[245].mxu1  ;;  %v3666_v0 = vld [vmem:[%s23518_s7 + $0x48] sm:$0xff] }
 0x4b4   : > { %v3589_v26 = vadd.f32 %v3588_v40, %v3328_v9  ;;  %15820 = vrot.lane.b32.xlu0 %v18204_v20, %s23517_s28  ;;  %15049 = vmatpush1.bf16.msra.mxu1 %v15048_v58  ;;  %v3668_v58 = vld [vmem:[%s23518_s7 + $0x58] sm:$0xff]  ;;  %v3670_v40 = vld [vmem:[%s23518_s7 + $0x68] sm:$0xff] }
 0x4b5   : > { %15050 = vmatprep.subr.bf16.mxu1 %v23492_v13 }
 0x4b6   : > { %v14614_v21 = vpop.f32.mrb[246].mxu1  ;;  %v18209_v24 = vpack.i.bf16 %v3594_v10, %v3589_v26  ;;  %v15051_v52 = vpack.c.bf16 %v3594_v10, %v3589_v26  ;;  %v3667_v10 = vld [vmem:[%s23518_s7 + $0x50] sm:$0xff]  ;;  %v5424_v26 = vld [vmem:[%s23522_s6 + $0x8] sm:$0xff] }
 0x4b7   : > { %v3604_v35 = vadd.f32 %v14614_v21, %v3343_v19  ;;  %v3598_v39 = vpop.f32.mrb[247].mxu1  ;;  %v5425_v21 = vld [vmem:[%s23522_s6 + $0x10] sm:$0xff] }
 0x4b8   : > { %v3599_v11 = vadd.f32 %v3598_v39, %v3338_v2  ;;  %15825 = vrot.lane.b32.xlu1 %v18209_v24, %s23517_s28  ;;  %15052 = vmatpush1.bf16.msra.mxu1 %v15051_v52  ;;  %v3672_v52 = vld [vmem:[%s23518_s7 + $0x78] sm:$0xff]  ;;  %v5427_v39 = vld [vmem:[%s23522_s6 + $0x20] sm:$0xff] }
 0x4b9   : > { %15053 = vmatprep.subr.bf16.mxu1 %v23492_v13 }
 0x4ba   : > { %v14617_v59 = vpop.f32.mrb[248].mxu1  ;;  %v18214_v46 = vpack.i.bf16 %v3604_v35, %v3599_v11  ;;  %v15054_v14 = vpack.c.bf16 %v3604_v35, %v3599_v11  ;;  %v5426_v35 = vld [vmem:[%s23522_s6 + $0x18] sm:$0xff]  ;;  %v3674_v11 = vld [vmem:[%s23518_s7 + $0x88] sm:$0xff] }
 0x4bb   : > { %v3614_v28 = vadd.f32 %v14617_v59, %v3353_v44  ;;  %v3608_v29 = vpop.f32.mrb[249].mxu1  ;;  %v3662_v44 = vld [vmem:[%s23518_s7 + $0x28] sm:$0xff]  ;;  %v5429_v59 = vld [vmem:[%s23522_s6 + $0x30] sm:$0xff] }
 0x4bc   : > { %v3609_v17 = vadd.f32 %v3608_v29, %v3348_v47  ;;  %15830 = vrot.lane.b32.xlu0 %v18214_v46, %s23517_s28  ;;  %15055 = vmatpush1.bf16.msra.mxu1 %v15054_v14  ;;  %v5423_v47 = vld [vmem:[%s23522_s6] sm:$0xff]  ;;  %v3676_v14 = vld [vmem:[%s23518_s7 + $0x98] sm:$0xff] }
 0x4bd   : > { %15056 = vmatprep.subr.bf16.mxu1 %v23492_v13  ;;  %v5431_v29 = vld [vmem:[%s23522_s6 + $0x40] sm:$0xff] }
 0x4be   : > { %v14620_v8 = vpop.f32.mrb[250].mxu1  ;;  %v18219_v27 = vpack.i.bf16 %v3614_v28, %v3609_v17  ;;  %v15057_v48 = vpack.c.bf16 %v3614_v28, %v3609_v17  ;;  %v5430_v28 = vld [vmem:[%s23522_s6 + $0x38] sm:$0xff]  ;;  %v3675_v17 = vld [vmem:[%s23518_s7 + $0x90] sm:$0xff] }
 0x4bf   : > { %v3624_v43 = vadd.f32 %v14620_v8, %v3363_v49  ;;  %v3618_v31 = vpop.f32.mrb[251].mxu1  ;;  %v3671_v49 = vld [vmem:[%s23518_s7 + $0x70] sm:$0xff]  ;;  %v5432_v8 = vld [vmem:[%s23522_s6 + $0x48] sm:$0xff] }
 0x4c0   : > { %v3619_v55 = vadd.f32 %v3618_v31, %v3358_v5  ;;  %15835 = vrot.lane.b32.xlu1 %v18219_v27, %s23517_s28  ;;  %15058 = vmatpush1.bf16.msra.mxu1 %v15057_v48  ;;  %v5428_v5 = vld [vmem:[%s23522_s6 + $0x28] sm:$0xff]  ;;  %v3677_v48 = vld [vmem:[%s23518_s7 + $0xa0] sm:$0xff] }
 0x4c1   : > { %15059 = vmatprep.subr.bf16.mxu1 %v23492_v13  ;;  %v5435_v31 = vld [vmem:[%s23522_s6 + $0x60] sm:$0xff] }
 0x4c2   : > { %v14623_v57 = vpop.f32.mrb[252].mxu1  ;;  %v18224_v51 = vpack.i.bf16 %v3624_v43, %v3619_v55  ;;  %v15060_v1 = vpack.c.bf16 %v3624_v43, %v3619_v55  ;;  %v5434_v43 = vld [vmem:[%s23522_s6 + $0x58] sm:$0xff]  ;;  %v3679_v55 = vld [vmem:[%s23518_s7 + $0xb0] sm:$0xff] }
 0x4c3   : > { %v3634_v54 = vadd.f32 %v14623_v57, %v3373_v33  ;;  %v3628_v30 = vpop.f32.mrb[253].mxu1  ;;  %v3678_v33 = vld [vmem:[%s23518_s7 + $0xa8] sm:$0xff] }
 0x4c4   : > { %v3629_v23 = vadd.f32 %v3628_v30, %v3368_v4  ;;  %15840 = vrot.lane.b32.xlu0 %v18224_v51, %s23517_s28  ;;  %15061 = vmatpush1.bf16.msra.mxu1 %v15060_v1  ;;  %v3680_v4 = vld [vmem:[%s23518_s7 + $0xb8] sm:$0xff]  ;;  %v3682_v57 = vld [vmem:[%s23518_s7 + $0xc8] sm:$0xff]  ;;  %v5437_v1 = vld [vmem:[%s23522_s6 + $0x70] sm:$0xff] }
 0x4c5   : > { %15062 = vmatprep.subr.bf16.mxu1 %v23492_v13  ;;  %v3684_v30 = vld [vmem:[%s23518_s7 + $0xd8] sm:$0xff] }
 0x4c6   : > { %v14626_v62 = vpop.f32.mrb[254].mxu1  ;;  %v15844_v56 = vpack.i.bf16 %v3634_v54, %v3629_v23  ;;  %v15063_v50 = vpack.c.bf16 %v3634_v54, %v3629_v23  ;;  %v3681_v54 = vld [vmem:[%s23518_s7 + $0xc0] sm:$0xff] }
 0x4c7   : > { %v3644_v45 = vadd.f32 %v14626_v62, %v3383_v25  ;;  %v3638_v63 = vpop.f32.mrb[255].mxu1  ;;  %v5438_v25 = vld [vmem:[%s23522_s6 + $0x78] sm:$0xff]  ;;  %v5439_v23 = vld [vmem:[%s23522_s6 + $0x80] sm:$0xff]  ;;  %v3686_v62 = vld [vmem:[%s23518_s7 + $0xe8] sm:$0xff] }
 0x4c8   : > { %v3639_v9 = vadd.f32 %v3638_v63, %v3378_v36  ;;  %15845 = vrot.lane.b32.xlu1 %v15844_v56, %s23517_s28  ;;  %15064 = vmatpush1.bf16.msra.mxu1 %v15063_v50  ;;  %v3683_v36 = vld [vmem:[%s23518_s7 + $0xd0] sm:$0xff]  ;;  %v3688_v63 = vld [vmem:[%s23518_s7 + $0xf8] sm:$0xff] }
 0x4c9   : > { %15065 = vmatprep.subr.bf16.mxu1 %v23492_v13  ;;  %v5441_v50 = vld [vmem:[%s23522_s6 + $0x90] sm:$0xff] }
 0x4ca   : > { %v14629_v38 = vpop.f32.mrb[0].mxu1  ;;  %v15849_v6 = vpack.i.bf16 %v3644_v45, %v3639_v9  ;;  %v15066_v60 = vpack.c.bf16 %v3644_v45, %v3639_v9  ;;  %v3685_v45 = vld [vmem:[%s23518_s7 + $0xe0] sm:$0xff]  ;;  %v5442_v9 = vld [vmem:[%s23522_s6 + $0x98] sm:$0xff] }
 0x4cb   : > { %v3654_v19 = vadd.f32 %v14629_v38, %v3393_v16  ;;  %v3648_v61 = vpop.f32.mrb[1].mxu1  ;;  %v3690_v16 = vld [vmem:[%s23518_s7 + $0x108] sm:$0xff] }
 0x4cc   : > { %v3649_v2 = vadd.f32 %v3648_v61, %v3388_v37  ;;  %15850 = vrot.lane.b32.xlu0 %v15849_v6, %s23517_s28  ;;  %15067 = vmatpush1.bf16.msra.mxu1 %v15066_v60  ;;  %v5444_v38 = vld [vmem:[%s23522_s6 + $0xa8] sm:$0xff]  ;;  %v3689_v60 = vld [vmem:[%s23518_s7 + $0x100] sm:$0xff]  ;;  %v3692_v37 = vld [vmem:[%s23518_s7 + $0x118] sm:$0xff] }
 0x4cd   : > { %15068 = vmatprep.subr.bf16.mxu1 %v23492_v13  ;;  %v5447_v61 = vld [vmem:[%s23522_s6 + $0xc0] sm:$0xff] }
 0x4ce   : > { %v15069_v3 = vpack.c.bf16 %v3654_v19, %v3649_v2  ;;  %v15854_v7 = vpack.i.bf16 %v3654_v19, %v3649_v2  ;;  %v5446_v19 = vld [vmem:[%s23522_s6 + $0xb8] sm:$0xff] }
 0x4d0   : > { %15855 = vrot.lane.b32.xlu1 %v15854_v7, %s23517_s28  ;;  %15860 = vrot.lane.b32.xlu0 %v18184_v53, %s23521_s1  ;;  %v3659_v53 = vld [vmem:[%s23518_s7 + $0x10] sm:$0xff] }
 0x4d1   : > { %15071 = vmatpush1.bf16.msk.msra.mxu1 %vm18243_vm9, %v15069_v3  ;;  %v3691_v3 = vld [vmem:[%s23518_s7 + $0x110] sm:$0xff] }
 0x4d2   : > { %15109 = vmatprep.subr.bf16.mxu1 %v23492_v13 }
 0x4d4   : > { %15865 = vrot.lane.b32.xlu1 %v18189_v32, %s23521_s1  ;;  %15870 = vrot.lane.b32.xlu0 %v18194_v12, %s23521_s1  ;;  %v3661_v32 = vld [vmem:[%s23518_s7 + $0x20] sm:$0xff]  ;;  %v3664_v12 = vld [vmem:[%s23518_s7 + $0x38] sm:$0xff] }
 0x4d5   : > { %4564 = vmatmul.mubr.f32.vlgmr.msra.gmra.mrb[2].mxu1 %v3657_v41 }
 0x4d6   : > { %12713 = vmatprep.mubr.msk.f32.mxu1 %vm3933_vm7, %v3660_v22  ;;  %v3694_v22 = vld [vmem:[%s23518_s7 + $0x128] sm:$0xff] }
 0x4d8   : > { %15875 = vrot.lane.b32.xlu1 %v18199_v34, %s23521_s1  ;;  %15880 = vrot.lane.b32.xlu0 %v18204_v20, %s23521_s1  ;;  %v3663_v34 = vld [vmem:[%s23518_s7 + $0x30] sm:$0xff]  ;;  %v3665_v20 = vld [vmem:[%s23518_s7 + $0x40] sm:$0xff] }
 0x4d9   : > { %4569 = vmatmul.mubr.f32.gmra.mrb[4].mxu1 %v3659_v53 }
 0x4da   : > { %12714 = vmatprep.mubr.msk.f32.mxu1 %vm3933_vm7, %v3662_v44  ;;  %v5448_v44 = vld [vmem:[%s23522_s6 + $0xc8] sm:$0xff] }
 0x4dc   : > { %15885 = vrot.lane.b32.xlu1 %v18209_v24, %s23521_s1  ;;  %15890 = vrot.lane.b32.xlu0 %v18214_v46, %s23521_s1  ;;  %v3669_v24 = vld [vmem:[%s23518_s7 + $0x60] sm:$0xff] }
 0x4dd   : > { %4574 = vmatmul.mubr.f32.gmra.mrb[6].mxu1 %v3661_v32  ;;  %v3673_v46 = vld [vmem:[%s23518_s7 + $0x80] sm:$0xff]  ;;  %v5449_v32 = vld [vmem:[%s23522_s6 + $0xd0] sm:$0xff] }
 0x4de   : > { %12715 = vmatprep.mubr.msk.f32.mxu1 %vm3933_vm7, %v3664_v12 }
 0x4e0   : > { %15895 = vrot.lane.b32.xlu1 %v18219_v27, %s23521_s1  ;;  %15900 = vrot.lane.b32.xlu0 %v18224_v51, %s23521_s1  ;;  %v5433_v27 = vld [vmem:[%s23522_s6 + $0x50] sm:$0xff]  ;;  %v5436_v51 = vld [vmem:[%s23522_s6 + $0x68] sm:$0xff] }
 0x4e1   : > { %4579 = vmatmul.mubr.f32.gmra.mrb[8].mxu1 %v3663_v34  ;;  %v3693_v34 = vld [vmem:[%s23518_s7 + $0x120] sm:$0xff] }
 0x4e2   : > { %12716 = vmatprep.mubr.msk.f32.mxu1 %vm3933_vm7, %v3666_v0 }
 0x4e4   : > { %15905 = vrot.lane.b32.xlu1 %v15844_v56, %s23521_s1  ;;  %15910 = vrot.lane.b32.xlu0 %v15849_v6, %s23521_s1  ;;  %v5440_v56 = vld [vmem:[%s23522_s6 + $0x88] sm:$0xff]  ;;  %v5445_v6 = vld [vmem:[%s23522_s6 + $0xb0] sm:$0xff] }
 0x4e5   : > { %4584 = vmatmul.mubr.f32.gmra.mrb[10].mxu1 %v3665_v20 }
 0x4e6   : > { %12717 = vmatprep.mubr.msk.f32.mxu1 %vm3933_vm7, %v3668_v58  ;;  %v3696_v58 = vld [vmem:[%s23518_s7 + $0x138] sm:$0xff] }
 0x4e8   : > { %15915 = vrot.lane.b32.xlu1 %v15854_v7, %s23521_s1  ;;  %5470 = vperm.xlu0 %15797, %v5423_v47  }
 0x4e9   : > { %4589 = vmatmul.mubr.f32.gmra.mrb[12].mxu1 %v3667_v10  ;;  %v5450_v10 = vld [vmem:[%s23522_s6 + $0xd8] sm:$0xff] }
 0x4ea   : > { %12718 = vmatprep.mubr.msk.f32.mxu1 %vm3933_vm7, %v3670_v40  ;;  %v5451_v40 = vld [vmem:[%s23522_s6 + $0xe0] sm:$0xff] }
 0x4ec   : > { %5475 = vperm.xlu1 %15798, %v5424_v26   ;;  %5480 = vperm.xlu0 %15797, %v5425_v21   ;;  %v3695_v21 = vld [vmem:[%s23518_s7 + $0x130] sm:$0xff] }
 0x4ed   : > { %4594 = vmatmul.mubr.f32.gmra.mrb[14].mxu1 %v3669_v24 }
 0x4ee   : > { %12719 = vmatprep.mubr.msk.f32.mxu1 %vm3933_vm7, %v3672_v52 }
 0x4f0   : > { %5485 = vperm.xlu1 %15798, %v5426_v35   ;;  %5490 = vperm.xlu0 %15797, %v5427_v39   ;;  %v3698_v35 = vld [vmem:[%s23518_s7 + $0x148] sm:$0xff] }
 0x4f1   : > { %4599 = vmatmul.mubr.f32.gmra.mrb[16].mxu1 %v3671_v49  ;;  %v5452_v49 = vld [vmem:[%s23522_s6 + $0xe8] sm:$0xff] }
 0x4f2   : > { %12720 = vmatprep.mubr.msk.f32.mxu1 %vm3933_vm7, %v3674_v11  ;;  %v5453_v11 = vld [vmem:[%s23522_s6 + $0xf0] sm:$0xff] }
 0x4f4   : > { %5495 = vperm.xlu1 %15798, %v5428_v5   ;;  %5500 = vperm.xlu0 %15797, %v5429_v59   ;;  %v3697_v59 = vld [vmem:[%s23518_s7 + $0x140] sm:$0xff] }
 0x4f5   : > { %4604 = vmatmul.mubr.f32.gmra.mrb[18].mxu1 %v3673_v46 }
 0x4f6   : > { %12721 = vmatprep.mubr.msk.f32.mxu1 %vm3933_vm7, %v3676_v14 }
 0x4f8   : > { %5505 = vperm.xlu1 %15798, %v5430_v28   ;;  %5510 = vperm.xlu0 %15797, %v5431_v29   ;;  %v3700_v28 = vld [vmem:[%s23518_s7 + $0x158] sm:$0xff] }
 0x4f9   : > { %4609 = vmatmul.mubr.f32.gmra.mrb[20].mxu1 %v3675_v17  ;;  %v5454_v17 = vld [vmem:[%s23522_s6 + $0xf8] sm:$0xff] }
 0x4fa   : > { %12722 = vmatprep.mubr.msk.f32.mxu1 %vm3933_vm7, %v3678_v33  ;;  %v5455_v33 = vld [vmem:[%s23522_s6 + $0x100] sm:$0xff] }
 0x4fc   : > { %5515 = vperm.xlu1 %15798, %v5432_v8   ;;  %5520 = vperm.xlu0 %15797, %v5433_v27   ;;  %v3699_v27 = vld [vmem:[%s23518_s7 + $0x150] sm:$0xff] }
 0x4fd   : > { %4614 = vmatmul.mubr.f32.gmra.mrb[22].mxu1 %v3677_v48 }
 0x4fe   : > { %12723 = vmatprep.mubr.msk.f32.mxu1 %vm3933_vm7, %v3680_v4 }
 0x500   : > { %5525 = vperm.xlu1 %15798, %v5434_v43   ;;  %5530 = vperm.xlu0 %15797, %v5435_v31   ;;  %v3702_v43 = vld [vmem:[%s23518_s7 + $0x168] sm:$0xff] }
 0x501   : > { %4619 = vmatmul.mubr.f32.gmra.mrb[24].mxu1 %v3679_v55  ;;  %v5456_v55 = vld [vmem:[%s23522_s6 + $0x108] sm:$0xff] }
 0x502   : > { %12724 = vmatprep.mubr.msk.f32.mxu1 %vm3933_vm7, %v3682_v57  ;;  %v5457_v57 = vld [vmem:[%s23522_s6 + $0x110] sm:$0xff] }
 0x504   : > { %5535 = vperm.xlu1 %15798, %v5436_v51   ;;  %5540 = vperm.xlu0 %15797, %v5437_v1   ;;  %v3701_v1 = vld [vmem:[%s23518_s7 + $0x160] sm:$0xff] }
 0x505   : > { %4624 = vmatmul.mubr.f32.gmra.mrb[26].mxu1 %v3681_v54 }
 0x506   : > { %12725 = vmatprep.mubr.msk.f32.mxu1 %vm3933_vm7, %v3684_v30 }
 0x508   : > { %5545 = vperm.xlu1 %15798, %v5438_v25   ;;  %5550 = vperm.xlu0 %15797, %v5439_v23   ;;  %v3704_v25 = vld [vmem:[%s23518_s7 + $0x178] sm:$0xff] }
 0x509   : > { %4629 = vmatmul.mubr.f32.gmra.mrb[28].mxu1 %v3683_v36  ;;  %v5458_v36 = vld [vmem:[%s23522_s6 + $0x118] sm:$0xff] }
 0x50a   : > { %12726 = vmatprep.mubr.msk.f32.mxu1 %vm3933_vm7, %v3686_v62  ;;  %v5459_v62 = vld [vmem:[%s23522_s6 + $0x120] sm:$0xff] }
 0x50c   : > { %5555 = vperm.xlu1 %15798, %v5440_v56   ;;  %5560 = vperm.xlu0 %15797, %v5441_v50   ;;  %v3703_v50 = vld [vmem:[%s23518_s7 + $0x170] sm:$0xff] }
 0x50d   : > { %4634 = vmatmul.mubr.f32.gmra.mrb[30].mxu1 %v3685_v45 }
 0x50e   : > { %12727 = vmatprep.mubr.msk.f32.mxu1 %vm3933_vm7, %v3688_v63 }
 0x510   : > { %5565 = vperm.xlu1 %15798, %v5442_v9   ;;  %5570 = vperm.xlu0 %15797, %v5443_v42   ;;  %v3706_v9 = vld [vmem:[%s23518_s7 + $0x188] sm:$0xff] }
 0x511   : > { %4639 = vmatmul.mubr.f32.gmra.mrb[32].mxu1 %v3687_v15  ;;  %v5460_v15 = vld [vmem:[%s23522_s6 + $0x128] sm:$0xff] }
 0x512   : > { %12728 = vmatprep.mubr.msk.f32.mxu1 %vm3933_vm7, %v3690_v16  ;;  %v5461_v16 = vld [vmem:[%s23522_s6 + $0x130] sm:$0xff] }
 0x514   : > { %5575 = vperm.xlu1 %15798, %v5444_v38   ;;  %5580 = vperm.xlu0 %15797, %v5445_v6   ;;  %v3705_v6 = vld [vmem:[%s23518_s7 + $0x180] sm:$0xff] }
 0x515   : > { %4644 = vmatmul.mubr.f32.gmra.mrb[34].mxu1 %v3689_v60 }
 0x516   : > { %v15801_v2 = vpop.permute.xlu0 %15800  ;;  %12729 = vmatprep.mubr.msk.f32.mxu1 %vm3933_vm7, %v3692_v37 }
 0x517   : > { %v15803_v7 = vunpack.i.h.bf16 %v15801_v2  ;;  %v15802_v41 = vunpack.i.l.bf16 %v15801_v2  ;;  %v5462_v2 = vld [vmem:[%s23522_s6 + $0x138] sm:$0xff] }
 0x518   : > { %5585 = vperm.xlu1 %15798, %v5446_v19   ;;  %5590 = vperm.xlu0 %15797, %v5447_v61   ;;  %v3708_v19 = vld [vmem:[%s23518_s7 + $0x198] sm:$0xff] }
 0x519   : > { %v14999_v53 = vpack.c.bf16 %v15803_v7, %v15802_v41  ;;  %4649 = vmatmul.mubr.f32.gmra.mrb[36].mxu1 %v3691_v3  ;;  %v5463_v3 = vld [vmem:[%s23522_s6 + $0x140] sm:$0xff]  ;;  %v3707_v41 = vld [vmem:[%s23518_s7 + $0x190] sm:$0xff] }
 0x51a   : > { %v15806_v12 = vpop.permute.xlu1 %15805  ;;  %12730 = vmatprep.mubr.msk.f32.mxu1 %vm3933_vm7, %v3694_v22 }
 0x51b   : > { %v15808_v0 = vunpack.i.h.bf16 %v15806_v12  ;;  %v15807_v20 = vunpack.i.l.bf16 %v15806_v12  ;;  %15000 = vmatpush1.bf16.msra.mxu0 %v14999_v53  ;;  %v5464_v12 = vld [vmem:[%s23522_s6 + $0x148] sm:$0xff] }
 0x51c   : > { %5595 = vperm.xlu1 %15798, %v5448_v44   ;;  %5600 = vperm.xlu0 %15797, %v5449_v32   ;;  %v3710_v44 = vld [vmem:[%s23518_s7 + $0x1a8] sm:$0xff] }
 0x51d   : > { %v15002_v47 = vpack.c.bf16 %v15808_v0, %v15807_v20  ;;  %15001 = vmatprep.subr.bf16.mxu0 %v23492_v13  ;;  %4654 = vmatmul.mubr.f32.gmra.mrb[38].mxu1 %v3693_v34  ;;  %v5465_v34 = vld [vmem:[%s23522_s6 + $0x150] sm:$0xff]  ;;  %v3709_v20 = vld [vmem:[%s23518_s7 + $0x1a0] sm:$0xff] }
 0x51e   : > { %v15811_v26 = vpop.permute.xlu0 %15810  ;;  %12731 = vmatprep.mubr.msk.f32.mxu1 %vm3933_vm7, %v3696_v58 }
 0x51f   : > { %v15813_v24 = vunpack.i.h.bf16 %v15811_v26  ;;  %v15812_v52 = vunpack.i.l.bf16 %v15811_v26  ;;  %15003 = vmatpush1.bf16.msra.mxu0 %v15002_v47  ;;  %v5466_v26 = vld [vmem:[%s23522_s6 + $0x158] sm:$0xff] }
 0x520   : > { %5605 = vperm.xlu1 %15798, %v5450_v10   ;;  %5610 = vperm.xlu0 %15797, %v5451_v40   ;;  %v3712_v10 = vld [vmem:[%s23518_s7 + $0x1b8] sm:$0xff] }
 0x521   : > { %v15005_v39 = vpack.c.bf16 %v15813_v24, %v15812_v52  ;;  %15004 = vmatprep.subr.bf16.mxu0 %v23492_v13  ;;  %4659 = vmatmul.mubr.f32.gmra.mrb[40].mxu1 %v3695_v21  ;;  %v5467_v21 = vld [vmem:[%s23522_s6 + $0x160] sm:$0xff]  ;;  %v3711_v52 = vld [vmem:[%s23518_s7 + $0x1b0] sm:$0xff] }
 0x522   : > { %v15816_v5 = vpop.permute.xlu1 %15815  ;;  %12732 = vmatprep.mubr.msk.f32.mxu1 %vm3933_vm7, %v3698_v35 }
 0x523   : > { %v15818_v46 = vunpack.i.h.bf16 %v15816_v5  ;;  %v15817_v14 = vunpack.i.l.bf16 %v15816_v5  ;;  %15006 = vmatpush1.bf16.msra.mxu0 %v15005_v39  ;;  %v6272_v5 = vld [vmem:[%s23419_s10] sm:$0xff] }
 0x524   : > { %5615 = vperm.xlu1 %15798, %v5452_v49   ;;  %5620 = vperm.xlu0 %15797, %v5453_v11   ;;  %v3714_v49 = vld [vmem:[%s23518_s7 + $0x1c8] sm:$0xff] }
 0x525   : > { %v15008_v29 = vpack.c.bf16 %v15818_v46, %v15817_v14  ;;  %15007 = vmatprep.subr.bf16.mxu0 %v23492_v13  ;;  %4664 = vmatmul.mubr.f32.gmra.mrb[42].mxu1 %v3697_v59  ;;  %v6273_v59 = vld [vmem:[%s23419_s10 + $0x8] sm:$0xff] }
 0x526   : > { %v15821_v8 = vpop.permute.xlu0 %15820  ;;  %12733 = vmatprep.mubr.msk.f32.mxu1 %vm3933_vm7, %v3700_v28  ;;  %v3713_v28 = vld [vmem:[%s23518_s7 + $0x1c0] sm:$0xff] }
 0x527   : > { %v15823_v48 = vunpack.i.h.bf16 %v15821_v8  ;;  %v15822_v4 = vunpack.i.l.bf16 %v15821_v8  ;;  %15009 = vmatpush1.bf16.msra.mxu0 %v15008_v29 }
 0x528   : > { %5625 = vperm.xlu1 %15798, %v5454_v17   ;;  %5630 = vperm.xlu0 %15797, %v5455_v33   ;;  %v3716_v33 = vld [vmem:[%s23518_s7 + $0x1d8] sm:$0xff] }
 0x529   : > { %v15011_v31 = vpack.c.bf16 %v15823_v48, %v15822_v4  ;;  %15010 = vmatprep.subr.bf16.mxu0 %v23492_v13  ;;  %4669 = vmatmul.mubr.f32.gmra.mrb[44].mxu1 %v3699_v27  ;;  %v6274_v4 = vld [vmem:[%s23419_s10 + $0x10] sm:$0xff] }
 0x52a   : > { %v15826_v51 = vpop.permute.xlu1 %15825  ;;  %12734 = vmatprep.mubr.msk.f32.mxu1 %vm3933_vm7, %v3702_v43  ;;  %v6275_v43 = vld [vmem:[%s23419_s10 + $0x18] sm:$0xff] }
 0x52b   : > { %v15828_v54 = vunpack.i.h.bf16 %v15826_v51  ;;  %v15827_v30 = vunpack.i.l.bf16 %v15826_v51  ;;  %15012 = vmatpush1.bf16.msra.mxu0 %v15011_v31  ;;  %v3718_v51 = vld [vmem:[%s23518_s7 + $0x1e8] sm:$0xff] }
 0x52c   : > { %5635 = vperm.xlu1 %15798, %v5456_v55   ;;  %5640 = vperm.xlu0 %15797, %v5457_v57   ;;  %v3715_v55 = vld [vmem:[%s23518_s7 + $0x1d0] sm:$0xff] }
 0x52d   : > { %v15014_v23 = vpack.c.bf16 %v15828_v54, %v15827_v30  ;;  %15013 = vmatprep.subr.bf16.mxu0 %v23492_v13  ;;  %4674 = vmatmul.mubr.f32.gmra.mrb[46].mxu1 %v3701_v1  ;;  %v12575_v57 = vld [vmem:[%s23518_s7 + $0x2d0] sm:$0xff]  ;;  %v12578_v1 = vld [vmem:[%s23518_s7 + $0x2e8] sm:$0xff] }
 0x52e   : > { %v15831_v56 = vpop.permute.xlu0 %15830  ;;  %12735 = vmatprep.mubr.msk.f32.mxu1 %vm3933_vm7, %v3704_v25 }
 0x52f   : > { %v15833_v45 = vunpack.i.h.bf16 %v15831_v56  ;;  %v15832_v63 = vunpack.i.l.bf16 %v15831_v56  ;;  %15015 = vmatpush1.bf16.msra.mxu0 %v15014_v23  ;;  %v6276_v23 = vld [vmem:[%s23419_s10 + $0x20] sm:$0xff] }
 0x530   : > { %5645 = vperm.xlu1 %15798, %v5458_v36   ;;  %5650 = vperm.xlu0 %15797, %v5459_v62   ;;  %v6277_v36 = vld [vmem:[%s23419_s10 + $0x28] sm:$0xff]  ;;  %v3717_v56 = vld [vmem:[%s23518_s7 + $0x1e0] sm:$0xff] }
 0x531   : > { %v15017_v42 = vpack.c.bf16 %v15833_v45, %v15832_v63  ;;  %15016 = vmatprep.subr.bf16.mxu0 %v23492_v13  ;;  %4679 = vmatmul.mubr.f32.gmra.mrb[48].mxu1 %v3703_v50  ;;  %v12577_v50 = vld [vmem:[%s23518_s7 + $0x2e0] sm:$0xff]  ;;  %v3720_v45 = vld [vmem:[%s23518_s7 + $0x1f8] sm:$0xff] }
 0x532   : > { %v15836_v38 = vpop.permute.xlu1 %15835  ;;  %12736 = vmatprep.mubr.msk.f32.mxu1 %vm3933_vm7, %v3706_v9  ;;  %v12580_v63 = vld [vmem:[%s23518_s7 + $0x2f8] sm:$0xff] }
 0x533   : > { %v15838_v60 = vunpack.i.h.bf16 %v15836_v38  ;;  %v15837_v37 = vunpack.i.l.bf16 %v15836_v38  ;;  %15018 = vmatpush1.bf16.msra.mxu0 %v15017_v42  ;;  %v6279_v38 = vld [vmem:[%s23419_s10 + $0x38] sm:$0xff] }
 0x534   : > { %5655 = vperm.xlu1 %15798, %v5460_v15   ;;  %5660 = vperm.xlu0 %15797, %v5461_v16   ;;  %v6278_v16 = vld [vmem:[%s23419_s10 + $0x30] sm:$0xff] }
 0x535   : > { %v15020_v61 = vpack.c.bf16 %v15838_v60, %v15837_v37  ;;  %15019 = vmatprep.subr.bf16.mxu0 %v23492_v13  ;;  %4684 = vmatmul.mubr.f32.gmra.mrb[50].mxu1 %v3705_v6  ;;  %v3719_v60 = vld [vmem:[%s23518_s7 + $0x1f0] sm:$0xff] }
 0x536   : > { %v15841_v7 = vpop.permute.xlu0 %15840  ;;  %12737 = vmatprep.mubr.msk.f32.mxu1 %vm3933_vm7, %v3708_v19  ;;  %v12579_v37 = vld [vmem:[%s23518_s7 + $0x2f0] sm:$0xff]  ;;  %v3722_v19 = vld [vmem:[%s23518_s7 + $0x208] sm:$0xff] }
 0x537   : > { %v15843_v22 = vunpack.i.h.bf16 %v15841_v7  ;;  %v15842_v53 = vunpack.i.l.bf16 %v15841_v7  ;;  %15021 = vmatpush1.bf16.msra.mxu0 %v15020_v61  ;;  %v12582_v61 = vld [vmem:[%s23518_s7 + $0x308] sm:$0xff] }
 0x538   : > { %5665 = vperm.xlu1 %15798, %v5462_v2   ;;  %5670 = vperm.xlu0 %15797, %v5463_v3  }
 0x539   : > { %v15023_v32 = vpack.c.bf16 %v15843_v22, %v15842_v53  ;;  %15022 = vmatprep.subr.bf16.mxu0 %v23492_v13  ;;  %4689 = vmatmul.mubr.f32.gmra.mrb[52].mxu1 %v3707_v41  ;;  %v6280_v41 = vld [vmem:[%s23419_s10 + $0x40] sm:$0xff]  ;;  %v6281_v22 = vld [vmem:[%s23419_s10 + $0x48] sm:$0xff] }
 0x53a   : > { %v15846_v0 = vpop.permute.xlu1 %15845  ;;  %12738 = vmatprep.mubr.msk.f32.mxu1 %vm3933_vm7, %v3710_v44  ;;  %v3721_v44 = vld [vmem:[%s23518_s7 + $0x200] sm:$0xff] }
 0x53b   : > { %v15848_v58 = vunpack.i.h.bf16 %v15846_v0  ;;  %v15847_v47 = vunpack.i.l.bf16 %v15846_v0  ;;  %15024 = vmatpush1.bf16.msra.mxu0 %v15023_v32  ;;  %v12581_v32 = vld [vmem:[%s23518_s7 + $0x300] sm:$0xff] }
 0x53c   : > { %5675 = vperm.xlu1 %15798, %v5464_v12   ;;  %5680 = vperm.xlu0 %15797, %v5465_v34   ;;  %v3724_v12 = vld [vmem:[%s23518_s7 + $0x218] sm:$0xff] }
 0x53d   : > { %v15026_v40 = vpack.c.bf16 %v15848_v58, %v15847_v47  ;;  %15025 = vmatprep.subr.bf16.mxu0 %v23492_v13  ;;  %4694 = vmatmul.mubr.f32.gmra.mrb[54].mxu1 %v3709_v20  ;;  %v12584_v34 = vld [vmem:[%s23518_s7 + $0x318] sm:$0xff]  ;;  %v6282_v47 = vld [vmem:[%s23419_s10 + $0x50] sm:$0xff] }
 0x53e   : > { %v15851_v24 = vpop.permute.xlu0 %15850  ;;  %12739 = vmatprep.mubr.msk.f32.mxu1 %vm3933_vm7, %v3712_v10  ;;  %v6283_v10 = vld [vmem:[%s23419_s10 + $0x58] sm:$0xff] }
 0x53f   : > { %v15853_v35 = vunpack.i.h.bf16 %v15851_v24  ;;  %v15852_v39 = vunpack.i.l.bf16 %v15851_v24  ;;  %15027 = vmatpush1.bf16.msra.mxu0 %v15026_v40  ;;  %v3726_v24 = vld [vmem:[%s23518_s7 + $0x228] sm:$0xff] }
 0x540   : > { %5685 = vperm.xlu1 %15798, %v5466_v26   ;;  %5690 = vperm.xlu0 %15797, %v5467_v21   ;;  %v3723_v26 = vld [vmem:[%s23518_s7 + $0x210] sm:$0xff] }
 0x541   : > { %v15029_v11 = vpack.c.bf16 %v15853_v35, %v15852_v39  ;;  %15028 = vmatprep.subr.bf16.mxu0 %v23492_v13  ;;  %4699 = vmatmul.mubr.f32.gmra.mrb[56].mxu1 %v3711_v52  ;;  %v12583_v21 = vld [vmem:[%s23518_s7 + $0x310] sm:$0xff]  ;;  %v12586_v52 = vld [vmem:[%s23518_s7 + $0x328] sm:$0xff] }
 0x542   : > { %v15856_v46 = vpop.permute.xlu1 %15855  ;;  %v15861_v14 = vpop.permute.xlu0 %15860  ;;  %12740 = vmatprep.mubr.msk.f32.mxu1 %vm3933_vm7, %v3714_v49 }
 0x543   : > { %v15858_v29 = vunpack.i.h.bf16 %v15856_v46  ;;  %v15857_v17 = vunpack.i.l.bf16 %v15856_v46  ;;  %15030 = vmatpush1.bf16.msra.mxu0 %v15029_v11  ;;  %v15863_v27 = vunpack.i.h.bf16 %v15861_v14  ;;  %v15862_v48 = vunpack.i.l.bf16 %v15861_v14  ;;  %v6284_v11 = vld [vmem:[%s23419_s10 + $0x60] sm:$0xff] }
 0x544   : > { %6296 = vperm.xlu1 %15798, %v6272_v5   ;;  %6301 = vperm.xlu0 %15797, %v6273_v59   ;;  %v6285_v5 = vld [vmem:[%s23419_s10 + $0x68] sm:$0xff]  ;;  %v3725_v46 = vld [vmem:[%s23518_s7 + $0x220] sm:$0xff] }
 0x545   : > { %v15032_v8 = vpack.c.bf16 %v15858_v29, %v15857_v17  ;;  %15031 = vmatprep.subr.bf16.mxu0 %v23492_v13  ;;  %4704 = vmatmul.mubr.f32.gmra.mrb[58].mxu1 %v3713_v28  ;;  %v15073_v54 = vpack.c.bf16 %v15863_v27, %v15862_v48  ;;  %v12585_v14 = vld [vmem:[%s23518_s7 + $0x320] sm:$0xff]  ;;  %v3728_v28 = vld [vmem:[%s23518_s7 + $0x238] sm:$0xff]  ;;  %v6286_v27 = vld [vmem:[%s23419_s10 + $0x70] sm:$0xff] }
 0x546   : > { %v15866_v31 = vpop.permute.xlu1 %15865  ;;  %12741 = vmatprep.mubr.msk.f32.mxu1 %vm3933_vm7, %v3716_v33  ;;  %v15871_v62 = vpop.permute.xlu0 %15870  ;;  %v12588_v29 = vld [vmem:[%s23518_s7 + $0x338] sm:$0xff] }
 0x547   : > { %15034 = vmatpush1.bf16.msk.msra.mxu0 %vm18243_vm9, %v15032_v8  ;;  %v15868_v30 = vunpack.i.h.bf16 %v15866_v31  ;;  %v15867_v25 = vunpack.i.l.bf16 %v15866_v31  ;;  %v15873_v42 = vunpack.i.h.bf16 %v15871_v62  ;;  %v15872_v15 = vunpack.i.l.bf16 %v15871_v62  ;;  %v6287_v48 = vld [vmem:[%s23419_s10 + $0x78] sm:$0xff]  ;;  %v12587_v31 = vld [vmem:[%s23518_s7 + $0x330] sm:$0xff]  ;;  %v12589_v62 = vld [vmem:[%s23518_s7 + $0x340] sm:$0xff] }
 0x548   : > { %6306 = vperm.xlu1 %15798, %v6274_v4   ;;  %6311 = vperm.xlu0 %15797, %v6275_v43   ;;  %v3727_v43 = vld [vmem:[%s23518_s7 + $0x230] sm:$0xff] }
 0x549   : > { %15072 = vmatprep.subr.bf16.mxu0 %v23492_v13  ;;  %4709 = vmatmul.mubr.f32.gmra.mrb[60].mxu1 %v3715_v55  ;;  %v15076_v9 = vpack.c.bf16 %v15868_v30, %v15867_v25  ;;  %v15079_v2 = vpack.c.bf16 %v15873_v42, %v15872_v15  ;;  %v3730_v55 = vld [vmem:[%s23518_s7 + $0x248] sm:$0xff]  ;;  %v6288_v30 = vld [vmem:[%s23419_s10 + $0x80] sm:$0xff]  ;;  %v6290_v42 = vld [vmem:[%s23419_s10 + $0x90] sm:$0xff] }
 0x54a   : > { %4137 = vmatmul.mubr.f32.vlgmr.msra.gmra.mrb[120].mxu0 %v12575_v57  ;;  %12742 = vmatprep.mubr.msk.f32.mxu1 %vm3933_vm7, %v3718_v51  ;;  %v15876_v6 = vpop.permute.xlu1 %15875  ;;  %v15881_v53 = vpop.permute.xlu0 %15880  ;;  %v12590_v57 = vld [vmem:[%s23518_s7 + $0x348] sm:$0xff]  ;;  %v6291_v15 = vld [vmem:[%s23419_s10 + $0x98] sm:$0xff] }
 0x54b   : > { %15074 = vmatpush1.bf16.msra.mxu0 %v15073_v54  ;;  %12667 = vmatprep.mubr.msk.f32.mxu0 %vm3933_vm7, %v12578_v1  ;;  %v15878_v3 = vunpack.i.h.bf16 %v15876_v6  ;;  %v15877_v7 = vunpack.i.l.bf16 %v15876_v6  ;;  %v15883_v20 = vunpack.i.h.bf16 %v15881_v53  ;;  %v15882_v58 = vunpack.i.l.bf16 %v15881_v53  ;;  %v6289_v25 = vld [vmem:[%s23419_s10 + $0x88] sm:$0xff]  ;;  %v12591_v6 = vld [vmem:[%s23518_s7 + $0x350] sm:$0xff]  ;;  %v12593_v53 = vld [vmem:[%s23518_s7 + $0x360] sm:$0xff] }
 0x54c   : > { %6316 = vperm.xlu1 %15798, %v6276_v23   ;;  %6321 = vperm.xlu0 %15797, %v6277_v36   ;;  %v3729_v36 = vld [vmem:[%s23518_s7 + $0x240] sm:$0xff] }
 0x54d   : > { %15075 = vmatprep.subr.bf16.mxu0 %v23492_v13  ;;  %4714 = vmatmul.mubr.f32.gmra.mrb[62].mxu1 %v3717_v56  ;;  %v15082_v0 = vpack.c.bf16 %v15878_v3, %v15877_v7  ;;  %v15085_v35 = vpack.c.bf16 %v15883_v20, %v15882_v58  ;;  %v3732_v56 = vld [vmem:[%s23518_s7 + $0x258] sm:$0xff]  ;;  %v6292_v3 = vld [vmem:[%s23419_s10 + $0xa0] sm:$0xff]  ;;  %v6293_v7 = vld [vmem:[%s23419_s10 + $0xa8] sm:$0xff] }
 0x54e   : > { %4142 = vmatmul.mubr.f32.gmra.mrb[122].mxu0 %v12577_v50  ;;  %12743 = vmatprep.mubr.msk.f32.mxu1 %vm3933_vm7, %v3720_v45  ;;  %v15886_v40 = vpop.permute.xlu1 %15885  ;;  %v15891_v59 = vpop.permute.xlu0 %15890  ;;  %v12592_v50 = vld [vmem:[%s23518_s7 + $0x358] sm:$0xff]  ;;  %v3735_v58 = vld [vmem:[%s23518_s7 + $0x270] sm:$0xff] }
 0x54f   : > { %15077 = vmatpush1.bf16.msra.mxu0 %v15076_v9  ;;  %12668 = vmatprep.mubr.msk.f32.mxu0 %vm3933_vm7, %v12580_v63  ;;  %v15888_v39 = vunpack.i.h.bf16 %v15886_v40  ;;  %v15887_v49 = vunpack.i.l.bf16 %v15886_v40  ;;  %v15893_v33 = vunpack.i.h.bf16 %v15891_v59  ;;  %v15892_v8 = vunpack.i.l.bf16 %v15891_v59  ;;  %v12598_v40 = vld [vmem:[%s23518_s7 + $0x388] sm:$0xff]  ;;  %v12599_v59 = vld [vmem:[%s23518_s7 + $0x390] sm:$0xff] }
 0x550   : > { %6326 = vperm.xlu1 %15798, %v6278_v16   ;;  %6331 = vperm.xlu0 %15797, %v6279_v38   ;;  %v3731_v38 = vld [vmem:[%s23518_s7 + $0x250] sm:$0xff] }
 0x551   : > { %15078 = vmatprep.subr.bf16.mxu0 %v23492_v13  ;;  %4719 = vmatmul.mubr.f32.gmra.mrb[64].mxu1 %v3719_v60  ;;  %v15088_v17 = vpack.c.bf16 %v15888_v39, %v15887_v49  ;;  %v15091_v51 = vpack.c.bf16 %v15893_v33, %v15892_v8  ;;  %v3734_v60 = vld [vmem:[%s23518_s7 + $0x268] sm:$0xff]  ;;  %v3740_v39 = vld [vmem:[%s23518_s7 + $0x298] sm:$0xff]  ;;  %v3743_v33 = vld [vmem:[%s23518_s7 + $0x2b0] sm:$0xff] }
 0x552   : > { %4147 = vmatmul.mubr.f32.gmra.mrb[124].mxu0 %v12579_v37  ;;  %12744 = vmatprep.mubr.msk.f32.mxu1 %vm3933_vm7, %v3722_v19  ;;  %v15896_v4 = vpop.permute.xlu1 %15895  ;;  %v15901_v23 = vpop.permute.xlu0 %15900  ;;  %v12594_v37 = vld [vmem:[%s23518_s7 + $0x368] sm:$0xff]  ;;  %v12600_v49 = vld [vmem:[%s23518_s7 + $0x398] sm:$0xff]  ;;  %v12603_v8 = vld [vmem:[%s23518_s7 + $0x3b0] sm:$0xff] }
 0x553   : > { %15080 = vmatpush1.bf16.msra.mxu0 %v15079_v2  ;;  %12669 = vmatprep.mubr.msk.f32.mxu0 %vm3933_vm7, %v12582_v61  ;;  %v15898_v1 = vunpack.i.h.bf16 %v15896_v4  ;;  %v15897_v54 = vunpack.i.l.bf16 %v15896_v4  ;;  %v15903_v63 = vunpack.i.h.bf16 %v15901_v23  ;;  %v15902_v9 = vunpack.i.l.bf16 %v15901_v23  ;;  %v3745_v4 = vld [vmem:[%s23518_s7 + $0x2c0] sm:$0xff]  ;;  %v12616_v23 = vld [vmem:[%s23518_s7 + $0x418] sm:$0xff] }
 0x554   : > { %6336 = vperm.xlu1 %15798, %v6280_v41   ;;  %6341 = vperm.xlu0 %15797, %v6281_v22   ;;  %v3733_v22 = vld [vmem:[%s23518_s7 + $0x260] sm:$0xff] }
 0x555   : > { %15081 = vmatprep.subr.bf16.mxu0 %v23492_v13  ;;  %4724 = vmatmul.mubr.f32.gmra.mrb[66].mxu1 %v3721_v44  ;;  %v15094_v45 = vpack.c.bf16 %v15898_v1, %v15897_v54  ;;  %v15097_v19 = vpack.c.bf16 %v15903_v63, %v15902_v9  ;;  %v3736_v44 = vld [vmem:[%s23518_s7 + $0x278] sm:$0xff]  ;;  %v12611_v54 = vld [vmem:[%s23518_s7 + $0x3f0] sm:$0xff]  ;;  %v12622_v63 = vld [vmem:[%s23518_s7 + $0x448] sm:$0xff] }
 0x556   : > { %4152 = vmatmul.mubr.f32.gmra.mrb[126].mxu0 %v12581_v32  ;;  %12745 = vmatprep.mubr.msk.f32.mxu1 %vm3933_vm7, %v3724_v12  ;;  %v15906_v16 = vpop.permute.xlu1 %15905  ;;  %v15911_v41 = vpop.permute.xlu0 %15910  ;;  %v12596_v32 = vld [vmem:[%s23518_s7 + $0x378] sm:$0xff]  ;;  %v12621_v9 = vld [vmem:[%s23518_s7 + $0x440] sm:$0xff] }
 0x557   : > { %15083 = vmatpush1.bf16.msra.mxu0 %v15082_v0  ;;  %12670 = vmatprep.mubr.msk.f32.mxu0 %vm3933_vm7, %v12584_v34  ;;  %v15908_v61 = vunpack.i.h.bf16 %v15906_v16  ;;  %v15907_v2 = vunpack.i.l.bf16 %v15906_v16  ;;  %v15913_v34 = vunpack.i.h.bf16 %v15911_v41  ;;  %v15912_v0 = vunpack.i.l.bf16 %v15911_v41  ;;  %v12612_v1 = vld [vmem:[%s23518_s7 + $0x3f8] sm:$0xff]  ;;  %v12626_v16 = vld [vmem:[%s23518_s7 + $0x468] sm:$0xff] }
 0x558   : > { %6346 = vperm.xlu1 %15798, %v6282_v47   ;;  %6351 = vperm.xlu0 %15797, %v6283_v10   ;;  %v12595_v47 = vld [vmem:[%s23518_s7 + $0x370] sm:$0xff]  ;;  %v3738_v10 = vld [vmem:[%s23518_s7 + $0x288] sm:$0xff] }
 0x559   : > { %15084 = vmatprep.subr.bf16.mxu0 %v23492_v13  ;;  %4729 = vmatmul.mubr.f32.gmra.mrb[68].mxu1 %v3723_v26  ;;  %v15100_v12 = vpack.c.bf16 %v15908_v61, %v15907_v2  ;;  %v15103_v26 = vpack.c.bf16 %v15913_v34, %v15912_v0  ;;  %v12627_v2 = vld [vmem:[%s23518_s7 + $0x470] sm:$0xff]  ;;  %v12634_v34 = vld [vmem:[%s23518_s7 + $0x4a8] sm:$0xff] }
 0x55a   : > { %4157 = vmatmul.mubr.f32.gmra.mrb[128].mxu0 %v12583_v21  ;;  %12746 = vmatprep.mubr.msk.f32.mxu1 %vm3933_vm7, %v3726_v24  ;;  %v15916_v20 = vpop.permute.xlu1 %15915 }
 0x55b   : > { %15086 = vmatpush1.bf16.msra.mxu0 %v15085_v35  ;;  %12671 = vmatprep.mubr.msk.f32.mxu0 %vm3933_vm7, %v12586_v52  ;;  %v15918_v21 = vunpack.i.h.bf16 %v15916_v20  ;;  %v15917_v24 = vunpack.i.l.bf16 %v15916_v20  ;;  %v3737_v52 = vld [vmem:[%s23518_s7 + $0x280] sm:$0xff] }
 0x55c   : > { %6356 = vperm.xlu1 %15798, %v6284_v11   ;;  %6361 = vperm.xlu0 %15797, %v6285_v5   ;;  %v12597_v35 = vld [vmem:[%s23518_s7 + $0x380] sm:$0xff]  ;;  %v3739_v5 = vld [vmem:[%s23518_s7 + $0x290] sm:$0xff] }
 0x55d   : > { %15087 = vmatprep.subr.bf16.mxu0 %v23492_v13  ;;  %4734 = vmatmul.mubr.f32.gmra.mrb[70].mxu1 %v3725_v46  ;;  %v15106_v11 = vpack.c.bf16 %v15918_v21, %v15917_v24  ;;  %v3742_v46 = vld [vmem:[%s23518_s7 + $0x2a8] sm:$0xff] }
 0x55e   : > { %4162 = vmatmul.mubr.f32.gmra.mrb[130].mxu0 %v12585_v14  ;;  %12747 = vmatprep.mubr.msk.f32.mxu1 %vm3933_vm7, %v3728_v28  ;;  %v12602_v14 = vld [vmem:[%s23518_s7 + $0x3a8] sm:$0xff]  ;;  %v12601_v28 = vld [vmem:[%s23518_s7 + $0x3a0] sm:$0xff] }
 0x55f   : > { %15089 = vmatpush1.bf16.msra.mxu0 %v15088_v17  ;;  %12672 = vmatprep.mubr.msk.f32.mxu0 %vm3933_vm7, %v12588_v29  ;;  %v3744_v29 = vld [vmem:[%s23518_s7 + $0x2b8] sm:$0xff]  ;;  %v12638_v21 = vld [vmem:[%s23518_s7 + $0x4c8] sm:$0xff] }
 0x560   : > { %6366 = vperm.xlu1 %15798, %v6286_v27   ;;  %6371 = vperm.xlu0 %15797, %v6287_v48   ;;  %v12604_v17 = vld [vmem:[%s23518_s7 + $0x3b8] sm:$0xff]  ;;  %v3746_v27 = vld [vmem:[%s23518_s7 + $0x2c8] sm:$0xff] }
 0x561   : > { %15090 = vmatprep.subr.bf16.mxu0 %v23492_v13  ;;  %4739 = vmatmul.mubr.f32.gmra.mrb[72].mxu1 %v3727_v43  ;;  %v12606_v48 = vld [vmem:[%s23518_s7 + $0x3c8] sm:$0xff]  ;;  %v12605_v43 = vld [vmem:[%s23518_s7 + $0x3c0] sm:$0xff] }
 0x562   : > { %4167 = vmatmul.mubr.f32.gmra.mrb[132].mxu0 %v12587_v31  ;;  %12748 = vmatprep.mubr.msk.f32.mxu1 %vm3933_vm7, %v3730_v55  ;;  %v12608_v31 = vld [vmem:[%s23518_s7 + $0x3d8] sm:$0xff]  ;;  %v12607_v55 = vld [vmem:[%s23518_s7 + $0x3d0] sm:$0xff] }
 0x563   : > { %15092 = vmatpush1.bf16.msra.mxu0 %v15091_v51  ;;  %12673 = vmatprep.mubr.msk.f32.mxu0 %vm3933_vm7, %v12590_v57  ;;  %v12610_v57 = vld [vmem:[%s23518_s7 + $0x3e8] sm:$0xff]  ;;  %v12609_v51 = vld [vmem:[%s23518_s7 + $0x3e0] sm:$0xff] }
 0x564   : > { %6376 = vperm.xlu1 %15798, %v6288_v30   ;;  %6381 = vperm.xlu0 %15797, %v6289_v25   ;;  %v12614_v30 = vld [vmem:[%s23518_s7 + $0x408] sm:$0xff]  ;;  %v12613_v25 = vld [vmem:[%s23518_s7 + $0x400] sm:$0xff] }
 0x565   : > { %15093 = vmatprep.subr.bf16.mxu0 %v23492_v13  ;;  %4744 = vmatmul.mubr.f32.gmra.mrb[74].mxu1 %v3729_v36  ;;  %v12615_v36 = vld [vmem:[%s23518_s7 + $0x410] sm:$0xff] }
 0x566   : > { %4172 = vmatmul.mubr.f32.gmra.mrb[134].mxu0 %v12589_v62  ;;  %12749 = vmatprep.mubr.msk.f32.mxu1 %vm3933_vm7, %v3732_v56  ;;  %v12618_v62 = vld [vmem:[%s23518_s7 + $0x428] sm:$0xff]  ;;  %v12617_v56 = vld [vmem:[%s23518_s7 + $0x420] sm:$0xff] }
 0x567   : > { %15095 = vmatpush1.bf16.msra.mxu0 %v15094_v45  ;;  %12674 = vmatprep.mubr.msk.f32.mxu0 %vm3933_vm7, %v12592_v50  ;;  %v12620_v50 = vld [vmem:[%s23518_s7 + $0x438] sm:$0xff]  ;;  %v12619_v45 = vld [vmem:[%s23518_s7 + $0x430] sm:$0xff] }
 0x568   : > { %6386 = vperm.xlu1 %15798, %v6290_v42   ;;  %6391 = vperm.xlu0 %15797, %v6291_v15   ;;  %v12624_v42 = vld [vmem:[%s23518_s7 + $0x458] sm:$0xff]  ;;  %v12623_v15 = vld [vmem:[%s23518_s7 + $0x450] sm:$0xff] }
 0x569   : > { %15096 = vmatprep.subr.bf16.mxu0 %v23492_v13  ;;  %4749 = vmatmul.mubr.f32.gmra.mrb[76].mxu1 %v3731_v38 }
 0x56a   : > { %4177 = vmatmul.mubr.f32.gmra.mrb[136].mxu0 %v12591_v6  ;;  %12750 = vmatprep.mubr.msk.f32.mxu1 %vm3933_vm7, %v3734_v60  ;;  %v12625_v60 = vld [vmem:[%s23518_s7 + $0x460] sm:$0xff] }
 0x56b   : > { %15098 = vmatpush1.bf16.msra.mxu0 %v15097_v19  ;;  %12675 = vmatprep.mubr.msk.f32.mxu0 %vm3933_vm7, %v12594_v37  ;;  %v12628_v37 = vld [vmem:[%s23518_s7 + $0x478] sm:$0xff] }
 0x56c   : > { %6396 = vperm.xlu1 %15798, %v6292_v3   ;;  %6401 = vperm.xlu0 %15797, %v6293_v7   ;;  %v12630_v3 = vld [vmem:[%s23518_s7 + $0x488] sm:$0xff] }
 0x56d   : > { %15099 = vmatprep.subr.bf16.mxu0 %v23492_v13  ;;  %4754 = vmatmul.mubr.f32.gmra.mrb[78].mxu1 %v3733_v22  ;;  %v12629_v22 = vld [vmem:[%s23518_s7 + $0x480] sm:$0xff] }
 0x56e   : > { %4182 = vmatmul.mubr.f32.gmra.mrb[138].mxu0 %v12593_v53  ;;  %12751 = vmatprep.mubr.msk.f32.mxu1 %vm3933_vm7, %v3736_v44  ;;  %v12632_v53 = vld [vmem:[%s23518_s7 + $0x498] sm:$0xff] }
 0x56f   : > { %15101 = vmatpush1.bf16.msra.mxu0 %v15100_v12  ;;  %12676 = vmatprep.mubr.msk.f32.mxu0 %vm3933_vm7, %v12596_v32  ;;  %v12631_v12 = vld [vmem:[%s23518_s7 + $0x490] sm:$0xff] }
 0x570   : > { %15102 = vmatprep.subr.bf16.mxu0 %v23492_v13 }
 0x571   : > { %4759 = vmatmul.mubr.f32.gmra.mrb[80].mxu1 %v3735_v58  ;;  %v12633_v58 = vld [vmem:[%s23518_s7 + $0x4a0] sm:$0xff] }
 0x572   : > { %4187 = vmatmul.mubr.f32.gmra.mrb[140].mxu0 %v12595_v47  ;;  %12752 = vmatprep.mubr.msk.f32.mxu1 %vm3933_vm7, %v3738_v10  ;;  %v12636_v47 = vld [vmem:[%s23518_s7 + $0x4b8] sm:$0xff] }
 0x573   : > { %15104 = vmatpush1.bf16.msra.mxu0 %v15103_v26  ;;  %12677 = vmatprep.mubr.msk.f32.mxu0 %vm3933_vm7, %v12598_v40  ;;  %v12635_v26 = vld [vmem:[%s23518_s7 + $0x4b0] sm:$0xff] }
 0x574   : > { %15105 = vmatprep.subr.bf16.mxu0 %v23492_v13 }
 0x575   : > { %4764 = vmatmul.mubr.f32.gmra.mrb[82].mxu1 %v3737_v52 }
 0x576   : > { %4192 = vmatmul.mubr.f32.gmra.mrb[142].mxu0 %v12597_v35  ;;  %12753 = vmatprep.mubr.msk.f32.mxu1 %vm3933_vm7, %v3740_v39  ;;  %v12637_v35 = vld [vmem:[%s23518_s7 + $0x4c0] sm:$0xff]  ;;  %v12640_v39 = vld [vmem:[%s23518_s7 + $0x4d8] sm:$0xff] }
 0x577   : > { %15108 = vmatpush1.bf16.msk.msra.mxu0 %vm18243_vm9, %v15106_v11  ;;  %12678 = vmatprep.mubr.msk.f32.mxu0 %vm3933_vm7, %v12600_v49 }
 0x578   : > { %15195 = vmatprep.subr.bf16.mxu0 %v23492_v13 }
 0x579   : > { %4769 = vmatmul.mubr.f32.gmra.mrb[84].mxu1 %v3739_v5  ;;  %v12639_v5 = vld [vmem:[%s23518_s7 + $0x4d0] sm:$0xff] }
 0x57a   : > { %4197 = vmatmul.mubr.f32.gmra.mrb[144].mxu0 %v12599_v59  ;;  %12754 = vmatprep.mubr.msk.f32.mxu1 %vm3933_vm7, %v3742_v46  ;;  %v12642_v59 = vld [vmem:[%s23518_s7 + $0x4e8] sm:$0xff] }
 0x57b   : > { %12679 = vmatprep.mubr.msk.f32.mxu0 %vm3933_vm7, %v12602_v14 }
 0x57d   : > { %4774 = vmatmul.mubr.f32.gmra.mrb[86].mxu1 %v3741_v18  ;;  %v12641_v18 = vld [vmem:[%s23518_s7 + $0x4e0] sm:$0xff] }
 0x57e   : > { %4202 = vmatmul.mubr.f32.gmra.mrb[146].mxu0 %v12601_v28  ;;  %12755 = vmatprep.mubr.msk.f32.mxu1 %vm3933_vm7, %v3744_v29  ;;  %v12644_v28 = vld [vmem:[%s23518_s7 + $0x4f8] sm:$0xff] }
 0x57f   : > { %12680 = vmatprep.mubr.msk.f32.mxu0 %vm3933_vm7, %v12604_v17 }
 0x581   : > { %4779 = vmatmul.mubr.f32.gmra.mrb[88].mxu1 %v3743_v33  ;;  %v12643_v33 = vld [vmem:[%s23518_s7 + $0x4f0] sm:$0xff] }
 0x582   : > { %4207 = vmatmul.mubr.f32.gmra.mrb[148].mxu0 %v12603_v8  ;;  %12756 = vmatprep.mubr.msk.f32.mxu1 %vm3933_vm7, %v3746_v27  ;;  %v12646_v8 = vld [vmem:[%s23518_s7 + $0x508] sm:$0xff] }
 0x583   : > { %12681 = vmatprep.mubr.msk.f32.mxu0 %vm3933_vm7, %v12606_v48 }
 0x585   : > { %4784 = vmatmul.mubr.f32.gmra.mrb[90].mxu1 %v3745_v4  ;;  %v12645_v4 = vld [vmem:[%s23518_s7 + $0x500] sm:$0xff] }
 0x586   : > { %4212 = vmatmul.mubr.f32.gmra.mrb[150].mxu0 %v12605_v43  ;;  %v12648_v43 = vld [vmem:[%s23518_s7 + $0x518] sm:$0xff] }
 0x587   : > { %12682 = vmatprep.mubr.msk.f32.mxu0 %vm3933_vm7, %v12608_v31 }
 0x58a   : > { %4217 = vmatmul.mubr.f32.gmra.mrb[152].mxu0 %v12607_v55 }
 0x58b   : > { %12683 = vmatprep.mubr.msk.f32.mxu0 %vm3933_vm7, %v12610_v57  ;;  %v12647_v57 = vld [vmem:[%s23518_s7 + $0x510] sm:$0xff] }
 0x58e   : > { %4222 = vmatmul.mubr.f32.gmra.mrb[154].mxu0 %v12609_v51  ;;  %v12650_v51 = vld [vmem:[%s23518_s7 + $0x528] sm:$0xff] }
 0x58f   : > { %12684 = vmatprep.mubr.msk.f32.mxu0 %vm3933_vm7, %v12612_v1 }
 0x592   : > { %4227 = vmatmul.mubr.f32.gmra.mrb[156].mxu0 %v12611_v54 }
 0x593   : > { %12685 = vmatprep.mubr.msk.f32.mxu0 %vm3933_vm7, %v12614_v30  ;;  %v12649_v30 = vld [vmem:[%s23518_s7 + $0x520] sm:$0xff] }
 0x596   : > { %4232 = vmatmul.mubr.f32.gmra.mrb[158].mxu0 %v12613_v25  ;;  %v12652_v25 = vld [vmem:[%s23518_s7 + $0x538] sm:$0xff] }
 0x597   : > { %12686 = vmatprep.mubr.msk.f32.mxu0 %vm3933_vm7, %v12616_v23 }
 0x59a   : > { %4237 = vmatmul.mubr.f32.gmra.mrb[160].mxu0 %v12615_v36 }
 0x59b   : > { %12687 = vmatprep.mubr.msk.f32.mxu0 %vm3933_vm7, %v12618_v62  ;;  %v12651_v62 = vld [vmem:[%s23518_s7 + $0x530] sm:$0xff] }
 0x59e   : > { %4242 = vmatmul.mubr.f32.gmra.mrb[162].mxu0 %v12617_v56  ;;  %v12654_v56 = vld [vmem:[%s23518_s7 + $0x548] sm:$0xff] }
 0x59f   : > { %12688 = vmatprep.mubr.msk.f32.mxu0 %vm3933_vm7, %v12620_v50 }
 0x5a2   : > { %4247 = vmatmul.mubr.f32.gmra.mrb[164].mxu0 %v12619_v45 }
 0x5a3   : > { %12689 = vmatprep.mubr.msk.f32.mxu0 %vm3933_vm7, %v12622_v63  ;;  %v12653_v63 = vld [vmem:[%s23518_s7 + $0x540] sm:$0xff] }
 0x5a6   : > { %4252 = vmatmul.mubr.f32.gmra.mrb[166].mxu0 %v12621_v9  ;;  %v12656_v9 = vld [vmem:[%s23518_s7 + $0x558] sm:$0xff] }
 0x5a7   : > { %12690 = vmatprep.mubr.msk.f32.mxu0 %vm3933_vm7, %v12624_v42 }
 0x5a8   : > { %v18986_v38 = vpop.f32.mrb[2].mxu1 }
 0x5a9   : > { %v4567_v6 = vpop.f32.mrb[3].mxu1 }
 0x5aa   : > { %4257 = vmatmul.mubr.f32.gmra.mrb[168].mxu0 %v12623_v15  ;;  %v12658_v6 = vld [vmem:[%s23518_s7 + $0x568] sm:$0xff] }
 0x5ab   : > { %12691 = vmatprep.mubr.msk.f32.mxu0 %vm3933_vm7, %v12626_v16  ;;  %v12655_v16 = vld [vmem:[%s23518_s7 + $0x550] sm:$0xff] }
 0x5ac   : > { %v18995_v19 = vpop.f32.mrb[4].mxu1 }
 0x5ad   : > { %v4572_v61 = vpop.f32.mrb[5].mxu1 }
 0x5ae   : > { %4262 = vmatmul.mubr.f32.gmra.mrb[170].mxu0 %v12625_v60  ;;  %v12657_v61 = vld [vmem:[%s23518_s7 + $0x560] sm:$0xff] }
 0x5af   : > { %12692 = vmatprep.mubr.msk.f32.mxu0 %vm3933_vm7, %v12628_v37 }
 0x5b0   : > { %v19004_v7 = vpop.f32.mrb[6].mxu1 }
 0x5b1   : > { %v4577_v41 = vpop.f32.mrb[7].mxu1 }
 0x5b2   : > { %4267 = vmatmul.mubr.f32.gmra.mrb[172].mxu0 %v12627_v2  ;;  %v12660_v2 = vld [vmem:[%s23518_s7 + $0x578] sm:$0xff] }
 0x5b3   : > { %12693 = vmatprep.mubr.msk.f32.mxu0 %vm3933_vm7, %v12630_v3 }
 0x5b4   : > { %v19013_v44 = vpop.f32.mrb[8].mxu1 }
 0x5b5   : > { %v4582_v32 = vpop.f32.mrb[9].mxu1 }
 0x5b6   : > { %4272 = vmatmul.mubr.f32.gmra.mrb[174].mxu0 %v12629_v22  ;;  %v12659_v22 = vld [vmem:[%s23518_s7 + $0x570] sm:$0xff] }
 0x5b7   : > { %12694 = vmatprep.mubr.msk.f32.mxu0 %vm3933_vm7, %v12632_v53  ;;  %v12662_v53 = vld [vmem:[%s23518_s7 + $0x588] sm:$0xff] }
 0x5b8   : > { %v19022_v0 = vpop.f32.mrb[10].mxu1 }
 0x5b9   : > { %v4587_v20 = vpop.f32.mrb[11].mxu1 }
 0x5ba   : > { %4277 = vmatmul.mubr.f32.gmra.mrb[176].mxu0 %v12631_v12  ;;  %v12664_v20 = vld [vmem:[%s23518_s7 + $0x598] sm:$0xff] }
 0x5bb   : > { %12695 = vmatprep.mubr.msk.f32.mxu0 %vm3933_vm7, %v12634_v34  ;;  %v12661_v34 = vld [vmem:[%s23518_s7 + $0x580] sm:$0xff] }
 0x5bc   : > { %v19031_v10 = vpop.f32.mrb[12].mxu1 }
 0x5bd   : > { %v4592_v40 = vpop.f32.mrb[13].mxu1 }
 0x5be   : > { %4282 = vmatmul.mubr.f32.gmra.mrb[178].mxu0 %v12633_v58  ;;  %v12663_v40 = vld [vmem:[%s23518_s7 + $0x590] sm:$0xff] }
 0x5bf   : > { %12696 = vmatprep.mubr.msk.f32.mxu0 %vm3933_vm7, %v12636_v47 }
 0x5c0   : > { %v19040_v24 = vpop.f32.mrb[14].mxu1 }
 0x5c1   : > { %v4597_v52 = vpop.f32.mrb[15].mxu1 }
 0x5c2   : > { %4287 = vmatmul.mubr.f32.gmra.mrb[180].mxu0 %v12635_v26  ;;  %v12758_v26 = vld [vmem:[%s23518_s7 + $0x5a8] sm:$0xff] }
 0x5c3   : > { %12697 = vmatprep.mubr.msk.f32.mxu0 %vm3933_vm7, %v12638_v21 }
 0x5c4   : > { %v19049_v49 = vpop.f32.mrb[16].mxu1 }
 0x5c5   : > { %v4602_v11 = vpop.f32.mrb[17].mxu1 }
 0x5c6   : > { %4292 = vmatmul.mubr.f32.gmra.mrb[182].mxu0 %v12637_v35  ;;  %v12757_v35 = vld [vmem:[%s23518_s7 + $0x5a0] sm:$0xff] }
 0x5c7   : > { %12698 = vmatprep.mubr.msk.f32.mxu0 %vm3933_vm7, %v12640_v39  ;;  %v12760_v39 = vld [vmem:[%s23518_s7 + $0x5b8] sm:$0xff] }
 0x5c8   : > { %v19058_v46 = vpop.f32.mrb[18].mxu1 }
 0x5c9   : > { %v4607_v14 = vpop.f32.mrb[19].mxu1 }
 0x5ca   : > { %4297 = vmatmul.mubr.f32.gmra.mrb[184].mxu0 %v12639_v5  ;;  %v12762_v14 = vld [vmem:[%s23518_s7 + $0x5c8] sm:$0xff] }
 0x5cb   : > { %12699 = vmatprep.mubr.msk.f32.mxu0 %vm3933_vm7, %v12642_v59  ;;  %v12759_v59 = vld [vmem:[%s23518_s7 + $0x5b0] sm:$0xff] }
 0x5cc   : > { %v19067_v29 = vpop.f32.mrb[20].mxu1 }
 0x5cd   : > { %v4612_v17 = vpop.f32.mrb[21].mxu1 }
 0x5ce   : > { %4302 = vmatmul.mubr.f32.gmra.mrb[186].mxu0 %v12641_v18  ;;  %v12761_v17 = vld [vmem:[%s23518_s7 + $0x5c0] sm:$0xff] }
 0x5cf   : > { %12700 = vmatprep.mubr.msk.f32.mxu0 %vm3933_vm7, %v12644_v28 }
 0x5d0   : > { %v19076_v27 = vpop.f32.mrb[22].mxu1 }
 0x5d1   : > { %v4617_v48 = vpop.f32.mrb[23].mxu1 }
 0x5d2   : > { %4307 = vmatmul.mubr.f32.gmra.mrb[188].mxu0 %v12643_v33  ;;  %v12764_v33 = vld [vmem:[%s23518_s7 + $0x5d8] sm:$0xff] }
 0x5d3   : > { %12701 = vmatprep.mubr.msk.f32.mxu0 %vm3933_vm7, %v12646_v8 }
 0x5d4   : > { %v19085_v31 = vpop.f32.mrb[24].mxu1 }
 0x5d5   : > { %v4622_v55 = vpop.f32.mrb[25].mxu1 }
 0x5d6   : > { %4312 = vmatmul.mubr.f32.gmra.mrb[190].mxu0 %v12645_v4  ;;  %v12763_v4 = vld [vmem:[%s23518_s7 + $0x5d0] sm:$0xff] }
 0x5d7   : > { %12702 = vmatprep.mubr.msk.f32.mxu0 %vm3933_vm7, %v12648_v43  ;;  %v12766_v43 = vld [vmem:[%s23518_s7 + $0x5e8] sm:$0xff] }
 0x5d8   : > { %v19094_v1 = vpop.f32.mrb[26].mxu1 }
 0x5d9   : > { %v4627_v54 = vpop.f32.mrb[27].mxu1 }
 0x5da   : > { %4317 = vmatmul.mubr.f32.gmra.mrb[192].mxu0 %v12647_v57  ;;  %v12768_v54 = vld [vmem:[%s23518_s7 + $0x5f8] sm:$0xff] }
 0x5db   : > { %12703 = vmatprep.mubr.msk.f32.mxu0 %vm3933_vm7, %v12650_v51  ;;  %v12765_v51 = vld [vmem:[%s23518_s7 + $0x5e0] sm:$0xff] }
 0x5dc   : > { %v19103_v23 = vpop.f32.mrb[28].mxu1 }
 0x5dd   : > { %v4632_v36 = vpop.f32.mrb[29].mxu1 }
 0x5de   : > { %4322 = vmatmul.mubr.f32.gmra.mrb[194].mxu0 %v12649_v30  ;;  %v12767_v36 = vld [vmem:[%s23518_s7 + $0x5f0] sm:$0xff] }
 0x5df   : > { %12704 = vmatprep.mubr.msk.f32.mxu0 %vm3933_vm7, %v12652_v25 }
 0x5e0   : > { %v19112_v50 = vpop.f32.mrb[30].mxu1 }
 0x5e1   : > { %v4637_v45 = vpop.f32.mrb[31].mxu1 }
 0x5e2   : > { %4327 = vmatmul.mubr.f32.gmra.mrb[196].mxu0 %v12651_v62  ;;  %v12770_v62 = vld [vmem:[%s23518_s7 + $0x608] sm:$0xff] }
 0x5e3   : > { %12705 = vmatprep.mubr.msk.f32.mxu0 %vm3933_vm7, %v12654_v56 }
 0x5e4   : > { %v19121_v42 = vpop.f32.mrb[32].mxu1 }
 0x5e5   : > { %v4642_v15 = vpop.f32.mrb[33].mxu1 }
 0x5e6   : > { %4332 = vmatmul.mubr.f32.gmra.mrb[198].mxu0 %v12653_v63  ;;  %v12769_v63 = vld [vmem:[%s23518_s7 + $0x600] sm:$0xff] }
 0x5e7   : > { %12706 = vmatprep.mubr.msk.f32.mxu0 %vm3933_vm7, %v12656_v9  ;;  %v12772_v9 = vld [vmem:[%s23518_s7 + $0x618] sm:$0xff] }
 0x5e8   : > { %v19130_v60 = vpop.f32.mrb[34].mxu1 }
 0x5e9   : > { %v4647_v37 = vpop.f32.mrb[35].mxu1 }
 0x5ea   : > { %4337 = vmatmul.mubr.f32.gmra.mrb[200].mxu0 %v12655_v16  ;;  %v12774_v37 = vld [vmem:[%s23518_s7 + $0x628] sm:$0xff] }
 0x5eb   : > { %12707 = vmatprep.mubr.msk.f32.mxu0 %vm3933_vm7, %v12658_v6  ;;  %v12771_v6 = vld [vmem:[%s23518_s7 + $0x610] sm:$0xff] }
 0x5ec   : > { %v19139_v3 = vpop.f32.mrb[36].mxu1 }
 0x5ed   : > { %v4652_v41 = vpop.f32.mrb[37].mxu1 }
 0x5ee   : > { %4342 = vmatmul.mubr.f32.gmra.mrb[202].mxu0 %v12657_v61  ;;  %v12773_v41 = vld [vmem:[%s23518_s7 + $0x620] sm:$0xff] }
 0x5ef   : > { %12708 = vmatprep.mubr.msk.f32.mxu0 %vm3933_vm7, %v12660_v2 }
 0x5f0   : > { %v19148_v32 = vpop.f32.mrb[38].mxu1 }
 0x5f1   : > { %v4657_v12 = vpop.f32.mrb[39].mxu1 }
 0x5f2   : > { %4347 = vmatmul.mubr.f32.gmra.mrb[204].mxu0 %v12659_v22  ;;  %v12776_v22 = vld [vmem:[%s23518_s7 + $0x638] sm:$0xff] }
 0x5f3   : > { %12709 = vmatprep.mubr.msk.f32.mxu0 %vm3933_vm7, %v12662_v53 }
 0x5f4   : > { %v19157_v58 = vpop.f32.mrb[40].mxu1 }
 0x5f5   : > { %v4662_v47 = vpop.f32.mrb[41].mxu1 }
 0x5f6   : > { %4352 = vmatmul.mubr.f32.gmra.mrb[206].mxu0 %v12661_v34 }
 0x5f7   : > { %12710 = vmatprep.mubr.msk.f32.mxu0 %vm3933_vm7, %v12664_v20 }
 0x5f8   : > { %v19166_v21 = vpop.f32.mrb[42].mxu1 }
 0x5f9   : > { %v4667_v52 = vpop.f32.mrb[43].mxu1 }
 0x5fa   : > { %4357 = vmatmul.mubr.f32.gmra.mrb[208].mxu0 %v12663_v40  ;;  %v12775_v40 = vld [vmem:[%s23518_s7 + $0x630] sm:$0xff] }
 0x5fb   : > { %12848 = vmatprep.mubr.msk.f32.mxu0 %vm3933_vm7, %v12758_v26  ;;  %v12778_v26 = vld [vmem:[%s23518_s7 + $0x648] sm:$0xff] }
 0x5fc   : > { %v19175_v11 = vpop.f32.mrb[44].mxu1 }
 0x5fd   : > { %v4672_v5 = vpop.f32.mrb[45].mxu1 }
 0x5fe   : > { %5153 = vmatmul.mubr.f32.vlgmr.msra.gmra.mrb[210].mxu0 %v12757_v35 }
 0x5ff   : > { %12849 = vmatprep.mubr.msk.f32.mxu0 %vm3933_vm7, %v12760_v39 }
 0x600   : > { %v19184_v18 = vpop.f32.mrb[46].mxu1 }
 0x601   : > { %v4677_v28 = vpop.f32.mrb[47].mxu1 }
 0x602   : > { %5158 = vmatmul.mubr.f32.gmra.mrb[212].mxu0 %v12759_v59 }
 0x603   : > { %12850 = vmatprep.mubr.msk.f32.mxu0 %vm3933_vm7, %v12762_v14  ;;  %v12780_v14 = vld [vmem:[%s23518_s7 + $0x658] sm:$0xff] }
 0x604   : > { %v19193_v8 = vpop.f32.mrb[48].mxu1 }
 0x605   : > { %v4682_v48 = vpop.f32.mrb[49].mxu1 }
 0x606   : > { %5163 = vmatmul.mubr.f32.gmra.mrb[214].mxu0 %v12761_v17 }
 0x607   : > { %12851 = vmatprep.mubr.msk.f32.mxu0 %vm3933_vm7, %v12764_v33 }
 0x608   : > { %v19202_v55 = vpop.f32.mrb[50].mxu1 }
 0x609   : > { %v4687_v57 = vpop.f32.mrb[51].mxu1 }
 0x60a   : > { %5168 = vmatmul.mubr.f32.gmra.mrb[216].mxu0 %v12763_v4 }
 0x60b   : > { %12852 = vmatprep.mubr.msk.f32.mxu0 %vm3933_vm7, %v12766_v43  ;;  %v12782_v43 = vld [vmem:[%s23518_s7 + $0x668] sm:$0xff] }
 0x60c   : > { %v19211_v30 = vpop.f32.mrb[52].mxu1 }
 0x60d   : > { %v4692_v25 = vpop.f32.mrb[53].mxu1 }
 0x60e   : > { %5173 = vmatmul.mubr.f32.gmra.mrb[218].mxu0 %v12765_v51 }
 0x60f   : > { %12853 = vmatprep.mubr.msk.f32.mxu0 %vm3933_vm7, %v12768_v54 }
 0x610   : > { %v19220_v56 = vpop.f32.mrb[54].mxu1 }
 0x611   : > { %v4697_v45 = vpop.f32.mrb[55].mxu1 }
 0x612   : > { %5178 = vmatmul.mubr.f32.gmra.mrb[220].mxu0 %v12767_v36 }
 0x613   : > { %12854 = vmatprep.mubr.msk.f32.mxu0 %vm3933_vm7, %v12770_v62  ;;  %v12784_v62 = vld [vmem:[%s23518_s7 + $0x678] sm:$0xff] }
 0x614   : > { %v19229_v15 = vpop.f32.mrb[56].mxu1 }
 0x615   : > { %v4702_v16 = vpop.f32.mrb[57].mxu1 }
 0x616   : > { %5183 = vmatmul.mubr.f32.gmra.mrb[222].mxu0 %v12769_v63 }
 0x617   : > { %12855 = vmatprep.mubr.msk.f32.mxu0 %vm3933_vm7, %v12772_v9 }
 0x618   : > { %v19238_v61 = vpop.f32.mrb[58].mxu1 }
 0x619   : > { %v4707_v2 = vpop.f32.mrb[59].mxu1 }
 0x61a   : > { %5188 = vmatmul.mubr.f32.gmra.mrb[224].mxu0 %v12771_v6 }
 0x61b   : > { %12856 = vmatprep.mubr.msk.f32.mxu0 %vm3933_vm7, %v12774_v37  ;;  %v12786_v37 = vld [vmem:[%s23518_s7 + $0x688] sm:$0xff] }
 0x61c   : > { %v19247_v53 = vpop.f32.mrb[60].mxu1 }
 0x61d   : > { %v4138_v12 = vpop.f32.mrb[120].mxu0  ;;  %v4712_v34 = vpop.f32.mrb[61].mxu1 }
 0x61e   : > { %5193 = vmatmul.mubr.f32.gmra.mrb[226].mxu0 %v12773_v41  ;;  %v4140_v20 = vpop.f32.mrb[121].mxu0  ;;  %v19250_v47 = vadd.f32 %v18986_v38, %v4138_v12  ;;  %v12777_v38 = vld [vmem:[%s23518_s7 + $0x640] sm:$0xff] }
 0x61f   : > { %12857 = vmatprep.mubr.msk.f32.mxu0 %vm3933_vm7, %v12776_v22  ;;  %v12788_v20 = vld [vmem:[%s23518_s7 + $0x698] sm:$0xff] }
 0x620   : > { %v19259_v52 = vpop.f32.mrb[62].mxu1 }
 0x621   : > { %v4143_v35 = vpop.f32.mrb[122].mxu0  ;;  %v4717_v39 = vpop.f32.mrb[63].mxu1 }
 0x622   : > { %5198 = vmatmul.mubr.f32.gmra.mrb[228].mxu0 %v12775_v40  ;;  %v4145_v5 = vpop.f32.mrb[123].mxu0  ;;  %v19262_v59 = vadd.f32 %v18995_v19, %v4143_v35  ;;  %v12779_v19 = vld [vmem:[%s23518_s7 + $0x650] sm:$0xff] }
 0x623   : > { %12858 = vmatprep.mubr.msk.f32.mxu0 %vm3933_vm7, %v12778_v26 }
 0x624   : > { %v19271_v28 = vpop.f32.mrb[64].mxu1 }
 0x625   : > { %v4148_v17 = vpop.f32.mrb[124].mxu0  ;;  %v4722_v33 = vpop.f32.mrb[65].mxu1 }
 0x626   : > { %5203 = vmatmul.mubr.f32.gmra.mrb[230].mxu0 %v12777_v38  ;;  %v4150_v48 = vpop.f32.mrb[125].mxu0  ;;  %v19274_v4 = vadd.f32 %v19004_v7, %v4148_v17  ;;  %v12781_v7 = vld [vmem:[%s23518_s7 + $0x660] sm:$0xff]  ;;  %v12790_v38 = vld [vmem:[%s23518_s7 + $0x6a8] sm:$0xff] }
 0x627   : > { %12859 = vmatprep.mubr.msk.f32.mxu0 %vm3933_vm7, %v12780_v14 }
 0x628   : > { %v19283_v57 = vpop.f32.mrb[66].mxu1 }
 0x629   : > { %v4153_v51 = vpop.f32.mrb[126].mxu0  ;;  %v4727_v54 = vpop.f32.mrb[67].mxu1 }
 0x62a   : > { %5208 = vmatmul.mubr.f32.gmra.mrb[232].mxu0 %v12779_v19  ;;  %v4155_v25 = vpop.f32.mrb[127].mxu0  ;;  %v19286_v36 = vadd.f32 %v19013_v44, %v4153_v51  ;;  %v12783_v44 = vld [vmem:[%s23518_s7 + $0x670] sm:$0xff] }
 0x62b   : > { %12860 = vmatprep.mubr.msk.f32.mxu0 %vm3933_vm7, %v12782_v43  ;;  %v12792_v43 = vld [vmem:[%s23518_s7 + $0x6b8] sm:$0xff] }
 0x62c   : > { %v19295_v45 = vpop.f32.mrb[68].mxu1 }
 0x62d   : > { %v4158_v63 = vpop.f32.mrb[128].mxu0  ;;  %v4732_v9 = vpop.f32.mrb[69].mxu1 }
 0x62e   : > { %5213 = vmatmul.mubr.f32.gmra.mrb[234].mxu0 %v12781_v7  ;;  %v4160_v16 = vpop.f32.mrb[129].mxu0  ;;  %v19298_v6 = vadd.f32 %v19022_v0, %v4158_v63  ;;  %v12785_v0 = vld [vmem:[%s23518_s7 + $0x680] sm:$0xff]  ;;  %v12794_v63 = vld [vmem:[%s23518_s7 + $0x6c8] sm:$0xff] }
 0x62f   : > { %12861 = vmatprep.mubr.msk.f32.mxu0 %vm3933_vm7, %v12784_v62 }
 0x630   : > { %v19307_v2 = vpop.f32.mrb[70].mxu1 }
 0x631   : > { %v4163_v41 = vpop.f32.mrb[130].mxu0  ;;  %v4737_v22 = vpop.f32.mrb[71].mxu1 }
 0x632   : > { %5218 = vmatmul.mubr.f32.gmra.mrb[236].mxu0 %v12783_v44  ;;  %v4165_v12 = vpop.f32.mrb[131].mxu0  ;;  %v19310_v34 = vadd.f32 %v19031_v10, %v4163_v41  ;;  %v12787_v10 = vld [vmem:[%s23518_s7 + $0x690] sm:$0xff]  ;;  %v12796_v22 = vld [vmem:[%s23518_s7 + $0x6d8] sm:$0xff] }
 0x633   : > { %12862 = vmatprep.mubr.msk.f32.mxu0 %vm3933_vm7, %v12786_v37 }
 0x634   : > { %v19319_v40 = vpop.f32.mrb[72].mxu1 }
 0x635   : > { %v4168_v26 = vpop.f32.mrb[132].mxu0  ;;  %v4742_v35 = vpop.f32.mrb[73].mxu1 }
 0x636   : > { %5223 = vmatmul.mubr.f32.gmra.mrb[238].mxu0 %v12785_v0  ;;  %v4170_v39 = vpop.f32.mrb[133].mxu0  ;;  %v19322_v5 = vadd.f32 %v19040_v24, %v4168_v26  ;;  %v12789_v24 = vld [vmem:[%s23518_s7 + $0x6a0] sm:$0xff] }
 0x637   : > { %12863 = vmatprep.mubr.msk.f32.mxu0 %vm3933_vm7, %v12788_v20  ;;  %v12798_v39 = vld [vmem:[%s23518_s7 + $0x6e8] sm:$0xff] }
 0x638   : > { %v19331_v14 = vpop.f32.mrb[74].mxu1 }
 0x639   : > { %v4173_v17 = vpop.f32.mrb[134].mxu0  ;;  %v4747_v33 = vpop.f32.mrb[75].mxu1 }
 0x63a   : > { %5228 = vmatmul.mubr.f32.gmra.mrb[240].mxu0 %v12787_v10  ;;  %v4175_v48 = vpop.f32.mrb[135].mxu0  ;;  %v19334_v19 = vadd.f32 %v19049_v49, %v4173_v17  ;;  %v12791_v49 = vld [vmem:[%s23518_s7 + $0x6b0] sm:$0xff] }
 0x63b   : > { %12864 = vmatprep.mubr.msk.f32.mxu0 %vm3933_vm7, %v12790_v38 }
 0x63c   : > { %v19343_v51 = vpop.f32.mrb[76].mxu1 }
 0x63d   : > { %v4178_v54 = vpop.f32.mrb[136].mxu0  ;;  %v4752_v25 = vpop.f32.mrb[77].mxu1 }
 0x63e   : > { %5233 = vmatmul.mubr.f32.gmra.mrb[242].mxu0 %v12789_v24  ;;  %v4180_v7 = vpop.f32.mrb[137].mxu0  ;;  %v19346_v62 = vadd.f32 %v19058_v46, %v4178_v54  ;;  %v12793_v46 = vld [vmem:[%s23518_s7 + $0x6c0] sm:$0xff]  ;;  %v12800_v24 = vld [vmem:[%s23518_s7 + $0x6f8] sm:$0xff] }
 0x63f   : > { %12865 = vmatprep.mubr.msk.f32.mxu0 %vm3933_vm7, %v12792_v43 }
 0x640   : > { %v19355_v9 = vpop.f32.mrb[78].mxu1 }
 0x641   : > { %v4183_v16 = vpop.f32.mrb[138].mxu0  ;;  %v4757_v44 = vpop.f32.mrb[79].mxu1 }
 0x642   : > { %5238 = vmatmul.mubr.f32.gmra.mrb[244].mxu0 %v12791_v49  ;;  %v4185_v37 = vpop.f32.mrb[139].mxu0  ;;  %v19358_v41 = vadd.f32 %v19067_v29, %v4183_v16  ;;  %v12795_v29 = vld [vmem:[%s23518_s7 + $0x6d0] sm:$0xff] }
 0x643   : > { %12866 = vmatprep.mubr.msk.f32.mxu0 %vm3933_vm7, %v12794_v63  ;;  %v12802_v63 = vld [vmem:[%s23518_s7 + $0x708] sm:$0xff] }
 0x644   : > { %v19367_v12 = vpop.f32.mrb[80].mxu1 }
 0x645   : > { %v4188_v0 = vpop.f32.mrb[140].mxu0  ;;  %v4762_v20 = vpop.f32.mrb[81].mxu1 }
 0x646   : > { %5243 = vmatmul.mubr.f32.gmra.mrb[246].mxu0 %v12793_v46  ;;  %v4190_v26 = vpop.f32.mrb[141].mxu0  ;;  %v19370_v35 = vadd.f32 %v19076_v27, %v4188_v0  ;;  %v12797_v27 = vld [vmem:[%s23518_s7 + $0x6e0] sm:$0xff]  ;;  %v12804_v0 = vld [vmem:[%s23518_s7 + $0x718] sm:$0xff] }
 0x647   : > { %12867 = vmatprep.mubr.msk.f32.mxu0 %vm3933_vm7, %v12796_v22 }
 0x648   : > { %v19379_v10 = vpop.f32.mrb[82].mxu1 }
 0x649   : > { %v4193_v38 = vpop.f32.mrb[142].mxu0  ;;  %v4767_v17 = vpop.f32.mrb[83].mxu1 }
 0x64a   : > { %5248 = vmatmul.mubr.f32.gmra.mrb[248].mxu0 %v12795_v29  ;;  %v4195_v33 = vpop.f32.mrb[143].mxu0  ;;  %v19382_v48 = vadd.f32 %v19085_v31, %v4193_v38  ;;  %v12799_v31 = vld [vmem:[%s23518_s7 + $0x6f0] sm:$0xff]  ;;  %v12806_v17 = vld [vmem:[%s23518_s7 + $0x728] sm:$0xff] }
 0x64b   : > { %12868 = vmatprep.mubr.msk.f32.mxu0 %vm3933_vm7, %v12798_v39 }
 0x64c   : > { %v19391_v43 = vpop.f32.mrb[84].mxu1 }
 0x64d   : > { %v4198_v54 = vpop.f32.mrb[144].mxu0  ;;  %v4772_v25 = vpop.f32.mrb[85].mxu1 }
 0x64e   : > { %5253 = vmatmul.mubr.f32.gmra.mrb[250].mxu0 %v12797_v27  ;;  %v4200_v7 = vpop.f32.mrb[145].mxu0  ;;  %v19394_v49 = vadd.f32 %v19094_v1, %v4198_v54  ;;  %v12801_v1 = vld [vmem:[%s23518_s7 + $0x700] sm:$0xff] }
 0x64f   : > { %12869 = vmatprep.mubr.msk.f32.mxu0 %vm3933_vm7, %v12800_v24  ;;  %v12808_v7 = vld [vmem:[%s23518_s7 + $0x738] sm:$0xff] }
 0x650   : > { %v19403_v16 = vpop.f32.mrb[86].mxu1 }
 0x651   : > { %v4203_v44 = vpop.f32.mrb[146].mxu0  ;;  %v4777_v37 = vpop.f32.mrb[87].mxu1 }
 0x652   : > { %5258 = vmatmul.mubr.f32.gmra.mrb[252].mxu0 %v12799_v31  ;;  %v4205_v46 = vpop.f32.mrb[147].mxu0  ;;  %v19406_v22 = vadd.f32 %v19103_v23, %v4203_v44  ;;  %v12803_v23 = vld [vmem:[%s23518_s7 + $0x710] sm:$0xff]  ;;  %v12810_v37 = vld [vmem:[%s23518_s7 + $0x748] sm:$0xff] }
 0x653   : > { %12870 = vmatprep.mubr.msk.f32.mxu0 %vm3933_vm7, %v12802_v63 }
 0x654   : > { %v19415_v20 = vpop.f32.mrb[88].mxu1 }
 0x655   : > { %v4208_v26 = vpop.f32.mrb[148].mxu0  ;;  %v4782_v29 = vpop.f32.mrb[89].mxu1 }
 0x656   : > { %5263 = vmatmul.mubr.f32.gmra.mrb[254].mxu0 %v12801_v1  ;;  %v4210_v39 = vpop.f32.mrb[149].mxu0  ;;  %v19418_v38 = vadd.f32 %v19112_v50, %v4208_v26  ;;  %v12805_v50 = vld [vmem:[%s23518_s7 + $0x720] sm:$0xff]  ;;  %v12812_v26 = vld [vmem:[%s23518_s7 + $0x758] sm:$0xff] }
 0x657   : > { %12871 = vmatprep.mubr.msk.f32.mxu0 %vm3933_vm7, %v12804_v0 }
 0x658   : > { %v19427_v33 = vpop.f32.mrb[90].mxu1 }
 0x659   : > { %v4213_v27 = vpop.f32.mrb[150].mxu0  ;;  %v4787_v24 = vpop.f32.mrb[91].mxu1 }
 0x65a   : > { %5268 = vmatmul.mubr.f32.gmra.mrb[0].mxu0 %v12803_v23  ;;  %v4215_v54 = vpop.f32.mrb[151].mxu0  ;;  %v19430_v25 = vadd.f32 %v19121_v42, %v4213_v27  ;;  %v12807_v42 = vld [vmem:[%s23518_s7 + $0x730] sm:$0xff] }
 0x65b   : > { %12872 = vmatprep.mubr.msk.f32.mxu0 %vm3933_vm7, %v12806_v17  ;;  %v12814_v17 = vld [vmem:[%s23518_s7 + $0x768] sm:$0xff] }
 0x65d   : > { %v4218_v31 = vpop.f32.mrb[152].mxu0 }
 0x65e   : > { %5273 = vmatmul.mubr.f32.gmra.mrb[2].mxu0 %v12805_v50  ;;  %v4220_v63 = vpop.f32.mrb[153].mxu0  ;;  %v19440_v44 = vadd.f32 %v19130_v60, %v4218_v31  ;;  %v12809_v60 = vld [vmem:[%s23518_s7 + $0x740] sm:$0xff]  ;;  %v12816_v50 = vld [vmem:[%s23518_s7 + $0x778] sm:$0xff] }
 0x65f   : > { %12873 = vmatprep.mubr.msk.f32.mxu0 %vm3933_vm7, %v12808_v7 }
 0x661   : > { %v4223_v46 = vpop.f32.mrb[154].mxu0 }
 0x662   : > { %5278 = vmatmul.mubr.f32.gmra.mrb[4].mxu0 %v12807_v42  ;;  %v4225_v1 = vpop.f32.mrb[155].mxu0  ;;  %v19450_v0 = vadd.f32 %v19139_v3, %v4223_v46  ;;  %v12811_v3 = vld [vmem:[%s23518_s7 + $0x750] sm:$0xff]  ;;  %v12818_v42 = vld [vmem:[%s23518_s7 + $0x788] sm:$0xff] }
 0x663   : > { %12874 = vmatprep.mubr.msk.f32.mxu0 %vm3933_vm7, %v12810_v37 }
 0x665   : > { %v4228_v29 = vpop.f32.mrb[156].mxu0 }
 0x666   : > { %5283 = vmatmul.mubr.f32.gmra.mrb[6].mxu0 %v12809_v60  ;;  %v4230_v39 = vpop.f32.mrb[157].mxu0  ;;  %v19460_v23 = vadd.f32 %v19148_v32, %v4228_v29  ;;  %v12813_v32 = vld [vmem:[%s23518_s7 + $0x760] sm:$0xff]  ;;  %v12820_v60 = vld [vmem:[%s23518_s7 + $0x798] sm:$0xff] }
 0x667   : > { %12875 = vmatprep.mubr.msk.f32.mxu0 %vm3933_vm7, %v12812_v26 }
 0x669   : > { %v4233_v27 = vpop.f32.mrb[158].mxu0 }
 0x66a   : > { %5288 = vmatmul.mubr.f32.gmra.mrb[8].mxu0 %v12811_v3  ;;  %v4235_v24 = vpop.f32.mrb[159].mxu0  ;;  %v19470_v54 = vadd.f32 %v19157_v58, %v4233_v27  ;;  %v12815_v58 = vld [vmem:[%s23518_s7 + $0x770] sm:$0xff]  ;;  %v12822_v3 = vld [vmem:[%s23518_s7 + $0x7a8] sm:$0xff] }
 0x66b   : > { %12876 = vmatprep.mubr.msk.f32.mxu0 %vm3933_vm7, %v12814_v17 }
 0x66d   : > { %v4238_v7 = vpop.f32.mrb[160].mxu0 }
 0x66e   : > { %5293 = vmatmul.mubr.f32.gmra.mrb[10].mxu0 %v12813_v32  ;;  %v4240_v31 = vpop.f32.mrb[161].mxu0  ;;  %v19480_v63 = vadd.f32 %v19166_v21, %v4238_v7  ;;  %v12817_v21 = vld [vmem:[%s23518_s7 + $0x780] sm:$0xff]  ;;  %v12824_v32 = vld [vmem:[%s23518_s7 + $0x7b8] sm:$0xff] }
 0x66f   : > { %12877 = vmatprep.mubr.msk.f32.mxu0 %vm3933_vm7, %v12816_v50 }
 0x671   : > { %v4243_v37 = vpop.f32.mrb[162].mxu0 }
 0x672   : > { %5298 = vmatmul.mubr.f32.gmra.mrb[12].mxu0 %v12815_v58  ;;  %v4245_v46 = vpop.f32.mrb[163].mxu0  ;;  %v19490_v1 = vadd.f32 %v19175_v11, %v4243_v37  ;;  %v12819_v11 = vld [vmem:[%s23518_s7 + $0x790] sm:$0xff]  ;;  %v12826_v58 = vld [vmem:[%s23518_s7 + $0x7c8] sm:$0xff] }
 0x673   : > { %12878 = vmatprep.mubr.msk.f32.mxu0 %vm3933_vm7, %v12818_v42 }
 0x675   : > { %v4248_v26 = vpop.f32.mrb[164].mxu0 }
 0x676   : > { %5303 = vmatmul.mubr.f32.gmra.mrb[14].mxu0 %v12817_v21  ;;  %v4250_v29 = vpop.f32.mrb[165].mxu0  ;;  %v19500_v39 = vadd.f32 %v19184_v18, %v4248_v26  ;;  %v12821_v18 = vld [vmem:[%s23518_s7 + $0x7a0] sm:$0xff]  ;;  %v12828_v21 = vld [vmem:[%s23518_s7 + $0x7d8] sm:$0xff] }
 0x677   : > { %12879 = vmatprep.mubr.msk.f32.mxu0 %vm3933_vm7, %v12820_v60 }
 0x679   : > { %v4253_v17 = vpop.f32.mrb[166].mxu0 }
 0x67a   : > { %5308 = vmatmul.mubr.f32.gmra.mrb[16].mxu0 %v12819_v11  ;;  %v4255_v27 = vpop.f32.mrb[167].mxu0  ;;  %v19510_v24 = vadd.f32 %v19193_v8, %v4253_v17  ;;  %v12823_v8 = vld [vmem:[%s23518_s7 + $0x7b0] sm:$0xff]  ;;  %v12830_v11 = vld [vmem:[%s23518_s7 + $0x7e8] sm:$0xff] }
 0x67b   : > { %12880 = vmatprep.mubr.msk.f32.mxu0 %vm3933_vm7, %v12822_v3 }
 0x67d   : > { %v4258_v50 = vpop.f32.mrb[168].mxu0 }
 0x67e   : > { %5313 = vmatmul.mubr.f32.gmra.mrb[18].mxu0 %v12821_v18  ;;  %v4260_v7 = vpop.f32.mrb[169].mxu0  ;;  %v19520_v31 = vadd.f32 %v19202_v55, %v4258_v50  ;;  %v12825_v55 = vld [vmem:[%s23518_s7 + $0x7c0] sm:$0xff]  ;;  %v12832_v18 = vld [vmem:[%s23518_s7 + $0x7f8] sm:$0xff] }
 0x67f   : > { %12881 = vmatprep.mubr.msk.f32.mxu0 %vm3933_vm7, %v12824_v32 }
 0x681   : > { %v4263_v42 = vpop.f32.mrb[170].mxu0 }
 0x682   : > { %5318 = vmatmul.mubr.f32.gmra.mrb[20].mxu0 %v12823_v8  ;;  %v4265_v37 = vpop.f32.mrb[171].mxu0  ;;  %v19530_v46 = vadd.f32 %v19211_v30, %v4263_v42  ;;  %v12827_v30 = vld [vmem:[%s23518_s7 + $0x7d0] sm:$0xff]  ;;  %v12834_v8 = vld [vmem:[%s23518_s7 + $0x808] sm:$0xff] }
 0x683   : > { %12882 = vmatprep.mubr.msk.f32.mxu0 %vm3933_vm7, %v12826_v58 }
 0x685   : > { %v4268_v60 = vpop.f32.mrb[172].mxu0 }
 0x686   : > { %5323 = vmatmul.mubr.f32.gmra.mrb[22].mxu0 %v12825_v55  ;;  %v4270_v26 = vpop.f32.mrb[173].mxu0  ;;  %v19540_v29 = vadd.f32 %v19220_v56, %v4268_v60  ;;  %v12829_v56 = vld [vmem:[%s23518_s7 + $0x7e0] sm:$0xff]  ;;  %v12836_v55 = vld [vmem:[%s23518_s7 + $0x818] sm:$0xff] }
 0x687   : > { %12883 = vmatprep.mubr.msk.f32.mxu0 %vm3933_vm7, %v12828_v21 }
 0x689   : > { %v4273_v3 = vpop.f32.mrb[174].mxu0 }
 0x68a   : > { %5328 = vmatmul.mubr.f32.gmra.mrb[24].mxu0 %v12827_v30  ;;  %v4275_v17 = vpop.f32.mrb[175].mxu0  ;;  %v19550_v27 = vadd.f32 %v19229_v15, %v4273_v3  ;;  %v12831_v15 = vld [vmem:[%s23518_s7 + $0x7f0] sm:$0xff]  ;;  %v12838_v30 = vld [vmem:[%s23518_s7 + $0x828] sm:$0xff] }
 0x68b   : > { %12884 = vmatprep.mubr.msk.f32.mxu0 %vm3933_vm7, %v12830_v11 }
 0x68d   : > { %v4278_v32 = vpop.f32.mrb[176].mxu0 }
 0x68e   : > { %5333 = vmatmul.mubr.f32.gmra.mrb[26].mxu0 %v12829_v56  ;;  %v4280_v50 = vpop.f32.mrb[177].mxu0  ;;  %v19560_v7 = vadd.f32 %v19238_v61, %v4278_v32  ;;  %v12833_v61 = vld [vmem:[%s23518_s7 + $0x800] sm:$0xff]  ;;  %v12840_v56 = vld [vmem:[%s23518_s7 + $0x838] sm:$0xff] }
 0x68f   : > { %12885 = vmatprep.mubr.msk.f32.mxu0 %vm3933_vm7, %v12832_v18 }
 0x691   : > { %v4283_v58 = vpop.f32.mrb[178].mxu0 }
 0x692   : > { %5338 = vmatmul.mubr.f32.gmra.mrb[28].mxu0 %v12831_v15  ;;  %v4285_v42 = vpop.f32.mrb[179].mxu0  ;;  %v19570_v37 = vadd.f32 %v19247_v53, %v4283_v58  ;;  %v12835_v53 = vld [vmem:[%s23518_s7 + $0x810] sm:$0xff]  ;;  %v12842_v15 = vld [vmem:[%s23518_s7 + $0x848] sm:$0xff] }
 0x693   : > { %12886 = vmatprep.mubr.msk.f32.mxu0 %vm3933_vm7, %v12834_v8 }
 0x695   : > { %v4288_v21 = vpop.f32.mrb[180].mxu0 }
 0x696   : > { %5343 = vmatmul.mubr.f32.gmra.mrb[30].mxu0 %v12833_v61  ;;  %v4290_v60 = vpop.f32.mrb[181].mxu0  ;;  %v19580_v26 = vadd.f32 %v19259_v52, %v4288_v21  ;;  %v12837_v52 = vld [vmem:[%s23518_s7 + $0x820] sm:$0xff]  ;;  %v12844_v61 = vld [vmem:[%s23518_s7 + $0x858] sm:$0xff] }
 0x697   : > { %12887 = vmatprep.mubr.msk.f32.mxu0 %vm3933_vm7, %v12836_v55 }
 0x699   : > { %v4293_v11 = vpop.f32.mrb[182].mxu0 }
 0x69a   : > { %5348 = vmatmul.mubr.f32.gmra.mrb[32].mxu0 %v12835_v53  ;;  %v4295_v3 = vpop.f32.mrb[183].mxu0  ;;  %v19590_v17 = vadd.f32 %v19271_v28, %v4293_v11  ;;  %v12839_v28 = vld [vmem:[%s23518_s7 + $0x830] sm:$0xff]  ;;  %v12846_v53 = vld [vmem:[%s23518_s7 + $0x868] sm:$0xff] }
 0x69b   : > { %12888 = vmatprep.mubr.msk.f32.mxu0 %vm3933_vm7, %v12838_v30 }
 0x69d   : > { %v4298_v18 = vpop.f32.mrb[184].mxu0 }
 0x69e   : > { %5353 = vmatmul.mubr.f32.gmra.mrb[34].mxu0 %v12837_v52  ;;  %v4300_v32 = vpop.f32.mrb[185].mxu0  ;;  %v19600_v50 = vadd.f32 %v19283_v57, %v4298_v18  ;;  %v12841_v57 = vld [vmem:[%s23518_s7 + $0x840] sm:$0xff] }
 0x69f   : > { %12889 = vmatprep.mubr.msk.f32.mxu0 %vm3933_vm7, %v12840_v56 }
 0x6a1   : > { %v4303_v8 = vpop.f32.mrb[186].mxu0 }
 0x6a2   : > { %5358 = vmatmul.mubr.f32.gmra.mrb[36].mxu0 %v12839_v28  ;;  %v4305_v58 = vpop.f32.mrb[187].mxu0  ;;  %v19610_v42 = vadd.f32 %v19295_v45, %v4303_v8  ;;  %v12843_v45 = vld [vmem:[%s23518_s7 + $0x850] sm:$0xff] }
 0x6a3   : > { %12890 = vmatprep.mubr.msk.f32.mxu0 %vm3933_vm7, %v12842_v15 }
 0x6a5   : > { %v4308_v55 = vpop.f32.mrb[188].mxu0 }
 0x6a6   : > { %5363 = vmatmul.mubr.f32.gmra.mrb[38].mxu0 %v12841_v57  ;;  %v4310_v21 = vpop.f32.mrb[189].mxu0  ;;  %v19620_v60 = vadd.f32 %v19307_v2, %v4308_v55  ;;  %v12845_v2 = vld [vmem:[%s23518_s7 + $0x860] sm:$0xff] }
 0x6a7   : > { %12891 = vmatprep.mubr.msk.f32.mxu0 %vm3933_vm7, %v12844_v61 }
 0x6a9   : > { %v4313_v30 = vpop.f32.mrb[190].mxu0 }
 0x6aa   : > { %5368 = vmatmul.mubr.f32.gmra.mrb[40].mxu0 %v12843_v45  ;;  %v4315_v11 = vpop.f32.mrb[191].mxu0  ;;  %v19630_v3 = vadd.f32 %v19319_v40, %v4313_v30 }
 0x6ab   : > { %12892 = vmatprep.mubr.msk.f32.mxu0 %vm3933_vm7, %v12846_v53 }
 0x6ad   : > { %v4318_v52 = vpop.f32.mrb[192].mxu0 }
 0x6ae   : > { %5373 = vmatmul.mubr.f32.gmra.mrb[42].mxu0 %v12845_v2  ;;  %v4320_v56 = vpop.f32.mrb[193].mxu0  ;;  %v19637_v18 = vadd.f32 %v19331_v14, %v4318_v52 }
 0x6b1   : > { %v4323_v32 = vpop.f32.mrb[194].mxu0 }
 0x6b2   : > { %v4325_v28 = vpop.f32.mrb[195].mxu0  ;;  %v19640_v15 = vadd.f32 %v19343_v51, %v4323_v32 }
 0x6b5   : > { %v4328_v8 = vpop.f32.mrb[196].mxu0 }
 0x6b6   : > { %v4330_v40 = vpop.f32.mrb[197].mxu0  ;;  %v19643_v58 = vadd.f32 %v19355_v9, %v4328_v8 }
 0x6b9   : > { %v4333_v57 = vpop.f32.mrb[198].mxu0 }
 0x6ba   : > { %v4335_v61 = vpop.f32.mrb[199].mxu0  ;;  %v19646_v55 = vadd.f32 %v19367_v12, %v4333_v57  ;;  %v5471_v57 = vpop.permute.xlu0 %5470 }
 0x6bd   : > { %v4338_v21 = vpop.f32.mrb[200].mxu0 }
 0x6be   : > { %v4340_v45 = vpop.f32.mrb[201].mxu0  ;;  %v19649_v14 = vadd.f32 %v19379_v10, %v4338_v21 }
 0x6c1   : > { %v4343_v53 = vpop.f32.mrb[202].mxu0 }
 0x6c2   : > { %v4345_v30 = vpop.f32.mrb[203].mxu0  ;;  %v19652_v51 = vadd.f32 %v19391_v43, %v4343_v53  ;;  %v5476_v53 = vpop.permute.xlu1 %5475 }
 0x6c5   : > { %v4348_v11 = vpop.f32.mrb[204].mxu0 }
 0x6c6   : > { %v4350_v2 = vpop.f32.mrb[205].mxu0  ;;  %v19655_v9 = vadd.f32 %v19403_v16, %v4348_v11 }
 0x6c9   : > { %v4353_v52 = vpop.f32.mrb[206].mxu0 }
 0x6ca   : > { %v4355_v56 = vpop.f32.mrb[207].mxu0  ;;  %v19658_v12 = vadd.f32 %v19415_v20, %v4353_v52  ;;  %v5784_v20 = vld [vmem:[%s23523_s2 + $0x8] sm:$0xff] }
 0x6cb   : > { %5980 = vmatprep.mubr.f32.mxu1 %v5784_v20 }
 0x6cd   : > { %v4358_v32 = vpop.f32.mrb[208].mxu0 }
 0x6ce   : > { %v4360_v28 = vpop.f32.mrb[209].mxu0  ;;  %v19661_v10 = vadd.f32 %v19427_v33, %v4358_v32  ;;  %v5481_v32 = vpop.permute.xlu0 %5480 }
 0x6d1   : > { %v5154_v8 = vpop.f32.mrb[210].mxu0 }
 0x6d2   : > { %v5378_v40 = vadd.f32 %v5154_v8, %v19250_v47  ;;  %v5156_v43 = vpop.f32.mrb[211].mxu0 }
 0x6d3   : > { %v5486_v43 = vpop.permute.xlu1 %5485 }
 0x6d4   : > { %v5693_v21 = vadd.f32 %v5471_v57, %v5378_v40 }
 0x6d5   : > { %v5159_v61 = vpop.f32.mrb[212].mxu0 }
 0x6d6   : > { %v5379_v16 = vadd.f32 %v5159_v61, %v19262_v59  ;;  %v5161_v45 = vpop.f32.mrb[213].mxu0  ;;  %v5738_v33 = vmax.f32 %v5693_v21, 0.0 }
 0x6d8   : > { %v5694_v30 = vadd.f32 %v5476_v53, %v5379_v16 }
 0x6d9   : > { %v5164_v11 = vpop.f32.mrb[214].mxu0 }
 0x6da   : > { %v5739_v2 = vmax.f32 %v5694_v30, 0.0  ;;  %v5380_v52 = vadd.f32 %v5164_v11, %v19274_v4  ;;  %v5166_v47 = vpop.f32.mrb[215].mxu0  ;;  %v5491_v30 = vpop.permute.xlu0 %5490 }
 0x6dc   : > { %v15110_v56 = vpack.c.bf16 %v5739_v2, %v5738_v33  ;;  %v5695_v8 = vadd.f32 %v5481_v32, %v5380_v52  ;;  %v5496_v2 = vpop.permute.xlu1 %5495 }
 0x6dd   : > { %v5169_v28 = vpop.f32.mrb[216].mxu0 }
 0x6de   : > { %v5381_v59 = vadd.f32 %v5169_v28, %v19286_v36  ;;  %15111 = vmatpush1.bf16.msra.mxu1 %v15110_v56  ;;  %v5171_v40 = vpop.f32.mrb[217].mxu0  ;;  %v5740_v16 = vmax.f32 %v5695_v8, 0.0 }
 0x6df   : > { %15112 = vmatprep.subr.bf16.mxu1 %v23492_v13 }
 0x6e0   : > { %v5696_v57 = vadd.f32 %v5486_v43, %v5381_v59  ;;  %v5501_v59 = vpop.permute.xlu0 %5500 }
 0x6e1   : > { %v5174_v61 = vpop.f32.mrb[218].mxu0 }
 0x6e2   : > { %v5741_v45 = vmax.f32 %v5696_v57, 0.0  ;;  %v5382_v21 = vadd.f32 %v5174_v61, %v19298_v6  ;;  %v5176_v53 = vpop.f32.mrb[219].mxu0  ;;  %v5506_v61 = vpop.permute.xlu1 %5505 }
 0x6e4   : > { %v15113_v4 = vpack.c.bf16 %v5741_v45, %v5740_v16  ;;  %v5697_v11 = vadd.f32 %v5491_v30, %v5382_v21 }
 0x6e5   : > { %v5179_v20 = vpop.f32.mrb[220].mxu0 }
 0x6e6   : > { %v5383_v33 = vadd.f32 %v5179_v20, %v19310_v34  ;;  %15114 = vmatpush1.bf16.msra.mxu1 %v15113_v4  ;;  %v5181_v36 = vpop.f32.mrb[221].mxu0  ;;  %v5742_v56 = vmax.f32 %v5697_v11, 0.0  ;;  %v5511_v20 = vpop.permute.xlu0 %5510 }
 0x6e7   : > { %15115 = vmatprep.subr.bf16.mxu1 %v23492_v13 }
 0x6e8   : > { %v5698_v52 = vadd.f32 %v5496_v2, %v5383_v33  ;;  %v5516_v2 = vpop.permute.xlu1 %5515 }
 0x6e9   : > { %v5184_v47 = vpop.f32.mrb[222].mxu0 }
 0x6ea   : > { %v5743_v32 = vmax.f32 %v5698_v52, 0.0  ;;  %v5384_v28 = vadd.f32 %v5184_v47, %v19322_v5  ;;  %v5186_v8 = vpop.f32.mrb[223].mxu0 }
 0x6ec   : > { %v15116_v6 = vpack.c.bf16 %v5743_v32, %v5742_v56  ;;  %v5699_v43 = vadd.f32 %v5501_v59, %v5384_v28 }
 0x6ed   : > { %v5189_v40 = vpop.f32.mrb[224].mxu0 }
 0x6ee   : > { %v5385_v57 = vadd.f32 %v5189_v40, %v19334_v19  ;;  %15117 = vmatpush1.bf16.msra.mxu1 %v15116_v6  ;;  %v5191_v34 = vpop.f32.mrb[225].mxu0  ;;  %v5744_v21 = vmax.f32 %v5699_v43, 0.0  ;;  %v5521_v6 = vpop.permute.xlu0 %5520 }
 0x6ef   : > { %15118 = vmatprep.subr.bf16.mxu1 %v23492_v13 }
 0x6f0   : > { %v5700_v16 = vadd.f32 %v5506_v61, %v5385_v57  ;;  %v5526_v57 = vpop.permute.xlu1 %5525 }
 0x6f1   : > { %v5194_v45 = vpop.f32.mrb[226].mxu0 }
 0x6f2   : > { %v5745_v53 = vmax.f32 %v5700_v16, 0.0  ;;  %v5386_v4 = vadd.f32 %v5194_v45, %v19346_v62  ;;  %v5196_v30 = vpop.f32.mrb[227].mxu0 }
 0x6f4   : > { %v15119_v5 = vpack.c.bf16 %v5745_v53, %v5744_v21  ;;  %v5701_v33 = vadd.f32 %v5511_v20, %v5386_v4  ;;  %v5531_v4 = vpop.permute.xlu0 %5530 }
 0x6f5   : > { %v5199_v11 = vpop.f32.mrb[228].mxu0 }
 0x6f6   : > { %v5387_v36 = vadd.f32 %v5199_v11, %v19358_v41  ;;  %15120 = vmatpush1.bf16.msra.mxu1 %v15119_v5  ;;  %v5201_v19 = vpop.f32.mrb[229].mxu0  ;;  %v5746_v56 = vmax.f32 %v5701_v33, 0.0  ;;  %v5536_v11 = vpop.permute.xlu1 %5535 }
 0x6f7   : > { %15121 = vmatprep.subr.bf16.mxu1 %v23492_v13 }
 0x6f8   : > { %v5702_v52 = vadd.f32 %v5516_v2, %v5387_v36 }
 0x6f9   : > { %v5204_v47 = vpop.f32.mrb[230].mxu0 }
 0x6fa   : > { %v5747_v32 = vmax.f32 %v5702_v52, 0.0  ;;  %v5388_v28 = vadd.f32 %v5204_v47, %v19370_v35  ;;  %v5206_v8 = vpop.f32.mrb[231].mxu0 }
 0x6fc   : > { %v15122_v62 = vpack.c.bf16 %v5747_v32, %v5746_v56  ;;  %v5703_v40 = vadd.f32 %v5521_v6, %v5388_v28  ;;  %v5541_v56 = vpop.permute.xlu0 %5540 }
 0x6fd   : > { %v5209_v59 = vpop.f32.mrb[232].mxu0 }
 0x6fe   : > { %v5389_v43 = vadd.f32 %v5209_v59, %v19382_v48  ;;  %15123 = vmatpush1.bf16.msra.mxu1 %v15122_v62  ;;  %v5211_v41 = vpop.f32.mrb[233].mxu0  ;;  %v5748_v16 = vmax.f32 %v5703_v40, 0.0  ;;  %v5546_v62 = vpop.permute.xlu1 %5545 }
 0x6ff   : > { %15124 = vmatprep.subr.bf16.mxu1 %v23492_v13 }
 0x700   : > { %v5704_v34 = vadd.f32 %v5526_v57, %v5389_v43 }
 0x701   : > { %v5214_v61 = vpop.f32.mrb[234].mxu0 }
 0x702   : > { %v5749_v45 = vmax.f32 %v5704_v34, 0.0  ;;  %v5390_v21 = vadd.f32 %v5214_v61, %v19394_v49  ;;  %v5216_v53 = vpop.f32.mrb[235].mxu0  ;;  %v5551_v34 = vpop.permute.xlu0 %5550 }
 0x704   : > { %v15125_v35 = vpack.c.bf16 %v5749_v45, %v5748_v16  ;;  %v5705_v5 = vadd.f32 %v5531_v4, %v5390_v21  ;;  %v5556_v21 = vpop.permute.xlu1 %5555 }
 0x705   : > { %v5219_v30 = vpop.f32.mrb[236].mxu0 }
 0x706   : > { %v5391_v20 = vadd.f32 %v5219_v30, %v19406_v22  ;;  %15126 = vmatpush1.bf16.msra.mxu1 %v15125_v35  ;;  %v5221_v48 = vpop.f32.mrb[237].mxu0  ;;  %v5750_v19 = vmax.f32 %v5705_v5, 0.0 }
 0x707   : > { %15127 = vmatprep.subr.bf16.mxu1 %v23492_v13  ;;  %v5561_v48 = vpop.permute.xlu0 %5560 }
 0x708   : > { %v5706_v33 = vadd.f32 %v5536_v11, %v5391_v20 }
 0x709   : > { %v5224_v36 = vpop.f32.mrb[238].mxu0 }
 0x70a   : > { %v5751_v2 = vmax.f32 %v5706_v33, 0.0  ;;  %v5392_v52 = vadd.f32 %v5224_v36, %v19418_v38  ;;  %v5226_v47 = vpop.f32.mrb[239].mxu0 }
 0x70c   : > { %v15128_v49 = vpack.c.bf16 %v5751_v2, %v5750_v19  ;;  %v5707_v28 = vadd.f32 %v5541_v56, %v5392_v52  ;;  %v5566_v19 = vpop.permute.xlu1 %5565 }
 0x70d   : > { %v5229_v32 = vpop.f32.mrb[240].mxu0 }
 0x70e   : > { %v5393_v8 = vadd.f32 %v5229_v32, %v19430_v25  ;;  %15129 = vmatpush1.bf16.msra.mxu1 %v15128_v49  ;;  %v5231_v22 = vpop.f32.mrb[241].mxu0  ;;  %v5752_v40 = vmax.f32 %v5707_v28, 0.0  ;;  %v5571_v28 = vpop.permute.xlu0 %5570 }
 0x70f   : > { %15130 = vmatprep.subr.bf16.mxu1 %v23492_v13 }
 0x710   : > { %v5708_v6 = vadd.f32 %v5546_v62, %v5393_v8 }
 0x711   : > { %v5234_v59 = vpop.f32.mrb[242].mxu0 }
 0x712   : > { %v5753_v43 = vmax.f32 %v5708_v6, 0.0  ;;  %v5394_v41 = vadd.f32 %v5234_v59, %v19440_v44  ;;  %v5236_v57 = vpop.f32.mrb[243].mxu0  ;;  %v5576_v6 = vpop.permute.xlu1 %5575 }
 0x714   : > { %v15131_v38 = vpack.c.bf16 %v5753_v43, %v5752_v40  ;;  %v5709_v16 = vadd.f32 %v5551_v34, %v5394_v41  ;;  %v5581_v34 = vpop.permute.xlu0 %5580 }
 0x715   : > { %v5239_v61 = vpop.f32.mrb[244].mxu0 }
 0x716   : > { %v5395_v45 = vadd.f32 %v5239_v61, %v19450_v0  ;;  %15132 = vmatpush1.bf16.msra.mxu1 %v15131_v38  ;;  %v5241_v25 = vpop.f32.mrb[245].mxu0  ;;  %v5754_v4 = vmax.f32 %v5709_v16, 0.0 }
 0x717   : > { %15133 = vmatprep.subr.bf16.mxu1 %v23492_v13  ;;  %v5586_v25 = vpop.permute.xlu1 %5585 }
 0x718   : > { %v5710_v53 = vadd.f32 %v5556_v21, %v5395_v45 }
 0x719   : > { %v5244_v35 = vpop.f32.mrb[246].mxu0 }
 0x71a   : > { %v5755_v30 = vmax.f32 %v5710_v53, 0.0  ;;  %v5396_v5 = vadd.f32 %v5244_v35, %v19460_v23  ;;  %v5246_v20 = vpop.f32.mrb[247].mxu0 }
 0x71b   : > { %v5591_v20 = vpop.permute.xlu0 %5590 }
 0x71c   : > { %v15134_v44 = vpack.c.bf16 %v5755_v30, %v5754_v4  ;;  %v5711_v33 = vadd.f32 %v5561_v48, %v5396_v5 }
 0x71d   : > { %v5249_v11 = vpop.f32.mrb[248].mxu0 }
 0x71e   : > { %v5397_v36 = vadd.f32 %v5249_v11, %v19470_v54  ;;  %15135 = vmatpush1.bf16.msra.mxu1 %v15134_v44  ;;  %v5251_v0 = vpop.f32.mrb[249].mxu0  ;;  %v5756_v47 = vmax.f32 %v5711_v33, 0.0  ;;  %v5596_v33 = vpop.permute.xlu1 %5595 }
 0x71f   : > { %15136 = vmatprep.subr.bf16.mxu1 %v23492_v13 }
 0x720   : > { %v5712_v2 = vadd.f32 %v5566_v19, %v5397_v36 }
 0x721   : > { %v5254_v52 = vpop.f32.mrb[250].mxu0 }
 0x722   : > { %v5757_v49 = vmax.f32 %v5712_v2, 0.0  ;;  %v5398_v56 = vadd.f32 %v5254_v52, %v19480_v63  ;;  %v5256_v32 = vpop.f32.mrb[251].mxu0 }
 0x724   : > { %v15137_v23 = vpack.c.bf16 %v5757_v49, %v5756_v47  ;;  %v5713_v22 = vadd.f32 %v5571_v28, %v5398_v56  ;;  %v5601_v49 = vpop.permute.xlu0 %5600  ;;  %v5606_v28 = vpop.permute.xlu1 %5605 }
 0x725   : > { %v5259_v8 = vpop.f32.mrb[252].mxu0 }
 0x726   : > { %v5399_v62 = vadd.f32 %v5259_v8, %v19490_v1  ;;  %15138 = vmatpush1.bf16.msra.mxu1 %v15137_v23  ;;  %v5261_v54 = vpop.f32.mrb[253].mxu0  ;;  %v5758_v43 = vmax.f32 %v5713_v22, 0.0 }
 0x727   : > { %15139 = vmatprep.subr.bf16.mxu1 %v23492_v13 }
 0x728   : > { %v5714_v59 = vadd.f32 %v5576_v6, %v5399_v62 }
 0x729   : > { %v5264_v40 = vpop.f32.mrb[254].mxu0 }
 0x72a   : > { %v5759_v41 = vmax.f32 %v5714_v59, 0.0  ;;  %v5400_v57 = vadd.f32 %v5264_v40, %v19500_v39  ;;  %v5266_v38 = vpop.f32.mrb[255].mxu0  ;;  %v5611_v40 = vpop.permute.xlu0 %5610 }
 0x72b   : > { %v5616_v38 = vpop.permute.xlu1 %5615 }
 0x72c   : > { %v15140_v63 = vpack.c.bf16 %v5759_v41, %v5758_v43  ;;  %v5715_v16 = vadd.f32 %v5581_v34, %v5400_v57 }
 0x72d   : > { %v5269_v61 = vpop.f32.mrb[0].mxu0 }
 0x72e   : > { %v5401_v45 = vadd.f32 %v5269_v61, %v19510_v24  ;;  %15141 = vmatpush1.bf16.msra.mxu1 %v15140_v63  ;;  %v5271_v1 = vpop.f32.mrb[1].mxu0  ;;  %v5760_v35 = vmax.f32 %v5715_v16, 0.0 }
 0x72f   : > { %15142 = vmatprep.subr.bf16.mxu1 %v23492_v13 }
 0x730   : > { %v5716_v21 = vadd.f32 %v5586_v25, %v5401_v45  ;;  %v5621_v25 = vpop.permute.xlu0 %5620 }
 0x731   : > { %v5274_v53 = vpop.f32.mrb[2].mxu0 }
 0x732   : > { %v5761_v4 = vmax.f32 %v5716_v21, 0.0  ;;  %v5402_v30 = vadd.f32 %v5274_v53, %v19520_v31  ;;  %v5276_v5 = vpop.f32.mrb[3].mxu0 }
 0x734   : > { %v15143_v39 = vpack.c.bf16 %v5761_v4, %v5760_v35  ;;  %v5717_v48 = vadd.f32 %v5591_v20, %v5402_v30  ;;  %v5626_v4 = vpop.permute.xlu1 %5625 }
 0x735   : > { %v5279_v44 = vpop.f32.mrb[4].mxu0 }
 0x736   : > { %v5403_v11 = vadd.f32 %v5279_v44, %v19530_v46  ;;  %15144 = vmatpush1.bf16.msra.mxu1 %v15143_v39  ;;  %v5281_v24 = vpop.f32.mrb[5].mxu0  ;;  %v5762_v19 = vmax.f32 %v5717_v48, 0.0 }
 0x737   : > { %15145 = vmatprep.subr.bf16.mxu1 %v23492_v13 }
 0x738   : > { %v5718_v36 = vadd.f32 %v5596_v33, %v5403_v11  ;;  %v5631_v11 = vpop.permute.xlu0 %5630 }
 0x739   : > { %v5284_v0 = vpop.f32.mrb[6].mxu0 }
 0x73a   : > { %v5763_v2 = vmax.f32 %v5718_v36, 0.0  ;;  %v5404_v52 = vadd.f32 %v5284_v0, %v19540_v29  ;;  %v5286_v47 = vpop.f32.mrb[7].mxu0  ;;  %v5783_v0 = vld [vmem:[%s23523_s2] sm:$0xff] }
 0x73c   : > { %v15146_v31 = vpack.c.bf16 %v5763_v2, %v5762_v19  ;;  %v5719_v32 = vadd.f32 %v5601_v49, %v5404_v52  ;;  %v5636_v19 = vpop.permute.xlu1 %5635  ;;  %v5787_v2 = vld [vmem:[%s23523_s2 + $0x20] sm:$0xff] }
 0x73d   : > { %v5289_v56 = vpop.f32.mrb[8].mxu0 }
 0x73e   : > { %v5405_v23 = vadd.f32 %v5289_v56, %v19550_v27  ;;  %15147 = vmatpush1.bf16.msra.mxu1 %v15146_v31  ;;  %v5291_v46 = vpop.f32.mrb[9].mxu0  ;;  %v5764_v62 = vmax.f32 %v5719_v32, 0.0  ;;  %v5790_v32 = vld [vmem:[%s23523_s2 + $0x38] sm:$0xff] }
 0x73f   : > { %15148 = vmatprep.subr.bf16.mxu1 %v23492_v13  ;;  %v5641_v46 = vpop.permute.xlu0 %5640 }
 0x740   : > { %v5720_v8 = vadd.f32 %v5606_v28, %v5405_v23 }
 0x741   : > { %v5294_v22 = vpop.f32.mrb[10].mxu0 }
 0x742   : > { %v5765_v54 = vmax.f32 %v5720_v8, 0.0  ;;  %v5406_v6 = vadd.f32 %v5294_v22, %v19560_v7  ;;  %v5296_v59 = vpop.f32.mrb[11].mxu0 }
 0x744   : > { %v15149_v29 = vpack.c.bf16 %v5765_v54, %v5764_v62  ;;  %v5721_v41 = vadd.f32 %v5611_v40, %v5406_v6  ;;  %v5789_v62 = vld [vmem:[%s23523_s2 + $0x30] sm:$0xff]  ;;  %v5646_v54 = vpop.permute.xlu1 %5645 }
 0x745   : > { %v5299_v43 = vpop.f32.mrb[12].mxu0  ;;  %v5793_v6 = vld [vmem:[%s23523_s2 + $0x50] sm:$0xff] }
 0x746   : > { %v5407_v57 = vadd.f32 %v5299_v43, %v19570_v37  ;;  %15150 = vmatpush1.bf16.msra.mxu1 %v15149_v29  ;;  %v5301_v27 = vpop.f32.mrb[13].mxu0  ;;  %v5766_v61 = vmax.f32 %v5721_v41, 0.0 }
 0x747   : > { %15151 = vmatprep.subr.bf16.mxu1 %v23492_v13  ;;  %v5796_v27 = vld [vmem:[%s23523_s2 + $0x68] sm:$0xff] }
 0x748   : > { %v5722_v63 = vadd.f32 %v5616_v38, %v5407_v57 }
 0x749   : > { %v5304_v34 = vpop.f32.mrb[14].mxu0 }
 0x74a   : > { %v5767_v16 = vmax.f32 %v5722_v63, 0.0  ;;  %v5408_v45 = vadd.f32 %v5304_v34, %v19580_v26  ;;  %v5306_v1 = vpop.f32.mrb[15].mxu0  ;;  %v5651_v63 = vpop.permute.xlu0 %5650 }
 0x74b   : > { %v5656_v1 = vpop.permute.xlu1 %5655 }
 0x74c   : > { %v15152_v7 = vpack.c.bf16 %v5767_v16, %v5766_v61  ;;  %v5723_v53 = vadd.f32 %v5621_v25, %v5408_v45  ;;  %v5795_v45 = vld [vmem:[%s23523_s2 + $0x60] sm:$0xff] }
 0x74d   : > { %v5309_v21 = vpop.f32.mrb[16].mxu0 }
 0x74e   : > { %v5409_v35 = vadd.f32 %v5309_v21, %v19590_v17  ;;  %15153 = vmatpush1.bf16.msra.mxu1 %v15152_v7  ;;  %v5311_v37 = vpop.f32.mrb[17].mxu0  ;;  %v5768_v39 = vmax.f32 %v5723_v53, 0.0  ;;  %v5799_v7 = vld [vmem:[%s23523_s2 + $0x80] sm:$0xff] }
 0x74f   : > { %15154 = vmatprep.subr.bf16.mxu1 %v23492_v13 }
 0x750   : > { %v5724_v30 = vadd.f32 %v5626_v4, %v5409_v35 }
 0x751   : > { %v5314_v5 = vpop.f32.mrb[18].mxu0 }
 0x752   : > { %v5769_v20 = vmax.f32 %v5724_v30, 0.0  ;;  %v5410_v44 = vadd.f32 %v5314_v5, %v19600_v50  ;;  %v5316_v48 = vpop.f32.mrb[19].mxu0  ;;  %v5802_v30 = vld [vmem:[%s23523_s2 + $0x98] sm:$0xff] }
 0x754   : > { %v15155_v26 = vpack.c.bf16 %v5769_v20, %v5768_v39  ;;  %v5725_v33 = vadd.f32 %v5631_v11, %v5410_v44  ;;  %v5661_v39 = vpop.permute.xlu0 %5660  ;;  %v5666_v11 = vpop.permute.xlu1 %5665 }
 0x755   : > { %v5319_v24 = vpop.f32.mrb[20].mxu0 }
 0x756   : > { %v5411_v36 = vadd.f32 %v5319_v24, %v19610_v42  ;;  %15156 = vmatpush1.bf16.msra.mxu1 %v15155_v26  ;;  %v5321_v17 = vpop.f32.mrb[21].mxu0  ;;  %v5786_v42 = vld [vmem:[%s23523_s2 + $0x18] sm:$0xff]  ;;  %v5770_v49 = vmax.f32 %v5725_v33, 0.0  ;;  %v5801_v26 = vld [vmem:[%s23523_s2 + $0x90] sm:$0xff] }
 0x757   : > { %v5805_v24 = vld [vmem:[%s23523_s2 + $0xb0] sm:$0xff] }
 0x758   : > { %v5726_v52 = vadd.f32 %v5636_v19, %v5411_v36 }
 0x759   : > { %v5324_v50 = vpop.f32.mrb[22].mxu0  ;;  %5981 = vmatmul.mubr.f32.vlgmr.msra.gmra.mrb[92].mxu1 %v5783_v0 }
 0x75a   : > { %v5412_v47 = vadd.f32 %v5324_v50, %v19620_v60  ;;  %v5326_v31 = vpop.f32.mrb[23].mxu0  ;;  %5985 = vmatprep.mubr.f32.mxu1 %v5787_v2  ;;  %v5771_v56 = vmax.f32 %v5726_v52, 0.0  ;;  %v5808_v52 = vld [vmem:[%s23523_s2 + $0xc8] sm:$0xff] }
 0x75c   : > { %v15157_v23 = vpack.c.bf16 %v5771_v56, %v5770_v49  ;;  %v5727_v8 = vadd.f32 %v5641_v46, %v5412_v47  ;;  %v5671_v47 = vpop.permute.xlu0 %5670  ;;  %v5807_v56 = vld [vmem:[%s23523_s2 + $0xc0] sm:$0xff] }
 0x75d   : > { %v5329_v28 = vpop.f32.mrb[24].mxu0  ;;  %5986 = vmatmul.mubr.f32.gmra.mrb[94].mxu1 %v5786_v42 }
 0x75e   : > { %v5413_v22 = vadd.f32 %v5329_v28, %v19630_v3  ;;  %15158 = vmatprep.subr.bf16.mxu1 %v15157_v23  ;;  %v5331_v60 = vpop.f32.mrb[25].mxu0  ;;  %5990 = vmatprep.mubr.f32.mxu1 %v5790_v32  ;;  %v5792_v3 = vld [vmem:[%s23523_s2 + $0x48] sm:$0xff]  ;;  %v5772_v41 = vmax.f32 %v5727_v8, 0.0  ;;  %v5676_v32 = vpop.permute.xlu1 %5675 }
 0x75f   : > { %15160 = vmatpush3.bf16.msra.mxu1 %v15157_v23  ;;  %v5811_v23 = vld [vmem:[%s23523_s2 + $0xe0] sm:$0xff] }
 0x760   : > { %v5728_v59 = vadd.f32 %v5646_v54, %v5413_v22  ;;  %v5814_v54 = vld [vmem:[%s23523_s2 + $0xf8] sm:$0xff] }
 0x761   : > { %v5334_v29 = vpop.f32.mrb[26].mxu0  ;;  %5991 = vmatmul.mubr.f32.gmra.mrb[96].mxu1 %v5789_v62 }
 0x762   : > { %v5414_v40 = vadd.f32 %v5334_v29, %v19637_v18  ;;  %v5336_v43 = vpop.f32.mrb[27].mxu0  ;;  %5995 = vmatprep.mubr.f32.mxu1 %v5793_v6  ;;  %v5773_v57 = vmax.f32 %v5728_v59, 0.0  ;;  %v5681_v59 = vpop.permute.xlu0 %5680 }
 0x764   : > { %v15161_v38 = vpack.c.bf16 %v5773_v57, %v5772_v41  ;;  %v5729_v61 = vadd.f32 %v5651_v63, %v5414_v40  ;;  %v5686_v41 = vpop.permute.xlu1 %5685  ;;  %v5817_v57 = vld [vmem:[%s23523_s2 + $0x110] sm:$0xff] }
 0x765   : > { %v5339_v34 = vpop.f32.mrb[28].mxu0  ;;  %5996 = vmatmul.mubr.f32.gmra.mrb[98].mxu1 %v5792_v3  ;;  %v5813_v3 = vld [vmem:[%s23523_s2 + $0xf0] sm:$0xff] }
 0x766   : > { %v5415_v16 = vadd.f32 %v5339_v34, %v19640_v15  ;;  %15162 = vmatprep.subr.bf16.mxu1 %v15161_v38  ;;  %v5341_v18 = vpop.f32.mrb[29].mxu0  ;;  %6000 = vmatprep.mubr.f32.mxu1 %v5796_v27  ;;  %v5798_v15 = vld [vmem:[%s23523_s2 + $0x78] sm:$0xff]  ;;  %v5774_v37 = vmax.f32 %v5729_v61, 0.0 }
 0x767   : > { %15164 = vmatpush3.bf16.msra.mxu1 %v15161_v38  ;;  %v5691_v18 = vpop.permute.xlu0 %5690 }
 0x768   : > { %v5730_v25 = vadd.f32 %v5656_v1, %v5415_v16 }
 0x769   : > { %v5344_v21 = vpop.f32.mrb[30].mxu0  ;;  %6001 = vmatmul.mubr.f32.gmra.mrb[100].mxu1 %v5795_v45  ;;  %v5820_v45 = vld [vmem:[%s23523_s2 + $0x128] sm:$0xff] }
 0x76a   : > { %v5416_v53 = vadd.f32 %v5344_v21, %v19643_v58  ;;  %v5346_v35 = vpop.f32.mrb[31].mxu0  ;;  %6005 = vmatprep.mubr.f32.mxu1 %v5799_v7  ;;  %v5775_v4 = vmax.f32 %v5730_v25, 0.0  ;;  %v5823_v21 = vld [vmem:[%s23523_s2 + $0x140] sm:$0xff] }
 0x76b   : > { %v5826_v35 = vld [vmem:[%s23523_s2 + $0x158] sm:$0xff] }
 0x76c   : > { %v15165_v5 = vpack.c.bf16 %v5775_v4, %v5774_v37  ;;  %v5731_v44 = vadd.f32 %v5661_v39, %v5416_v53  ;;  %v5822_v53 = vld [vmem:[%s23523_s2 + $0x138] sm:$0xff]  ;;  %v5829_v37 = vld [vmem:[%s23523_s2 + $0x170] sm:$0xff]  ;;  %v5828_v4 = vld [vmem:[%s23523_s2 + $0x168] sm:$0xff] }
 0x76d   : > { %v5349_v20 = vpop.f32.mrb[32].mxu0  ;;  %6006 = vmatmul.mubr.f32.gmra.mrb[102].mxu1 %v5798_v15  ;;  %v5825_v15 = vld [vmem:[%s23523_s2 + $0x150] sm:$0xff]  ;;  %v5835_v39 = vld [vmem:[%s23523_s2 + $0x1a0] sm:$0xff] }
 0x76e   : > { %v5417_v48 = vadd.f32 %v5349_v20, %v19646_v55  ;;  %15166 = vmatprep.subr.bf16.mxu1 %v15165_v5  ;;  %v5351_v58 = vpop.f32.mrb[33].mxu0  ;;  %6010 = vmatprep.mubr.f32.mxu1 %v5802_v30  ;;  %v5804_v55 = vld [vmem:[%s23523_s2 + $0xa8] sm:$0xff]  ;;  %v5776_v19 = vmax.f32 %v5731_v44, 0.0  ;;  %v5834_v20 = vld [vmem:[%s23523_s2 + $0x198] sm:$0xff] }
 0x76f   : > { %15168 = vmatpush3.bf16.msra.mxu1 %v15165_v5  ;;  %v5832_v30 = vld [vmem:[%s23523_s2 + $0x188] sm:$0xff]  ;;  %v5831_v5 = vld [vmem:[%s23523_s2 + $0x180] sm:$0xff]  ;;  %v5838_v44 = vld [vmem:[%s23523_s2 + $0x1b8] sm:$0xff] }
 0x770   : > { %v5732_v33 = vadd.f32 %v5666_v11, %v5417_v48  ;;  %v5837_v48 = vld [vmem:[%s23523_s2 + $0x1b0] sm:$0xff]  ;;  %v5844_v11 = vld [vmem:[%s23523_s2 + $0x1e8] sm:$0xff] }
 0x771   : > { %v5354_v36 = vpop.f32.mrb[34].mxu0  ;;  %6011 = vmatmul.mubr.f32.gmra.mrb[104].mxu1 %v5801_v26  ;;  %v5841_v58 = vld [vmem:[%s23523_s2 + $0x1d0] sm:$0xff]  ;;  %v5840_v26 = vld [vmem:[%s23523_s2 + $0x1c8] sm:$0xff] }
 0x772   : > { %v5418_v17 = vadd.f32 %v5354_v36, %v19649_v14  ;;  %v5356_v0 = vpop.f32.mrb[35].mxu0  ;;  %6015 = vmatprep.mubr.f32.mxu1 %v5805_v24  ;;  %v5777_v2 = vmax.f32 %v5732_v33, 0.0  ;;  %v5843_v24 = vld [vmem:[%s23523_s2 + $0x1e0] sm:$0xff]  ;;  %v5846_v36 = vld [vmem:[%s23523_s2 + $0x1f8] sm:$0xff] }
 0x773   : > { %v5847_v33 = vld [vmem:[%s23523_s2 + $0x200] sm:$0xff]  ;;  %v5788_v0 = vld [vmem:[%s23523_s2 + $0x28] sm:$0xff] }
 0x774   : > { %v15169_v50 = vpack.c.bf16 %v5777_v2, %v5776_v19  ;;  %v5733_v42 = vadd.f32 %v5671_v47, %v5418_v17  ;;  %v5785_v17 = vld [vmem:[%s23523_s2 + $0x10] sm:$0xff]  ;;  %v5794_v19 = vld [vmem:[%s23523_s2 + $0x58] sm:$0xff] }
 0x775   : > { %v5359_v31 = vpop.f32.mrb[36].mxu0  ;;  %6016 = vmatmul.mubr.f32.gmra.mrb[106].mxu1 %v5804_v55  ;;  %v5791_v55 = vld [vmem:[%s23523_s2 + $0x40] sm:$0xff]  ;;  %v5797_v2 = vld [vmem:[%s23523_s2 + $0x70] sm:$0xff]  ;;  %v5806_v47 = vld [vmem:[%s23523_s2 + $0xb8] sm:$0xff] }
 0x776   : > { %v5419_v49 = vadd.f32 %v5359_v31, %v19652_v51  ;;  %15170 = vmatprep.subr.bf16.mxu1 %v15169_v50  ;;  %v5361_v14 = vpop.f32.mrb[37].mxu0  ;;  %6020 = vmatprep.mubr.f32.mxu1 %v5808_v52  ;;  %v5810_v51 = vld [vmem:[%s23523_s2 + $0xd8] sm:$0xff]  ;;  %v5778_v60 = vmax.f32 %v5733_v42, 0.0  ;;  %v5800_v52 = vld [vmem:[%s23523_s2 + $0x88] sm:$0xff]  ;;  %v5809_v31 = vld [vmem:[%s23523_s2 + $0xd0] sm:$0xff] }
 0x777   : > { %15172 = vmatpush3.bf16.msra.mxu1 %v15169_v50  ;;  %v5803_v50 = vld [vmem:[%s23523_s2 + $0xa0] sm:$0xff]  ;;  %v5812_v42 = vld [vmem:[%s23523_s2 + $0xe8] sm:$0xff]  ;;  %v5818_v14 = vld [vmem:[%s23523_s2 + $0x118] sm:$0xff] }
 0x778   : > { %v5734_v46 = vadd.f32 %v5676_v32, %v5419_v49  ;;  %v5815_v49 = vld [vmem:[%s23523_s2 + $0x100] sm:$0xff]  ;;  %v5824_v32 = vld [vmem:[%s23523_s2 + $0x148] sm:$0xff] }
 0x779   : > { %v5364_v28 = vpop.f32.mrb[38].mxu0  ;;  %6021 = vmatmul.mubr.f32.gmra.mrb[108].mxu1 %v5807_v56  ;;  %v5821_v56 = vld [vmem:[%s23523_s2 + $0x130] sm:$0xff] }
 0x77a   : > { %v5420_v8 = vadd.f32 %v5364_v28, %v19655_v9  ;;  %v5366_v22 = vpop.f32.mrb[39].mxu0  ;;  %6025 = vmatprep.mubr.f32.mxu1 %v5811_v23  ;;  %v5779_v62 = vmax.f32 %v5734_v46, 0.0  ;;  %v5827_v23 = vld [vmem:[%s23523_s2 + $0x160] sm:$0xff]  ;;  %v5830_v46 = vld [vmem:[%s23523_s2 + $0x178] sm:$0xff]  ;;  %v5833_v28 = vld [vmem:[%s23523_s2 + $0x190] sm:$0xff] }
 0x77b   : > { %v5839_v22 = vld [vmem:[%s23523_s2 + $0x1c0] sm:$0xff] }
 0x77c   : > { %v15173_v6 = vpack.c.bf16 %v5779_v62, %v5778_v60  ;;  %v5735_v40 = vadd.f32 %v5681_v59, %v5420_v8  ;;  %v5836_v8 = vld [vmem:[%s23523_s2 + $0x1a8] sm:$0xff]  ;;  %v5845_v60 = vld [vmem:[%s23523_s2 + $0x1f0] sm:$0xff] }
 0x77d   : > { %v5369_v29 = vpop.f32.mrb[40].mxu0  ;;  %6026 = vmatmul.mubr.f32.gmra.mrb[110].mxu1 %v5810_v51  ;;  %v5842_v51 = vld [vmem:[%s23523_s2 + $0x1d8] sm:$0xff]  ;;  %v5848_v62 = vld [vmem:[%s23523_s2 + $0x208] sm:$0xff] }
 0x77e   : > { %v5421_v43 = vadd.f32 %v5369_v29, %v19658_v12  ;;  %15174 = vmatprep.subr.bf16.mxu1 %v15173_v6  ;;  %v5371_v9 = vpop.f32.mrb[41].mxu0  ;;  %6030 = vmatprep.mubr.f32.mxu1 %v5814_v54  ;;  %v5816_v12 = vld [vmem:[%s23523_s2 + $0x108] sm:$0xff]  ;;  %v5780_v34 = vmax.f32 %v5735_v40, 0.0  ;;  %v6266_v54 = vld [vmem:[%s23418_s9] sm:$0xff]  ;;  %v6268_v29 = vld [vmem:[%s23418_s9 + $0x10] sm:$0xff] }
 0x77f   : > { %15176 = vmatpush3.bf16.msra.mxu1 %v15173_v6  ;;  %v6267_v6 = vld [vmem:[%s23418_s9 + $0x8] sm:$0xff]  ;;  %v6269_v40 = vld [vmem:[%s23418_s9 + $0x18] sm:$0xff]  ;;  %v6270_v9 = vld [vmem:[%s23418_s9 + $0x20] sm:$0xff] }
 0x780   : > { %v5736_v27 = vadd.f32 %v5686_v41, %v5421_v43  ;;  %v15181_v59 = vpack.c.bf16 %v6267_v6, %v6266_v54  ;;  %v15185_v43 = vpack.c.bf16 %v6269_v40, %v6268_v29 }
 0x781   : > { %v5374_v38 = vpop.f32.mrb[42].mxu0  ;;  %6031 = vmatmul.mubr.f32.gmra.mrb[112].mxu1 %v5813_v3  ;;  %v6271_v3 = vld [vmem:[%s23418_s9 + $0x28] sm:$0x1f] }
 0x782   : > { %v5422_v63 = vadd.f32 %v5374_v38, %v19661_v10  ;;  %6035 = vmatprep.mubr.f32.mxu1 %v5817_v57  ;;  %v5781_v61 = vmax.f32 %v5736_v27, 0.0  ;;  %v5376_v16 = vpop.f32.mrb[43].mxu0  ;;  %v5819_v10 = vld [vmem:[%s23523_s2 + $0x120] sm:$0xff]  ;;  %v15189_v41 = vpack.c.bf16 %v6271_v3, %v6270_v9 }
 0x784   : > { %v15177_v1 = vpack.c.bf16 %v5781_v61, %v5780_v34  ;;  %v5737_v7 = vadd.f32 %v5691_v18, %v5422_v63 }
 0x785   : > { %6036 = vmatmul.mubr.f32.gmra.mrb[114].mxu1 %v5816_v12 }
 0x786   : > { %15178 = vmatprep.subr.bf16.mxu1 %v15177_v1  ;;  %6040 = vmatprep.mubr.f32.mxu1 %v5820_v45  ;;  %v5782_v25 = vmax.f32 %v5737_v7, 0.0 }
 0x787   : > { %15180 = vmatpush3.bf16.msra.mxu1 %v15177_v1 }
 0x788   : > { %14654 = vmatprep.subr.mxu1 %v5782_v25 }
 0x789   : > { %6041 = vmatmul.mubr.f32.gmra.mrb[116].mxu1 %v5819_v10 }
 0x78a   : > { %6045 = vmatprep.mubr.f32.mxu1 %v5823_v21 }
 0x78b   : > { %14655 = vmatpush3.msra.mxu1 %v5782_v25 }
 0x78c   : > { %15182 = vmatprep.subr.bf16.mxu1 %v15181_v59 }
 0x78d   : > { %6046 = vmatmul.mubr.f32.gmra.mrb[118].mxu1 %v5822_v53 }
 0x78e   : > { %6050 = vmatprep.mubr.f32.mxu1 %v5826_v35 }
 0x791   : > { %6051 = vmatmul.mubr.f32.gmra.mrb[120].mxu1 %v5825_v15 }
 0x792   : > { %6055 = vmatprep.mubr.f32.mxu1 %v5829_v37 }
 0x795   : > { %6056 = vmatmul.mubr.f32.gmra.mrb[122].mxu1 %v5828_v4 }
 0x796   : > { %6060 = vmatprep.mubr.f32.mxu1 %v5832_v30 }
 0x799   : > { %6061 = vmatmul.mubr.f32.gmra.mrb[124].mxu1 %v5831_v5 }
 0x79a   : > { %6065 = vmatprep.mubr.f32.mxu1 %v5835_v39 }
 0x79d   : > { %6066 = vmatmul.mubr.f32.gmra.mrb[126].mxu1 %v5834_v20 }
 0x79e   : > { %6070 = vmatprep.mubr.f32.mxu1 %v5838_v44 }
 0x7a1   : > { %6071 = vmatmul.mubr.f32.gmra.mrb[128].mxu1 %v5837_v48 }
 0x7a2   : > { %6075 = vmatprep.mubr.f32.mxu1 %v5841_v58 }
 0x7a5   : > { %6076 = vmatmul.mubr.f32.gmra.mrb[130].mxu1 %v5840_v26 }
 0x7a6   : > { %6080 = vmatprep.mubr.f32.mxu1 %v5844_v11 }
 0x7a9   : > { %6081 = vmatmul.mubr.f32.gmra.mrb[132].mxu1 %v5843_v24 }
 0x7aa   : > { %6085 = vmatprep.mubr.f32.mxu1 %v5847_v33 }
 0x7ad   : > { %6086 = vmatmul.mubr.f32.gmra.mrb[134].mxu1 %v5846_v36 }
 0x7ae   : > { %14656 = vmatprep.mubr.msk.f32.mxu1 %vm5849_vm10, %v5785_v17 }
 0x7b1   : > { %14657 = vmatmul.mubr.msk.f32.vlgmr.msra.gmra.mrb[136].mxu1 %vm5849_vm10, %v5788_v0 }
 0x7b2   : > { %14659 = vmatprep.mubr.msk.f32.mxu1 %vm5849_vm10, %v5791_v55  ;;  %15184 = vmatpush3.bf16.msra.mxu1 %v15181_v59 }
 0x7b3   : > { %15186 = vmatprep.subr.bf16.mxu1 %v15185_v43 }
 0x7b5   : > { %14660 = vmatmul.mubr.msk.f32.gmra.mrb[138].mxu1 %vm5849_vm10, %v5794_v19 }
 0x7b6   : > { %14662 = vmatprep.mubr.msk.f32.mxu1 %vm5849_vm10, %v5797_v2  ;;  %15188 = vmatpush3.bf16.msra.mxu1 %v15185_v43 }
 0x7b7   : > { %15191 = vmatprep.subr.msk.bf16.mxu1 %vm15190_vm12, %v15189_v41 }
 0x7b9   : > { %14663 = vmatmul.mubr.msk.f32.gmra.mrb[140].mxu1 %vm5849_vm10, %v5800_v52 }
 0x7ba   : > { %14665 = vmatprep.mubr.msk.f32.mxu1 %vm5849_vm10, %v5803_v50  ;;  %15194 = vmatpush3.bf16.msk.msra.mxu1 %vm15190_vm12, %v15189_v41 }
 0x7bb   : > { %15228 = vmatprep.subr.bf16.mxu1 %v23492_v13 }
 0x7bd   : > { %14666 = vmatmul.mubr.msk.f32.gmra.mrb[142].mxu1 %vm5849_vm10, %v5806_v47 }
 0x7be   : > { %14668 = vmatprep.mubr.msk.f32.mxu1 %vm5849_vm10, %v5809_v31 }
 0x7c1   : > { %14669 = vmatmul.mubr.msk.f32.gmra.mrb[144].mxu1 %vm5849_vm10, %v5812_v42 }
 0x7c2   : > { %14671 = vmatprep.mubr.msk.f32.mxu1 %vm5849_vm10, %v5815_v49 }
 0x7c5   : > { %14672 = vmatmul.mubr.msk.f32.gmra.mrb[146].mxu1 %vm5849_vm10, %v5818_v14 }
 0x7c6   : > { %14674 = vmatprep.mubr.msk.f32.mxu1 %vm5849_vm10, %v5821_v56 }
 0x7c9   : > { %14675 = vmatmul.mubr.msk.f32.gmra.mrb[148].mxu1 %vm5849_vm10, %v5824_v32 }
 0x7ca   : > { %14677 = vmatprep.mubr.msk.f32.mxu1 %vm5849_vm10, %v5827_v23 }
 0x7cd   : > { %14678 = vmatmul.mubr.msk.f32.gmra.mrb[150].mxu1 %vm5849_vm10, %v5830_v46 }
 0x7ce   : > { %14680 = vmatprep.mubr.msk.f32.mxu1 %vm5849_vm10, %v5833_v28 }
 0x7d1   : > { %14681 = vmatmul.mubr.msk.f32.gmra.mrb[152].mxu1 %vm5849_vm10, %v5836_v8 }
 0x7d2   : > { %14683 = vmatprep.mubr.msk.f32.mxu1 %vm5849_vm10, %v5839_v22 }
 0x7d5   : > { %14684 = vmatmul.mubr.msk.f32.gmra.mrb[154].mxu1 %vm5849_vm10, %v5842_v51 }
 0x7d6   : > { %14686 = vmatprep.mubr.msk.f32.mxu1 %vm5849_vm10, %v5845_v60 }
 0x7d9   : > { %14687 = vmatmul.mubr.msk.f32.gmra.mrb[156].mxu1 %vm5849_vm10, %v5848_v62 }
 0x82c   : > { %v5982_v57 = vpop.f32.mrb[92].mxu1 }
 0x82d   : > { %v5984_v27 = vpop.f32.mrb[93].mxu1 }
 0x830   : > { %v5987_v38 = vpop.f32.mrb[94].mxu1 }
 0x831   : > { %v5989_v63 = vpop.f32.mrb[95].mxu1 }
 0x834   : > { %v5992_v12 = vpop.f32.mrb[96].mxu1 }
 0x835   : > { %v5994_v34 = vpop.f32.mrb[97].mxu1 }
 0x838   : > { %v5997_v61 = vpop.f32.mrb[98].mxu1 }
 0x839   : > { %v5999_v16 = vpop.f32.mrb[99].mxu1 }
 0x83c   : > { %v6002_v18 = vpop.f32.mrb[100].mxu1 }
 0x83d   : > { %v6004_v45 = vpop.f32.mrb[101].mxu1 }
 0x840   : > { %v6007_v1 = vpop.f32.mrb[102].mxu1 }
 0x841   : > { %v6009_v7 = vpop.f32.mrb[103].mxu1 }
 0x844   : > { %v6012_v25 = vpop.f32.mrb[104].mxu1 }
 0x845   : > { %v6014_v10 = vpop.f32.mrb[105].mxu1 }
 0x848   : > { %v6017_v21 = vpop.f32.mrb[106].mxu1 }
 0x849   : > { %v6019_v53 = vpop.f32.mrb[107].mxu1 }
 0x84c   : > { %v6022_v35 = vpop.f32.mrb[108].mxu1 }
 0x84d   : > { %v6024_v15 = vpop.f32.mrb[109].mxu1 }
 0x850   : > { %v6027_v37 = vpop.f32.mrb[110].mxu1 }
 0x851   : > { %v6029_v4 = vpop.f32.mrb[111].mxu1 }
 0x854   : > { %v6032_v30 = vpop.f32.mrb[112].mxu1 }
 0x855   : > { %v6034_v5 = vpop.f32.mrb[113].mxu1 }
 0x858   : > { %v6037_v39 = vpop.f32.mrb[114].mxu1 }
 0x859   : > { %v6039_v20 = vpop.f32.mrb[115].mxu1 }
 0x85c   : > { %v6042_v44 = vpop.f32.mrb[116].mxu1 }
 0x85d   : > { %v6044_v48 = vpop.f32.mrb[117].mxu1 }
 0x85e   : > { %v6302_v48 = vpop.permute.xlu0 %6301 }
 0x860   : > { %v6047_v58 = vpop.f32.mrb[118].mxu1 }
 0x861   : > { %v6049_v26 = vpop.f32.mrb[119].mxu1 }
 0x862   : > { %v6312_v26 = vpop.permute.xlu0 %6311 }
 0x864   : > { %v6052_v11 = vpop.f32.mrb[120].mxu1 }
 0x865   : > { %v6054_v24 = vpop.f32.mrb[121].mxu1 }
 0x866   : > { %v6322_v24 = vpop.permute.xlu0 %6321 }
 0x868   : > { %v6057_v33 = vpop.f32.mrb[122].mxu1 }
 0x869   : > { %v6059_v36 = vpop.f32.mrb[123].mxu1 }
 0x86a   : > { %v6332_v36 = vpop.permute.xlu0 %6331 }
 0x86c   : > { %v19963_v17 = vpop.f32.mrb[124].mxu1 }
 0x86d   : > { %v6064_v0 = vpop.f32.mrb[125].mxu1 }
 0x870   : > { %v6067_v55 = vpop.f32.mrb[126].mxu1 }
 0x871   : > { %v6069_v19 = vpop.f32.mrb[127].mxu1 }
 0x874   : > { %v19965_v2 = vpop.f32.mrb[128].mxu1 }
 0x875   : > { %v6074_v52 = vpop.f32.mrb[129].mxu1 }
 0x876   : > { %v6342_v52 = vpop.permute.xlu0 %6341 }
 0x878   : > { %v6077_v50 = vpop.f32.mrb[130].mxu1 }
 0x879   : > { %v6079_v47 = vpop.f32.mrb[131].mxu1 }
 0x87c   : > { %v19967_v31 = vpop.f32.mrb[132].mxu1 }
 0x87d   : > { %v6084_v42 = vpop.f32.mrb[133].mxu1 }
 0x880   : > { %v19969_v49 = vpop.f32.mrb[134].mxu1 }
 0x881   : > { %v6089_v14 = vpop.f32.mrb[135].mxu1 }
 0x884   : > { %v14658_v56 = vpop.f32.mrb[136].mxu1 }
 0x885   : > { %v6163_v32 = vadd.f32 %v14658_v56, %v5987_v38  ;;  %v6157_v23 = vpop.f32.mrb[137].mxu1 }
 0x886   : > { %v6158_v46 = vadd.f32 %v6157_v23, %v5982_v57 }
 0x888   : > { %v14661_v28 = vpop.f32.mrb[138].mxu1  ;;  %14701 = vmatprep.mubr.msk.f32.mxu1 %vm6404_vm13, %v6158_v46 }
 0x889   : > { %v6173_v8 = vadd.f32 %v14661_v28, %v5997_v61  ;;  %v6167_v22 = vpop.f32.mrb[139].mxu1  ;;  %14702 = vmatmul.mubr.msk.f32.vlgmr.msra.gmra.mrb[158].mxu1 %vm6404_vm13, %v6163_v32 }
 0x88a   : > { %v6168_v51 = vadd.f32 %v6167_v22, %v5992_v12  ;;  %v6352_v22 = vpop.permute.xlu0 %6351 }
 0x88c   : > { %v14664_v60 = vpop.f32.mrb[140].mxu1  ;;  %14704 = vmatprep.mubr.msk.f32.mxu1 %vm6404_vm13, %v6168_v51 }
 0x88d   : > { %v6183_v62 = vadd.f32 %v14664_v60, %v6007_v1  ;;  %v6177_v54 = vpop.f32.mrb[141].mxu1  ;;  %14705 = vmatmul.mubr.msk.f32.gmra.mrb[160].mxu1 %vm6404_vm13, %v6173_v8 }
 0x88e   : > { %v6178_v6 = vadd.f32 %v6177_v54, %v6002_v18 }
 0x890   : > { %v14667_v59 = vpop.f32.mrb[142].mxu1  ;;  %14707 = vmatprep.mubr.msk.f32.mxu1 %vm6404_vm13, %v6178_v6 }
 0x891   : > { %v6193_v29 = vadd.f32 %v14667_v59, %v6017_v21  ;;  %v6187_v40 = vpop.f32.mrb[143].mxu1  ;;  %14708 = vmatmul.mubr.msk.f32.gmra.mrb[162].mxu1 %vm6404_vm13, %v6183_v62 }
 0x892   : > { %v6188_v43 = vadd.f32 %v6187_v40, %v6012_v25 }
 0x894   : > { %v14670_v9 = vpop.f32.mrb[144].mxu1  ;;  %14710 = vmatprep.mubr.msk.f32.mxu1 %vm6404_vm13, %v6188_v43  ;;  %v6362_v43 = vpop.permute.xlu0 %6361 }
 0x895   : > { %v6203_v3 = vadd.f32 %v14670_v9, %v6027_v37  ;;  %v6197_v41 = vpop.f32.mrb[145].mxu1  ;;  %14711 = vmatmul.mubr.msk.f32.gmra.mrb[164].mxu1 %vm6404_vm13, %v6193_v29 }
 0x896   : > { %v6198_v57 = vadd.f32 %v6197_v41, %v6022_v35 }
 0x898   : > { %v14673_v27 = vpop.f32.mrb[146].mxu1  ;;  %14713 = vmatprep.mubr.msk.f32.mxu1 %vm6404_vm13, %v6198_v57 }
 0x899   : > { %v6213_v38 = vadd.f32 %v14673_v27, %v6037_v39  ;;  %v6207_v63 = vpop.f32.mrb[147].mxu1  ;;  %14714 = vmatmul.mubr.msk.f32.gmra.mrb[166].mxu1 %vm6404_vm13, %v6203_v3 }
 0x89a   : > { %v6208_v12 = vadd.f32 %v6207_v63, %v6032_v30 }
 0x89c   : > { %v14676_v34 = vpop.f32.mrb[148].mxu1  ;;  %14716 = vmatprep.mubr.msk.f32.mxu1 %vm6404_vm13, %v6208_v12 }
 0x89d   : > { %v6223_v61 = vadd.f32 %v14676_v34, %v6047_v58  ;;  %v6217_v16 = vpop.f32.mrb[149].mxu1  ;;  %14717 = vmatmul.mubr.msk.f32.gmra.mrb[168].mxu1 %vm6404_vm13, %v6213_v38  ;;  %v6297_v58 = vpop.permute.xlu1 %6296 }
 0x89e   : > { %v6218_v18 = vadd.f32 %v6217_v16, %v6042_v44 }
 0x8a0   : > { %v14679_v45 = vpop.f32.mrb[150].mxu1  ;;  %14719 = vmatprep.mubr.msk.f32.mxu1 %vm6404_vm13, %v6218_v18 }
 0x8a1   : > { %v6233_v1 = vadd.f32 %v14679_v45, %v6057_v33  ;;  %v6227_v7 = vpop.f32.mrb[151].mxu1  ;;  %14720 = vmatmul.mubr.msk.f32.gmra.mrb[170].mxu1 %vm6404_vm13, %v6223_v61  ;;  %v6372_v45 = vpop.permute.xlu0 %6371 }
 0x8a2   : > { %v6228_v25 = vadd.f32 %v6227_v7, %v6052_v11  ;;  %v6307_v11 = vpop.permute.xlu1 %6306 }
 0x8a4   : > { %v14682_v10 = vpop.f32.mrb[152].mxu1  ;;  %14722 = vmatprep.mubr.msk.f32.mxu1 %vm6404_vm13, %v6228_v25 }
 0x8a5   : > { %v6243_v21 = vadd.f32 %v14682_v10, %v6067_v55  ;;  %v6237_v53 = vpop.f32.mrb[153].mxu1  ;;  %14723 = vmatmul.mubr.msk.f32.gmra.mrb[172].mxu1 %vm6404_vm13, %v6233_v1 }
 0x8a6   : > { %v6238_v35 = vadd.f32 %v6237_v53, %v19963_v17  ;;  %v6317_v33 = vpop.permute.xlu1 %6316 }
 0x8a8   : > { %v14685_v15 = vpop.f32.mrb[154].mxu1  ;;  %14725 = vmatprep.mubr.msk.f32.mxu1 %vm6404_vm13, %v6238_v35 }
 0x8a9   : > { %v6253_v37 = vadd.f32 %v14685_v15, %v6077_v50  ;;  %v6247_v4 = vpop.f32.mrb[155].mxu1  ;;  %14726 = vmatmul.mubr.msk.f32.gmra.mrb[174].mxu1 %vm6404_vm13, %v6243_v21 }
 0x8aa   : > { %v6248_v30 = vadd.f32 %v6247_v4, %v19965_v2  ;;  %v6327_v17 = vpop.permute.xlu1 %6326 }
 0x8ac   : > { %v14688_v5 = vpop.f32.mrb[156].mxu1  ;;  %14728 = vmatprep.mubr.msk.f32.mxu1 %vm6404_vm13, %v6248_v30 }
 0x8ad   : > { %v6263_v39 = vadd.f32 %v14688_v5, %v19969_v49  ;;  %v6257_v20 = vpop.f32.mrb[157].mxu1  ;;  %14729 = vmatmul.mubr.msk.f32.gmra.mrb[176].mxu1 %vm6404_vm13, %v6253_v37  ;;  %v6382_v37 = vpop.permute.xlu0 %6381 }
 0x8ae   : > { %v6258_v44 = vadd.f32 %v6257_v20, %v19967_v31  ;;  %v6337_v42 = vpop.permute.xlu1 %6336 }
 0x8b0   : > { %14731 = vmatprep.mubr.msk.f32.mxu1 %vm6404_vm13, %v6258_v44 }
 0x8b1   : > { %14732 = vmatmul.mubr.msk.f32.gmra.mrb[178].mxu1 %vm6404_vm13, %v6263_v39 }
 0x8b2   : > { %v6347_v60 = vpop.permute.xlu1 %6346 }
 0x8b6   : > { %v6357_v57 = vpop.permute.xlu1 %6356 }
 0x8ba   : > { %v6367_v7 = vpop.permute.xlu1 %6366 }
 0x8be   : > { %v6377_v39 = vpop.permute.xlu1 %6376 }
 0x95c   : > { %v14703_v0 = vpop.f32.mrb[158].mxu1 }
 0x95d   : > { %v6547_v55 = vadd.f32 %v14703_v0, %v6302_v48  ;;  %v6541_v19 = vpop.f32.mrb[159].mxu1  ;;  %v6387_v0 = vpop.permute.xlu1 %6386 }
 0x95e   : > { %v6542_v2 = vadd.f32 %v6541_v19, %v6297_v58 }
 0x960   : > { %v14706_v50 = vpop.f32.mrb[160].mxu1  ;;  %v19997_v47 = vpack.i.bf16 %v6547_v55, %v6542_v2  ;;  %v15229_v31 = vpack.c.bf16 %v6547_v55, %v6542_v2 }
 0x961   : > { %v6557_v49 = vadd.f32 %v14706_v50, %v6312_v26  ;;  %v6551_v14 = vpop.f32.mrb[161].mxu1 }
 0x962   : > { %v6552_v56 = vadd.f32 %v6551_v14, %v6307_v11  ;;  %15920 = vrot.lane.b32.xlu1 %v19997_v47, %s23517_s28  ;;  %15230 = vmatpush1.bf16.msra.mxu1 %v15229_v31 }
 0x963   : > { %15231 = vmatprep.subr.bf16.mxu1 %v23492_v13 }
 0x964   : > { %v14709_v32 = vpop.f32.mrb[162].mxu1  ;;  %v20002_v23 = vpack.i.bf16 %v6557_v49, %v6552_v56  ;;  %v15232_v46 = vpack.c.bf16 %v6557_v49, %v6552_v56  ;;  %v6651_v49 = vld [vmem:[%s23420_s11 + $0x8] sm:$0xff] }
 0x965   : > { %v6567_v28 = vadd.f32 %v14709_v32, %v6322_v24  ;;  %v6561_v8 = vpop.f32.mrb[163].mxu1  ;;  %13058 = vmatprep.mubr.msk.f32.mxu1 %vm6899_vm14, %v6651_v49  ;;  %v6680_v49 = vld [vmem:[%s23420_s11 + $0xf0] sm:$0xff] }
 0x966   : > { %v6562_v51 = vadd.f32 %v6561_v8, %v6317_v33  ;;  %15925 = vrot.lane.b32.xlu0 %v20002_v23, %s23517_s28  ;;  %15233 = vmatpush1.bf16.msra.mxu1 %v15232_v46 }
 0x967   : > { %15234 = vmatprep.subr.bf16.mxu1 %v23492_v13 }
 0x968   : > { %v14712_v62 = vpop.f32.mrb[164].mxu1  ;;  %v20007_v54 = vpack.i.bf16 %v6567_v28, %v6562_v51  ;;  %v15235_v6 = vpack.c.bf16 %v6567_v28, %v6562_v51  ;;  %v6397_v28 = vpop.permute.xlu1 %6396 }
 0x969   : > { %v6577_v59 = vadd.f32 %v14712_v62, %v6332_v36  ;;  %v6571_v29 = vpop.f32.mrb[165].mxu1  ;;  %v6392_v36 = vpop.permute.xlu0 %6391 }
 0x96a   : > { %v6572_v40 = vadd.f32 %v6571_v29, %v6327_v17  ;;  %15930 = vrot.lane.b32.xlu1 %v20007_v54, %s23517_s28  ;;  %15236 = vmatpush1.bf16.msra.mxu1 %v15235_v6  ;;  %v6650_v6 = vld [vmem:[%s23420_s11] sm:$0xff]  ;;  %v6655_v29 = vld [vmem:[%s23420_s11 + $0x28] sm:$0xff] }
 0x96b   : > { %15237 = vmatprep.subr.bf16.mxu1 %v23492_v13 }
 0x96c   : > { %v14715_v9 = vpop.f32.mrb[166].mxu1  ;;  %v20012_v3 = vpack.i.bf16 %v6577_v59, %v6572_v40  ;;  %v15238_v41 = vpack.c.bf16 %v6577_v59, %v6572_v40  ;;  %v6653_v59 = vld [vmem:[%s23420_s11 + $0x18] sm:$0xff]  ;;  %v6656_v40 = vld [vmem:[%s23420_s11 + $0x30] sm:$0xff] }
 0x96d   : > { %v6587_v27 = vadd.f32 %v14715_v9, %v6342_v52  ;;  %v6581_v38 = vpop.f32.mrb[167].mxu1  ;;  %v6402_v14 = vpop.permute.xlu0 %6401  ;;  %v6658_v9 = vld [vmem:[%s23420_s11 + $0x40] sm:$0xff] }
 0x96e   : > { %v6582_v63 = vadd.f32 %v6581_v38, %v6337_v42  ;;  %15935 = vrot.lane.b32.xlu0 %v20012_v3, %s23517_s28  ;;  %15239 = vmatpush1.bf16.msra.mxu1 %v15238_v41  ;;  %v12939_v42 = vld [vmem:[%s23420_s11 + $0x288] sm:$0xff] }
 0x96f   : > { %15240 = vmatprep.subr.bf16.mxu1 %v23492_v13  ;;  %13018 = vmatprep.mubr.msk.f32.mxu0 %vm6899_vm14, %v12939_v42  ;;  %v8243_v41 = vld [vmem:[%s23421_s12 + $0x8] sm:$0xff]  ;;  %v8262_v42 = vld [vmem:[%s23421_s12 + $0xa0] sm:$0xff] }
 0x970   : > { %v14718_v12 = vpop.f32.mrb[168].mxu1  ;;  %v20017_v34 = vpack.i.bf16 %v6587_v27, %v6582_v63  ;;  %v15241_v61 = vpack.c.bf16 %v6587_v27, %v6582_v63  ;;  %v6660_v27 = vld [vmem:[%s23420_s11 + $0x50] sm:$0xff]  ;;  %v6663_v38 = vld [vmem:[%s23420_s11 + $0x68] sm:$0xff]  ;;  %v8245_v63 = vld [vmem:[%s23421_s12 + $0x18] sm:$0xff] }
 0x971   : > { %v6597_v16 = vadd.f32 %v14718_v12, %v6352_v22  ;;  %v6591_v18 = vpop.f32.mrb[169].mxu1  ;;  %v8244_v12 = vld [vmem:[%s23421_s12 + $0x10] sm:$0xff] }
 0x972   : > { %v6592_v1 = vadd.f32 %v6591_v18, %v6347_v60  ;;  %15940 = vrot.lane.b32.xlu1 %v20017_v34, %s23517_s28  ;;  %15242 = vmatpush1.bf16.msra.mxu1 %v15241_v61  ;;  %v6665_v61 = vld [vmem:[%s23420_s11 + $0x78] sm:$0xff]  ;;  %v8246_v18 = vld [vmem:[%s23421_s12 + $0x20] sm:$0xff] }
 0x973   : > { %15243 = vmatprep.subr.bf16.mxu1 %v23492_v13 }
 0x974   : > { %v14721_v25 = vpop.f32.mrb[170].mxu1  ;;  %v20022_v10 = vpack.i.bf16 %v6597_v16, %v6592_v1  ;;  %v15244_v21 = vpack.c.bf16 %v6597_v16, %v6592_v1  ;;  %v8247_v16 = vld [vmem:[%s23421_s12 + $0x28] sm:$0xff] }
 0x975   : > { %v6607_v53 = vadd.f32 %v14721_v25, %v6362_v43  ;;  %v6601_v35 = vpop.f32.mrb[171].mxu1  ;;  %v6659_v43 = vld [vmem:[%s23420_s11 + $0x48] sm:$0xff]  ;;  %v8248_v25 = vld [vmem:[%s23421_s12 + $0x30] sm:$0xff] }
 0x976   : > { %v6602_v15 = vadd.f32 %v6601_v35, %v6357_v57  ;;  %15945 = vrot.lane.b32.xlu0 %v20022_v10, %s23517_s28  ;;  %15245 = vmatpush1.bf16.msra.mxu1 %v15244_v21  ;;  %v8242_v57 = vld [vmem:[%s23421_s12] sm:$0xff]  ;;  %v6667_v1 = vld [vmem:[%s23420_s11 + $0x88] sm:$0xff]  ;;  %v6669_v21 = vld [vmem:[%s23420_s11 + $0x98] sm:$0xff] }
 0x977   : > { %15246 = vmatprep.subr.bf16.mxu1 %v23492_v13  ;;  %v8250_v35 = vld [vmem:[%s23421_s12 + $0x40] sm:$0xff] }
 0x978   : > { %v14724_v4 = vpop.f32.mrb[172].mxu1  ;;  %v20027_v30 = vpack.i.bf16 %v6607_v53, %v6602_v15  ;;  %v15247_v5 = vpack.c.bf16 %v6607_v53, %v6602_v15  ;;  %v8251_v53 = vld [vmem:[%s23421_s12 + $0x48] sm:$0xff]  ;;  %v6668_v15 = vld [vmem:[%s23420_s11 + $0x90] sm:$0xff] }
 0x979   : > { %v6617_v20 = vadd.f32 %v14724_v4, %v6372_v45  ;;  %v6611_v44 = vpop.f32.mrb[173].mxu1  ;;  %v6664_v45 = vld [vmem:[%s23420_s11 + $0x70] sm:$0xff]  ;;  %v8253_v4 = vld [vmem:[%s23421_s12 + $0x58] sm:$0xff] }
 0x97a   : > { %v6612_v48 = vadd.f32 %v6611_v44, %v6367_v7  ;;  %15950 = vrot.lane.b32.xlu1 %v20027_v30, %s23517_s28  ;;  %15248 = vmatpush1.bf16.msra.mxu1 %v15247_v5  ;;  %v8249_v7 = vld [vmem:[%s23421_s12 + $0x38] sm:$0xff]  ;;  %v6670_v5 = vld [vmem:[%s23420_s11 + $0xa0] sm:$0xff] }
 0x97b   : > { %15249 = vmatprep.subr.bf16.mxu1 %v23492_v13  ;;  %v8254_v44 = vld [vmem:[%s23421_s12 + $0x60] sm:$0xff] }
 0x97c   : > { %v14727_v58 = vpop.f32.mrb[174].mxu1  ;;  %v15954_v26 = vpack.i.bf16 %v6617_v20, %v6612_v48  ;;  %v15250_v11 = vpack.c.bf16 %v6617_v20, %v6612_v48  ;;  %v8255_v20 = vld [vmem:[%s23421_s12 + $0x68] sm:$0xff]  ;;  %v6672_v48 = vld [vmem:[%s23420_s11 + $0xb0] sm:$0xff] }
 0x97d   : > { %v6627_v24 = vadd.f32 %v14727_v58, %v6382_v37  ;;  %v6621_v33 = vpop.f32.mrb[175].mxu1  ;;  %v6671_v37 = vld [vmem:[%s23420_s11 + $0xa8] sm:$0xff] }
 0x97e   : > { %v6622_v17 = vadd.f32 %v6621_v33, %v6377_v39  ;;  %15955 = vrot.lane.b32.xlu0 %v15954_v26, %s23517_s28  ;;  %15251 = vmatpush1.bf16.msra.mxu1 %v15250_v11  ;;  %v6673_v39 = vld [vmem:[%s23420_s11 + $0xb8] sm:$0xff]  ;;  %v6675_v58 = vld [vmem:[%s23420_s11 + $0xc8] sm:$0xff]  ;;  %v8256_v11 = vld [vmem:[%s23421_s12 + $0x70] sm:$0xff] }
 0x97f   : > { %15252 = vmatprep.subr.bf16.mxu1 %v23492_v13  ;;  %v6677_v33 = vld [vmem:[%s23420_s11 + $0xd8] sm:$0xff] }
 0x980   : > { %v14730_v55 = vpop.f32.mrb[176].mxu1  ;;  %v15959_v19 = vpack.i.bf16 %v6627_v24, %v6622_v17  ;;  %v15253_v2 = vpack.c.bf16 %v6627_v24, %v6622_v17  ;;  %v6674_v24 = vld [vmem:[%s23420_s11 + $0xc0] sm:$0xff] }
 0x981   : > { %v6637_v52 = vadd.f32 %v14730_v55, %v6392_v36  ;;  %v6631_v50 = vpop.f32.mrb[177].mxu1  ;;  %v8259_v36 = vld [vmem:[%s23421_s12 + $0x88] sm:$0xff]  ;;  %v8258_v17 = vld [vmem:[%s23421_s12 + $0x80] sm:$0xff] }
 0x982   : > { %v6632_v31 = vadd.f32 %v6631_v50, %v6387_v0  ;;  %15960 = vrot.lane.b32.xlu1 %v15959_v19, %s23517_s28  ;;  %15254 = vmatpush1.bf16.msra.mxu1 %v15253_v2  ;;  %v6676_v0 = vld [vmem:[%s23420_s11 + $0xd0] sm:$0xff]  ;;  %v6679_v55 = vld [vmem:[%s23420_s11 + $0xe8] sm:$0xff]  ;;  %v6681_v50 = vld [vmem:[%s23420_s11 + $0xf8] sm:$0xff] }
 0x983   : > { %15255 = vmatprep.subr.bf16.mxu1 %v23492_v13  ;;  %v8260_v2 = vld [vmem:[%s23421_s12 + $0x90] sm:$0xff] }
 0x984   : > { %v14733_v56 = vpop.f32.mrb[178].mxu1  ;;  %v15964_v32 = vpack.i.bf16 %v6637_v52, %v6632_v31  ;;  %v15256_v46 = vpack.c.bf16 %v6637_v52, %v6632_v31  ;;  %v6678_v52 = vld [vmem:[%s23420_s11 + $0xe0] sm:$0xff]  ;;  %v8263_v31 = vld [vmem:[%s23421_s12 + $0xa8] sm:$0xff] }
 0x985   : > { %v6647_v8 = vadd.f32 %v14733_v56, %v6402_v14  ;;  %v6641_v22 = vpop.f32.mrb[179].mxu1  ;;  %v6683_v14 = vld [vmem:[%s23420_s11 + $0x108] sm:$0xff]  ;;  %v8265_v56 = vld [vmem:[%s23421_s12 + $0xb8] sm:$0xff] }
 0x986   : > { %v6642_v51 = vadd.f32 %v6641_v22, %v6397_v28  ;;  %15965 = vrot.lane.b32.xlu0 %v15964_v32, %s23517_s28  ;;  %15257 = vmatpush1.bf16.msra.mxu1 %v15256_v46  ;;  %v6682_v46 = vld [vmem:[%s23420_s11 + $0x100] sm:$0xff]  ;;  %v6685_v28 = vld [vmem:[%s23420_s11 + $0x118] sm:$0xff] }
 0x987   : > { %15258 = vmatprep.subr.bf16.mxu1 %v23492_v13  ;;  %v8266_v22 = vld [vmem:[%s23421_s12 + $0xc0] sm:$0xff] }
 0x988   : > { %v15969_v60 = vpack.i.bf16 %v6647_v8, %v6642_v51  ;;  %v15259_v62 = vpack.c.bf16 %v6647_v8, %v6642_v51  ;;  %v8267_v8 = vld [vmem:[%s23421_s12 + $0xc8] sm:$0xff]  ;;  %v6684_v51 = vld [vmem:[%s23420_s11 + $0x110] sm:$0xff] }
 0x98a   : > { %15975 = vrot.lane.b32.xlu0 %v19997_v47, %s23521_s1  ;;  %15970 = vrot.lane.b32.xlu1 %v15969_v60, %s23517_s28  ;;  %v6652_v47 = vld [vmem:[%s23420_s11 + $0x10] sm:$0xff] }
 0x98b   : > { %15260 = vmatpush1.bf16.msra.mxu1 %v15259_v62  ;;  %v8269_v62 = vld [vmem:[%s23421_s12 + $0xd8] sm:$0xff] }
 0x98c   : > { %15294 = vmatprep.subr.bf16.mxu1 %v23492_v13 }
 0x98e   : > { %15985 = vrot.lane.b32.xlu0 %v20007_v54, %s23521_s1  ;;  %15980 = vrot.lane.b32.xlu1 %v20002_v23, %s23521_s1  ;;  %v6654_v23 = vld [vmem:[%s23420_s11 + $0x20] sm:$0xff]  ;;  %v6657_v54 = vld [vmem:[%s23420_s11 + $0x38] sm:$0xff] }
 0x98f   : > { %7470 = vmatmul.mubr.f32.vlgmr.msra.gmra.mrb[180].mxu1 %v6650_v6  ;;  %v8268_v6 = vld [vmem:[%s23421_s12 + $0xd0] sm:$0xff] }
 0x990   : > { %13059 = vmatprep.mubr.msk.f32.mxu1 %vm6899_vm14, %v6653_v59 }
 0x992   : > { %15995 = vrot.lane.b32.xlu0 %v20017_v34, %s23521_s1  ;;  %15990 = vrot.lane.b32.xlu1 %v20012_v3, %s23521_s1  ;;  %v6661_v3 = vld [vmem:[%s23420_s11 + $0x58] sm:$0xff]  ;;  %v6662_v34 = vld [vmem:[%s23420_s11 + $0x60] sm:$0xff] }
 0x993   : > { %7475 = vmatmul.mubr.f32.gmra.mrb[182].mxu1 %v6652_v47  ;;  %v6686_v47 = vld [vmem:[%s23420_s11 + $0x120] sm:$0xff] }
 0x994   : > { %13060 = vmatprep.mubr.msk.f32.mxu1 %vm6899_vm14, %v6655_v29 }
 0x996   : > { %16005 = vrot.lane.b32.xlu0 %v20027_v30, %s23521_s1  ;;  %16000 = vrot.lane.b32.xlu1 %v20022_v10, %s23521_s1  ;;  %v6666_v10 = vld [vmem:[%s23420_s11 + $0x80] sm:$0xff]  ;;  %v8252_v30 = vld [vmem:[%s23421_s12 + $0x50] sm:$0xff] }
 0x997   : > { %7480 = vmatmul.mubr.f32.gmra.mrb[184].mxu1 %v6654_v23 }
 0x998   : > { %13061 = vmatprep.mubr.msk.f32.mxu1 %vm6899_vm14, %v6657_v54  ;;  %v6689_v54 = vld [vmem:[%s23420_s11 + $0x138] sm:$0xff] }
 0x99a   : > { %16015 = vrot.lane.b32.xlu0 %v15959_v19, %s23521_s1  ;;  %16010 = vrot.lane.b32.xlu1 %v15954_v26, %s23521_s1  ;;  %v8257_v26 = vld [vmem:[%s23421_s12 + $0x78] sm:$0xff] }
 0x99b   : > { %7485 = vmatmul.mubr.f32.gmra.mrb[186].mxu1 %v6656_v40  ;;  %v8261_v19 = vld [vmem:[%s23421_s12 + $0x98] sm:$0xff] }
 0x99c   : > { %13062 = vmatprep.mubr.msk.f32.mxu1 %vm6899_vm14, %v6659_v43  ;;  %v8271_v43 = vld [vmem:[%s23421_s12 + $0xe8] sm:$0xff] }
 0x99e   : > { %16025 = vrot.lane.b32.xlu0 %v15969_v60, %s23521_s1  ;;  %16020 = vrot.lane.b32.xlu1 %v15964_v32, %s23521_s1  ;;  %v8264_v32 = vld [vmem:[%s23421_s12 + $0xb0] sm:$0xff]  ;;  %v6687_v60 = vld [vmem:[%s23420_s11 + $0x128] sm:$0xff] }
 0x99f   : > { %7490 = vmatmul.mubr.f32.gmra.mrb[188].mxu1 %v6658_v9  ;;  %v8270_v9 = vld [vmem:[%s23421_s12 + $0xe0] sm:$0xff] }
 0x9a0   : > { %13063 = vmatprep.mubr.msk.f32.mxu1 %vm6899_vm14, %v6661_v3 }
 0x9a2   : > { %8289 = vperm.xlu0 %15797, %v8243_v41   ;;  %8284 = vperm.xlu1 %15798, %v8242_v57   ;;  %v6688_v41 = vld [vmem:[%s23420_s11 + $0x130] sm:$0xff] }
 0x9a3   : > { %7495 = vmatmul.mubr.f32.gmra.mrb[190].mxu1 %v6660_v27 }
 0x9a4   : > { %13064 = vmatprep.mubr.msk.f32.mxu1 %vm6899_vm14, %v6663_v38  ;;  %v6691_v38 = vld [vmem:[%s23420_s11 + $0x148] sm:$0xff] }
 0x9a6   : > { %8299 = vperm.xlu0 %15797, %v8245_v63   ;;  %8294 = vperm.xlu1 %15798, %v8244_v12   ;;  %v8273_v12 = vld [vmem:[%s23421_s12 + $0xf8] sm:$0xff] }
 0x9a7   : > { %7500 = vmatmul.mubr.f32.gmra.mrb[192].mxu1 %v6662_v34  ;;  %v8272_v34 = vld [vmem:[%s23421_s12 + $0xf0] sm:$0xff] }
 0x9a8   : > { %13065 = vmatprep.mubr.msk.f32.mxu1 %vm6899_vm14, %v6665_v61 }
 0x9aa   : > { %8309 = vperm.xlu0 %15797, %v8247_v16   ;;  %8304 = vperm.xlu1 %15798, %v8246_v18   ;;  %v6690_v16 = vld [vmem:[%s23420_s11 + $0x140] sm:$0xff] }
 0x9ab   : > { %7505 = vmatmul.mubr.f32.gmra.mrb[194].mxu1 %v6664_v45 }
 0x9ac   : > { %13066 = vmatprep.mubr.msk.f32.mxu1 %vm6899_vm14, %v6667_v1  ;;  %v6693_v1 = vld [vmem:[%s23420_s11 + $0x158] sm:$0xff] }
 0x9ae   : > { %8319 = vperm.xlu0 %15797, %v8249_v7   ;;  %8314 = vperm.xlu1 %15798, %v8248_v25   ;;  %v8275_v25 = vld [vmem:[%s23421_s12 + $0x108] sm:$0xff] }
 0x9af   : > { %7510 = vmatmul.mubr.f32.gmra.mrb[196].mxu1 %v6666_v10  ;;  %v8274_v10 = vld [vmem:[%s23421_s12 + $0x100] sm:$0xff] }
 0x9b0   : > { %13067 = vmatprep.mubr.msk.f32.mxu1 %vm6899_vm14, %v6669_v21 }
 0x9b2   : > { %8329 = vperm.xlu0 %15797, %v8251_v53   ;;  %8324 = vperm.xlu1 %15798, %v8250_v35   ;;  %v6692_v53 = vld [vmem:[%s23420_s11 + $0x150] sm:$0xff] }
 0x9b3   : > { %7515 = vmatmul.mubr.f32.gmra.mrb[198].mxu1 %v6668_v15 }
 0x9b4   : > { %13068 = vmatprep.mubr.msk.f32.mxu1 %vm6899_vm14, %v6671_v37  ;;  %v6695_v37 = vld [vmem:[%s23420_s11 + $0x168] sm:$0xff] }
 0x9b6   : > { %8339 = vperm.xlu0 %15797, %v8253_v4   ;;  %8334 = vperm.xlu1 %15798, %v8252_v30   ;;  %v8277_v30 = vld [vmem:[%s23421_s12 + $0x118] sm:$0xff] }
 0x9b7   : > { %7520 = vmatmul.mubr.f32.gmra.mrb[200].mxu1 %v6670_v5  ;;  %v8276_v5 = vld [vmem:[%s23421_s12 + $0x110] sm:$0xff] }
 0x9b8   : > { %13069 = vmatprep.mubr.msk.f32.mxu1 %vm6899_vm14, %v6673_v39 }
 0x9ba   : > { %8349 = vperm.xlu0 %15797, %v8255_v20   ;;  %8344 = vperm.xlu1 %15798, %v8254_v44   ;;  %v6694_v20 = vld [vmem:[%s23420_s11 + $0x160] sm:$0xff] }
 0x9bb   : > { %7525 = vmatmul.mubr.f32.gmra.mrb[202].mxu1 %v6672_v48 }
 0x9bc   : > { %13070 = vmatprep.mubr.msk.f32.mxu1 %vm6899_vm14, %v6675_v58  ;;  %v6697_v58 = vld [vmem:[%s23420_s11 + $0x178] sm:$0xff] }
 0x9be   : > { %8359 = vperm.xlu0 %15797, %v8257_v26   ;;  %8354 = vperm.xlu1 %15798, %v8256_v11   ;;  %v8279_v11 = vld [vmem:[%s23421_s12 + $0x128] sm:$0xff] }
 0x9bf   : > { %7530 = vmatmul.mubr.f32.gmra.mrb[204].mxu1 %v6674_v24  ;;  %v8278_v24 = vld [vmem:[%s23421_s12 + $0x120] sm:$0xff] }
 0x9c0   : > { %13071 = vmatprep.mubr.msk.f32.mxu1 %vm6899_vm14, %v6677_v33 }
 0x9c2   : > { %8369 = vperm.xlu0 %15797, %v8259_v36   ;;  %8364 = vperm.xlu1 %15798, %v8258_v17   ;;  %v6696_v36 = vld [vmem:[%s23420_s11 + $0x170] sm:$0xff] }
 0x9c3   : > { %7535 = vmatmul.mubr.f32.gmra.mrb[206].mxu1 %v6676_v0 }
 0x9c4   : > { %13072 = vmatprep.mubr.msk.f32.mxu1 %vm6899_vm14, %v6679_v55  ;;  %v6699_v55 = vld [vmem:[%s23420_s11 + $0x188] sm:$0xff] }
 0x9c6   : > { %8379 = vperm.xlu0 %15797, %v8261_v19   ;;  %8374 = vperm.xlu1 %15798, %v8260_v2   ;;  %v8281_v2 = vld [vmem:[%s23421_s12 + $0x138] sm:$0xff] }
 0x9c7   : > { %7540 = vmatmul.mubr.f32.gmra.mrb[208].mxu1 %v6678_v52  ;;  %v8280_v52 = vld [vmem:[%s23421_s12 + $0x130] sm:$0xff] }
 0x9c8   : > { %13073 = vmatprep.mubr.msk.f32.mxu1 %vm6899_vm14, %v6681_v50 }
 0x9ca   : > { %8389 = vperm.xlu0 %15797, %v8263_v31   ;;  %8384 = vperm.xlu1 %15798, %v8262_v42   ;;  %v6698_v31 = vld [vmem:[%s23420_s11 + $0x180] sm:$0xff] }
 0x9cb   : > { %7545 = vmatmul.mubr.f32.gmra.mrb[210].mxu1 %v6680_v49 }
 0x9cc   : > { %13074 = vmatprep.mubr.msk.f32.mxu1 %vm6899_vm14, %v6683_v14  ;;  %v6701_v14 = vld [vmem:[%s23420_s11 + $0x198] sm:$0xff] }
 0x9ce   : > { %8399 = vperm.xlu0 %15797, %v8265_v56   ;;  %8394 = vperm.xlu1 %15798, %v8264_v32   ;;  %v9017_v32 = vld [vmem:[%s23424_s15 + $0x8] sm:$0xff] }
 0x9cf   : > { %7550 = vmatmul.mubr.f32.gmra.mrb[212].mxu1 %v6682_v46  ;;  %v9016_v46 = vld [vmem:[%s23424_s15] sm:$0xff] }
 0x9d0   : > { %13075 = vmatprep.mubr.msk.f32.mxu1 %vm6899_vm14, %v6685_v28 }
 0x9d2   : > { %8409 = vperm.xlu0 %15797, %v8267_v8   ;;  %8404 = vperm.xlu1 %15798, %v8266_v22   ;;  %v6700_v8 = vld [vmem:[%s23420_s11 + $0x190] sm:$0xff] }
 0x9d3   : > { %7555 = vmatmul.mubr.f32.gmra.mrb[214].mxu1 %v6684_v51 }
 0x9d4   : > { %v15921_v59 = vpop.permute.xlu1 %15920  ;;  %13076 = vmatprep.mubr.msk.f32.mxu1 %vm6899_vm14, %v6687_v60  ;;  %v6703_v60 = vld [vmem:[%s23420_s11 + $0x1a8] sm:$0xff] }
 0x9d5   : > { %v15923_v29 = vunpack.i.h.bf16 %v15921_v59  ;;  %v15922_v23 = vunpack.i.l.bf16 %v15921_v59  ;;  %v9018_v59 = vld [vmem:[%s23424_s15 + $0x10] sm:$0xff] }
 0x9d6   : > { %8419 = vperm.xlu0 %15797, %v8269_v62   ;;  %8414 = vperm.xlu1 %15798, %v8268_v6   ;;  %v9019_v6 = vld [vmem:[%s23424_s15 + $0x18] sm:$0xff] }
 0x9d7   : > { %v15196_v40 = vpack.c.bf16 %v15923_v29, %v15922_v23  ;;  %7560 = vmatmul.mubr.f32.gmra.mrb[216].mxu1 %v6686_v47  ;;  %v6702_v29 = vld [vmem:[%s23420_s11 + $0x1a0] sm:$0xff] }
 0x9d8   : > { %v15926_v3 = vpop.permute.xlu0 %15925  ;;  %13077 = vmatprep.mubr.msk.f32.mxu1 %vm6899_vm14, %v6689_v54 }
 0x9d9   : > { %v15928_v57 = vunpack.i.h.bf16 %v15926_v3  ;;  %v15927_v27 = vunpack.i.l.bf16 %v15926_v3  ;;  %15197 = vmatpush1.bf16.msra.mxu0 %v15196_v40  ;;  %v6705_v40 = vld [vmem:[%s23420_s11 + $0x1b8] sm:$0xff]  ;;  %v9020_v3 = vld [vmem:[%s23424_s15 + $0x20] sm:$0xff] }
 0x9da   : > { %8429 = vperm.xlu0 %15797, %v8271_v43   ;;  %8424 = vperm.xlu1 %15798, %v8270_v9   ;;  %v9021_v9 = vld [vmem:[%s23424_s15 + $0x28] sm:$0xff] }
 0x9db   : > { %v15199_v63 = vpack.c.bf16 %v15928_v57, %v15927_v27  ;;  %15198 = vmatprep.subr.bf16.mxu0 %v23492_v13  ;;  %7565 = vmatmul.mubr.f32.gmra.mrb[218].mxu1 %v6688_v41  ;;  %v6704_v57 = vld [vmem:[%s23420_s11 + $0x1b0] sm:$0xff] }
 0x9dc   : > { %v15931_v61 = vpop.permute.xlu1 %15930  ;;  %13078 = vmatprep.mubr.msk.f32.mxu1 %vm6899_vm14, %v6691_v38 }
 0x9dd   : > { %v15933_v18 = vunpack.i.h.bf16 %v15931_v61  ;;  %v15932_v45 = vunpack.i.l.bf16 %v15931_v61  ;;  %15200 = vmatpush1.bf16.msra.mxu0 %v15199_v63  ;;  %v6707_v63 = vld [vmem:[%s23420_s11 + $0x1c8] sm:$0xff]  ;;  %v9022_v61 = vld [vmem:[%s23424_s15 + $0x30] sm:$0xff] }
 0x9de   : > { %8439 = vperm.xlu0 %15797, %v8273_v12   ;;  %8434 = vperm.xlu1 %15798, %v8272_v34   ;;  %v9023_v34 = vld [vmem:[%s23424_s15 + $0x38] sm:$0xff] }
 0x9df   : > { %v15202_v7 = vpack.c.bf16 %v15933_v18, %v15932_v45  ;;  %15201 = vmatprep.subr.bf16.mxu0 %v23492_v13  ;;  %7570 = vmatmul.mubr.f32.gmra.mrb[220].mxu1 %v6690_v16  ;;  %v6706_v45 = vld [vmem:[%s23420_s11 + $0x1c0] sm:$0xff] }
 0x9e0   : > { %v15936_v21 = vpop.permute.xlu0 %15935  ;;  %13079 = vmatprep.mubr.msk.f32.mxu1 %vm6899_vm14, %v6693_v1 }
 0x9e1   : > { %v15938_v35 = vunpack.i.h.bf16 %v15936_v21  ;;  %v15937_v15 = vunpack.i.l.bf16 %v15936_v21  ;;  %15203 = vmatpush1.bf16.msra.mxu0 %v15202_v7 }
 0x9e2   : > { %8449 = vperm.xlu0 %15797, %v8275_v25   ;;  %8444 = vperm.xlu1 %15798, %v8274_v10   ;;  %v6709_v25 = vld [vmem:[%s23420_s11 + $0x1d8] sm:$0xff] }
 0x9e3   : > { %v15205_v4 = vpack.c.bf16 %v15938_v35, %v15937_v15  ;;  %15204 = vmatprep.subr.bf16.mxu0 %v23492_v13  ;;  %7575 = vmatmul.mubr.f32.gmra.mrb[222].mxu1 %v6692_v53  ;;  %v9025_v35 = vld [vmem:[%s23424_s15 + $0x48] sm:$0xff]  ;;  %v9024_v15 = vld [vmem:[%s23424_s15 + $0x40] sm:$0xff] }
 0x9e4   : > { %v15941_v39 = vpop.permute.xlu1 %15940  ;;  %13080 = vmatprep.mubr.msk.f32.mxu1 %vm6899_vm14, %v6695_v37 }
 0x9e5   : > { %v15943_v44 = vunpack.i.h.bf16 %v15941_v39  ;;  %v15942_v48 = vunpack.i.l.bf16 %v15941_v39  ;;  %15206 = vmatpush1.bf16.msra.mxu0 %v15205_v4  ;;  %v6708_v4 = vld [vmem:[%s23420_s11 + $0x1d0] sm:$0xff]  ;;  %v12941_v39 = vld [vmem:[%s23420_s11 + $0x298] sm:$0xff] }
 0x9e6   : > { %8459 = vperm.xlu0 %15797, %v8277_v30   ;;  %8454 = vperm.xlu1 %15798, %v8276_v5   ;;  %v12938_v30 = vld [vmem:[%s23420_s11 + $0x280] sm:$0xff]  ;;  %v6711_v5 = vld [vmem:[%s23420_s11 + $0x1e8] sm:$0xff] }
 0x9e7   : > { %v15208_v26 = vpack.c.bf16 %v15943_v44, %v15942_v48  ;;  %15207 = vmatprep.subr.bf16.mxu0 %v23492_v13  ;;  %7580 = vmatmul.mubr.f32.gmra.mrb[224].mxu1 %v6694_v20 }
 0x9e8   : > { %v15946_v33 = vpop.permute.xlu0 %15945  ;;  %13081 = vmatprep.mubr.msk.f32.mxu1 %vm6899_vm14, %v6697_v58  ;;  %v9027_v58 = vld [vmem:[%s23424_s15 + $0x58] sm:$0xff] }
 0x9e9   : > { %v15948_v17 = vunpack.i.h.bf16 %v15946_v33  ;;  %v15947_v0 = vunpack.i.l.bf16 %v15946_v33  ;;  %15209 = vmatpush1.bf16.msra.mxu0 %v15208_v26  ;;  %v9026_v26 = vld [vmem:[%s23424_s15 + $0x50] sm:$0xff] }
 0x9ea   : > { %8469 = vperm.xlu0 %15797, %v8279_v11   ;;  %8464 = vperm.xlu1 %15798, %v8278_v24   ;;  %v6710_v24 = vld [vmem:[%s23420_s11 + $0x1e0] sm:$0xff]  ;;  %v12940_v33 = vld [vmem:[%s23420_s11 + $0x290] sm:$0xff] }
 0x9eb   : > { %v15211_v19 = vpack.c.bf16 %v15948_v17, %v15947_v0  ;;  %15210 = vmatprep.subr.bf16.mxu0 %v23492_v13  ;;  %7585 = vmatmul.mubr.f32.gmra.mrb[226].mxu1 %v6696_v36  ;;  %v6713_v36 = vld [vmem:[%s23420_s11 + $0x1f8] sm:$0xff]  ;;  %v12943_v17 = vld [vmem:[%s23420_s11 + $0x2a8] sm:$0xff] }
 0x9ec   : > { %v15951_v50 = vpop.permute.xlu1 %15950  ;;  %13082 = vmatprep.mubr.msk.f32.mxu1 %vm6899_vm14, %v6699_v55 }
 0x9ed   : > { %v15953_v42 = vunpack.i.h.bf16 %v15951_v50  ;;  %v15952_v49 = vunpack.i.l.bf16 %v15951_v50  ;;  %15212 = vmatpush1.bf16.msra.mxu0 %v15211_v19 }
 0x9ee   : > { %8479 = vperm.xlu0 %15797, %v8281_v2   ;;  %8474 = vperm.xlu1 %15798, %v8280_v52   ;;  %v9029_v2 = vld [vmem:[%s23424_s15 + $0x68] sm:$0xff]  ;;  %v9028_v52 = vld [vmem:[%s23424_s15 + $0x60] sm:$0xff] }
 0x9ef   : > { %v15214_v56 = vpack.c.bf16 %v15953_v42, %v15952_v49  ;;  %15213 = vmatprep.subr.bf16.mxu0 %v23492_v13  ;;  %7590 = vmatmul.mubr.f32.gmra.mrb[228].mxu1 %v6698_v31  ;;  %v6712_v31 = vld [vmem:[%s23420_s11 + $0x1f0] sm:$0xff]  ;;  %v12942_v42 = vld [vmem:[%s23420_s11 + $0x2a0] sm:$0xff]  ;;  %v6715_v49 = vld [vmem:[%s23420_s11 + $0x208] sm:$0xff] }
 0x9f0   : > { %v15956_v28 = vpop.permute.xlu0 %15955  ;;  %13083 = vmatprep.mubr.msk.f32.mxu1 %vm6899_vm14, %v6701_v14  ;;  %v12945_v14 = vld [vmem:[%s23420_s11 + $0x2b8] sm:$0xff] }
 0x9f1   : > { %v15958_v22 = vunpack.i.h.bf16 %v15956_v28  ;;  %v15957_v51 = vunpack.i.l.bf16 %v15956_v28  ;;  %15215 = vmatpush1.bf16.msra.mxu0 %v15214_v56  ;;  %v9031_v28 = vld [vmem:[%s23424_s15 + $0x78] sm:$0xff] }
 0x9f2   : > { %9043 = vperm.xlu0 %15797, %v9017_v32   ;;  %9038 = vperm.xlu1 %15798, %v9016_v46  }
 0x9f3   : > { %v15217_v62 = vpack.c.bf16 %v15958_v22, %v15957_v51  ;;  %15216 = vmatprep.subr.bf16.mxu0 %v23492_v13  ;;  %7595 = vmatmul.mubr.f32.gmra.mrb[230].mxu1 %v6700_v8  ;;  %v9030_v8 = vld [vmem:[%s23424_s15 + $0x70] sm:$0xff]  ;;  %v6714_v51 = vld [vmem:[%s23420_s11 + $0x200] sm:$0xff] }
 0x9f4   : > { %v15961_v47 = vpop.permute.xlu1 %15960  ;;  %13084 = vmatprep.mubr.msk.f32.mxu1 %vm6899_vm14, %v6703_v60  ;;  %v12944_v60 = vld [vmem:[%s23420_s11 + $0x2b0] sm:$0xff] }
 0x9f5   : > { %v15963_v23 = vunpack.i.h.bf16 %v15961_v47  ;;  %v15962_v54 = vunpack.i.l.bf16 %v15961_v47  ;;  %15218 = vmatpush1.bf16.msra.mxu0 %v15217_v62  ;;  %v6717_v62 = vld [vmem:[%s23420_s11 + $0x218] sm:$0xff] }
 0x9f6   : > { %9053 = vperm.xlu0 %15797, %v9019_v6   ;;  %9048 = vperm.xlu1 %15798, %v9018_v59   ;;  %v12947_v6 = vld [vmem:[%s23420_s11 + $0x2c8] sm:$0xff] }
 0x9f7   : > { %v15220_v43 = vpack.c.bf16 %v15963_v23, %v15962_v54  ;;  %15219 = vmatprep.subr.bf16.mxu0 %v23492_v13  ;;  %7600 = vmatmul.mubr.f32.gmra.mrb[232].mxu1 %v6702_v29  ;;  %v9033_v23 = vld [vmem:[%s23424_s15 + $0x88] sm:$0xff]  ;;  %v9032_v54 = vld [vmem:[%s23424_s15 + $0x80] sm:$0xff] }
 0x9f8   : > { %v15966_v41 = vpop.permute.xlu0 %15965  ;;  %13085 = vmatprep.mubr.msk.f32.mxu1 %vm6899_vm14, %v6705_v40 }
 0x9f9   : > { %v15968_v27 = vunpack.i.h.bf16 %v15966_v41  ;;  %v15967_v38 = vunpack.i.l.bf16 %v15966_v41  ;;  %15221 = vmatpush1.bf16.msra.mxu0 %v15220_v43  ;;  %v6716_v43 = vld [vmem:[%s23420_s11 + $0x210] sm:$0xff]  ;;  %v12949_v41 = vld [vmem:[%s23420_s11 + $0x2d8] sm:$0xff] }
 0x9fa   : > { %9063 = vperm.xlu0 %15797, %v9021_v9   ;;  %9058 = vperm.xlu1 %15798, %v9020_v3   ;;  %v12946_v9 = vld [vmem:[%s23420_s11 + $0x2c0] sm:$0xff]  ;;  %v6719_v3 = vld [vmem:[%s23420_s11 + $0x228] sm:$0xff] }
 0x9fb   : > { %v15223_v12 = vpack.c.bf16 %v15968_v27, %v15967_v38  ;;  %15222 = vmatprep.subr.bf16.mxu0 %v23492_v13  ;;  %7605 = vmatmul.mubr.f32.gmra.mrb[234].mxu1 %v6704_v57 }
 0x9fc   : > { %v15976_v16 = vpop.permute.xlu0 %15975  ;;  %v15971_v18 = vpop.permute.xlu1 %15970  ;;  %13086 = vmatprep.mubr.msk.f32.mxu1 %vm6899_vm14, %v6707_v63  ;;  %v9035_v63 = vld [vmem:[%s23424_s15 + $0x98] sm:$0xff] }
 0x9fd   : > { %v15973_v1 = vunpack.i.h.bf16 %v15971_v18  ;;  %v15972_v7 = vunpack.i.l.bf16 %v15971_v18  ;;  %15224 = vmatpush1.bf16.msra.mxu0 %v15223_v12  ;;  %v15978_v10 = vunpack.i.h.bf16 %v15976_v16  ;;  %v15977_v21 = vunpack.i.l.bf16 %v15976_v16  ;;  %v9034_v12 = vld [vmem:[%s23424_s15 + $0x90] sm:$0xff]  ;;  %v6721_v18 = vld [vmem:[%s23420_s11 + $0x238] sm:$0xff] }
 0x9fe   : > { %9073 = vperm.xlu0 %15797, %v9023_v34   ;;  %9068 = vperm.xlu1 %15798, %v9022_v61   ;;  %v6718_v61 = vld [vmem:[%s23420_s11 + $0x220] sm:$0xff]  ;;  %v12948_v16 = vld [vmem:[%s23420_s11 + $0x2d0] sm:$0xff] }
 0x9ff   : > { %v15226_v53 = vpack.c.bf16 %v15973_v1, %v15972_v7  ;;  %15225 = vmatprep.subr.bf16.mxu0 %v23492_v13  ;;  %7610 = vmatmul.mubr.f32.gmra.mrb[236].mxu1 %v6706_v45  ;;  %v15262_v20 = vpack.c.bf16 %v15978_v10, %v15977_v21  ;;  %v12951_v45 = vld [vmem:[%s23420_s11 + $0x2e8] sm:$0xff]  ;;  %v6720_v21 = vld [vmem:[%s23420_s11 + $0x230] sm:$0xff] }
 0xa00   : > { %v15981_v37 = vpop.permute.xlu1 %15980  ;;  %13087 = vmatprep.mubr.msk.f32.mxu1 %vm6899_vm14, %v6709_v25  ;;  %v15986_v11 = vpop.permute.xlu0 %15985 }
 0xa01   : > { %15227 = vmatpush1.bf16.msra.mxu0 %v15226_v53  ;;  %v15983_v44 = vunpack.i.h.bf16 %v15981_v37  ;;  %v15982_v48 = vunpack.i.l.bf16 %v15981_v37  ;;  %v15988_v0 = vunpack.i.h.bf16 %v15986_v11  ;;  %v15987_v55 = vunpack.i.l.bf16 %v15986_v11  ;;  %v12950_v53 = vld [vmem:[%s23420_s11 + $0x2e0] sm:$0xff] }
 0xa02   : > { %9083 = vperm.xlu0 %15797, %v9025_v35   ;;  %9078 = vperm.xlu1 %15798, %v9024_v15   ;;  %v6723_v35 = vld [vmem:[%s23420_s11 + $0x248] sm:$0xff]  ;;  %v12953_v15 = vld [vmem:[%s23420_s11 + $0x2f8] sm:$0xff] }
 0xa03   : > { %15261 = vmatprep.subr.bf16.mxu0 %v23492_v13  ;;  %7615 = vmatmul.mubr.f32.gmra.mrb[238].mxu1 %v6708_v4  ;;  %v15265_v19 = vpack.c.bf16 %v15983_v44, %v15982_v48  ;;  %v15268_v56 = vpack.c.bf16 %v15988_v0, %v15987_v55  ;;  %v6725_v44 = vld [vmem:[%s23420_s11 + $0x258] sm:$0xff]  ;;  %v12955_v48 = vld [vmem:[%s23420_s11 + $0x308] sm:$0xff] }
 0xa04   : > { %7085 = vmatmul.mubr.f32.vlgmr.msra.gmra.mrb[44].mxu0 %v12938_v30  ;;  %13088 = vmatprep.mubr.msk.f32.mxu1 %vm6899_vm14, %v6711_v5  ;;  %v15991_v50 = vpop.permute.xlu1 %15990  ;;  %v15996_v22 = vpop.permute.xlu0 %15995  ;;  %v12957_v0 = vld [vmem:[%s23420_s11 + $0x318] sm:$0xff] }
 0xa05   : > { %15263 = vmatpush1.bf16.msra.mxu0 %v15262_v20  ;;  %13019 = vmatprep.mubr.msk.f32.mxu0 %vm6899_vm14, %v12941_v39  ;;  %v15993_v32 = vunpack.i.h.bf16 %v15991_v50  ;;  %v15992_v46 = vunpack.i.l.bf16 %v15991_v50  ;;  %v15998_v59 = vunpack.i.h.bf16 %v15996_v22  ;;  %v15997_v47 = vunpack.i.l.bf16 %v15996_v22  ;;  %v6722_v39 = vld [vmem:[%s23420_s11 + $0x240] sm:$0xff]  ;;  %v12952_v20 = vld [vmem:[%s23420_s11 + $0x2f0] sm:$0xff] }
 0xa06   : > { %9093 = vperm.xlu0 %15797, %v9027_v58   ;;  %9088 = vperm.xlu1 %15798, %v9026_v26   ;;  %v6726_v50 = vld [vmem:[%s23420_s11 + $0x260] sm:$0xff] }
 0xa07   : > { %15264 = vmatprep.subr.bf16.mxu0 %v23492_v13  ;;  %7620 = vmatmul.mubr.f32.gmra.mrb[240].mxu1 %v6710_v24  ;;  %v15271_v29 = vpack.c.bf16 %v15993_v32, %v15992_v46  ;;  %v15274_v57 = vpack.c.bf16 %v15998_v59, %v15997_v47  ;;  %v6728_v46 = vld [vmem:[%s23420_s11 + $0x270] sm:$0xff]  ;;  %v12967_v47 = vld [vmem:[%s23420_s11 + $0x368] sm:$0xff] }
 0xa08   : > { %7090 = vmatmul.mubr.f32.gmra.mrb[46].mxu0 %v12940_v33  ;;  %13089 = vmatprep.mubr.msk.f32.mxu1 %vm6899_vm14, %v6713_v36  ;;  %v16001_v40 = vpop.permute.xlu1 %16000  ;;  %v16006_v34 = vpop.permute.xlu0 %16005  ;;  %v6724_v33 = vld [vmem:[%s23420_s11 + $0x250] sm:$0xff]  ;;  %v12954_v36 = vld [vmem:[%s23420_s11 + $0x300] sm:$0xff] }
 0xa09   : > { %15266 = vmatpush1.bf16.msra.mxu0 %v15265_v19  ;;  %13020 = vmatprep.mubr.msk.f32.mxu0 %vm6899_vm14, %v12943_v17  ;;  %v16003_v27 = vunpack.i.h.bf16 %v16001_v40  ;;  %v16002_v38 = vunpack.i.l.bf16 %v16001_v40  ;;  %v16008_v1 = vunpack.i.h.bf16 %v16006_v34  ;;  %v16007_v7 = vunpack.i.l.bf16 %v16006_v34  ;;  %v6727_v17 = vld [vmem:[%s23420_s11 + $0x268] sm:$0xff]  ;;  %v12964_v59 = vld [vmem:[%s23420_s11 + $0x350] sm:$0xff]  ;;  %v12981_v34 = vld [vmem:[%s23420_s11 + $0x3d8] sm:$0xff] }
 0xa0a   : > { %9103 = vperm.xlu0 %15797, %v9029_v2   ;;  %9098 = vperm.xlu1 %15798, %v9028_v52   ;;  %v12971_v40 = vld [vmem:[%s23420_s11 + $0x388] sm:$0xff] }
 0xa0b   : > { %15267 = vmatprep.subr.bf16.mxu0 %v23492_v13  ;;  %7625 = vmatmul.mubr.f32.gmra.mrb[242].mxu1 %v6712_v31  ;;  %v15277_v25 = vpack.c.bf16 %v16003_v27, %v16002_v38  ;;  %v15280_v37 = vpack.c.bf16 %v16008_v1, %v16007_v7  ;;  %v12956_v31 = vld [vmem:[%s23420_s11 + $0x310] sm:$0xff]  ;;  %v12977_v27 = vld [vmem:[%s23420_s11 + $0x3b8] sm:$0xff]  ;;  %v12987_v7 = vld [vmem:[%s23420_s11 + $0x408] sm:$0xff] }
 0xa0c   : > { %7095 = vmatmul.mubr.f32.gmra.mrb[48].mxu0 %v12942_v42  ;;  %13090 = vmatprep.mubr.msk.f32.mxu1 %vm6899_vm14, %v6715_v49  ;;  %v16011_v10 = vpop.permute.xlu1 %16010  ;;  %v16016_v5 = vpop.permute.xlu0 %16015  ;;  %v6729_v42 = vld [vmem:[%s23420_s11 + $0x278] sm:$0xff]  ;;  %v12959_v49 = vld [vmem:[%s23420_s11 + $0x328] sm:$0xff]  ;;  %v12976_v38 = vld [vmem:[%s23420_s11 + $0x3b0] sm:$0xff] }
 0xa0d   : > { %15269 = vmatpush1.bf16.msra.mxu0 %v15268_v56  ;;  %13021 = vmatprep.mubr.msk.f32.mxu0 %vm6899_vm14, %v12945_v14  ;;  %v16013_v4 = vunpack.i.h.bf16 %v16011_v10  ;;  %v16012_v30 = vunpack.i.l.bf16 %v16011_v10  ;;  %v16018_v58 = vunpack.i.h.bf16 %v16016_v5  ;;  %v16017_v26 = vunpack.i.l.bf16 %v16016_v5  ;;  %v12984_v1 = vld [vmem:[%s23420_s11 + $0x3f0] sm:$0xff]  ;;  %v12989_v10 = vld [vmem:[%s23420_s11 + $0x418] sm:$0xff] }
 0xa0e   : > { %9113 = vperm.xlu0 %15797, %v9031_v28   ;;  %9108 = vperm.xlu1 %15798, %v9030_v8   ;;  %v12958_v28 = vld [vmem:[%s23420_s11 + $0x320] sm:$0xff]  ;;  %v12961_v8 = vld [vmem:[%s23420_s11 + $0x338] sm:$0xff] }
 0xa0f   : > { %15270 = vmatprep.subr.bf16.mxu0 %v23492_v13  ;;  %7630 = vmatmul.mubr.f32.gmra.mrb[244].mxu1 %v6714_v51  ;;  %v15283_v11 = vpack.c.bf16 %v16013_v4, %v16012_v30  ;;  %v15286_v55 = vpack.c.bf16 %v16018_v58, %v16017_v26  ;;  %v12960_v51 = vld [vmem:[%s23420_s11 + $0x330] sm:$0xff]  ;;  %v12990_v30 = vld [vmem:[%s23420_s11 + $0x420] sm:$0xff]  ;;  %v12993_v5 = vld [vmem:[%s23420_s11 + $0x438] sm:$0xff] }
 0xa10   : > { %7100 = vmatmul.mubr.f32.gmra.mrb[50].mxu0 %v12944_v60  ;;  %13091 = vmatprep.mubr.msk.f32.mxu1 %vm6899_vm14, %v6717_v62  ;;  %v16021_v24 = vpop.permute.xlu1 %16020  ;;  %v16026_v52 = vpop.permute.xlu0 %16025  ;;  %v12963_v60 = vld [vmem:[%s23420_s11 + $0x348] sm:$0xff]  ;;  %v12962_v62 = vld [vmem:[%s23420_s11 + $0x340] sm:$0xff] }
 0xa11   : > { %15272 = vmatpush1.bf16.msra.mxu0 %v15271_v29  ;;  %13022 = vmatprep.mubr.msk.f32.mxu0 %vm6899_vm14, %v12947_v6  ;;  %v16023_v19 = vunpack.i.h.bf16 %v16021_v24  ;;  %v16022_v2 = vunpack.i.l.bf16 %v16021_v24  ;;  %v16028_v14 = vunpack.i.h.bf16 %v16026_v52  ;;  %v16027_v56 = vunpack.i.l.bf16 %v16026_v52  ;;  %v12965_v6 = vld [vmem:[%s23420_s11 + $0x358] sm:$0xff]  ;;  %v12966_v29 = vld [vmem:[%s23420_s11 + $0x360] sm:$0xff] }
 0xa12   : > { %9123 = vperm.xlu0 %15797, %v9033_v23   ;;  %9118 = vperm.xlu1 %15798, %v9032_v54   ;;  %v12969_v23 = vld [vmem:[%s23420_s11 + $0x378] sm:$0xff]  ;;  %v12968_v54 = vld [vmem:[%s23420_s11 + $0x370] sm:$0xff] }
 0xa13   : > { %15273 = vmatprep.subr.bf16.mxu0 %v23492_v13  ;;  %7635 = vmatmul.mubr.f32.gmra.mrb[246].mxu1 %v6716_v43  ;;  %v15289_v32 = vpack.c.bf16 %v16023_v19, %v16022_v2  ;;  %v15292_v22 = vpack.c.bf16 %v16028_v14, %v16027_v56  ;;  %v12970_v43 = vld [vmem:[%s23420_s11 + $0x380] sm:$0xff]  ;;  %v12997_v24 = vld [vmem:[%s23420_s11 + $0x458] sm:$0xff] }
 0xa14   : > { %7105 = vmatmul.mubr.f32.gmra.mrb[52].mxu0 %v12946_v9  ;;  %13092 = vmatprep.mubr.msk.f32.mxu1 %vm6899_vm14, %v6719_v3  ;;  %v12973_v9 = vld [vmem:[%s23420_s11 + $0x398] sm:$0xff]  ;;  %v12972_v3 = vld [vmem:[%s23420_s11 + $0x390] sm:$0xff]  ;;  %v12998_v2 = vld [vmem:[%s23420_s11 + $0x460] sm:$0xff] }
 0xa15   : > { %15275 = vmatpush1.bf16.msra.mxu0 %v15274_v57  ;;  %13023 = vmatprep.mubr.msk.f32.mxu0 %vm6899_vm14, %v12949_v41  ;;  %v12975_v41 = vld [vmem:[%s23420_s11 + $0x3a8] sm:$0xff]  ;;  %v12974_v57 = vld [vmem:[%s23420_s11 + $0x3a0] sm:$0xff]  ;;  %v13001_v52 = vld [vmem:[%s23420_s11 + $0x478] sm:$0xff] }
 0xa16   : > { %9133 = vperm.xlu0 %15797, %v9035_v63   ;;  %9128 = vperm.xlu1 %15798, %v9034_v12   ;;  %v12979_v63 = vld [vmem:[%s23420_s11 + $0x3c8] sm:$0xff]  ;;  %v12978_v12 = vld [vmem:[%s23420_s11 + $0x3c0] sm:$0xff] }
 0xa17   : > { %15276 = vmatprep.subr.bf16.mxu0 %v23492_v13  ;;  %7640 = vmatmul.mubr.f32.gmra.mrb[248].mxu1 %v6718_v61  ;;  %v12980_v61 = vld [vmem:[%s23420_s11 + $0x3d0] sm:$0xff] }
 0xa18   : > { %7110 = vmatmul.mubr.f32.gmra.mrb[54].mxu0 %v12948_v16  ;;  %13093 = vmatprep.mubr.msk.f32.mxu1 %vm6899_vm14, %v6721_v18  ;;  %v12983_v16 = vld [vmem:[%s23420_s11 + $0x3e8] sm:$0xff]  ;;  %v12982_v18 = vld [vmem:[%s23420_s11 + $0x3e0] sm:$0xff] }
 0xa19   : > { %15278 = vmatpush1.bf16.msra.mxu0 %v15277_v25  ;;  %13024 = vmatprep.mubr.msk.f32.mxu0 %vm6899_vm14, %v12951_v45  ;;  %v12985_v45 = vld [vmem:[%s23420_s11 + $0x3f8] sm:$0xff]  ;;  %v12986_v25 = vld [vmem:[%s23420_s11 + $0x400] sm:$0xff] }
 0xa1a   : > { %15279 = vmatprep.subr.bf16.mxu0 %v23492_v13 }
 0xa1b   : > { %7645 = vmatmul.mubr.f32.gmra.mrb[250].mxu1 %v6720_v21 }
 0xa1c   : > { %7115 = vmatmul.mubr.f32.gmra.mrb[56].mxu0 %v12950_v53  ;;  %13094 = vmatprep.mubr.msk.f32.mxu1 %vm6899_vm14, %v6723_v35  ;;  %v12988_v35 = vld [vmem:[%s23420_s11 + $0x410] sm:$0xff] }
 0xa1d   : > { %15281 = vmatpush1.bf16.msra.mxu0 %v15280_v37  ;;  %13025 = vmatprep.mubr.msk.f32.mxu0 %vm6899_vm14, %v12953_v15  ;;  %v12991_v15 = vld [vmem:[%s23420_s11 + $0x428] sm:$0xff] }
 0xa1e   : > { %15282 = vmatprep.subr.bf16.mxu0 %v23492_v13 }
 0xa1f   : > { %7650 = vmatmul.mubr.f32.gmra.mrb[252].mxu1 %v6722_v39 }
 0xa20   : > { %7120 = vmatmul.mubr.f32.gmra.mrb[58].mxu0 %v12952_v20  ;;  %13095 = vmatprep.mubr.msk.f32.mxu1 %vm6899_vm14, %v6725_v44  ;;  %v12992_v44 = vld [vmem:[%s23420_s11 + $0x430] sm:$0xff] }
 0xa21   : > { %15284 = vmatpush1.bf16.msra.mxu0 %v15283_v11  ;;  %13026 = vmatprep.mubr.msk.f32.mxu0 %vm6899_vm14, %v12955_v48  ;;  %v12995_v48 = vld [vmem:[%s23420_s11 + $0x448] sm:$0xff]  ;;  %v12994_v11 = vld [vmem:[%s23420_s11 + $0x440] sm:$0xff] }
 0xa22   : > { %15285 = vmatprep.subr.bf16.mxu0 %v23492_v13 }
 0xa23   : > { %7655 = vmatmul.mubr.f32.gmra.mrb[254].mxu1 %v6724_v33 }
 0xa24   : > { %7125 = vmatmul.mubr.f32.gmra.mrb[60].mxu0 %v12954_v36  ;;  %13096 = vmatprep.mubr.msk.f32.mxu1 %vm6899_vm14, %v6727_v17  ;;  %v12996_v17 = vld [vmem:[%s23420_s11 + $0x450] sm:$0xff] }
 0xa25   : > { %15287 = vmatpush1.bf16.msra.mxu0 %v15286_v55  ;;  %13027 = vmatprep.mubr.msk.f32.mxu0 %vm6899_vm14, %v12957_v0  ;;  %v12999_v0 = vld [vmem:[%s23420_s11 + $0x468] sm:$0xff] }
 0xa26   : > { %15288 = vmatprep.subr.bf16.mxu0 %v23492_v13 }
 0xa27   : > { %7660 = vmatmul.mubr.f32.gmra.mrb[0].mxu1 %v6726_v50 }
 0xa28   : > { %7130 = vmatmul.mubr.f32.gmra.mrb[62].mxu0 %v12956_v31  ;;  %13097 = vmatprep.mubr.msk.f32.mxu1 %vm6899_vm14, %v6729_v42  ;;  %v13000_v42 = vld [vmem:[%s23420_s11 + $0x470] sm:$0xff] }
 0xa29   : > { %15290 = vmatpush1.bf16.msra.mxu0 %v15289_v32  ;;  %13028 = vmatprep.mubr.msk.f32.mxu0 %vm6899_vm14, %v12959_v49  ;;  %v13003_v49 = vld [vmem:[%s23420_s11 + $0x488] sm:$0xff]  ;;  %v13002_v32 = vld [vmem:[%s23420_s11 + $0x480] sm:$0xff] }
 0xa2a   : > { %15291 = vmatprep.subr.bf16.mxu0 %v23492_v13 }
 0xa2b   : > { %7665 = vmatmul.mubr.f32.gmra.mrb[2].mxu1 %v6728_v46  ;;  %v13005_v46 = vld [vmem:[%s23420_s11 + $0x498] sm:$0xff] }
 0xa2c   : > { %7135 = vmatmul.mubr.f32.gmra.mrb[64].mxu0 %v12958_v28 }
 0xa2d   : > { %15293 = vmatpush1.bf16.msra.mxu0 %v15292_v22  ;;  %13029 = vmatprep.mubr.msk.f32.mxu0 %vm6899_vm14, %v12961_v8  ;;  %v13004_v22 = vld [vmem:[%s23420_s11 + $0x490] sm:$0xff] }
 0xa2e   : > { %15362 = vmatprep.subr.bf16.mxu0 %v23492_v13 }
 0xa30   : > { %7140 = vmatmul.mubr.f32.gmra.mrb[66].mxu0 %v12960_v51  ;;  %v13007_v51 = vld [vmem:[%s23420_s11 + $0x4a8] sm:$0xff] }
 0xa31   : > { %13030 = vmatprep.mubr.msk.f32.mxu0 %vm6899_vm14, %v12963_v60 }
 0xa34   : > { %7145 = vmatmul.mubr.f32.gmra.mrb[68].mxu0 %v12962_v62 }
 0xa35   : > { %13031 = vmatprep.mubr.msk.f32.mxu0 %vm6899_vm14, %v12965_v6  ;;  %v13006_v6 = vld [vmem:[%s23420_s11 + $0x4a0] sm:$0xff] }
 0xa38   : > { %7150 = vmatmul.mubr.f32.gmra.mrb[70].mxu0 %v12964_v59  ;;  %v13009_v59 = vld [vmem:[%s23420_s11 + $0x4b8] sm:$0xff] }
 0xa39   : > { %13032 = vmatprep.mubr.msk.f32.mxu0 %vm6899_vm14, %v12967_v47 }
 0xa3c   : > { %7155 = vmatmul.mubr.f32.gmra.mrb[72].mxu0 %v12966_v29 }
 0xa3d   : > { %13033 = vmatprep.mubr.msk.f32.mxu0 %vm6899_vm14, %v12969_v23  ;;  %v13008_v23 = vld [vmem:[%s23420_s11 + $0x4b0] sm:$0xff] }
 0xa40   : > { %7160 = vmatmul.mubr.f32.gmra.mrb[74].mxu0 %v12968_v54  ;;  %v13011_v54 = vld [vmem:[%s23420_s11 + $0x4c8] sm:$0xff] }
 0xa41   : > { %13034 = vmatprep.mubr.msk.f32.mxu0 %vm6899_vm14, %v12971_v40 }
 0xa44   : > { %7165 = vmatmul.mubr.f32.gmra.mrb[76].mxu0 %v12970_v43 }
 0xa45   : > { %13035 = vmatprep.mubr.msk.f32.mxu0 %vm6899_vm14, %v12973_v9  ;;  %v13010_v9 = vld [vmem:[%s23420_s11 + $0x4c0] sm:$0xff] }
 0xa48   : > { %7170 = vmatmul.mubr.f32.gmra.mrb[78].mxu0 %v12972_v3  ;;  %v13013_v3 = vld [vmem:[%s23420_s11 + $0x4d8] sm:$0xff] }
 0xa49   : > { %13036 = vmatprep.mubr.msk.f32.mxu0 %vm6899_vm14, %v12975_v41 }
 0xa4c   : > { %7175 = vmatmul.mubr.f32.gmra.mrb[80].mxu0 %v12974_v57 }
 0xa4d   : > { %13037 = vmatprep.mubr.msk.f32.mxu0 %vm6899_vm14, %v12977_v27  ;;  %v13012_v27 = vld [vmem:[%s23420_s11 + $0x4d0] sm:$0xff] }
 0xa50   : > { %7180 = vmatmul.mubr.f32.gmra.mrb[82].mxu0 %v12976_v38  ;;  %v13015_v38 = vld [vmem:[%s23420_s11 + $0x4e8] sm:$0xff] }
 0xa51   : > { %13038 = vmatprep.mubr.msk.f32.mxu0 %vm6899_vm14, %v12979_v63 }
 0xa54   : > { %7185 = vmatmul.mubr.f32.gmra.mrb[84].mxu0 %v12978_v12 }
 0xa55   : > { %13039 = vmatprep.mubr.msk.f32.mxu0 %vm6899_vm14, %v12981_v34  ;;  %v13014_v34 = vld [vmem:[%s23420_s11 + $0x4e0] sm:$0xff] }
 0xa58   : > { %7190 = vmatmul.mubr.f32.gmra.mrb[86].mxu0 %v12980_v61  ;;  %v13017_v61 = vld [vmem:[%s23420_s11 + $0x4f8] sm:$0xff] }
 0xa59   : > { %13040 = vmatprep.mubr.msk.f32.mxu0 %vm6899_vm14, %v12983_v16 }
 0xa5c   : > { %7195 = vmatmul.mubr.f32.gmra.mrb[88].mxu0 %v12982_v18 }
 0xa5d   : > { %13041 = vmatprep.mubr.msk.f32.mxu0 %vm6899_vm14, %v12985_v45  ;;  %v13016_v45 = vld [vmem:[%s23420_s11 + $0x4f0] sm:$0xff] }
 0xa60   : > { %7200 = vmatmul.mubr.f32.gmra.mrb[90].mxu0 %v12984_v1  ;;  %v13099_v1 = vld [vmem:[%s23420_s11 + $0x508] sm:$0xff] }
 0xa61   : > { %13042 = vmatprep.mubr.msk.f32.mxu0 %vm6899_vm14, %v12987_v7 }
 0xa62   : > { %v20718_v21 = vpop.f32.mrb[180].mxu1 }
 0xa63   : > { %v7473_v53 = vpop.f32.mrb[181].mxu1 }
 0xa64   : > { %7205 = vmatmul.mubr.f32.gmra.mrb[92].mxu0 %v12986_v25  ;;  %v13101_v53 = vld [vmem:[%s23420_s11 + $0x518] sm:$0xff] }
 0xa65   : > { %13043 = vmatprep.mubr.msk.f32.mxu0 %vm6899_vm14, %v12989_v10  ;;  %v13098_v10 = vld [vmem:[%s23420_s11 + $0x500] sm:$0xff] }
 0xa66   : > { %v20727_v37 = vpop.f32.mrb[182].mxu1 }
 0xa67   : > { %v7478_v4 = vpop.f32.mrb[183].mxu1 }
 0xa68   : > { %7210 = vmatmul.mubr.f32.gmra.mrb[94].mxu0 %v12988_v35  ;;  %v13100_v4 = vld [vmem:[%s23420_s11 + $0x510] sm:$0xff] }
 0xa69   : > { %13044 = vmatprep.mubr.msk.f32.mxu0 %vm6899_vm14, %v12991_v15 }
 0xa6a   : > { %v20736_v39 = vpop.f32.mrb[184].mxu1 }
 0xa6b   : > { %v7483_v20 = vpop.f32.mrb[185].mxu1 }
 0xa6c   : > { %7215 = vmatmul.mubr.f32.gmra.mrb[96].mxu0 %v12990_v30  ;;  %v13103_v30 = vld [vmem:[%s23420_s11 + $0x528] sm:$0xff] }
 0xa6d   : > { %13045 = vmatprep.mubr.msk.f32.mxu0 %vm6899_vm14, %v12993_v5 }
 0xa6e   : > { %v20745_v58 = vpop.f32.mrb[186].mxu1 }
 0xa6f   : > { %v7488_v26 = vpop.f32.mrb[187].mxu1 }
 0xa70   : > { %7220 = vmatmul.mubr.f32.gmra.mrb[98].mxu0 %v12992_v44  ;;  %v13102_v44 = vld [vmem:[%s23420_s11 + $0x520] sm:$0xff] }
 0xa71   : > { %13046 = vmatprep.mubr.msk.f32.mxu0 %vm6899_vm14, %v12995_v48  ;;  %v13105_v48 = vld [vmem:[%s23420_s11 + $0x538] sm:$0xff] }
 0xa72   : > { %v20754_v33 = vpop.f32.mrb[188].mxu1 }
 0xa73   : > { %v7493_v36 = vpop.f32.mrb[189].mxu1 }
 0xa74   : > { %7225 = vmatmul.mubr.f32.gmra.mrb[100].mxu0 %v12994_v11  ;;  %v13107_v36 = vld [vmem:[%s23420_s11 + $0x548] sm:$0xff] }
 0xa75   : > { %13047 = vmatprep.mubr.msk.f32.mxu0 %vm6899_vm14, %v12997_v24  ;;  %v13104_v24 = vld [vmem:[%s23420_s11 + $0x530] sm:$0xff] }
 0xa76   : > { %v20763_v55 = vpop.f32.mrb[190].mxu1 }
 0xa77   : > { %v7498_v19 = vpop.f32.mrb[191].mxu1 }
 0xa78   : > { %7230 = vmatmul.mubr.f32.gmra.mrb[102].mxu0 %v12996_v17  ;;  %v13106_v19 = vld [vmem:[%s23420_s11 + $0x540] sm:$0xff] }
 0xa79   : > { %13048 = vmatprep.mubr.msk.f32.mxu0 %vm6899_vm14, %v12999_v0 }
 0xa7a   : > { %v20772_v50 = vpop.f32.mrb[192].mxu1 }
 0xa7b   : > { %v7503_v31 = vpop.f32.mrb[193].mxu1 }
 0xa7c   : > { %7235 = vmatmul.mubr.f32.gmra.mrb[104].mxu0 %v12998_v2  ;;  %v13109_v2 = vld [vmem:[%s23420_s11 + $0x558] sm:$0xff] }
 0xa7d   : > { %13049 = vmatprep.mubr.msk.f32.mxu0 %vm6899_vm14, %v13001_v52 }
 0xa7e   : > { %v20781_v14 = vpop.f32.mrb[194].mxu1 }
 0xa7f   : > { %v7508_v56 = vpop.f32.mrb[195].mxu1 }
 0xa80   : > { %7240 = vmatmul.mubr.f32.gmra.mrb[106].mxu0 %v13000_v42  ;;  %v13108_v42 = vld [vmem:[%s23420_s11 + $0x550] sm:$0xff] }
 0xa81   : > { %13050 = vmatprep.mubr.msk.f32.mxu0 %vm6899_vm14, %v13003_v49  ;;  %v13111_v49 = vld [vmem:[%s23420_s11 + $0x568] sm:$0xff] }
 0xa82   : > { %v20790_v28 = vpop.f32.mrb[196].mxu1 }
 0xa83   : > { %v7513_v8 = vpop.f32.mrb[197].mxu1 }
 0xa84   : > { %7245 = vmatmul.mubr.f32.gmra.mrb[108].mxu0 %v13002_v32  ;;  %v13113_v8 = vld [vmem:[%s23420_s11 + $0x578] sm:$0xff] }
 0xa85   : > { %13051 = vmatprep.mubr.msk.f32.mxu0 %vm6899_vm14, %v13005_v46  ;;  %v13110_v46 = vld [vmem:[%s23420_s11 + $0x560] sm:$0xff] }
 0xa86   : > { %v20799_v60 = vpop.f32.mrb[198].mxu1 }
 0xa87   : > { %v7518_v62 = vpop.f32.mrb[199].mxu1 }
 0xa88   : > { %7250 = vmatmul.mubr.f32.gmra.mrb[110].mxu0 %v13004_v22  ;;  %v13112_v62 = vld [vmem:[%s23420_s11 + $0x570] sm:$0xff] }
 0xa89   : > { %13052 = vmatprep.mubr.msk.f32.mxu0 %vm6899_vm14, %v13007_v51 }
 0xa8a   : > { %v20808_v47 = vpop.f32.mrb[200].mxu1 }
 0xa8b   : > { %v7523_v29 = vpop.f32.mrb[201].mxu1 }
 0xa8c   : > { %7255 = vmatmul.mubr.f32.gmra.mrb[112].mxu0 %v13006_v6  ;;  %v13115_v6 = vld [vmem:[%s23420_s11 + $0x588] sm:$0xff] }
 0xa8d   : > { %13053 = vmatprep.mubr.msk.f32.mxu0 %vm6899_vm14, %v13009_v59 }
 0xa8e   : > { %v20817_v40 = vpop.f32.mrb[202].mxu1 }
 0xa8f   : > { %v7528_v43 = vpop.f32.mrb[203].mxu1 }
 0xa90   : > { %7260 = vmatmul.mubr.f32.gmra.mrb[114].mxu0 %v13008_v23  ;;  %v13114_v23 = vld [vmem:[%s23420_s11 + $0x580] sm:$0xff] }
 0xa91   : > { %13054 = vmatprep.mubr.msk.f32.mxu0 %vm6899_vm14, %v13011_v54  ;;  %v13117_v54 = vld [vmem:[%s23420_s11 + $0x598] sm:$0xff] }
 0xa92   : > { %v20826_v41 = vpop.f32.mrb[204].mxu1 }
 0xa93   : > { %v7533_v57 = vpop.f32.mrb[205].mxu1 }
 0xa94   : > { %7265 = vmatmul.mubr.f32.gmra.mrb[116].mxu0 %v13010_v9  ;;  %v13119_v57 = vld [vmem:[%s23420_s11 + $0x5a8] sm:$0xff] }
 0xa95   : > { %13055 = vmatprep.mubr.msk.f32.mxu0 %vm6899_vm14, %v13013_v3  ;;  %v13116_v3 = vld [vmem:[%s23420_s11 + $0x590] sm:$0xff] }
 0xa96   : > { %v20835_v63 = vpop.f32.mrb[206].mxu1 }
 0xa97   : > { %v7538_v12 = vpop.f32.mrb[207].mxu1 }
 0xa98   : > { %7270 = vmatmul.mubr.f32.gmra.mrb[118].mxu0 %v13012_v27  ;;  %v13118_v12 = vld [vmem:[%s23420_s11 + $0x5a0] sm:$0xff] }
 0xa99   : > { %13056 = vmatprep.mubr.msk.f32.mxu0 %vm6899_vm14, %v13015_v38 }
 0xa9a   : > { %v20844_v16 = vpop.f32.mrb[208].mxu1 }
 0xa9b   : > { %v7543_v18 = vpop.f32.mrb[209].mxu1 }
 0xa9c   : > { %7275 = vmatmul.mubr.f32.gmra.mrb[120].mxu0 %v13014_v34  ;;  %v13121_v34 = vld [vmem:[%s23420_s11 + $0x5b8] sm:$0xff] }
 0xa9d   : > { %13057 = vmatprep.mubr.msk.f32.mxu0 %vm6899_vm14, %v13017_v61 }
 0xa9e   : > { %v20853_v7 = vpop.f32.mrb[210].mxu1 }
 0xa9f   : > { %v7548_v25 = vpop.f32.mrb[211].mxu1 }
 0xaa0   : > { %7280 = vmatmul.mubr.f32.gmra.mrb[122].mxu0 %v13016_v45  ;;  %v13120_v45 = vld [vmem:[%s23420_s11 + $0x5b0] sm:$0xff] }
 0xaa1   : > { %13178 = vmatprep.mubr.msk.f32.mxu0 %vm6899_vm14, %v13099_v1  ;;  %v13123_v1 = vld [vmem:[%s23420_s11 + $0x5c8] sm:$0xff] }
 0xaa2   : > { %v20862_v35 = vpop.f32.mrb[212].mxu1 }
 0xaa3   : > { %v7553_v15 = vpop.f32.mrb[213].mxu1 }
 0xaa4   : > { %8002 = vmatmul.mubr.f32.vlgmr.msra.gmra.mrb[124].mxu0 %v13098_v10  ;;  %v13125_v15 = vld [vmem:[%s23420_s11 + $0x5d8] sm:$0xff] }
 0xaa5   : > { %13179 = vmatprep.mubr.msk.f32.mxu0 %vm6899_vm14, %v13101_v53  ;;  %v13122_v53 = vld [vmem:[%s23420_s11 + $0x5c0] sm:$0xff] }
 0xaa6   : > { %v20871_v5 = vpop.f32.mrb[214].mxu1 }
 0xaa7   : > { %v7558_v20 = vpop.f32.mrb[215].mxu1 }
 0xaa8   : > { %8007 = vmatmul.mubr.f32.gmra.mrb[126].mxu0 %v13100_v4  ;;  %v13124_v20 = vld [vmem:[%s23420_s11 + $0x5d0] sm:$0xff] }
 0xaa9   : > { %13180 = vmatprep.mubr.msk.f32.mxu0 %vm6899_vm14, %v13103_v30 }
 0xaaa   : > { %v20880_v26 = vpop.f32.mrb[216].mxu1 }
 0xaab   : > { %v7563_v11 = vpop.f32.mrb[217].mxu1 }
 0xaac   : > { %8012 = vmatmul.mubr.f32.gmra.mrb[128].mxu0 %v13102_v44  ;;  %v13127_v44 = vld [vmem:[%s23420_s11 + $0x5e8] sm:$0xff] }
 0xaad   : > { %13181 = vmatprep.mubr.msk.f32.mxu0 %vm6899_vm14, %v13105_v48 }
 0xaae   : > { %v20889_v17 = vpop.f32.mrb[218].mxu1 }
 0xaaf   : > { %v7568_v0 = vpop.f32.mrb[219].mxu1 }
 0xab0   : > { %8017 = vmatmul.mubr.f32.gmra.mrb[130].mxu0 %v13104_v24 }
 0xab1   : > { %13182 = vmatprep.mubr.msk.f32.mxu0 %vm6899_vm14, %v13107_v36 }
 0xab2   : > { %v20898_v52 = vpop.f32.mrb[220].mxu1 }
 0xab3   : > { %v7573_v31 = vpop.f32.mrb[221].mxu1 }
 0xab4   : > { %8022 = vmatmul.mubr.f32.gmra.mrb[132].mxu0 %v13106_v19  ;;  %v13126_v19 = vld [vmem:[%s23420_s11 + $0x5e0] sm:$0xff] }
 0xab5   : > { %13183 = vmatprep.mubr.msk.f32.mxu0 %vm6899_vm14, %v13109_v2  ;;  %v13129_v2 = vld [vmem:[%s23420_s11 + $0x5f8] sm:$0xff] }
 0xab6   : > { %v20907_v56 = vpop.f32.mrb[222].mxu1 }
 0xab7   : > { %v7578_v32 = vpop.f32.mrb[223].mxu1 }
 0xab8   : > { %8027 = vmatmul.mubr.f32.gmra.mrb[134].mxu0 %v13108_v42 }
 0xab9   : > { %13184 = vmatprep.mubr.msk.f32.mxu0 %vm6899_vm14, %v13111_v49 }
 0xaba   : > { %v20916_v22 = vpop.f32.mrb[224].mxu1 }
 0xabb   : > { %v7583_v51 = vpop.f32.mrb[225].mxu1 }
 0xabc   : > { %8032 = vmatmul.mubr.f32.gmra.mrb[136].mxu0 %v13110_v46 }
 0xabd   : > { %13185 = vmatprep.mubr.msk.f32.mxu0 %vm6899_vm14, %v13113_v8  ;;  %v13131_v8 = vld [vmem:[%s23420_s11 + $0x608] sm:$0xff] }
 0xabe   : > { %v20925_v59 = vpop.f32.mrb[226].mxu1 }
 0xabf   : > { %v7588_v29 = vpop.f32.mrb[227].mxu1 }
 0xac0   : > { %8037 = vmatmul.mubr.f32.gmra.mrb[138].mxu0 %v13112_v62 }
 0xac1   : > { %13186 = vmatprep.mubr.msk.f32.mxu0 %vm6899_vm14, %v13115_v6 }
 0xac2   : > { %v20934_v43 = vpop.f32.mrb[228].mxu1 }
 0xac3   : > { %v7593_v9 = vpop.f32.mrb[229].mxu1 }
 0xac4   : > { %8042 = vmatmul.mubr.f32.gmra.mrb[140].mxu0 %v13114_v23 }
 0xac5   : > { %13187 = vmatprep.mubr.msk.f32.mxu0 %vm6899_vm14, %v13117_v54  ;;  %v13133_v54 = vld [vmem:[%s23420_s11 + $0x618] sm:$0xff] }
 0xac6   : > { %v20943_v27 = vpop.f32.mrb[230].mxu1 }
 0xac7   : > { %v7598_v38 = vpop.f32.mrb[231].mxu1 }
 0xac8   : > { %8047 = vmatmul.mubr.f32.gmra.mrb[142].mxu0 %v13116_v3 }
 0xac9   : > { %13188 = vmatprep.mubr.msk.f32.mxu0 %vm6899_vm14, %v13119_v57 }
 0xaca   : > { %v20952_v61 = vpop.f32.mrb[232].mxu1 }
 0xacb   : > { %v7603_v18 = vpop.f32.mrb[233].mxu1 }
 0xacc   : > { %8052 = vmatmul.mubr.f32.gmra.mrb[144].mxu0 %v13118_v12 }
 0xacd   : > { %13189 = vmatprep.mubr.msk.f32.mxu0 %vm6899_vm14, %v13121_v34  ;;  %v13135_v34 = vld [vmem:[%s23420_s11 + $0x628] sm:$0xff] }
 0xace   : > { %v20961_v25 = vpop.f32.mrb[234].mxu1 }
 0xacf   : > { %v7608_v10 = vpop.f32.mrb[235].mxu1 }
 0xad0   : > { %8057 = vmatmul.mubr.f32.gmra.mrb[146].mxu0 %v13120_v45 }
 0xad1   : > { %13190 = vmatprep.mubr.msk.f32.mxu0 %vm6899_vm14, %v13123_v1 }
 0xad2   : > { %v20970_v4 = vpop.f32.mrb[236].mxu1 }
 0xad3   : > { %v7613_v30 = vpop.f32.mrb[237].mxu1 }
 0xad4   : > { %8062 = vmatmul.mubr.f32.gmra.mrb[148].mxu0 %v13122_v53 }
 0xad5   : > { %13191 = vmatprep.mubr.msk.f32.mxu0 %vm6899_vm14, %v13125_v15  ;;  %v13137_v15 = vld [vmem:[%s23420_s11 + $0x638] sm:$0xff] }
 0xad6   : > { %v20979_v48 = vpop.f32.mrb[238].mxu1 }
 0xad7   : > { %v7086_v11 = vpop.f32.mrb[44].mxu0  ;;  %v7618_v24 = vpop.f32.mrb[239].mxu1 }
 0xad8   : > { %8067 = vmatmul.mubr.f32.gmra.mrb[150].mxu0 %v13124_v20  ;;  %v7088_v36 = vpop.f32.mrb[45].mxu0  ;;  %v20982_v0 = vadd.f32 %v20718_v21, %v7086_v11  ;;  %v13128_v21 = vld [vmem:[%s23420_s11 + $0x5f0] sm:$0xff] }
 0xad9   : > { %13192 = vmatprep.mubr.msk.f32.mxu0 %vm6899_vm14, %v13127_v44  ;;  %v13139_v36 = vld [vmem:[%s23420_s11 + $0x648] sm:$0xff] }
 0xada   : > { %v20991_v31 = vpop.f32.mrb[240].mxu1 }
 0xadb   : > { %v7091_v42 = vpop.f32.mrb[46].mxu0  ;;  %v7623_v49 = vpop.f32.mrb[241].mxu1 }
 0xadc   : > { %8072 = vmatmul.mubr.f32.gmra.mrb[152].mxu0 %v13126_v19  ;;  %v7093_v32 = vpop.f32.mrb[47].mxu0  ;;  %v20994_v46 = vadd.f32 %v20727_v37, %v7091_v42  ;;  %v13130_v37 = vld [vmem:[%s23420_s11 + $0x600] sm:$0xff] }
 0xadd   : > { %13193 = vmatprep.mubr.msk.f32.mxu0 %vm6899_vm14, %v13129_v2 }
 0xade   : > { %v21003_v51 = vpop.f32.mrb[242].mxu1 }
 0xadf   : > { %v7096_v62 = vpop.f32.mrb[48].mxu0  ;;  %v7628_v6 = vpop.f32.mrb[243].mxu1 }
 0xae0   : > { %8077 = vmatmul.mubr.f32.gmra.mrb[154].mxu0 %v13128_v21  ;;  %v7098_v29 = vpop.f32.mrb[49].mxu0  ;;  %v21006_v23 = vadd.f32 %v20736_v39, %v7096_v62  ;;  %v13132_v39 = vld [vmem:[%s23420_s11 + $0x610] sm:$0xff]  ;;  %v13141_v21 = vld [vmem:[%s23420_s11 + $0x658] sm:$0xff] }
 0xae1   : > { %13194 = vmatprep.mubr.msk.f32.mxu0 %vm6899_vm14, %v13131_v8 }
 0xae2   : > { %v21015_v9 = vpop.f32.mrb[244].mxu1 }
 0xae3   : > { %v7101_v3 = vpop.f32.mrb[50].mxu0  ;;  %v7633_v57 = vpop.f32.mrb[245].mxu1 }
 0xae4   : > { %8082 = vmatmul.mubr.f32.gmra.mrb[156].mxu0 %v13130_v37  ;;  %v7103_v38 = vpop.f32.mrb[51].mxu0  ;;  %v21018_v12 = vadd.f32 %v20745_v58, %v7101_v3  ;;  %v13134_v58 = vld [vmem:[%s23420_s11 + $0x620] sm:$0xff] }
 0xae5   : > { %13195 = vmatprep.mubr.msk.f32.mxu0 %vm6899_vm14, %v13133_v54  ;;  %v13143_v54 = vld [vmem:[%s23420_s11 + $0x668] sm:$0xff] }
 0xae6   : > { %v21027_v18 = vpop.f32.mrb[246].mxu1 }
 0xae7   : > { %v7106_v45 = vpop.f32.mrb[52].mxu0  ;;  %v7638_v1 = vpop.f32.mrb[247].mxu1 }
 0xae8   : > { %8087 = vmatmul.mubr.f32.gmra.mrb[158].mxu0 %v13132_v39  ;;  %v7108_v10 = vpop.f32.mrb[53].mxu0  ;;  %v21030_v53 = vadd.f32 %v20754_v33, %v7106_v45  ;;  %v13136_v33 = vld [vmem:[%s23420_s11 + $0x630] sm:$0xff]  ;;  %v13145_v45 = vld [vmem:[%s23420_s11 + $0x678] sm:$0xff] }
 0xae9   : > { %13196 = vmatprep.mubr.msk.f32.mxu0 %vm6899_vm14, %v13135_v34 }
 0xaea   : > { %v21039_v30 = vpop.f32.mrb[248].mxu1 }
 0xaeb   : > { %v7111_v20 = vpop.f32.mrb[54].mxu0  ;;  %v7643_v44 = vpop.f32.mrb[249].mxu1 }
 0xaec   : > { %8092 = vmatmul.mubr.f32.gmra.mrb[160].mxu0 %v13134_v58  ;;  %v7113_v11 = vpop.f32.mrb[55].mxu0  ;;  %v21042_v24 = vadd.f32 %v20763_v55, %v7111_v20  ;;  %v13138_v55 = vld [vmem:[%s23420_s11 + $0x640] sm:$0xff]  ;;  %v13147_v44 = vld [vmem:[%s23420_s11 + $0x688] sm:$0xff] }
 0xaed   : > { %13197 = vmatprep.mubr.msk.f32.mxu0 %vm6899_vm14, %v13137_v15 }
 0xaee   : > { %v21051_v19 = vpop.f32.mrb[250].mxu1 }
 0xaef   : > { %v7116_v2 = vpop.f32.mrb[56].mxu0  ;;  %v7648_v42 = vpop.f32.mrb[251].mxu1 }
 0xaf0   : > { %8097 = vmatmul.mubr.f32.gmra.mrb[162].mxu0 %v13136_v33  ;;  %v7118_v49 = vpop.f32.mrb[57].mxu0  ;;  %v21054_v32 = vadd.f32 %v20772_v50, %v7116_v2  ;;  %v13140_v50 = vld [vmem:[%s23420_s11 + $0x650] sm:$0xff] }
 0xaf1   : > { %13198 = vmatprep.mubr.msk.f32.mxu0 %vm6899_vm14, %v13139_v36  ;;  %v13149_v49 = vld [vmem:[%s23420_s11 + $0x698] sm:$0xff] }
 0xaf2   : > { %v21063_v8 = vpop.f32.mrb[252].mxu1 }
 0xaf3   : > { %v7121_v62 = vpop.f32.mrb[58].mxu0  ;;  %v7653_v6 = vpop.f32.mrb[253].mxu1 }
 0xaf4   : > { %8102 = vmatmul.mubr.f32.gmra.mrb[164].mxu0 %v13138_v55  ;;  %v7123_v29 = vpop.f32.mrb[59].mxu0  ;;  %v21066_v37 = vadd.f32 %v20781_v14, %v7121_v62  ;;  %v13142_v14 = vld [vmem:[%s23420_s11 + $0x660] sm:$0xff]  ;;  %v13151_v6 = vld [vmem:[%s23420_s11 + $0x6a8] sm:$0xff] }
 0xaf5   : > { %13199 = vmatprep.mubr.msk.f32.mxu0 %vm6899_vm14, %v13141_v21 }
 0xaf6   : > { %v21075_v3 = vpop.f32.mrb[254].mxu1 }
 0xaf7   : > { %v7126_v57 = vpop.f32.mrb[60].mxu0  ;;  %v7658_v38 = vpop.f32.mrb[255].mxu1 }
 0xaf8   : > { %8107 = vmatmul.mubr.f32.gmra.mrb[166].mxu0 %v13140_v50  ;;  %v7128_v39 = vpop.f32.mrb[61].mxu0  ;;  %v21078_v34 = vadd.f32 %v20790_v28, %v7126_v57  ;;  %v13144_v28 = vld [vmem:[%s23420_s11 + $0x670] sm:$0xff]  ;;  %v13153_v57 = vld [vmem:[%s23420_s11 + $0x6b8] sm:$0xff] }
 0xaf9   : > { %13200 = vmatprep.mubr.msk.f32.mxu0 %vm6899_vm14, %v13143_v54 }
 0xafa   : > { %v21087_v1 = vpop.f32.mrb[0].mxu1 }
 0xafb   : > { %v7131_v10 = vpop.f32.mrb[62].mxu0  ;;  %v7663_v58 = vpop.f32.mrb[1].mxu1 }
 0xafc   : > { %8112 = vmatmul.mubr.f32.gmra.mrb[168].mxu0 %v13142_v14  ;;  %v7133_v15 = vpop.f32.mrb[63].mxu0  ;;  %v21090_v20 = vadd.f32 %v20799_v60, %v7131_v10  ;;  %v13146_v60 = vld [vmem:[%s23420_s11 + $0x680] sm:$0xff] }
 0xafd   : > { %13201 = vmatprep.mubr.msk.f32.mxu0 %vm6899_vm14, %v13145_v45  ;;  %v13155_v45 = vld [vmem:[%s23420_s11 + $0x6c8] sm:$0xff] }
 0xafe   : > { %v21099_v11 = vpop.f32.mrb[2].mxu1 }
 0xaff   : > { %v7136_v33 = vpop.f32.mrb[64].mxu0  ;;  %v7668_v36 = vpop.f32.mrb[3].mxu1 }
 0xb00   : > { %8117 = vmatmul.mubr.f32.gmra.mrb[170].mxu0 %v13144_v28  ;;  %v7138_v2 = vpop.f32.mrb[65].mxu0  ;;  %v21102_v42 = vadd.f32 %v20808_v47, %v7136_v33  ;;  %v13148_v47 = vld [vmem:[%s23420_s11 + $0x690] sm:$0xff]  ;;  %v13157_v28 = vld [vmem:[%s23420_s11 + $0x6d8] sm:$0xff] }
 0xb01   : > { %13202 = vmatprep.mubr.msk.f32.mxu0 %vm6899_vm14, %v13147_v44  ;;  %v13159_v2 = vld [vmem:[%s23420_s11 + $0x6e8] sm:$0xff] }
 0xb03   : > { %v7141_v55 = vpop.f32.mrb[66].mxu0 }
 0xb04   : > { %8122 = vmatmul.mubr.f32.gmra.mrb[172].mxu0 %v13146_v60  ;;  %v7143_v21 = vpop.f32.mrb[67].mxu0  ;;  %v21112_v62 = vadd.f32 %v20817_v40, %v7141_v55  ;;  %v13150_v40 = vld [vmem:[%s23420_s11 + $0x6a0] sm:$0xff] }
 0xb05   : > { %13203 = vmatprep.mubr.msk.f32.mxu0 %vm6899_vm14, %v13149_v49  ;;  %v13161_v21 = vld [vmem:[%s23420_s11 + $0x6f8] sm:$0xff] }
 0xb07   : > { %v7146_v29 = vpop.f32.mrb[68].mxu0 }
 0xb08   : > { %8127 = vmatmul.mubr.f32.gmra.mrb[174].mxu0 %v13148_v47  ;;  %v7148_v50 = vpop.f32.mrb[69].mxu0  ;;  %v21122_v54 = vadd.f32 %v20826_v41, %v7146_v29  ;;  %v13152_v41 = vld [vmem:[%s23420_s11 + $0x6b0] sm:$0xff] }
 0xb09   : > { %13204 = vmatprep.mubr.msk.f32.mxu0 %vm6899_vm14, %v13151_v6  ;;  %v13163_v50 = vld [vmem:[%s23420_s11 + $0x708] sm:$0xff] }
 0xb0b   : > { %v7151_v38 = vpop.f32.mrb[70].mxu0 }
 0xb0c   : > { %8132 = vmatmul.mubr.f32.gmra.mrb[176].mxu0 %v13150_v40  ;;  %v7153_v39 = vpop.f32.mrb[71].mxu0  ;;  %v21132_v14 = vadd.f32 %v20835_v63, %v7151_v38  ;;  %v13154_v63 = vld [vmem:[%s23420_s11 + $0x6c0] sm:$0xff] }
 0xb0d   : > { %13205 = vmatprep.mubr.msk.f32.mxu0 %vm6899_vm14, %v13153_v57  ;;  %v13165_v39 = vld [vmem:[%s23420_s11 + $0x718] sm:$0xff] }
 0xb0f   : > { %v7156_v10 = vpop.f32.mrb[72].mxu0 }
 0xb10   : > { %8137 = vmatmul.mubr.f32.gmra.mrb[178].mxu0 %v13152_v41  ;;  %v7158_v58 = vpop.f32.mrb[73].mxu0  ;;  %v21142_v15 = vadd.f32 %v20844_v16, %v7156_v10  ;;  %v13156_v16 = vld [vmem:[%s23420_s11 + $0x6d0] sm:$0xff] }
 0xb11   : > { %13206 = vmatprep.mubr.msk.f32.mxu0 %vm6899_vm14, %v13155_v45  ;;  %v13167_v58 = vld [vmem:[%s23420_s11 + $0x728] sm:$0xff] }
 0xb13   : > { %v7161_v44 = vpop.f32.mrb[74].mxu0 }
 0xb14   : > { %8142 = vmatmul.mubr.f32.gmra.mrb[180].mxu0 %v13154_v63  ;;  %v7163_v33 = vpop.f32.mrb[75].mxu0  ;;  %v21152_v36 = vadd.f32 %v20853_v7, %v7161_v44  ;;  %v13158_v7 = vld [vmem:[%s23420_s11 + $0x6e0] sm:$0xff] }
 0xb15   : > { %13207 = vmatprep.mubr.msk.f32.mxu0 %vm6899_vm14, %v13157_v28  ;;  %v13169_v33 = vld [vmem:[%s23420_s11 + $0x738] sm:$0xff] }
 0xb17   : > { %v7166_v60 = vpop.f32.mrb[76].mxu0 }
 0xb18   : > { %8147 = vmatmul.mubr.f32.gmra.mrb[182].mxu0 %v13156_v16  ;;  %v7168_v49 = vpop.f32.mrb[77].mxu0  ;;  %v21162_v55 = vadd.f32 %v20862_v35, %v7166_v60  ;;  %v13160_v35 = vld [vmem:[%s23420_s11 + $0x6f0] sm:$0xff] }
 0xb19   : > { %13208 = vmatprep.mubr.msk.f32.mxu0 %vm6899_vm14, %v13159_v2  ;;  %v13171_v49 = vld [vmem:[%s23420_s11 + $0x748] sm:$0xff] }
 0xb1b   : > { %v7171_v47 = vpop.f32.mrb[78].mxu0 }
 0xb1c   : > { %8152 = vmatmul.mubr.f32.gmra.mrb[184].mxu0 %v13158_v7  ;;  %v7173_v6 = vpop.f32.mrb[79].mxu0  ;;  %v21172_v29 = vadd.f32 %v20871_v5, %v7171_v47  ;;  %v13162_v5 = vld [vmem:[%s23420_s11 + $0x700] sm:$0xff] }
 0xb1d   : > { %13209 = vmatprep.mubr.msk.f32.mxu0 %vm6899_vm14, %v13161_v21  ;;  %v13173_v6 = vld [vmem:[%s23420_s11 + $0x758] sm:$0xff] }
 0xb1f   : > { %v7176_v40 = vpop.f32.mrb[80].mxu0 }
 0xb20   : > { %8157 = vmatmul.mubr.f32.gmra.mrb[186].mxu0 %v13160_v35  ;;  %v7178_v57 = vpop.f32.mrb[81].mxu0  ;;  %v21182_v38 = vadd.f32 %v20880_v26, %v7176_v40  ;;  %v13164_v26 = vld [vmem:[%s23420_s11 + $0x710] sm:$0xff] }
 0xb21   : > { %13210 = vmatprep.mubr.msk.f32.mxu0 %vm6899_vm14, %v13163_v50  ;;  %v13175_v57 = vld [vmem:[%s23420_s11 + $0x768] sm:$0xff] }
 0xb23   : > { %v7181_v41 = vpop.f32.mrb[82].mxu0 }
 0xb24   : > { %8162 = vmatmul.mubr.f32.gmra.mrb[188].mxu0 %v13162_v5  ;;  %v7183_v45 = vpop.f32.mrb[83].mxu0  ;;  %v21192_v10 = vadd.f32 %v20889_v17, %v7181_v41  ;;  %v13166_v17 = vld [vmem:[%s23420_s11 + $0x720] sm:$0xff] }
 0xb25   : > { %13211 = vmatprep.mubr.msk.f32.mxu0 %vm6899_vm14, %v13165_v39  ;;  %v13177_v45 = vld [vmem:[%s23420_s11 + $0x778] sm:$0xff] }
 0xb27   : > { %v7186_v63 = vpop.f32.mrb[84].mxu0 }
 0xb28   : > { %8167 = vmatmul.mubr.f32.gmra.mrb[190].mxu0 %v13164_v26  ;;  %v7188_v28 = vpop.f32.mrb[85].mxu0  ;;  %v21202_v44 = vadd.f32 %v20898_v52, %v7186_v63  ;;  %v13168_v52 = vld [vmem:[%s23420_s11 + $0x730] sm:$0xff] }
 0xb29   : > { %13212 = vmatprep.mubr.msk.f32.mxu0 %vm6899_vm14, %v13167_v58 }
 0xb2b   : > { %v7191_v16 = vpop.f32.mrb[86].mxu0 }
 0xb2c   : > { %8172 = vmatmul.mubr.f32.gmra.mrb[192].mxu0 %v13166_v17  ;;  %v7193_v2 = vpop.f32.mrb[87].mxu0  ;;  %v21212_v60 = vadd.f32 %v20907_v56, %v7191_v16  ;;  %v13170_v56 = vld [vmem:[%s23420_s11 + $0x740] sm:$0xff] }
 0xb2d   : > { %13213 = vmatprep.mubr.msk.f32.mxu0 %vm6899_vm14, %v13169_v33 }
 0xb2f   : > { %v7196_v7 = vpop.f32.mrb[88].mxu0 }
 0xb30   : > { %8177 = vmatmul.mubr.f32.gmra.mrb[194].mxu0 %v13168_v52  ;;  %v7198_v21 = vpop.f32.mrb[89].mxu0  ;;  %v21222_v47 = vadd.f32 %v20916_v22, %v7196_v7  ;;  %v13172_v22 = vld [vmem:[%s23420_s11 + $0x750] sm:$0xff] }
 0xb31   : > { %13214 = vmatprep.mubr.msk.f32.mxu0 %vm6899_vm14, %v13171_v49 }
 0xb33   : > { %v7201_v35 = vpop.f32.mrb[90].mxu0 }
 0xb34   : > { %8182 = vmatmul.mubr.f32.gmra.mrb[196].mxu0 %v13170_v56  ;;  %v7203_v50 = vpop.f32.mrb[91].mxu0  ;;  %v21232_v40 = vadd.f32 %v20925_v59, %v7201_v35  ;;  %v13174_v59 = vld [vmem:[%s23420_s11 + $0x760] sm:$0xff] }
 0xb35   : > { %13215 = vmatprep.mubr.msk.f32.mxu0 %vm6899_vm14, %v13173_v6 }
 0xb37   : > { %v7206_v5 = vpop.f32.mrb[92].mxu0 }
 0xb38   : > { %8187 = vmatmul.mubr.f32.gmra.mrb[198].mxu0 %v13172_v22  ;;  %v7208_v39 = vpop.f32.mrb[93].mxu0  ;;  %v21242_v41 = vadd.f32 %v20934_v43, %v7206_v5  ;;  %v13176_v43 = vld [vmem:[%s23420_s11 + $0x770] sm:$0xff] }
 0xb39   : > { %13216 = vmatprep.mubr.msk.f32.mxu0 %vm6899_vm14, %v13175_v57 }
 0xb3b   : > { %v7211_v26 = vpop.f32.mrb[94].mxu0 }
 0xb3c   : > { %8192 = vmatmul.mubr.f32.gmra.mrb[200].mxu0 %v13174_v59  ;;  %v7213_v58 = vpop.f32.mrb[95].mxu0  ;;  %v21252_v63 = vadd.f32 %v20943_v27, %v7211_v26 }
 0xb3d   : > { %13217 = vmatprep.mubr.msk.f32.mxu0 %vm6899_vm14, %v13177_v45 }
 0xb3f   : > { %v7216_v28 = vpop.f32.mrb[96].mxu0 }
 0xb40   : > { %8197 = vmatmul.mubr.f32.gmra.mrb[202].mxu0 %v13176_v43  ;;  %v7218_v17 = vpop.f32.mrb[97].mxu0  ;;  %v21259_v33 = vadd.f32 %v20952_v61, %v7216_v28 }
 0xb43   : > { %v7221_v16 = vpop.f32.mrb[98].mxu0 }
 0xb44   : > { %v7223_v2 = vpop.f32.mrb[99].mxu0  ;;  %v21262_v52 = vadd.f32 %v20961_v25, %v7221_v16 }
 0xb47   : > { %v7226_v49 = vpop.f32.mrb[100].mxu0 }
 0xb48   : > { %v7228_v27 = vpop.f32.mrb[101].mxu0  ;;  %v21265_v7 = vadd.f32 %v20970_v4, %v7226_v49 }
 0xb4b   : > { %v7231_v21 = vpop.f32.mrb[102].mxu0 }
 0xb4c   : > { %v7233_v56 = vpop.f32.mrb[103].mxu0  ;;  %v21268_v6 = vadd.f32 %v20979_v48, %v7231_v21 }
 0xb4f   : > { %v7236_v35 = vpop.f32.mrb[104].mxu0 }
 0xb50   : > { %v7238_v50 = vpop.f32.mrb[105].mxu0  ;;  %v21271_v61 = vadd.f32 %v20991_v31, %v7236_v35 }
 0xb53   : > { %v7241_v22 = vpop.f32.mrb[106].mxu0 }
 0xb54   : > { %v7243_v57 = vpop.f32.mrb[107].mxu0  ;;  %v21274_v25 = vadd.f32 %v21003_v51, %v7241_v22 }
 0xb55   : > { %v8285_v57 = vpop.permute.xlu1 %8284 }
 0xb57   : > { %v7246_v5 = vpop.f32.mrb[108].mxu0 }
 0xb58   : > { %v7248_v39 = vpop.f32.mrb[109].mxu0  ;;  %v21277_v4 = vadd.f32 %v21015_v9, %v7246_v5 }
 0xb5b   : > { %v7251_v59 = vpop.f32.mrb[110].mxu0 }
 0xb5c   : > { %v7253_v45 = vpop.f32.mrb[111].mxu0  ;;  %v21280_v48 = vadd.f32 %v21027_v18, %v7251_v59 }
 0xb5d   : > { %v8290_v45 = vpop.permute.xlu0 %8289 }
 0xb5f   : > { %v7256_v26 = vpop.f32.mrb[112].mxu0 }
 0xb60   : > { %v7258_v58 = vpop.f32.mrb[113].mxu0  ;;  %v21283_v31 = vadd.f32 %v21039_v30, %v7256_v26 }
 0xb63   : > { %v7261_v43 = vpop.f32.mrb[114].mxu0 }
 0xb64   : > { %v7263_v28 = vpop.f32.mrb[115].mxu0  ;;  %v21286_v51 = vadd.f32 %v21051_v19, %v7261_v43 }
 0xb67   : > { %v7266_v17 = vpop.f32.mrb[116].mxu0 }
 0xb68   : > { %v7268_v16 = vpop.f32.mrb[117].mxu0  ;;  %v21289_v9 = vadd.f32 %v21063_v8, %v7266_v17 }
 0xb69   : > { %v8295_v16 = vpop.permute.xlu1 %8294 }
 0xb6b   : > { %v7271_v2 = vpop.f32.mrb[118].mxu0 }
 0xb6c   : > { %v7273_v49 = vpop.f32.mrb[119].mxu0  ;;  %v21292_v18 = vadd.f32 %v21075_v3, %v7271_v2 }
 0xb6f   : > { %v7276_v27 = vpop.f32.mrb[120].mxu0 }
 0xb70   : > { %v7278_v21 = vpop.f32.mrb[121].mxu0  ;;  %v21295_v30 = vadd.f32 %v21087_v1, %v7276_v27  ;;  %v8563_v1 = vld [vmem:[%s23422_s13 + $0x8] sm:$0xff] }
 0xb71   : > { %8747 = vmatprep.mubr.f32.mxu1 %v8563_v1  ;;  %v8300_v21 = vpop.permute.xlu0 %8299 }
 0xb73   : > { %v7281_v56 = vpop.f32.mrb[122].mxu0 }
 0xb74   : > { %v7283_v35 = vpop.f32.mrb[123].mxu0  ;;  %v21298_v19 = vadd.f32 %v21099_v11, %v7281_v56 }
 0xb77   : > { %v8003_v50 = vpop.f32.mrb[124].mxu0 }
 0xb78   : > { %v8202_v22 = vadd.f32 %v8003_v50, %v20982_v0  ;;  %v8005_v8 = vpop.f32.mrb[125].mxu0 }
 0xb7a   : > { %v8482_v39 = vadd.f32 %v8285_v57, %v8202_v22 }
 0xb7b   : > { %v8008_v5 = vpop.f32.mrb[126].mxu0 }
 0xb7c   : > { %v8203_v3 = vadd.f32 %v8008_v5, %v20994_v46  ;;  %v8010_v59 = vpop.f32.mrb[127].mxu0  ;;  %v8522_v11 = vmax.f32 %v8482_v39, 0.0  ;;  %v8305_v5 = vpop.permute.xlu1 %8304 }
 0xb7e   : > { %v8483_v26 = vadd.f32 %v8290_v45, %v8203_v3  ;;  %v8310_v45 = vpop.permute.xlu0 %8309 }
 0xb7f   : > { %v8013_v58 = vpop.f32.mrb[128].mxu0 }
 0xb80   : > { %v8523_v43 = vmax.f32 %v8483_v26, 0.0  ;;  %v8204_v28 = vadd.f32 %v8013_v58, %v21006_v23  ;;  %v8015_v0 = vpop.f32.mrb[129].mxu0 }
 0xb81   : > { %v8315_v0 = vpop.permute.xlu1 %8314 }
 0xb82   : > { %v15295_v17 = vpack.c.bf16 %v8523_v43, %v8522_v11  ;;  %v8484_v49 = vadd.f32 %v8295_v16, %v8204_v28 }
 0xb83   : > { %v8018_v2 = vpop.f32.mrb[130].mxu0 }
 0xb84   : > { %v8205_v46 = vadd.f32 %v8018_v2, %v21018_v12  ;;  %15296 = vmatpush1.bf16.msra.mxu1 %v15295_v17  ;;  %v8020_v27 = vpop.f32.mrb[131].mxu0  ;;  %v8524_v50 = vmax.f32 %v8484_v49, 0.0  ;;  %v8320_v49 = vpop.permute.xlu0 %8319 }
 0xb85   : > { %15297 = vmatprep.subr.bf16.mxu1 %v23492_v13 }
 0xb86   : > { %v8485_v56 = vadd.f32 %v8300_v21, %v8205_v46 }
 0xb87   : > { %v8023_v35 = vpop.f32.mrb[132].mxu0 }
 0xb88   : > { %v8525_v22 = vmax.f32 %v8485_v56, 0.0  ;;  %v8206_v8 = vadd.f32 %v8023_v35, %v21030_v53  ;;  %v8025_v57 = vpop.f32.mrb[133].mxu0 }
 0xb8a   : > { %v15298_v23 = vpack.c.bf16 %v8525_v22, %v8524_v50  ;;  %v8486_v3 = vadd.f32 %v8305_v5, %v8206_v8  ;;  %v8325_v22 = vpop.permute.xlu1 %8324  ;;  %v8330_v5 = vpop.permute.xlu0 %8329 }
 0xb8b   : > { %v8028_v39 = vpop.f32.mrb[134].mxu0 }
 0xb8c   : > { %v8207_v59 = vadd.f32 %v8028_v39, %v21042_v24  ;;  %15299 = vmatpush1.bf16.msra.mxu1 %v15298_v23  ;;  %v8030_v12 = vpop.f32.mrb[135].mxu0  ;;  %v8526_v58 = vmax.f32 %v8486_v3, 0.0 }
 0xb8d   : > { %15300 = vmatprep.subr.bf16.mxu1 %v23492_v13 }
 0xb8e   : > { %v8487_v26 = vadd.f32 %v8310_v45, %v8207_v59 }
 0xb8f   : > { %v8033_v1 = vpop.f32.mrb[136].mxu0 }
 0xb90   : > { %v8527_v11 = vmax.f32 %v8487_v26, 0.0  ;;  %v8208_v43 = vadd.f32 %v8033_v1, %v21054_v32  ;;  %v8035_v28 = vpop.f32.mrb[137].mxu0  ;;  %v8335_v1 = vpop.permute.xlu1 %8334 }
 0xb91   : > { %v8340_v28 = vpop.permute.xlu0 %8339 }
 0xb92   : > { %v15301_v53 = vpack.c.bf16 %v8527_v11, %v8526_v58  ;;  %v8488_v16 = vadd.f32 %v8315_v0, %v8208_v43 }
 0xb93   : > { %v8038_v17 = vpop.f32.mrb[138].mxu0 }
 0xb94   : > { %v8209_v2 = vadd.f32 %v8038_v17, %v21066_v37  ;;  %15302 = vmatpush1.bf16.msra.mxu1 %v15301_v53  ;;  %v8040_v24 = vpop.f32.mrb[139].mxu0  ;;  %v8528_v21 = vmax.f32 %v8488_v16, 0.0 }
 0xb95   : > { %15303 = vmatprep.subr.bf16.mxu1 %v23492_v13 }
 0xb96   : > { %v8489_v46 = vadd.f32 %v8320_v49, %v8209_v2  ;;  %v8345_v49 = vpop.permute.xlu1 %8344 }
 0xb97   : > { %v8043_v27 = vpop.f32.mrb[140].mxu0 }
 0xb98   : > { %v8529_v56 = vmax.f32 %v8489_v46, 0.0  ;;  %v8210_v35 = vadd.f32 %v8043_v27, %v21078_v34  ;;  %v8045_v50 = vpop.f32.mrb[141].mxu0 }
 0xb9a   : > { %v15304_v32 = vpack.c.bf16 %v8529_v56, %v8528_v21  ;;  %v8490_v57 = vadd.f32 %v8325_v22, %v8210_v35  ;;  %v8350_v56 = vpop.permute.xlu0 %8349 }
 0xb9b   : > { %v8048_v8 = vpop.f32.mrb[142].mxu0 }
 0xb9c   : > { %v8211_v23 = vadd.f32 %v8048_v8, %v21090_v20  ;;  %15305 = vmatpush1.bf16.msra.mxu1 %v15304_v32  ;;  %v8050_v37 = vpop.f32.mrb[143].mxu0  ;;  %v8530_v59 = vmax.f32 %v8490_v57, 0.0 }
 0xb9d   : > { %15306 = vmatprep.subr.bf16.mxu1 %v23492_v13 }
 0xb9e   : > { %v8491_v39 = vadd.f32 %v8330_v5, %v8211_v23  ;;  %v8355_v23 = vpop.permute.xlu1 %8354 }
 0xb9f   : > { %v8053_v3 = vpop.f32.mrb[144].mxu0 }
 0xba0   : > { %v8531_v12 = vmax.f32 %v8491_v39, 0.0  ;;  %v8212_v45 = vadd.f32 %v8053_v3, %v21102_v42  ;;  %v8055_v26 = vpop.f32.mrb[145].mxu0  ;;  %v8360_v3 = vpop.permute.xlu0 %8359 }
 0xba2   : > { %v15307_v34 = vpack.c.bf16 %v8531_v12, %v8530_v59  ;;  %v8492_v11 = vadd.f32 %v8335_v1, %v8212_v45 }
 0xba3   : > { %v8058_v58 = vpop.f32.mrb[146].mxu0 }
 0xba4   : > { %v8213_v43 = vadd.f32 %v8058_v58, %v21112_v62  ;;  %15308 = vmatpush1.bf16.msra.mxu1 %v15307_v34  ;;  %v8060_v20 = vpop.f32.mrb[147].mxu0  ;;  %v8532_v17 = vmax.f32 %v8492_v11, 0.0  ;;  %v8365_v58 = vpop.permute.xlu1 %8364 }
 0xba5   : > { %15309 = vmatprep.subr.bf16.mxu1 %v23492_v13 }
 0xba6   : > { %v8493_v53 = vadd.f32 %v8340_v28, %v8213_v43  ;;  %v8370_v28 = vpop.permute.xlu0 %8369 }
 0xba7   : > { %v8063_v0 = vpop.f32.mrb[148].mxu0 }
 0xba8   : > { %v8533_v16 = vmax.f32 %v8493_v53, 0.0  ;;  %v8214_v2 = vadd.f32 %v8063_v0, %v21122_v54  ;;  %v8065_v24 = vpop.f32.mrb[149].mxu0 }
 0xbaa   : > { %v15310_v42 = vpack.c.bf16 %v8533_v16, %v8532_v17  ;;  %v8494_v27 = vadd.f32 %v8345_v49, %v8214_v2 }
 0xbab   : > { %v8068_v46 = vpop.f32.mrb[150].mxu0 }
 0xbac   : > { %v8215_v21 = vadd.f32 %v8068_v46, %v21132_v14  ;;  %15311 = vmatpush1.bf16.msra.mxu1 %v15310_v42  ;;  %v8070_v62 = vpop.f32.mrb[151].mxu0  ;;  %v8534_v32 = vmax.f32 %v8494_v27, 0.0  ;;  %v8375_v42 = vpop.permute.xlu1 %8374 }
 0xbad   : > { %15312 = vmatprep.subr.bf16.mxu1 %v23492_v13 }
 0xbae   : > { %v8495_v35 = vadd.f32 %v8350_v56, %v8215_v21  ;;  %v8380_v21 = vpop.permute.xlu0 %8379 }
 0xbaf   : > { %v8073_v50 = vpop.f32.mrb[152].mxu0 }
 0xbb0   : > { %v8535_v22 = vmax.f32 %v8495_v35, 0.0  ;;  %v8216_v8 = vadd.f32 %v8073_v50, %v21142_v15  ;;  %v8075_v57 = vpop.f32.mrb[153].mxu0 }
 0xbb2   : > { %v15313_v54 = vpack.c.bf16 %v8535_v22, %v8534_v32  ;;  %v8496_v5 = vadd.f32 %v8355_v23, %v8216_v8  ;;  %v8385_v8 = vpop.permute.xlu1 %8384 }
 0xbb3   : > { %v8078_v37 = vpop.f32.mrb[154].mxu0 }
 0xbb4   : > { %v8217_v39 = vadd.f32 %v8078_v37, %v21152_v36  ;;  %15314 = vmatpush1.bf16.msra.mxu1 %v15313_v54  ;;  %v8080_v14 = vpop.f32.mrb[155].mxu0  ;;  %v8536_v45 = vmax.f32 %v8496_v5, 0.0  ;;  %v8390_v37 = vpop.permute.xlu0 %8389 }
 0xbb5   : > { %15315 = vmatprep.subr.bf16.mxu1 %v23492_v13 }
 0xbb6   : > { %v8497_v59 = vadd.f32 %v8360_v3, %v8217_v39 }
 0xbb7   : > { %v8083_v12 = vpop.f32.mrb[156].mxu0 }
 0xbb8   : > { %v8537_v26 = vmax.f32 %v8497_v59, 0.0  ;;  %v8218_v34 = vadd.f32 %v8083_v12, %v21162_v55  ;;  %v8085_v1 = vpop.f32.mrb[157].mxu0 }
 0xbba   : > { %v15316_v15 = vpack.c.bf16 %v8537_v26, %v8536_v45  ;;  %v8498_v43 = vadd.f32 %v8365_v58, %v8218_v34  ;;  %v8395_v45 = vpop.permute.xlu1 %8394 }
 0xbbb   : > { %v8088_v11 = vpop.f32.mrb[158].mxu0 }
 0xbbc   : > { %v8219_v20 = vadd.f32 %v8088_v11, %v21172_v29  ;;  %15317 = vmatpush1.bf16.msra.mxu1 %v15316_v15  ;;  %v8090_v36 = vpop.f32.mrb[159].mxu0  ;;  %v8538_v17 = vmax.f32 %v8498_v43, 0.0  ;;  %v8400_v15 = vpop.permute.xlu0 %8399 }
 0xbbd   : > { %15318 = vmatprep.subr.bf16.mxu1 %v23492_v13 }
 0xbbe   : > { %v8499_v53 = vadd.f32 %v8370_v28, %v8219_v20 }
 0xbbf   : > { %v8093_v0 = vpop.f32.mrb[160].mxu0 }
 0xbc0   : > { %v8539_v16 = vmax.f32 %v8499_v53, 0.0  ;;  %v8220_v2 = vadd.f32 %v8093_v0, %v21182_v38  ;;  %v8095_v24 = vpop.f32.mrb[161].mxu0  ;;  %v8405_v53 = vpop.permute.xlu1 %8404 }
 0xbc2   : > { %v15319_v55 = vpack.c.bf16 %v8539_v16, %v8538_v17  ;;  %v8500_v46 = vadd.f32 %v8375_v42, %v8220_v2  ;;  %v8410_v2 = vpop.permute.xlu0 %8409 }
 0xbc3   : > { %v8098_v49 = vpop.f32.mrb[162].mxu0 }
 0xbc4   : > { %v8221_v27 = vadd.f32 %v8098_v49, %v21192_v10  ;;  %15320 = vmatpush1.bf16.msra.mxu1 %v15319_v55  ;;  %v8100_v29 = vpop.f32.mrb[163].mxu0  ;;  %v8540_v35 = vmax.f32 %v8500_v46, 0.0 }
 0xbc5   : > { %15321 = vmatprep.subr.bf16.mxu1 %v23492_v13  ;;  %v8415_v29 = vpop.permute.xlu1 %8414 }
 0xbc6   : > { %v8501_v62 = vadd.f32 %v8380_v21, %v8221_v27 }
 0xbc7   : > { %v8103_v56 = vpop.f32.mrb[164].mxu0 }
 0xbc8   : > { %v8541_v50 = vmax.f32 %v8501_v62, 0.0  ;;  %v8222_v32 = vadd.f32 %v8103_v56, %v21202_v44  ;;  %v8105_v22 = vpop.f32.mrb[165].mxu0 }
 0xbca   : > { %v15322_v38 = vpack.c.bf16 %v8541_v50, %v8540_v35  ;;  %v8502_v54 = vadd.f32 %v8385_v8, %v8222_v32  ;;  %v8420_v35 = vpop.permute.xlu0 %8419 }
 0xbcb   : > { %v8108_v57 = vpop.f32.mrb[166].mxu0 }
 0xbcc   : > { %v8223_v23 = vadd.f32 %v8108_v57, %v21212_v60  ;;  %15323 = vmatpush1.bf16.msra.mxu1 %v15322_v38  ;;  %v8110_v10 = vpop.f32.mrb[167].mxu0  ;;  %v8542_v14 = vmax.f32 %v8502_v54, 0.0  ;;  %v8425_v54 = vpop.permute.xlu1 %8424 }
 0xbcd   : > { %15324 = vmatprep.subr.bf16.mxu1 %v23492_v13 }
 0xbce   : > { %v8503_v5 = vadd.f32 %v8390_v37, %v8223_v23 }
 0xbcf   : > { %v8113_v39 = vpop.f32.mrb[168].mxu0 }
 0xbd0   : > { %v8543_v3 = vmax.f32 %v8503_v5, 0.0  ;;  %v8224_v59 = vadd.f32 %v8113_v39, %v21222_v47  ;;  %v8115_v12 = vpop.f32.mrb[169].mxu0  ;;  %v8430_v5 = vpop.permute.xlu0 %8429 }
 0xbd2   : > { %v15325_v44 = vpack.c.bf16 %v8543_v3, %v8542_v14  ;;  %v8504_v34 = vadd.f32 %v8395_v45, %v8224_v59  ;;  %v8435_v45 = vpop.permute.xlu1 %8434 }
 0xbd3   : > { %v8118_v26 = vpop.f32.mrb[170].mxu0 }
 0xbd4   : > { %v8225_v1 = vadd.f32 %v8118_v26, %v21232_v40  ;;  %15326 = vmatpush1.bf16.msra.mxu1 %v15325_v44  ;;  %v8120_v60 = vpop.f32.mrb[171].mxu0  ;;  %v8544_v43 = vmax.f32 %v8504_v34, 0.0 }
 0xbd5   : > { %15327 = vmatprep.subr.bf16.mxu1 %v23492_v13  ;;  %v8440_v60 = vpop.permute.xlu0 %8439 }
 0xbd6   : > { %v8505_v58 = vadd.f32 %v8400_v15, %v8225_v1 }
 0xbd7   : > { %v8123_v11 = vpop.f32.mrb[172].mxu0 }
 0xbd8   : > { %v8545_v20 = vmax.f32 %v8505_v58, 0.0  ;;  %v8226_v36 = vadd.f32 %v8123_v11, %v21242_v41  ;;  %v8125_v28 = vpop.f32.mrb[173].mxu0 }
 0xbd9   : > { %v8445_v28 = vpop.permute.xlu1 %8444 }
 0xbda   : > { %v15328_v47 = vpack.c.bf16 %v8545_v20, %v8544_v43  ;;  %v8506_v17 = vadd.f32 %v8405_v53, %v8226_v36 }
 0xbdb   : > { %v8128_v0 = vpop.f32.mrb[174].mxu0 }
 0xbdc   : > { %v8227_v16 = vadd.f32 %v8128_v0, %v21252_v63  ;;  %15329 = vmatpush1.bf16.msra.mxu1 %v15328_v47  ;;  %v8130_v40 = vpop.f32.mrb[175].mxu0  ;;  %v8546_v42 = vmax.f32 %v8506_v17, 0.0  ;;  %v8562_v17 = vld [vmem:[%s23422_s13] sm:$0xff] }
 0xbdd   : > { %15330 = vmatprep.subr.bf16.mxu1 %v23492_v13  ;;  %v8566_v40 = vld [vmem:[%s23422_s13 + $0x20] sm:$0xff] }
 0xbde   : > { %v8507_v24 = vadd.f32 %v8410_v2, %v8227_v16  ;;  %v8450_v16 = vpop.permute.xlu0 %8449 }
 0xbdf   : > { %v8133_v55 = vpop.f32.mrb[176].mxu0 }
 0xbe0   : > { %v8547_v49 = vmax.f32 %v8507_v24, 0.0  ;;  %v8228_v46 = vadd.f32 %v8133_v55, %v21259_v33  ;;  %v8135_v27 = vpop.f32.mrb[177].mxu0 }
 0xbe2   : > { %v15331_v41 = vpack.c.bf16 %v8547_v49, %v8546_v42  ;;  %v8508_v62 = vadd.f32 %v8415_v29, %v8228_v46  ;;  %v8569_v46 = vld [vmem:[%s23422_s13 + $0x38] sm:$0xff] }
 0xbe3   : > { %v8138_v21 = vpop.f32.mrb[178].mxu0 }
 0xbe4   : > { %v8229_v56 = vadd.f32 %v8138_v21, %v21262_v52  ;;  %15332 = vmatpush1.bf16.msra.mxu1 %v15331_v41  ;;  %v8140_v63 = vpop.f32.mrb[179].mxu0  ;;  %v8548_v22 = vmax.f32 %v8508_v62, 0.0  ;;  %v8455_v41 = vpop.permute.xlu1 %8454 }
 0xbe5   : > { %15333 = vmatprep.subr.bf16.mxu1 %v23492_v13  ;;  %v8460_v63 = vpop.permute.xlu0 %8459 }
 0xbe6   : > { %v8509_v50 = vadd.f32 %v8420_v35, %v8229_v56  ;;  %v8572_v35 = vld [vmem:[%s23422_s13 + $0x50] sm:$0xff] }
 0xbe7   : > { %v8143_v32 = vpop.f32.mrb[180].mxu0 }
 0xbe8   : > { %v8549_v38 = vmax.f32 %v8509_v50, 0.0  ;;  %v8230_v8 = vadd.f32 %v8143_v32, %v21265_v7  ;;  %v8145_v57 = vpop.f32.mrb[181].mxu0 }
 0xbe9   : > { %v8571_v57 = vld [vmem:[%s23422_s13 + $0x48] sm:$0xff] }
 0xbea   : > { %v15334_v33 = vpack.c.bf16 %v8549_v38, %v8548_v22  ;;  %v8510_v10 = vadd.f32 %v8425_v54, %v8230_v8 }
 0xbeb   : > { %v8148_v23 = vpop.f32.mrb[182].mxu0 }
 0xbec   : > { %v8231_v37 = vadd.f32 %v8148_v23, %v21268_v6  ;;  %15335 = vmatpush1.bf16.msra.mxu1 %v15334_v33  ;;  %v8150_v52 = vpop.f32.mrb[183].mxu0  ;;  %v8550_v3 = vmax.f32 %v8510_v10, 0.0  ;;  %v8575_v33 = vld [vmem:[%s23422_s13 + $0x68] sm:$0xff]  ;;  %v8465_v23 = vpop.permute.xlu1 %8464 }
 0xbed   : > { %15336 = vmatprep.subr.bf16.mxu1 %v23492_v13 }
 0xbee   : > { %v8511_v39 = vadd.f32 %v8430_v5, %v8231_v37 }
 0xbef   : > { %v8153_v14 = vpop.f32.mrb[184].mxu0 }
 0xbf0   : > { %v8551_v59 = vmax.f32 %v8511_v39, 0.0  ;;  %v8232_v12 = vadd.f32 %v8153_v14, %v21271_v61  ;;  %v8155_v44 = vpop.f32.mrb[185].mxu0  ;;  %v8470_v39 = vpop.permute.xlu0 %8469  ;;  %v8578_v14 = vld [vmem:[%s23422_s13 + $0x80] sm:$0xff] }
 0xbf2   : > { %v15337_v7 = vpack.c.bf16 %v8551_v59, %v8550_v3  ;;  %v8512_v34 = vadd.f32 %v8435_v45, %v8232_v12  ;;  %v8577_v45 = vld [vmem:[%s23422_s13 + $0x78] sm:$0xff] }
 0xbf3   : > { %v8158_v26 = vpop.f32.mrb[186].mxu0 }
 0xbf4   : > { %v8233_v1 = vadd.f32 %v8158_v26, %v21274_v25  ;;  %15338 = vmatpush1.bf16.msra.mxu1 %v15337_v7  ;;  %v8160_v6 = vpop.f32.mrb[187].mxu0  ;;  %v8552_v11 = vmax.f32 %v8512_v34, 0.0  ;;  %v8581_v26 = vld [vmem:[%s23422_s13 + $0x98] sm:$0xff] }
 0xbf5   : > { %15339 = vmatprep.subr.bf16.mxu1 %v23492_v13 }
 0xbf6   : > { %v8513_v15 = vadd.f32 %v8440_v60, %v8233_v1  ;;  %v8475_v1 = vpop.permute.xlu1 %8474 }
 0xbf7   : > { %v8163_v58 = vpop.f32.mrb[188].mxu0 }
 0xbf8   : > { %v8553_v43 = vmax.f32 %v8513_v15, 0.0  ;;  %v8234_v20 = vadd.f32 %v8163_v58, %v21277_v4  ;;  %v8165_v36 = vpop.f32.mrb[189].mxu0 }
 0xbfa   : > { %v15340_v61 = vpack.c.bf16 %v8553_v43, %v8552_v11  ;;  %v8514_v53 = vadd.f32 %v8445_v28, %v8234_v20  ;;  %v8480_v11 = vpop.permute.xlu0 %8479  ;;  %v8584_v43 = vld [vmem:[%s23422_s13 + $0xb0] sm:$0xff]  ;;  %v8587_v28 = vld [vmem:[%s23422_s13 + $0xc8] sm:$0xff] }
 0xbfb   : > { %v8168_v47 = vpop.f32.mrb[190].mxu0 }
 0xbfc   : > { %v8235_v0 = vadd.f32 %v8168_v47, %v21280_v48  ;;  %15341 = vmatpush1.bf16.msra.mxu1 %v15340_v61  ;;  %v8170_v25 = vpop.f32.mrb[191].mxu0  ;;  %v8554_v24 = vmax.f32 %v8514_v53, 0.0  ;;  %v8565_v48 = vld [vmem:[%s23422_s13 + $0x18] sm:$0xff]  ;;  %v8586_v53 = vld [vmem:[%s23422_s13 + $0xc0] sm:$0xff] }
 0xbfd   : > { %v8589_v25 = vld [vmem:[%s23422_s13 + $0xd8] sm:$0xff] }
 0xbfe   : > { %v8515_v2 = vadd.f32 %v8450_v16, %v8235_v0  ;;  %v8590_v0 = vld [vmem:[%s23422_s13 + $0xe0] sm:$0xff]  ;;  %v8592_v16 = vld [vmem:[%s23422_s13 + $0xf0] sm:$0xff] }
 0xbff   : > { %v8173_v4 = vpop.f32.mrb[192].mxu0  ;;  %8748 = vmatmul.mubr.f32.vlgmr.msra.gmra.mrb[4].mxu1 %v8562_v17  ;;  %v8593_v17 = vld [vmem:[%s23422_s13 + $0xf8] sm:$0xff] }
 0xc00   : > { %v8555_v55 = vmax.f32 %v8515_v2, 0.0  ;;  %v8236_v42 = vadd.f32 %v8173_v4, %v21283_v31  ;;  %v8175_v49 = vpop.f32.mrb[193].mxu0  ;;  %8752 = vmatprep.mubr.f32.mxu1 %v8566_v40  ;;  %v8568_v31 = vld [vmem:[%s23422_s13 + $0x30] sm:$0xff]  ;;  %v8595_v2 = vld [vmem:[%s23422_s13 + $0x108] sm:$0xff] }
 0xc01   : > { %v8596_v40 = vld [vmem:[%s23422_s13 + $0x110] sm:$0xff]  ;;  %v8599_v4 = vld [vmem:[%s23422_s13 + $0x128] sm:$0xff]  ;;  %v8605_v49 = vld [vmem:[%s23422_s13 + $0x158] sm:$0xff] }
 0xc02   : > { %v15342_v27 = vpack.c.bf16 %v8555_v55, %v8554_v24  ;;  %v8516_v21 = vadd.f32 %v8455_v41, %v8236_v42  ;;  %v8598_v24 = vld [vmem:[%s23422_s13 + $0x120] sm:$0xff]  ;;  %v8601_v42 = vld [vmem:[%s23422_s13 + $0x138] sm:$0xff]  ;;  %v8611_v41 = vld [vmem:[%s23422_s13 + $0x188] sm:$0xff] }
 0xc03   : > { %v8178_v29 = vpop.f32.mrb[194].mxu0  ;;  %8753 = vmatmul.mubr.f32.gmra.mrb[6].mxu1 %v8565_v48  ;;  %v8602_v55 = vld [vmem:[%s23422_s13 + $0x140] sm:$0xff]  ;;  %v8604_v48 = vld [vmem:[%s23422_s13 + $0x150] sm:$0xff] }
 0xc04   : > { %v8237_v62 = vadd.f32 %v8178_v29, %v21286_v51  ;;  %15343 = vmatprep.subr.bf16.mxu1 %v15342_v27  ;;  %v8180_v56 = vpop.f32.mrb[195].mxu0  ;;  %8757 = vmatprep.mubr.f32.mxu1 %v8569_v46  ;;  %v8556_v22 = vmax.f32 %v8516_v21, 0.0  ;;  %v8608_v46 = vld [vmem:[%s23422_s13 + $0x170] sm:$0xff]  ;;  %v8610_v29 = vld [vmem:[%s23422_s13 + $0x180] sm:$0xff] }
 0xc05   : > { %15345 = vmatpush3.bf16.msra.mxu1 %v15342_v27  ;;  %v8607_v27 = vld [vmem:[%s23422_s13 + $0x168] sm:$0xff]  ;;  %v8614_v21 = vld [vmem:[%s23422_s13 + $0x1a0] sm:$0xff]  ;;  %v8617_v56 = vld [vmem:[%s23422_s13 + $0x1b8] sm:$0xff] }
 0xc06   : > { %v8517_v50 = vadd.f32 %v8460_v63, %v8237_v62  ;;  %v8613_v62 = vld [vmem:[%s23422_s13 + $0x198] sm:$0xff]  ;;  %v8620_v63 = vld [vmem:[%s23422_s13 + $0x1d0] sm:$0xff] }
 0xc07   : > { %v8183_v32 = vpop.f32.mrb[196].mxu0  ;;  %8758 = vmatmul.mubr.f32.gmra.mrb[8].mxu1 %v8568_v31  ;;  %v8616_v31 = vld [vmem:[%s23422_s13 + $0x1b0] sm:$0xff] }
 0xc08   : > { %v8557_v38 = vmax.f32 %v8517_v50, 0.0  ;;  %v8238_v51 = vadd.f32 %v8183_v32, %v21289_v9  ;;  %v8185_v8 = vpop.f32.mrb[197].mxu0  ;;  %8762 = vmatprep.mubr.f32.mxu1 %v8572_v35  ;;  %v8574_v9 = vld [vmem:[%s23422_s13 + $0x60] sm:$0xff]  ;;  %v8619_v35 = vld [vmem:[%s23422_s13 + $0x1c8] sm:$0xff]  ;;  %v8564_v50 = vld [vmem:[%s23422_s13 + $0x10] sm:$0xff] }
 0xc09   : > { %v8567_v32 = vld [vmem:[%s23422_s13 + $0x28] sm:$0xff] }
 0xc0a   : > { %v15346_v54 = vpack.c.bf16 %v8557_v38, %v8556_v22  ;;  %v8518_v37 = vadd.f32 %v8465_v23, %v8238_v51  ;;  %v8570_v22 = vld [vmem:[%s23422_s13 + $0x40] sm:$0xff]  ;;  %v8573_v38 = vld [vmem:[%s23422_s13 + $0x58] sm:$0xff]  ;;  %v8576_v51 = vld [vmem:[%s23422_s13 + $0x70] sm:$0xff] }
 0xc0b   : > { %v8188_v10 = vpop.f32.mrb[198].mxu0  ;;  %8763 = vmatmul.mubr.f32.gmra.mrb[10].mxu1 %v8571_v57  ;;  %v8579_v8 = vld [vmem:[%s23422_s13 + $0x88] sm:$0xff]  ;;  %v8582_v57 = vld [vmem:[%s23422_s13 + $0xa0] sm:$0xff] }
 0xc0c   : > { %v8239_v52 = vadd.f32 %v8188_v10, %v21292_v18  ;;  %15347 = vmatprep.subr.bf16.mxu1 %v15346_v54  ;;  %v8190_v5 = vpop.f32.mrb[199].mxu0  ;;  %8767 = vmatprep.mubr.f32.mxu1 %v8575_v33  ;;  %v8558_v12 = vmax.f32 %v8518_v37, 0.0  ;;  %v8585_v33 = vld [vmem:[%s23422_s13 + $0xb8] sm:$0xff]  ;;  %v8591_v23 = vld [vmem:[%s23422_s13 + $0xe8] sm:$0xff]  ;;  %v8594_v10 = vld [vmem:[%s23422_s13 + $0x100] sm:$0xff] }
 0xc0d   : > { %15349 = vmatpush3.bf16.msra.mxu1 %v15346_v54  ;;  %v8588_v54 = vld [vmem:[%s23422_s13 + $0xd0] sm:$0xff]  ;;  %v8597_v37 = vld [vmem:[%s23422_s13 + $0x118] sm:$0xff]  ;;  %v8603_v5 = vld [vmem:[%s23422_s13 + $0x148] sm:$0xff] }
 0xc0e   : > { %v8519_v3 = vadd.f32 %v8470_v39, %v8239_v52  ;;  %v8600_v52 = vld [vmem:[%s23422_s13 + $0x130] sm:$0xff]  ;;  %v8609_v39 = vld [vmem:[%s23422_s13 + $0x178] sm:$0xff] }
 0xc0f   : > { %v8193_v59 = vpop.f32.mrb[200].mxu0  ;;  %8768 = vmatmul.mubr.f32.gmra.mrb[12].mxu1 %v8574_v9  ;;  %v8606_v9 = vld [vmem:[%s23422_s13 + $0x160] sm:$0xff] }
 0xc10   : > { %v8559_v44 = vmax.f32 %v8519_v3, 0.0  ;;  %v8240_v18 = vadd.f32 %v8193_v59, %v21295_v30  ;;  %v8195_v7 = vpop.f32.mrb[201].mxu0  ;;  %8772 = vmatprep.mubr.f32.mxu1 %v8578_v14  ;;  %v8580_v30 = vld [vmem:[%s23422_s13 + $0x90] sm:$0xff]  ;;  %v8615_v3 = vld [vmem:[%s23422_s13 + $0x1a8] sm:$0xff]  ;;  %v8618_v59 = vld [vmem:[%s23422_s13 + $0x1c0] sm:$0xff] }
 0xc11   : > { %v8612_v14 = vld [vmem:[%s23422_s13 + $0x190] sm:$0xff] }
 0xc12   : > { %v15350_v34 = vpack.c.bf16 %v8559_v44, %v8558_v12  ;;  %v8520_v60 = vadd.f32 %v8475_v1, %v8240_v18  ;;  %v8621_v12 = vld [vmem:[%s23422_s13 + $0x1d8] sm:$0xff]  ;;  %v9013_v44 = vld [vmem:[%s23423_s14] sm:$0xff]  ;;  %v9014_v18 = vld [vmem:[%s23423_s14 + $0x8] sm:$0xff] }
 0xc13   : > { %v8198_v6 = vpop.f32.mrb[202].mxu0  ;;  %8773 = vmatmul.mubr.f32.gmra.mrb[14].mxu1 %v8577_v45  ;;  %v15358_v7 = vpack.c.bf16 %v9014_v18, %v9013_v44  ;;  %v9015_v45 = vld [vmem:[%s23423_s14 + $0x10] sm:$0xf] }
 0xc14   : > { %v8241_v15 = vadd.f32 %v8198_v6, %v21298_v19  ;;  %15351 = vmatprep.subr.bf16.mxu1 %v15350_v34  ;;  %8777 = vmatprep.mubr.f32.mxu1 %v8581_v26  ;;  %v8200_v58 = vpop.f32.mrb[203].mxu0  ;;  %v8560_v36 = vmax.f32 %v8520_v60, 0.0  ;;  %v8583_v19 = vld [vmem:[%s23422_s13 + $0xa8] sm:$0xff] }
 0xc15   : > { %15353 = vmatpush3.bf16.msra.mxu1 %v15350_v34 }
 0xc16   : > { %v8521_v20 = vadd.f32 %v8480_v11, %v8241_v15 }
 0xc17   : > { %8778 = vmatmul.mubr.f32.gmra.mrb[16].mxu1 %v8580_v30 }
 0xc18   : > { %v8561_v61 = vmax.f32 %v8521_v20, 0.0  ;;  %8782 = vmatprep.mubr.f32.mxu1 %v8584_v43 }
 0xc1a   : > { %v15354_v47 = vpack.c.bf16 %v8561_v61, %v8560_v36 }
 0xc1b   : > { %8783 = vmatmul.mubr.f32.gmra.mrb[18].mxu1 %v8583_v19 }
 0xc1c   : > { %15355 = vmatprep.subr.bf16.mxu1 %v15354_v47  ;;  %8787 = vmatprep.mubr.f32.mxu1 %v8587_v28 }
 0xc1d   : > { %15357 = vmatpush3.bf16.msra.mxu1 %v15354_v47 }
 0xc1e   : > { %15359 = vmatprep.subr.bf16.mxu1 %v15358_v7 }
 0xc1f   : > { %8788 = vmatmul.mubr.f32.gmra.mrb[20].mxu1 %v8586_v53 }
 0xc20   : > { %8792 = vmatprep.mubr.f32.mxu1 %v8590_v0 }
 0xc23   : > { %8793 = vmatmul.mubr.f32.gmra.mrb[22].mxu1 %v8589_v25 }
 0xc24   : > { %8797 = vmatprep.mubr.f32.mxu1 %v8593_v17 }
 0xc27   : > { %8798 = vmatmul.mubr.f32.gmra.mrb[24].mxu1 %v8592_v16 }
 0xc28   : > { %8802 = vmatprep.mubr.f32.mxu1 %v8596_v40 }
 0xc2b   : > { %8803 = vmatmul.mubr.f32.gmra.mrb[26].mxu1 %v8595_v2 }
 0xc2c   : > { %8807 = vmatprep.mubr.f32.mxu1 %v8599_v4 }
 0xc2f   : > { %8808 = vmatmul.mubr.f32.gmra.mrb[28].mxu1 %v8598_v24 }
 0xc30   : > { %8812 = vmatprep.mubr.f32.mxu1 %v8602_v55 }
 0xc33   : > { %8813 = vmatmul.mubr.f32.gmra.mrb[30].mxu1 %v8601_v42 }
 0xc34   : > { %8817 = vmatprep.mubr.f32.mxu1 %v8605_v49 }
 0xc37   : > { %8818 = vmatmul.mubr.f32.gmra.mrb[32].mxu1 %v8604_v48 }
 0xc38   : > { %8822 = vmatprep.mubr.f32.mxu1 %v8608_v46 }
 0xc3b   : > { %8823 = vmatmul.mubr.f32.gmra.mrb[34].mxu1 %v8607_v27 }
 0xc3c   : > { %8827 = vmatprep.mubr.f32.mxu1 %v8611_v41 }
 0xc3f   : > { %8828 = vmatmul.mubr.f32.gmra.mrb[36].mxu1 %v8610_v29 }
 0xc40   : > { %8832 = vmatprep.mubr.f32.mxu1 %v8614_v21 }
 0xc43   : > { %8833 = vmatmul.mubr.f32.gmra.mrb[38].mxu1 %v8613_v62 }
 0xc44   : > { %8837 = vmatprep.mubr.f32.mxu1 %v8617_v56 }
 0xc47   : > { %8838 = vmatmul.mubr.f32.gmra.mrb[40].mxu1 %v8616_v31 }
 0xc48   : > { %8842 = vmatprep.mubr.f32.mxu1 %v8620_v63 }
 0xc4b   : > { %8843 = vmatmul.mubr.f32.gmra.mrb[42].mxu1 %v8619_v35 }
 0xc4c   : > { %14750 = vmatprep.mubr.msk.f32.mxu1 %vm8622_vm15, %v8564_v50 }
 0xc4f   : > { %14751 = vmatmul.mubr.msk.f32.vlgmr.msra.gmra.mrb[44].mxu1 %vm8622_vm15, %v8567_v32 }
 0xc50   : > { %14753 = vmatprep.mubr.msk.f32.mxu1 %vm8622_vm15, %v8570_v22  ;;  %15361 = vmatpush3.bf16.msra.mxu1 %v15358_v7 }
 0xc51   : > { %14784 = vmatprep.subr.msk.mxu1 %vm4069_vm8, %v9015_v45 }
 0xc53   : > { %14754 = vmatmul.mubr.msk.f32.gmra.mrb[46].mxu1 %vm8622_vm15, %v8573_v38 }
 0xc54   : > { %14756 = vmatprep.mubr.msk.f32.mxu1 %vm8622_vm15, %v8576_v51  ;;  %14785 = vmatpush3.msk.msra.mxu1 %vm4069_vm8, %v9015_v45 }
 0xc55   : > { %15392 = vmatprep.subr.bf16.mxu1 %v23492_v13 }
 0xc57   : > { %14757 = vmatmul.mubr.msk.f32.gmra.mrb[48].mxu1 %vm8622_vm15, %v8579_v8 }
 0xc58   : > { %14759 = vmatprep.mubr.msk.f32.mxu1 %vm8622_vm15, %v8582_v57 }
 0xc5b   : > { %14760 = vmatmul.mubr.msk.f32.gmra.mrb[50].mxu1 %vm8622_vm15, %v8585_v33 }
 0xc5c   : > { %14762 = vmatprep.mubr.msk.f32.mxu1 %vm8622_vm15, %v8588_v54 }
 0xc5f   : > { %14763 = vmatmul.mubr.msk.f32.gmra.mrb[52].mxu1 %vm8622_vm15, %v8591_v23 }
 0xc60   : > { %14765 = vmatprep.mubr.msk.f32.mxu1 %vm8622_vm15, %v8594_v10 }
 0xc63   : > { %14766 = vmatmul.mubr.msk.f32.gmra.mrb[54].mxu1 %vm8622_vm15, %v8597_v37 }
 0xc64   : > { %14768 = vmatprep.mubr.msk.f32.mxu1 %vm8622_vm15, %v8600_v52 }
 0xc67   : > { %14769 = vmatmul.mubr.msk.f32.gmra.mrb[56].mxu1 %vm8622_vm15, %v8603_v5 }
 0xc68   : > { %14771 = vmatprep.mubr.msk.f32.mxu1 %vm8622_vm15, %v8606_v9 }
 0xc6b   : > { %14772 = vmatmul.mubr.msk.f32.gmra.mrb[58].mxu1 %vm8622_vm15, %v8609_v39 }
 0xc6c   : > { %14774 = vmatprep.mubr.msk.f32.mxu1 %vm8622_vm15, %v8612_v14 }
 0xc6f   : > { %14775 = vmatmul.mubr.msk.f32.gmra.mrb[60].mxu1 %vm8622_vm15, %v8615_v3 }
 0xc70   : > { %14777 = vmatprep.mubr.msk.f32.mxu1 %vm8622_vm15, %v8618_v59 }
 0xc73   : > { %14778 = vmatmul.mubr.msk.f32.gmra.mrb[62].mxu1 %vm8622_vm15, %v8621_v12 }
 0xcd2   : > { %v8749_v26 = vpop.f32.mrb[4].mxu1 }
 0xcd3   : > { %v8751_v34 = vpop.f32.mrb[5].mxu1 }
 0xcd6   : > { %v8754_v1 = vpop.f32.mrb[6].mxu1 }
 0xcd7   : > { %v8756_v6 = vpop.f32.mrb[7].mxu1 }
 0xcda   : > { %v8759_v60 = vpop.f32.mrb[8].mxu1 }
 0xcdb   : > { %v8761_v15 = vpop.f32.mrb[9].mxu1 }
 0xcde   : > { %v8764_v30 = vpop.f32.mrb[10].mxu1 }
 0xcdf   : > { %v8766_v58 = vpop.f32.mrb[11].mxu1 }
 0xce2   : > { %v8769_v11 = vpop.f32.mrb[12].mxu1 }
 0xce3   : > { %v8771_v43 = vpop.f32.mrb[13].mxu1 }
 0xce6   : > { %v8774_v20 = vpop.f32.mrb[14].mxu1 }
 0xce7   : > { %v8776_v36 = vpop.f32.mrb[15].mxu1 }
 0xcea   : > { %v8779_v61 = vpop.f32.mrb[16].mxu1 }
 0xceb   : > { %v8781_v19 = vpop.f32.mrb[17].mxu1 }
 0xcee   : > { %v8784_v28 = vpop.f32.mrb[18].mxu1 }
 0xcef   : > { %v8786_v47 = vpop.f32.mrb[19].mxu1 }
 0xcf2   : > { %v8789_v53 = vpop.f32.mrb[20].mxu1 }
 0xcf3   : > { %v8791_v0 = vpop.f32.mrb[21].mxu1 }
 0xcf4   : > { %v9044_v0 = vpop.permute.xlu0 %9043 }
 0xcf6   : > { %v8794_v25 = vpop.f32.mrb[22].mxu1 }
 0xcf7   : > { %v8796_v17 = vpop.f32.mrb[23].mxu1 }
 0xcf8   : > { %v9054_v17 = vpop.permute.xlu0 %9053 }
 0xcfa   : > { %v8799_v16 = vpop.f32.mrb[24].mxu1 }
 0xcfb   : > { %v8801_v40 = vpop.f32.mrb[25].mxu1 }
 0xcfc   : > { %v9064_v40 = vpop.permute.xlu0 %9063 }
 0xcfe   : > { %v8804_v2 = vpop.f32.mrb[26].mxu1 }
 0xcff   : > { %v8806_v4 = vpop.f32.mrb[27].mxu1 }
 0xd00   : > { %v9074_v4 = vpop.permute.xlu0 %9073 }
 0xd02   : > { %v8809_v24 = vpop.f32.mrb[28].mxu1 }
 0xd03   : > { %v8811_v55 = vpop.f32.mrb[29].mxu1 }
 0xd06   : > { %v8814_v42 = vpop.f32.mrb[30].mxu1 }
 0xd07   : > { %v8816_v49 = vpop.f32.mrb[31].mxu1 }
 0xd0a   : > { %v8819_v48 = vpop.f32.mrb[32].mxu1 }
 0xd0b   : > { %v8821_v46 = vpop.f32.mrb[33].mxu1 }
 0xd0e   : > { %v8824_v27 = vpop.f32.mrb[34].mxu1 }
 0xd0f   : > { %v8826_v41 = vpop.f32.mrb[35].mxu1 }
 0xd12   : > { %v8829_v29 = vpop.f32.mrb[36].mxu1 }
 0xd13   : > { %v8831_v21 = vpop.f32.mrb[37].mxu1 }
 0xd16   : > { %v8834_v62 = vpop.f32.mrb[38].mxu1 }
 0xd17   : > { %v8836_v56 = vpop.f32.mrb[39].mxu1 }
 0xd1a   : > { %v8839_v31 = vpop.f32.mrb[40].mxu1 }
 0xd1b   : > { %v8841_v63 = vpop.f32.mrb[41].mxu1 }
 0xd1e   : > { %v8844_v35 = vpop.f32.mrb[42].mxu1 }
 0xd1f   : > { %v8846_v50 = vpop.f32.mrb[43].mxu1 }
 0xd22   : > { %v14752_v32 = vpop.f32.mrb[44].mxu1 }
 0xd23   : > { %v8920_v22 = vadd.f32 %v14752_v32, %v8754_v1  ;;  %v8914_v38 = vpop.f32.mrb[45].mxu1 }
 0xd24   : > { %v8915_v51 = vadd.f32 %v8914_v38, %v8749_v26 }
 0xd26   : > { %v14755_v8 = vpop.f32.mrb[46].mxu1  ;;  %14786 = vmatprep.mubr.msk.f32.mxu1 %vm9136_vm0, %v8915_v51 }
 0xd27   : > { %v8930_v57 = vadd.f32 %v14755_v8, %v8764_v30  ;;  %v8924_v33 = vpop.f32.mrb[47].mxu1  ;;  %14787 = vmatmul.mubr.msk.f32.vlgmr.msra.gmra.mrb[64].mxu1 %vm9136_vm0, %v8920_v22 }
 0xd28   : > { %v8925_v54 = vadd.f32 %v8924_v33, %v8759_v60 }
 0xd2a   : > { %v14758_v23 = vpop.f32.mrb[48].mxu1  ;;  %14789 = vmatprep.mubr.msk.f32.mxu1 %vm9136_vm0, %v8925_v54 }
 0xd2b   : > { %v8940_v10 = vadd.f32 %v14758_v23, %v8774_v20  ;;  %v8934_v37 = vpop.f32.mrb[49].mxu1  ;;  %14790 = vmatmul.mubr.msk.f32.gmra.mrb[66].mxu1 %vm9136_vm0, %v8930_v57 }
 0xd2c   : > { %v8935_v52 = vadd.f32 %v8934_v37, %v8769_v11 }
 0xd2e   : > { %v14761_v5 = vpop.f32.mrb[50].mxu1  ;;  %14792 = vmatprep.mubr.msk.f32.mxu1 %vm9136_vm0, %v8935_v52 }
 0xd2f   : > { %v8950_v9 = vadd.f32 %v14761_v5, %v8784_v28  ;;  %v8944_v39 = vpop.f32.mrb[51].mxu1  ;;  %14793 = vmatmul.mubr.msk.f32.gmra.mrb[68].mxu1 %vm9136_vm0, %v8940_v10 }
 0xd30   : > { %v8945_v14 = vadd.f32 %v8944_v39, %v8779_v61 }
 0xd32   : > { %v14764_v3 = vpop.f32.mrb[52].mxu1  ;;  %14795 = vmatprep.mubr.msk.f32.mxu1 %vm9136_vm0, %v8945_v14 }
 0xd33   : > { %v8960_v59 = vadd.f32 %v14764_v3, %v8794_v25  ;;  %v8954_v12 = vpop.f32.mrb[53].mxu1  ;;  %14796 = vmatmul.mubr.msk.f32.gmra.mrb[70].mxu1 %vm9136_vm0, %v8950_v9  ;;  %v9039_v25 = vpop.permute.xlu1 %9038 }
 0xd34   : > { %v8955_v44 = vadd.f32 %v8954_v12, %v8789_v53 }
 0xd36   : > { %v14767_v18 = vpop.f32.mrb[54].mxu1  ;;  %14798 = vmatprep.mubr.msk.f32.mxu1 %vm9136_vm0, %v8955_v44 }
 0xd37   : > { %v8970_v7 = vadd.f32 %v14767_v18, %v8804_v2  ;;  %v8964_v45 = vpop.f32.mrb[55].mxu1  ;;  %14799 = vmatmul.mubr.msk.f32.gmra.mrb[72].mxu1 %vm9136_vm0, %v8960_v59 }
 0xd38   : > { %v8965_v26 = vadd.f32 %v8964_v45, %v8799_v16  ;;  %v9049_v16 = vpop.permute.xlu1 %9048 }
 0xd3a   : > { %v14770_v34 = vpop.f32.mrb[56].mxu1  ;;  %14801 = vmatprep.mubr.msk.f32.mxu1 %vm9136_vm0, %v8965_v26 }
 0xd3b   : > { %v8980_v1 = vadd.f32 %v14770_v34, %v8814_v42  ;;  %v8974_v6 = vpop.f32.mrb[57].mxu1  ;;  %14802 = vmatmul.mubr.msk.f32.gmra.mrb[74].mxu1 %vm9136_vm0, %v8970_v7 }
 0xd3c   : > { %v8975_v60 = vadd.f32 %v8974_v6, %v8809_v24  ;;  %v9059_v2 = vpop.permute.xlu1 %9058 }
 0xd3e   : > { %v14773_v15 = vpop.f32.mrb[58].mxu1  ;;  %14804 = vmatprep.mubr.msk.f32.mxu1 %vm9136_vm0, %v8975_v60 }
 0xd3f   : > { %v8990_v30 = vadd.f32 %v14773_v15, %v8824_v27  ;;  %v8984_v58 = vpop.f32.mrb[59].mxu1  ;;  %14805 = vmatmul.mubr.msk.f32.gmra.mrb[76].mxu1 %vm9136_vm0, %v8980_v1 }
 0xd40   : > { %v8985_v11 = vadd.f32 %v8984_v58, %v8819_v48  ;;  %v9069_v55 = vpop.permute.xlu1 %9068 }
 0xd42   : > { %v14776_v43 = vpop.f32.mrb[60].mxu1  ;;  %14807 = vmatprep.mubr.msk.f32.mxu1 %vm9136_vm0, %v8985_v11 }
 0xd43   : > { %v9000_v20 = vadd.f32 %v14776_v43, %v8834_v62  ;;  %v8994_v36 = vpop.f32.mrb[61].mxu1  ;;  %14808 = vmatmul.mubr.msk.f32.gmra.mrb[78].mxu1 %vm9136_vm0, %v8990_v30  ;;  %v9084_v62 = vpop.permute.xlu0 %9083 }
 0xd44   : > { %v8995_v61 = vadd.f32 %v8994_v36, %v8829_v29 }
 0xd46   : > { %v14779_v19 = vpop.f32.mrb[62].mxu1  ;;  %14810 = vmatprep.mubr.msk.f32.mxu1 %vm9136_vm0, %v8995_v61 }
 0xd47   : > { %v9010_v28 = vadd.f32 %v14779_v19, %v8844_v35  ;;  %v9004_v47 = vpop.f32.mrb[63].mxu1  ;;  %14811 = vmatmul.mubr.msk.f32.gmra.mrb[80].mxu1 %vm9136_vm0, %v9000_v20  ;;  %v9094_v51 = vpop.permute.xlu0 %9093 }
 0xd48   : > { %v9005_v53 = vadd.f32 %v9004_v47, %v8839_v31  ;;  %v9079_v31 = vpop.permute.xlu1 %9078 }
 0xd4a   : > { %14813 = vmatprep.mubr.msk.f32.mxu1 %vm9136_vm0, %v9005_v53 }
 0xd4b   : > { %14814 = vmatmul.mubr.msk.f32.gmra.mrb[82].mxu1 %vm9136_vm0, %v9010_v28  ;;  %v9104_v3 = vpop.permute.xlu0 %9103 }
 0xd4c   : > { %v9089_v54 = vpop.permute.xlu1 %9088 }
 0xd4f   : > { %v9114_v1 = vpop.permute.xlu0 %9113 }
 0xd50   : > { %v9099_v12 = vpop.permute.xlu1 %9098 }
 0xd53   : > { %v9124_v47 = vpop.permute.xlu0 %9123 }
 0xd54   : > { %v9109_v30 = vpop.permute.xlu1 %9108 }
 0xdfa   : > { %v14788_v24 = vpop.f32.mrb[64].mxu1 }
 0xdfb   : > { %v9272_v42 = vadd.f32 %v14788_v24, %v9044_v0  ;;  %v9266_v49 = vpop.f32.mrb[65].mxu1  ;;  %v9119_v0 = vpop.permute.xlu1 %9118  ;;  %v13260_v24 = vld [vmem:[%s23425_s16 + $0x208] sm:$0xff] }
 0xdfc   : > { %v9267_v48 = vadd.f32 %v9266_v49, %v9039_v25  ;;  %13323 = vmatprep.mubr.msk.f32.mxu0 %vm9574_vm1, %v13260_v24  ;;  %v10722_v24 = vld [vmem:[%s23426_s17 + $0xd8] sm:$0xff] }
 0xdfe   : > { %v21587_v46 = vpack.i.bf16 %v9272_v42, %v9267_v48  ;;  %v15393_v27 = vpack.c.bf16 %v9272_v42, %v9267_v48  ;;  %v14791_v41 = vpop.f32.mrb[66].mxu1  ;;  %v9134_v42 = vpop.permute.xlu0 %9133 }
 0xdff   : > { %v9282_v29 = vadd.f32 %v14791_v41, %v9054_v17  ;;  %v9276_v21 = vpop.f32.mrb[67].mxu1  ;;  %v9129_v41 = vpop.permute.xlu1 %9128 }
 0xe00   : > { %v9277_v56 = vadd.f32 %v9276_v21, %v9049_v16  ;;  %16030 = vrot.lane.b32.xlu1 %v21587_v46, %s23517_s28  ;;  %15394 = vmatpush1.bf16.msra.mxu1 %v15393_v27 }
 0xe01   : > { %15395 = vmatprep.subr.bf16.mxu1 %v23492_v13 }
 0xe02   : > { %v21592_v63 = vpack.i.bf16 %v9282_v29, %v9277_v56  ;;  %v15396_v35 = vpack.c.bf16 %v9282_v29, %v9277_v56  ;;  %v14794_v50 = vpop.f32.mrb[68].mxu1 }
 0xe03   : > { %v9292_v32 = vadd.f32 %v14794_v50, %v9064_v40  ;;  %v9286_v22 = vpop.f32.mrb[69].mxu1  ;;  %v9368_v50 = vld [vmem:[%s23425_s16 + $0x18] sm:$0xff] }
 0xe04   : > { %v9287_v38 = vadd.f32 %v9286_v22, %v9059_v2  ;;  %16035 = vrot.lane.b32.xlu0 %v21592_v63, %s23517_s28  ;;  %15397 = vmatpush1.bf16.msra.mxu1 %v15396_v35  ;;  %v9365_v35 = vld [vmem:[%s23425_s16] sm:$0xff]  ;;  %v9372_v22 = vld [vmem:[%s23425_s16 + $0x38] sm:$0xff] }
 0xe05   : > { %15398 = vmatprep.subr.bf16.mxu1 %v23492_v13 }
 0xe06   : > { %v21597_v8 = vpack.i.bf16 %v9292_v32, %v9287_v38  ;;  %v15399_v57 = vpack.c.bf16 %v9292_v32, %v9287_v38  ;;  %v14797_v33 = vpop.f32.mrb[70].mxu1  ;;  %v9370_v32 = vld [vmem:[%s23425_s16 + $0x28] sm:$0xff]  ;;  %v9371_v38 = vld [vmem:[%s23425_s16 + $0x30] sm:$0xff] }
 0xe07   : > { %v9302_v23 = vadd.f32 %v14797_v33, %v9074_v4  ;;  %v9296_v10 = vpop.f32.mrb[71].mxu1  ;;  %v9376_v33 = vld [vmem:[%s23425_s16 + $0x58] sm:$0xff] }
 0xe08   : > { %v9297_v37 = vadd.f32 %v9296_v10, %v9069_v55  ;;  %16040 = vrot.lane.b32.xlu1 %v21597_v8, %s23517_s28  ;;  %15400 = vmatpush1.bf16.msra.mxu1 %v15399_v57  ;;  %v9366_v55 = vld [vmem:[%s23425_s16 + $0x8] sm:$0xff]  ;;  %v9373_v57 = vld [vmem:[%s23425_s16 + $0x40] sm:$0xff]  ;;  %v9375_v10 = vld [vmem:[%s23425_s16 + $0x50] sm:$0xff] }
 0xe09   : > { %15401 = vmatprep.subr.bf16.mxu1 %v23492_v13  ;;  %13355 = vmatprep.mubr.msk.f32.mxu1 %vm9574_vm1, %v9366_v55  ;;  %v10705_v55 = vld [vmem:[%s23426_s17 + $0x50] sm:$0xff] }
 0xe0a   : > { %v21602_v52 = vpack.i.bf16 %v9302_v23, %v9297_v37  ;;  %v15402_v5 = vpack.c.bf16 %v9302_v23, %v9297_v37  ;;  %v14800_v9 = vpop.f32.mrb[72].mxu1  ;;  %v10695_v23 = vld [vmem:[%s23426_s17] sm:$0xff]  ;;  %v9378_v37 = vld [vmem:[%s23425_s16 + $0x68] sm:$0xff] }
 0xe0b   : > { %v9312_v39 = vadd.f32 %v14800_v9, %v9084_v62  ;;  %v9306_v14 = vpop.f32.mrb[73].mxu1  ;;  %v9377_v9 = vld [vmem:[%s23425_s16 + $0x60] sm:$0xff] }
 0xe0c   : > { %v9307_v59 = vadd.f32 %v9306_v14, %v9079_v31  ;;  %16045 = vrot.lane.b32.xlu0 %v21602_v52, %s23517_s28  ;;  %15403 = vmatpush1.bf16.msra.mxu1 %v15402_v5  ;;  %v10713_v5 = vld [vmem:[%s23426_s17 + $0x90] sm:$0xff]  ;;  %v10714_v14 = vld [vmem:[%s23426_s17 + $0x98] sm:$0xff] }
 0xe0d   : > { %15404 = vmatprep.subr.bf16.mxu1 %v23492_v13 }
 0xe0e   : > { %v21607_v44 = vpack.i.bf16 %v9312_v39, %v9307_v59  ;;  %v15405_v18 = vpack.c.bf16 %v9312_v39, %v9307_v59  ;;  %v14803_v7 = vpop.f32.mrb[74].mxu1  ;;  %v9380_v39 = vld [vmem:[%s23425_s16 + $0x78] sm:$0xff]  ;;  %v9379_v59 = vld [vmem:[%s23425_s16 + $0x70] sm:$0xff] }
 0xe0f   : > { %v9322_v45 = vadd.f32 %v14803_v7, %v9094_v51  ;;  %v9316_v26 = vpop.f32.mrb[75].mxu1  ;;  %v9374_v51 = vld [vmem:[%s23425_s16 + $0x48] sm:$0xff]  ;;  %v9381_v7 = vld [vmem:[%s23425_s16 + $0x80] sm:$0xff] }
 0xe10   : > { %v9317_v34 = vadd.f32 %v9316_v26, %v9089_v54  ;;  %16050 = vrot.lane.b32.xlu1 %v21607_v44, %s23517_s28  ;;  %15406 = vmatpush1.bf16.msra.mxu1 %v15405_v18  ;;  %v10712_v54 = vld [vmem:[%s23426_s17 + $0x88] sm:$0xff]  ;;  %v10715_v18 = vld [vmem:[%s23426_s17 + $0xa0] sm:$0xff] }
 0xe11   : > { %15407 = vmatprep.subr.bf16.mxu1 %v23492_v13  ;;  %v10716_v26 = vld [vmem:[%s23426_s17 + $0xa8] sm:$0xff] }
 0xe12   : > { %v21612_v6 = vpack.i.bf16 %v9322_v45, %v9317_v34  ;;  %v15408_v60 = vpack.c.bf16 %v9322_v45, %v9317_v34  ;;  %v14806_v15 = vpop.f32.mrb[76].mxu1  ;;  %v9384_v45 = vld [vmem:[%s23425_s16 + $0x98] sm:$0xff]  ;;  %v10699_v34 = vld [vmem:[%s23426_s17 + $0x20] sm:$0xff] }
 0xe13   : > { %v9332_v58 = vadd.f32 %v14806_v15, %v9104_v3  ;;  %v9326_v11 = vpop.f32.mrb[77].mxu1  ;;  %v10697_v3 = vld [vmem:[%s23426_s17 + $0x10] sm:$0xff] }
 0xe14   : > { %v9327_v43 = vadd.f32 %v9326_v11, %v9099_v12  ;;  %16055 = vrot.lane.b32.xlu0 %v21612_v6, %s23517_s28  ;;  %15409 = vmatpush1.bf16.msra.mxu1 %v15408_v60  ;;  %v9382_v12 = vld [vmem:[%s23425_s16 + $0x88] sm:$0xff]  ;;  %v10717_v15 = vld [vmem:[%s23426_s17 + $0xb0] sm:$0xff]  ;;  %v10718_v11 = vld [vmem:[%s23426_s17 + $0xb8] sm:$0xff] }
 0xe15   : > { %15410 = vmatprep.subr.bf16.mxu1 %v23492_v13  ;;  %v10700_v60 = vld [vmem:[%s23426_s17 + $0x28] sm:$0xff] }
 0xe16   : > { %v16109_v20 = vpack.i.bf16 %v9332_v58, %v9327_v43  ;;  %v15411_v36 = vpack.c.bf16 %v9332_v58, %v9327_v43  ;;  %v14809_v61 = vpop.f32.mrb[78].mxu1  ;;  %v9388_v58 = vld [vmem:[%s23425_s16 + $0xb8] sm:$0xff]  ;;  %v10701_v43 = vld [vmem:[%s23426_s17 + $0x30] sm:$0xff] }
 0xe17   : > { %v9342_v19 = vadd.f32 %v14809_v61, %v9114_v1  ;;  %v9336_v28 = vpop.f32.mrb[79].mxu1  ;;  %v9383_v1 = vld [vmem:[%s23425_s16 + $0x90] sm:$0xff]  ;;  %v10702_v61 = vld [vmem:[%s23426_s17 + $0x38] sm:$0xff] }
 0xe18   : > { %v9337_v53 = vadd.f32 %v9336_v28, %v9109_v30  ;;  %16060 = vrot.lane.b32.xlu1 %v16109_v20, %s23517_s28  ;;  %15412 = vmatpush1.bf16.msra.mxu1 %v15411_v36  ;;  %v9385_v30 = vld [vmem:[%s23425_s16 + $0xa0] sm:$0xff]  ;;  %v9390_v36 = vld [vmem:[%s23425_s16 + $0xc8] sm:$0xff] }
 0xe19   : > { %15413 = vmatprep.subr.bf16.mxu1 %v23492_v13  ;;  %v9389_v28 = vld [vmem:[%s23425_s16 + $0xc0] sm:$0xff] }
 0xe1a   : > { %v16114_v25 = vpack.i.bf16 %v9342_v19, %v9337_v53  ;;  %v15414_v17 = vpack.c.bf16 %v9342_v19, %v9337_v53  ;;  %v14812_v16 = vpop.f32.mrb[80].mxu1  ;;  %v10719_v19 = vld [vmem:[%s23426_s17 + $0xc0] sm:$0xff]  ;;  %v10720_v53 = vld [vmem:[%s23426_s17 + $0xc8] sm:$0xff] }
 0xe1b   : > { %v9352_v40 = vadd.f32 %v14812_v16, %v9124_v47  ;;  %v9346_v2 = vpop.f32.mrb[81].mxu1  ;;  %v9392_v47 = vld [vmem:[%s23425_s16 + $0xd8] sm:$0xff]  ;;  %v10704_v16 = vld [vmem:[%s23426_s17 + $0x48] sm:$0xff] }
 0xe1c   : > { %v9347_v4 = vadd.f32 %v9346_v2, %v9119_v0  ;;  %16065 = vrot.lane.b32.xlu0 %v16114_v25, %s23517_s28  ;;  %15415 = vmatpush1.bf16.msra.mxu1 %v15414_v17  ;;  %v10703_v0 = vld [vmem:[%s23426_s17 + $0x40] sm:$0xff]  ;;  %v9394_v17 = vld [vmem:[%s23425_s16 + $0xe8] sm:$0xff] }
 0xe1d   : > { %15416 = vmatprep.subr.bf16.mxu1 %v23492_v13  ;;  %v9393_v2 = vld [vmem:[%s23425_s16 + $0xe0] sm:$0xff] }
 0xe1e   : > { %v16119_v49 = vpack.i.bf16 %v9352_v40, %v9347_v4  ;;  %v15417_v48 = vpack.c.bf16 %v9352_v40, %v9347_v4  ;;  %v14815_v27 = vpop.f32.mrb[82].mxu1  ;;  %v10721_v40 = vld [vmem:[%s23426_s17 + $0xd0] sm:$0xff]  ;;  %v9396_v4 = vld [vmem:[%s23425_s16 + $0xf8] sm:$0xff] }
 0xe1f   : > { %v9362_v29 = vadd.f32 %v14815_v27, %v9134_v42  ;;  %v9356_v21 = vpop.f32.mrb[83].mxu1  ;;  %v9395_v42 = vld [vmem:[%s23425_s16 + $0xf0] sm:$0xff]  ;;  %v10723_v27 = vld [vmem:[%s23426_s17 + $0xe0] sm:$0xff] }
 0xe20   : > { %v9357_v62 = vadd.f32 %v9356_v21, %v9129_v41  ;;  %16070 = vrot.lane.b32.xlu1 %v16119_v49, %s23517_s28  ;;  %15418 = vmatpush1.bf16.msra.mxu1 %v15417_v48  ;;  %v10706_v48 = vld [vmem:[%s23426_s17 + $0x58] sm:$0xff]  ;;  %v9397_v41 = vld [vmem:[%s23425_s16 + $0x100] sm:$0xff]  ;;  %v10724_v21 = vld [vmem:[%s23426_s17 + $0xe8] sm:$0xff] }
 0xe21   : > { %15419 = vmatprep.subr.bf16.mxu1 %v23492_v13 }
 0xe22   : > { %v16124_v56 = vpack.i.bf16 %v9362_v29, %v9357_v62  ;;  %v15420_v31 = vpack.c.bf16 %v9362_v29, %v9357_v62  ;;  %v9400_v29 = vld [vmem:[%s23425_s16 + $0x118] sm:$0xff]  ;;  %v10707_v62 = vld [vmem:[%s23426_s17 + $0x60] sm:$0xff] }
 0xe24   : > { %16075 = vrot.lane.b32.xlu0 %v16124_v56, %s23517_s28  ;;  %16080 = vrot.lane.b32.xlu1 %v21587_v46, %s23521_s1  ;;  %v9367_v46 = vld [vmem:[%s23425_s16 + $0x10] sm:$0xff] }
 0xe25   : > { %15421 = vmatpush1.bf16.msra.mxu1 %v15420_v31  ;;  %v9402_v31 = vld [vmem:[%s23425_s16 + $0x128] sm:$0xff] }
 0xe28   : > { %16085 = vrot.lane.b32.xlu0 %v21592_v63, %s23521_s1  ;;  %16090 = vrot.lane.b32.xlu1 %v21597_v8, %s23521_s1  ;;  %v9369_v63 = vld [vmem:[%s23425_s16 + $0x20] sm:$0xff] }
 0xe29   : > { %10057 = vmatmul.mubr.f32.vlgmr.msra.gmra.mrb[84].mxu1 %v9365_v35  ;;  %v10711_v8 = vld [vmem:[%s23426_s17 + $0x80] sm:$0xff]  ;;  %v10708_v35 = vld [vmem:[%s23426_s17 + $0x68] sm:$0xff] }
 0xe2a   : > { %13356 = vmatprep.mubr.msk.f32.mxu1 %vm9574_vm1, %v9368_v50  ;;  %v10725_v50 = vld [vmem:[%s23426_s17 + $0xf0] sm:$0xff] }
 0xe2c   : > { %16095 = vrot.lane.b32.xlu0 %v21602_v52, %s23521_s1  ;;  %16100 = vrot.lane.b32.xlu1 %v21607_v44, %s23521_s1  ;;  %v10696_v52 = vld [vmem:[%s23426_s17 + $0x8] sm:$0xff]  ;;  %v10698_v44 = vld [vmem:[%s23426_s17 + $0x18] sm:$0xff] }
 0xe2d   : > { %10062 = vmatmul.mubr.f32.gmra.mrb[86].mxu1 %v9367_v46  ;;  %v9401_v46 = vld [vmem:[%s23425_s16 + $0x120] sm:$0xff] }
 0xe2e   : > { %13357 = vmatprep.mubr.msk.f32.mxu1 %vm9574_vm1, %v9370_v32  ;;  %v9404_v32 = vld [vmem:[%s23425_s16 + $0x138] sm:$0xff] }
 0xe30   : > { %16105 = vrot.lane.b32.xlu0 %v21612_v6, %s23521_s1  ;;  %16110 = vrot.lane.b32.xlu1 %v16109_v20, %s23521_s1  ;;  %v9386_v6 = vld [vmem:[%s23425_s16 + $0xa8] sm:$0xff]  ;;  %v9387_v20 = vld [vmem:[%s23425_s16 + $0xb0] sm:$0xff] }
 0xe31   : > { %10067 = vmatmul.mubr.f32.gmra.mrb[88].mxu1 %v9369_v63  ;;  %v10726_v63 = vld [vmem:[%s23426_s17 + $0xf8] sm:$0xff] }
 0xe32   : > { %13358 = vmatprep.mubr.msk.f32.mxu1 %vm9574_vm1, %v9372_v22  ;;  %v10709_v22 = vld [vmem:[%s23426_s17 + $0x70] sm:$0xff] }
 0xe34   : > { %16115 = vrot.lane.b32.xlu0 %v16114_v25, %s23521_s1  ;;  %16120 = vrot.lane.b32.xlu1 %v16119_v49, %s23521_s1  ;;  %v9391_v25 = vld [vmem:[%s23425_s16 + $0xd0] sm:$0xff]  ;;  %v9398_v49 = vld [vmem:[%s23425_s16 + $0x108] sm:$0xff] }
 0xe35   : > { %10072 = vmatmul.mubr.f32.gmra.mrb[90].mxu1 %v9371_v38 }
 0xe36   : > { %13359 = vmatprep.mubr.msk.f32.mxu1 %vm9574_vm1, %v9374_v51  ;;  %v9403_v51 = vld [vmem:[%s23425_s16 + $0x130] sm:$0xff] }
 0xe38   : > { %16125 = vrot.lane.b32.xlu0 %v16124_v56, %s23521_s1  ;;  %10809 = vperm.xlu1 %15798, %v10711_v8   ;;  %v9399_v56 = vld [vmem:[%s23425_s16 + $0x110] sm:$0xff] }
 0xe39   : > { %10077 = vmatmul.mubr.f32.gmra.mrb[92].mxu1 %v9373_v57 }
 0xe3a   : > { %13360 = vmatprep.mubr.msk.f32.mxu1 %vm9574_vm1, %v9376_v33  ;;  %v9406_v33 = vld [vmem:[%s23425_s16 + $0x148] sm:$0xff] }
 0xe3c   : > { %10814 = vperm.xlu0 %15797, %v10712_v54   ;;  %10729 = vperm.xlu1 %15798, %v10695_v23   ;;  %v10710_v23 = vld [vmem:[%s23426_s17 + $0x78] sm:$0xff] }
 0xe3d   : > { %10082 = vmatmul.mubr.f32.gmra.mrb[94].mxu1 %v9375_v10 }
 0xe3e   : > { %13361 = vmatprep.mubr.msk.f32.mxu1 %vm9574_vm1, %v9378_v37  ;;  %v9405_v37 = vld [vmem:[%s23425_s16 + $0x140] sm:$0xff] }
 0xe40   : > { %10734 = vperm.xlu0 %15797, %v10696_v52   ;;  %10819 = vperm.xlu1 %15798, %v10713_v5  }
 0xe41   : > { %10087 = vmatmul.mubr.f32.gmra.mrb[96].mxu1 %v9377_v9  ;;  %v9408_v9 = vld [vmem:[%s23425_s16 + $0x158] sm:$0xff] }
 0xe42   : > { %13362 = vmatprep.mubr.msk.f32.mxu1 %vm9574_vm1, %v9380_v39 }
 0xe44   : > { %10824 = vperm.xlu0 %15797, %v10714_v14   ;;  %10739 = vperm.xlu1 %15798, %v10697_v3   ;;  %v9407_v3 = vld [vmem:[%s23425_s16 + $0x150] sm:$0xff] }
 0xe45   : > { %10092 = vmatmul.mubr.f32.gmra.mrb[98].mxu1 %v9379_v59 }
 0xe46   : > { %13363 = vmatprep.mubr.msk.f32.mxu1 %vm9574_vm1, %v9382_v12 }
 0xe48   : > { %10744 = vperm.xlu0 %15797, %v10698_v44   ;;  %10829 = vperm.xlu1 %15798, %v10715_v18   ;;  %v9410_v44 = vld [vmem:[%s23425_s16 + $0x168] sm:$0xff] }
 0xe49   : > { %10097 = vmatmul.mubr.f32.gmra.mrb[100].mxu1 %v9381_v7 }
 0xe4a   : > { %13364 = vmatprep.mubr.msk.f32.mxu1 %vm9574_vm1, %v9384_v45  ;;  %v9409_v45 = vld [vmem:[%s23425_s16 + $0x160] sm:$0xff] }
 0xe4c   : > { %10834 = vperm.xlu0 %15797, %v10716_v26   ;;  %10749 = vperm.xlu1 %15798, %v10699_v34  }
 0xe4d   : > { %10102 = vmatmul.mubr.f32.gmra.mrb[102].mxu1 %v9383_v1  ;;  %v9412_v1 = vld [vmem:[%s23425_s16 + $0x178] sm:$0xff] }
 0xe4e   : > { %13365 = vmatprep.mubr.msk.f32.mxu1 %vm9574_vm1, %v9386_v6 }
 0xe50   : > { %10754 = vperm.xlu0 %15797, %v10700_v60   ;;  %10839 = vperm.xlu1 %15798, %v10717_v15   ;;  %v9411_v15 = vld [vmem:[%s23425_s16 + $0x170] sm:$0xff] }
 0xe51   : > { %10107 = vmatmul.mubr.f32.gmra.mrb[104].mxu1 %v9385_v30 }
 0xe52   : > { %13366 = vmatprep.mubr.msk.f32.mxu1 %vm9574_vm1, %v9388_v58 }
 0xe54   : > { %10844 = vperm.xlu0 %15797, %v10718_v11   ;;  %10759 = vperm.xlu1 %15798, %v10701_v43   ;;  %v9414_v11 = vld [vmem:[%s23425_s16 + $0x188] sm:$0xff] }
 0xe55   : > { %10112 = vmatmul.mubr.f32.gmra.mrb[106].mxu1 %v9387_v20 }
 0xe56   : > { %13367 = vmatprep.mubr.msk.f32.mxu1 %vm9574_vm1, %v9390_v36  ;;  %v9413_v36 = vld [vmem:[%s23425_s16 + $0x180] sm:$0xff] }
 0xe58   : > { %10764 = vperm.xlu0 %15797, %v10702_v61   ;;  %10849 = vperm.xlu1 %15798, %v10719_v19  }
 0xe59   : > { %10117 = vmatmul.mubr.f32.gmra.mrb[108].mxu1 %v9389_v28  ;;  %v9416_v28 = vld [vmem:[%s23425_s16 + $0x198] sm:$0xff] }
 0xe5a   : > { %13368 = vmatprep.mubr.msk.f32.mxu1 %vm9574_vm1, %v9392_v47 }
 0xe5c   : > { %10854 = vperm.xlu0 %15797, %v10720_v53   ;;  %10769 = vperm.xlu1 %15798, %v10703_v0   ;;  %v9415_v0 = vld [vmem:[%s23425_s16 + $0x190] sm:$0xff] }
 0xe5d   : > { %10122 = vmatmul.mubr.f32.gmra.mrb[110].mxu1 %v9391_v25 }
 0xe5e   : > { %13369 = vmatprep.mubr.msk.f32.mxu1 %vm9574_vm1, %v9394_v17 }
 0xe60   : > { %10774 = vperm.xlu0 %15797, %v10704_v16   ;;  %10859 = vperm.xlu1 %15798, %v10721_v40   ;;  %v9418_v16 = vld [vmem:[%s23425_s16 + $0x1a8] sm:$0xff] }
 0xe61   : > { %10127 = vmatmul.mubr.f32.gmra.mrb[112].mxu1 %v9393_v2 }
 0xe62   : > { %13370 = vmatprep.mubr.msk.f32.mxu1 %vm9574_vm1, %v9396_v4  ;;  %v9417_v4 = vld [vmem:[%s23425_s16 + $0x1a0] sm:$0xff] }
 0xe64   : > { %10864 = vperm.xlu0 %15797, %v10722_v24   ;;  %10779 = vperm.xlu1 %15798, %v10705_v55  }
 0xe65   : > { %10132 = vmatmul.mubr.f32.gmra.mrb[114].mxu1 %v9395_v42  ;;  %v9420_v42 = vld [vmem:[%s23425_s16 + $0x1b8] sm:$0xff] }
 0xe66   : > { %13371 = vmatprep.mubr.msk.f32.mxu1 %vm9574_vm1, %v9398_v49 }
 0xe68   : > { %10784 = vperm.xlu0 %15797, %v10706_v48   ;;  %10869 = vperm.xlu1 %15798, %v10723_v27   ;;  %v9419_v27 = vld [vmem:[%s23425_s16 + $0x1b0] sm:$0xff] }
 0xe69   : > { %10137 = vmatmul.mubr.f32.gmra.mrb[116].mxu1 %v9397_v41 }
 0xe6a   : > { %13372 = vmatprep.mubr.msk.f32.mxu1 %vm9574_vm1, %v9400_v29 }
 0xe6c   : > { %10874 = vperm.xlu0 %15797, %v10724_v21   ;;  %10789 = vperm.xlu1 %15798, %v10707_v62   ;;  %v9422_v21 = vld [vmem:[%s23425_s16 + $0x1c8] sm:$0xff] }
 0xe6d   : > { %10142 = vmatmul.mubr.f32.gmra.mrb[118].mxu1 %v9399_v56 }
 0xe6e   : > { %13373 = vmatprep.mubr.msk.f32.mxu1 %vm9574_vm1, %v9402_v31 }
 0xe70   : > { %10794 = vperm.xlu0 %15797, %v10708_v35   ;;  %10879 = vperm.xlu1 %15798, %v10725_v50   ;;  %v9421_v35 = vld [vmem:[%s23425_s16 + $0x1c0] sm:$0xff] }
 0xe71   : > { %10147 = vmatmul.mubr.f32.gmra.mrb[120].mxu1 %v9401_v46 }
 0xe72   : > { %v16031_v38 = vpop.permute.xlu1 %16030  ;;  %13374 = vmatprep.mubr.msk.f32.mxu1 %vm9574_vm1, %v9404_v32  ;;  %v9424_v32 = vld [vmem:[%s23425_s16 + $0x1d8] sm:$0xff] }
 0xe73   : > { %v16033_v8 = vunpack.i.h.bf16 %v16031_v38  ;;  %v16032_v57 = vunpack.i.l.bf16 %v16031_v38 }
 0xe74   : > { %10884 = vperm.xlu0 %15797, %v10726_v63   ;;  %10799 = vperm.xlu1 %15798, %v10709_v22  }
 0xe75   : > { %v15363_v54 = vpack.c.bf16 %v16033_v8, %v16032_v57  ;;  %10152 = vmatmul.mubr.f32.gmra.mrb[122].mxu1 %v9403_v51  ;;  %v9423_v8 = vld [vmem:[%s23425_s16 + $0x1d0] sm:$0xff]  ;;  %v13259_v57 = vld [vmem:[%s23425_s16 + $0x200] sm:$0xff] }
 0xe76   : > { %v16036_v10 = vpop.permute.xlu0 %16035  ;;  %13375 = vmatprep.mubr.msk.f32.mxu1 %vm9574_vm1, %v9406_v33  ;;  %v9426_v33 = vld [vmem:[%s23425_s16 + $0x1e8] sm:$0xff] }
 0xe77   : > { %v16038_v52 = vunpack.i.h.bf16 %v16036_v10  ;;  %v16037_v5 = vunpack.i.l.bf16 %v16036_v10  ;;  %15364 = vmatpush1.bf16.msra.mxu0 %v15363_v54  ;;  %v13262_v54 = vld [vmem:[%s23425_s16 + $0x218] sm:$0xff] }
 0xe78   : > { %10804 = vperm.xlu0 %15797, %v10710_v23   ;;  %15365 = vmatprep.subr.bf16.mxu0 %v23492_v13 }
 0xe79   : > { %v15366_v39 = vpack.c.bf16 %v16038_v52, %v16037_v5  ;;  %10157 = vmatmul.mubr.f32.gmra.mrb[124].mxu1 %v9405_v37  ;;  %v9425_v5 = vld [vmem:[%s23425_s16 + $0x1e0] sm:$0xff] }
 0xe7a   : > { %v16041_v14 = vpop.permute.xlu1 %16040  ;;  %13376 = vmatprep.mubr.msk.f32.mxu1 %vm9574_vm1, %v9408_v9  ;;  %v13261_v9 = vld [vmem:[%s23425_s16 + $0x210] sm:$0xff] }
 0xe7b   : > { %v16043_v59 = vunpack.i.h.bf16 %v16041_v14  ;;  %v16042_v12 = vunpack.i.l.bf16 %v16041_v14  ;;  %15367 = vmatpush1.bf16.msra.mxu0 %v15366_v39  ;;  %v9428_v39 = vld [vmem:[%s23425_s16 + $0x1f8] sm:$0xff]  ;;  %v13264_v14 = vld [vmem:[%s23425_s16 + $0x228] sm:$0xff] }
 0xe7c   : > { %15368 = vmatprep.subr.bf16.mxu0 %v23492_v13 }
 0xe7d   : > { %v15369_v18 = vpack.c.bf16 %v16043_v59, %v16042_v12  ;;  %10162 = vmatmul.mubr.f32.gmra.mrb[126].mxu1 %v9407_v3 }
 0xe7e   : > { %v16046_v7 = vpop.permute.xlu0 %16045  ;;  %13377 = vmatprep.mubr.msk.f32.mxu1 %vm9574_vm1, %v9410_v44 }
 0xe7f   : > { %v16048_v26 = vunpack.i.h.bf16 %v16046_v7  ;;  %v16047_v34 = vunpack.i.l.bf16 %v16046_v7  ;;  %15370 = vmatpush1.bf16.msra.mxu0 %v15369_v18  ;;  %v9427_v18 = vld [vmem:[%s23425_s16 + $0x1f0] sm:$0xff]  ;;  %v13263_v7 = vld [vmem:[%s23425_s16 + $0x220] sm:$0xff] }
 0xe80   : > { %15371 = vmatprep.subr.bf16.mxu0 %v23492_v13 }
 0xe81   : > { %v15372_v6 = vpack.c.bf16 %v16048_v26, %v16047_v34  ;;  %10167 = vmatmul.mubr.f32.gmra.mrb[128].mxu1 %v9409_v45  ;;  %v13266_v45 = vld [vmem:[%s23425_s16 + $0x238] sm:$0xff] }
 0xe82   : > { %v16051_v60 = vpop.permute.xlu1 %16050  ;;  %13378 = vmatprep.mubr.msk.f32.mxu1 %vm9574_vm1, %v9412_v1 }
 0xe83   : > { %v16053_v30 = vunpack.i.h.bf16 %v16051_v60  ;;  %v16052_v58 = vunpack.i.l.bf16 %v16051_v60  ;;  %15373 = vmatpush1.bf16.msra.mxu0 %v15372_v6  ;;  %v13265_v60 = vld [vmem:[%s23425_s16 + $0x230] sm:$0xff] }
 0xe84   : > { %15374 = vmatprep.subr.bf16.mxu0 %v23492_v13 }
 0xe85   : > { %v15375_v43 = vpack.c.bf16 %v16053_v30, %v16052_v58  ;;  %10172 = vmatmul.mubr.f32.gmra.mrb[130].mxu1 %v9411_v15  ;;  %v13268_v15 = vld [vmem:[%s23425_s16 + $0x248] sm:$0xff] }
 0xe86   : > { %v16056_v20 = vpop.permute.xlu0 %16055  ;;  %13379 = vmatprep.mubr.msk.f32.mxu1 %vm9574_vm1, %v9414_v11 }
 0xe87   : > { %v16058_v61 = vunpack.i.h.bf16 %v16056_v20  ;;  %v16057_v19 = vunpack.i.l.bf16 %v16056_v20  ;;  %15376 = vmatpush1.bf16.msra.mxu0 %v15375_v43  ;;  %v13267_v20 = vld [vmem:[%s23425_s16 + $0x240] sm:$0xff] }
 0xe88   : > { %15377 = vmatprep.subr.bf16.mxu0 %v23492_v13 }
 0xe89   : > { %v15378_v47 = vpack.c.bf16 %v16058_v61, %v16057_v19  ;;  %10177 = vmatmul.mubr.f32.gmra.mrb[132].mxu1 %v9413_v36  ;;  %v13270_v36 = vld [vmem:[%s23425_s16 + $0x258] sm:$0xff] }
 0xe8a   : > { %v16061_v53 = vpop.permute.xlu1 %16060  ;;  %13380 = vmatprep.mubr.msk.f32.mxu1 %vm9574_vm1, %v9416_v28 }
 0xe8b   : > { %v16063_v25 = vunpack.i.h.bf16 %v16061_v53  ;;  %v16062_v17 = vunpack.i.l.bf16 %v16061_v53  ;;  %15379 = vmatpush1.bf16.msra.mxu0 %v15378_v47  ;;  %v13269_v53 = vld [vmem:[%s23425_s16 + $0x250] sm:$0xff] }
 0xe8c   : > { %15380 = vmatprep.subr.bf16.mxu0 %v23492_v13 }
 0xe8d   : > { %v15381_v40 = vpack.c.bf16 %v16063_v25, %v16062_v17  ;;  %10182 = vmatmul.mubr.f32.gmra.mrb[134].mxu1 %v9415_v0  ;;  %v13272_v0 = vld [vmem:[%s23425_s16 + $0x268] sm:$0xff] }
 0xe8e   : > { %v16066_v2 = vpop.permute.xlu0 %16065  ;;  %13381 = vmatprep.mubr.msk.f32.mxu1 %vm9574_vm1, %v9418_v16 }
 0xe8f   : > { %v16068_v24 = vunpack.i.h.bf16 %v16066_v2  ;;  %v16067_v55 = vunpack.i.l.bf16 %v16066_v2  ;;  %15382 = vmatpush1.bf16.msra.mxu0 %v15381_v40  ;;  %v13271_v2 = vld [vmem:[%s23425_s16 + $0x260] sm:$0xff] }
 0xe90   : > { %15383 = vmatprep.subr.bf16.mxu0 %v23492_v13 }
 0xe91   : > { %v15384_v49 = vpack.c.bf16 %v16068_v24, %v16067_v55  ;;  %10187 = vmatmul.mubr.f32.gmra.mrb[136].mxu1 %v9417_v4  ;;  %v13274_v4 = vld [vmem:[%s23425_s16 + $0x278] sm:$0xff] }
 0xe92   : > { %v16071_v48 = vpop.permute.xlu1 %16070  ;;  %13382 = vmatprep.mubr.msk.f32.mxu1 %vm9574_vm1, %v9420_v42 }
 0xe93   : > { %v16073_v41 = vunpack.i.h.bf16 %v16071_v48  ;;  %v16072_v29 = vunpack.i.l.bf16 %v16071_v48  ;;  %15385 = vmatpush1.bf16.msra.mxu0 %v15384_v49  ;;  %v13273_v48 = vld [vmem:[%s23425_s16 + $0x270] sm:$0xff] }
 0xe94   : > { %15386 = vmatprep.subr.bf16.mxu0 %v23492_v13 }
 0xe95   : > { %v15387_v62 = vpack.c.bf16 %v16073_v41, %v16072_v29  ;;  %10192 = vmatmul.mubr.f32.gmra.mrb[138].mxu1 %v9419_v27  ;;  %v13276_v27 = vld [vmem:[%s23425_s16 + $0x288] sm:$0xff] }
 0xe96   : > { %v16076_v56 = vpop.permute.xlu0 %16075  ;;  %v16081_v31 = vpop.permute.xlu1 %16080  ;;  %13383 = vmatprep.mubr.msk.f32.mxu1 %vm9574_vm1, %v9422_v21 }
 0xe97   : > { %v16078_v50 = vunpack.i.h.bf16 %v16076_v56  ;;  %v16077_v46 = vunpack.i.l.bf16 %v16076_v56  ;;  %15388 = vmatpush1.bf16.msra.mxu0 %v15387_v62  ;;  %v16083_v22 = vunpack.i.h.bf16 %v16081_v31  ;;  %v16082_v38 = vunpack.i.l.bf16 %v16081_v31  ;;  %v13275_v56 = vld [vmem:[%s23425_s16 + $0x280] sm:$0xff]  ;;  %v13278_v31 = vld [vmem:[%s23425_s16 + $0x298] sm:$0xff] }
 0xe98   : > { %15389 = vmatprep.subr.bf16.mxu0 %v23492_v13 }
 0xe99   : > { %v15390_v63 = vpack.c.bf16 %v16078_v50, %v16077_v46  ;;  %10197 = vmatmul.mubr.f32.gmra.mrb[140].mxu1 %v9421_v35  ;;  %v15423_v23 = vpack.c.bf16 %v16083_v22, %v16082_v38  ;;  %v13279_v38 = vld [vmem:[%s23425_s16 + $0x2a0] sm:$0xff] }
 0xe9a   : > { %v16086_v51 = vpop.permute.xlu0 %16085  ;;  %13384 = vmatprep.mubr.msk.f32.mxu1 %vm9574_vm1, %v9424_v32  ;;  %v16091_v52 = vpop.permute.xlu1 %16090  ;;  %v13277_v32 = vld [vmem:[%s23425_s16 + $0x290] sm:$0xff] }
 0xe9b   : > { %15391 = vmatpush1.bf16.msra.mxu0 %v15390_v63  ;;  %v16088_v10 = vunpack.i.h.bf16 %v16086_v51  ;;  %v16087_v37 = vunpack.i.l.bf16 %v16086_v51  ;;  %v16093_v59 = vunpack.i.h.bf16 %v16091_v52  ;;  %v16092_v12 = vunpack.i.l.bf16 %v16091_v52  ;;  %v13280_v63 = vld [vmem:[%s23425_s16 + $0x2a8] sm:$0xff]  ;;  %v13282_v51 = vld [vmem:[%s23425_s16 + $0x2b8] sm:$0xff] }
 0xe9c   : > { %15422 = vmatprep.subr.bf16.mxu0 %v23492_v13  ;;  %v13290_v52 = vld [vmem:[%s23425_s16 + $0x2f8] sm:$0xff] }
 0xe9d   : > { %10202 = vmatmul.mubr.f32.gmra.mrb[142].mxu1 %v9423_v8  ;;  %v15426_v3 = vpack.c.bf16 %v16088_v10, %v16087_v37  ;;  %v15429_v26 = vpack.c.bf16 %v16093_v59, %v16092_v12  ;;  %v13281_v8 = vld [vmem:[%s23425_s16 + $0x2b0] sm:$0xff]  ;;  %v13288_v10 = vld [vmem:[%s23425_s16 + $0x2e8] sm:$0xff]  ;;  %v13287_v37 = vld [vmem:[%s23425_s16 + $0x2e0] sm:$0xff] }
 0xe9e   : > { %9736 = vmatmul.mubr.f32.vlgmr.msra.gmra.mrb[204].mxu0 %v13259_v57  ;;  %13385 = vmatprep.mubr.msk.f32.mxu1 %vm9574_vm1, %v9426_v33  ;;  %v16096_v44 = vpop.permute.xlu0 %16095  ;;  %v16101_v6 = vpop.permute.xlu1 %16100  ;;  %v13284_v57 = vld [vmem:[%s23425_s16 + $0x2c8] sm:$0xff]  ;;  %v13283_v33 = vld [vmem:[%s23425_s16 + $0x2c0] sm:$0xff] }
 0xe9f   : > { %15424 = vmatpush1.bf16.msra.mxu0 %v15423_v23  ;;  %13324 = vmatprep.mubr.msk.f32.mxu0 %vm9574_vm1, %v13262_v54  ;;  %v16098_v34 = vunpack.i.h.bf16 %v16096_v44  ;;  %v16097_v1 = vunpack.i.l.bf16 %v16096_v44  ;;  %v16103_v58 = vunpack.i.h.bf16 %v16101_v6  ;;  %v16102_v11 = vunpack.i.l.bf16 %v16101_v6  ;;  %v13286_v54 = vld [vmem:[%s23425_s16 + $0x2d8] sm:$0xff]  ;;  %v13285_v23 = vld [vmem:[%s23425_s16 + $0x2d0] sm:$0xff]  ;;  %v13296_v59 = vld [vmem:[%s23425_s16 + $0x328] sm:$0xff] }
 0xea0   : > { %15425 = vmatprep.subr.bf16.mxu0 %v23492_v13  ;;  %v13295_v12 = vld [vmem:[%s23425_s16 + $0x320] sm:$0xff]  ;;  %v13298_v44 = vld [vmem:[%s23425_s16 + $0x338] sm:$0xff] }
 0xea1   : > { %10207 = vmatmul.mubr.f32.gmra.mrb[144].mxu1 %v9425_v5  ;;  %v15432_v30 = vpack.c.bf16 %v16098_v34, %v16097_v1  ;;  %v15435_v61 = vpack.c.bf16 %v16103_v58, %v16102_v11  ;;  %v13289_v5 = vld [vmem:[%s23425_s16 + $0x2f0] sm:$0xff]  ;;  %v13304_v1 = vld [vmem:[%s23425_s16 + $0x368] sm:$0xff]  ;;  %v13303_v6 = vld [vmem:[%s23425_s16 + $0x360] sm:$0xff] }
 0xea2   : > { %9741 = vmatmul.mubr.f32.gmra.mrb[206].mxu0 %v13261_v9  ;;  %13386 = vmatprep.mubr.msk.f32.mxu1 %vm9574_vm1, %v9428_v39  ;;  %v16106_v43 = vpop.permute.xlu0 %16105  ;;  %v16111_v47 = vpop.permute.xlu1 %16110  ;;  %v13292_v9 = vld [vmem:[%s23425_s16 + $0x308] sm:$0xff]  ;;  %v13291_v39 = vld [vmem:[%s23425_s16 + $0x300] sm:$0xff]  ;;  %v13301_v34 = vld [vmem:[%s23425_s16 + $0x350] sm:$0xff] }
 0xea3   : > { %15427 = vmatpush1.bf16.msra.mxu0 %v15426_v3  ;;  %13325 = vmatprep.mubr.msk.f32.mxu0 %vm9574_vm1, %v13264_v14  ;;  %v16108_v19 = vunpack.i.h.bf16 %v16106_v43  ;;  %v16107_v28 = vunpack.i.l.bf16 %v16106_v43  ;;  %v16113_v17 = vunpack.i.h.bf16 %v16111_v47  ;;  %v16112_v16 = vunpack.i.l.bf16 %v16111_v47  ;;  %v13294_v14 = vld [vmem:[%s23425_s16 + $0x318] sm:$0xff]  ;;  %v13293_v3 = vld [vmem:[%s23425_s16 + $0x310] sm:$0xff]  ;;  %v13307_v58 = vld [vmem:[%s23425_s16 + $0x380] sm:$0xff] }
 0xea4   : > { %15428 = vmatprep.subr.bf16.mxu0 %v23492_v13  ;;  %v13310_v11 = vld [vmem:[%s23425_s16 + $0x398] sm:$0xff]  ;;  %v13311_v47 = vld [vmem:[%s23425_s16 + $0x3a0] sm:$0xff] }
 0xea5   : > { %10212 = vmatmul.mubr.f32.gmra.mrb[146].mxu1 %v9427_v18  ;;  %v15438_v25 = vpack.c.bf16 %v16108_v19, %v16107_v28  ;;  %v15441_v24 = vpack.c.bf16 %v16113_v17, %v16112_v16  ;;  %v13297_v18 = vld [vmem:[%s23425_s16 + $0x330] sm:$0xff]  ;;  %v13316_v16 = vld [vmem:[%s23425_s16 + $0x3c8] sm:$0xff] }
 0xea6   : > { %9746 = vmatmul.mubr.f32.gmra.mrb[208].mxu0 %v13263_v7  ;;  %v16116_v40 = vpop.permute.xlu0 %16115  ;;  %v16121_v49 = vpop.permute.xlu1 %16120  ;;  %v13300_v7 = vld [vmem:[%s23425_s16 + $0x348] sm:$0xff]  ;;  %v13313_v17 = vld [vmem:[%s23425_s16 + $0x3b0] sm:$0xff] }
 0xea7   : > { %15430 = vmatpush1.bf16.msra.mxu0 %v15429_v26  ;;  %13326 = vmatprep.mubr.msk.f32.mxu0 %vm9574_vm1, %v13266_v45  ;;  %v16118_v55 = vunpack.i.h.bf16 %v16116_v40  ;;  %v16117_v42 = vunpack.i.l.bf16 %v16116_v40  ;;  %v16123_v29 = vunpack.i.h.bf16 %v16121_v49  ;;  %v16122_v21 = vunpack.i.l.bf16 %v16121_v49  ;;  %v13299_v45 = vld [vmem:[%s23425_s16 + $0x340] sm:$0xff]  ;;  %v13302_v26 = vld [vmem:[%s23425_s16 + $0x358] sm:$0xff]  ;;  %v13317_v49 = vld [vmem:[%s23425_s16 + $0x3d0] sm:$0xff] }
 0xea8   : > { %15431 = vmatprep.subr.bf16.mxu0 %v23492_v13 }
 0xea9   : > { %v15444_v41 = vpack.c.bf16 %v16118_v55, %v16117_v42  ;;  %v15447_v35 = vpack.c.bf16 %v16123_v29, %v16122_v21  ;;  %v13319_v29 = vld [vmem:[%s23425_s16 + $0x3e0] sm:$0xff]  ;;  %v13322_v21 = vld [vmem:[%s23425_s16 + $0x3f8] sm:$0xff] }
 0xeaa   : > { %9751 = vmatmul.mubr.f32.gmra.mrb[210].mxu0 %v13265_v60  ;;  %v16126_v62 = vpop.permute.xlu0 %16125  ;;  %v13306_v60 = vld [vmem:[%s23425_s16 + $0x378] sm:$0xff] }
 0xeab   : > { %15433 = vmatpush1.bf16.msra.mxu0 %v15432_v30  ;;  %13327 = vmatprep.mubr.msk.f32.mxu0 %vm9574_vm1, %v13268_v15  ;;  %v16128_v50 = vunpack.i.h.bf16 %v16126_v62  ;;  %v16127_v46 = vunpack.i.l.bf16 %v16126_v62  ;;  %v13305_v15 = vld [vmem:[%s23425_s16 + $0x370] sm:$0xff]  ;;  %v13308_v30 = vld [vmem:[%s23425_s16 + $0x388] sm:$0xff] }
 0xeac   : > { %15434 = vmatprep.subr.bf16.mxu0 %v23492_v13 }
 0xead   : > { %v15450_v22 = vpack.c.bf16 %v16128_v50, %v16127_v46 }
 0xeae   : > { %9756 = vmatmul.mubr.f32.gmra.mrb[212].mxu0 %v13267_v20 }
 0xeaf   : > { %15436 = vmatpush1.bf16.msra.mxu0 %v15435_v61  ;;  %13328 = vmatprep.mubr.msk.f32.mxu0 %vm9574_vm1, %v13270_v36  ;;  %v13309_v36 = vld [vmem:[%s23425_s16 + $0x390] sm:$0xff]  ;;  %v13312_v61 = vld [vmem:[%s23425_s16 + $0x3a8] sm:$0xff] }
 0xeb0   : > { %15437 = vmatprep.subr.bf16.mxu0 %v23492_v13 }
 0xeb2   : > { %9761 = vmatmul.mubr.f32.gmra.mrb[214].mxu0 %v13269_v53  ;;  %v13314_v53 = vld [vmem:[%s23425_s16 + $0x3b8] sm:$0xff] }
 0xeb3   : > { %15439 = vmatpush1.bf16.msra.mxu0 %v15438_v25  ;;  %13329 = vmatprep.mubr.msk.f32.mxu0 %vm9574_vm1, %v13272_v0 }
 0xeb4   : > { %15440 = vmatprep.subr.bf16.mxu0 %v23492_v13 }
 0xeb6   : > { %9766 = vmatmul.mubr.f32.gmra.mrb[216].mxu0 %v13271_v2 }
 0xeb7   : > { %15442 = vmatpush1.bf16.msra.mxu0 %v15441_v24  ;;  %13330 = vmatprep.mubr.msk.f32.mxu0 %vm9574_vm1, %v13274_v4  ;;  %v13315_v4 = vld [vmem:[%s23425_s16 + $0x3c0] sm:$0xff]  ;;  %v13318_v24 = vld [vmem:[%s23425_s16 + $0x3d8] sm:$0xff] }
 0xeb8   : > { %15443 = vmatprep.subr.bf16.mxu0 %v23492_v13 }
 0xeba   : > { %9771 = vmatmul.mubr.f32.gmra.mrb[218].mxu0 %v13273_v48  ;;  %v13320_v48 = vld [vmem:[%s23425_s16 + $0x3e8] sm:$0xff] }
 0xebb   : > { %15445 = vmatpush1.bf16.msra.mxu0 %v15444_v41  ;;  %13331 = vmatprep.mubr.msk.f32.mxu0 %vm9574_vm1, %v13276_v27 }
 0xebc   : > { %15446 = vmatprep.subr.bf16.mxu0 %v23492_v13 }
 0xebe   : > { %9776 = vmatmul.mubr.f32.gmra.mrb[220].mxu0 %v13275_v56 }
 0xebf   : > { %15448 = vmatpush1.bf16.msra.mxu0 %v15447_v35  ;;  %13332 = vmatprep.mubr.msk.f32.mxu0 %vm9574_vm1, %v13278_v31  ;;  %v13321_v31 = vld [vmem:[%s23425_s16 + $0x3f0] sm:$0xff]  ;;  %v13388_v35 = vld [vmem:[%s23425_s16 + $0x408] sm:$0xff] }
 0xec0   : > { %15449 = vmatprep.subr.bf16.mxu0 %v23492_v13 }
 0xec2   : > { %9781 = vmatmul.mubr.f32.gmra.mrb[222].mxu0 %v13277_v32  ;;  %v13387_v32 = vld [vmem:[%s23425_s16 + $0x400] sm:$0xff] }
 0xec3   : > { %15451 = vmatpush1.bf16.msra.mxu0 %v15450_v22  ;;  %13333 = vmatprep.mubr.msk.f32.mxu0 %vm9574_vm1, %v13280_v63  ;;  %v13390_v63 = vld [vmem:[%s23425_s16 + $0x418] sm:$0xff] }
 0xec4   : > { %15484 = vmatprep.subr.bf16.mxu0 %v23492_v13 }
 0xec6   : > { %9786 = vmatmul.mubr.f32.gmra.mrb[224].mxu0 %v13279_v38 }
 0xec7   : > { %13334 = vmatprep.mubr.msk.f32.mxu0 %vm9574_vm1, %v13282_v51  ;;  %v13389_v51 = vld [vmem:[%s23425_s16 + $0x410] sm:$0xff] }
 0xeca   : > { %9791 = vmatmul.mubr.f32.gmra.mrb[226].mxu0 %v13281_v8  ;;  %v13392_v8 = vld [vmem:[%s23425_s16 + $0x428] sm:$0xff] }
 0xecb   : > { %13335 = vmatprep.mubr.msk.f32.mxu0 %vm9574_vm1, %v13284_v57 }
 0xece   : > { %9796 = vmatmul.mubr.f32.gmra.mrb[228].mxu0 %v13283_v33 }
 0xecf   : > { %13336 = vmatprep.mubr.msk.f32.mxu0 %vm9574_vm1, %v13286_v54  ;;  %v13391_v54 = vld [vmem:[%s23425_s16 + $0x420] sm:$0xff] }
 0xed2   : > { %9801 = vmatmul.mubr.f32.gmra.mrb[230].mxu0 %v13285_v23  ;;  %v13394_v23 = vld [vmem:[%s23425_s16 + $0x438] sm:$0xff] }
 0xed3   : > { %13337 = vmatprep.mubr.msk.f32.mxu0 %vm9574_vm1, %v13288_v10 }
 0xed6   : > { %9806 = vmatmul.mubr.f32.gmra.mrb[232].mxu0 %v13287_v37 }
 0xed7   : > { %13338 = vmatprep.mubr.msk.f32.mxu0 %vm9574_vm1, %v13290_v52  ;;  %v13393_v52 = vld [vmem:[%s23425_s16 + $0x430] sm:$0xff] }
 0xeda   : > { %9811 = vmatmul.mubr.f32.gmra.mrb[234].mxu0 %v13289_v5  ;;  %v13396_v5 = vld [vmem:[%s23425_s16 + $0x448] sm:$0xff] }
 0xedb   : > { %13339 = vmatprep.mubr.msk.f32.mxu0 %vm9574_vm1, %v13292_v9 }
 0xede   : > { %9816 = vmatmul.mubr.f32.gmra.mrb[236].mxu0 %v13291_v39 }
 0xedf   : > { %13340 = vmatprep.mubr.msk.f32.mxu0 %vm9574_vm1, %v13294_v14  ;;  %v13395_v14 = vld [vmem:[%s23425_s16 + $0x440] sm:$0xff] }
 0xee2   : > { %9821 = vmatmul.mubr.f32.gmra.mrb[238].mxu0 %v13293_v3  ;;  %v13398_v3 = vld [vmem:[%s23425_s16 + $0x458] sm:$0xff] }
 0xee3   : > { %13341 = vmatprep.mubr.msk.f32.mxu0 %vm9574_vm1, %v13296_v59 }
 0xee6   : > { %9826 = vmatmul.mubr.f32.gmra.mrb[240].mxu0 %v13295_v12 }
 0xee7   : > { %13342 = vmatprep.mubr.msk.f32.mxu0 %vm9574_vm1, %v13298_v44  ;;  %v13397_v44 = vld [vmem:[%s23425_s16 + $0x450] sm:$0xff] }
 0xeea   : > { %9831 = vmatmul.mubr.f32.gmra.mrb[242].mxu0 %v13297_v18  ;;  %v13400_v18 = vld [vmem:[%s23425_s16 + $0x468] sm:$0xff] }
 0xeeb   : > { %13343 = vmatprep.mubr.msk.f32.mxu0 %vm9574_vm1, %v13300_v7 }
 0xeee   : > { %9836 = vmatmul.mubr.f32.gmra.mrb[244].mxu0 %v13299_v45 }
 0xeef   : > { %13344 = vmatprep.mubr.msk.f32.mxu0 %vm9574_vm1, %v13302_v26  ;;  %v13399_v26 = vld [vmem:[%s23425_s16 + $0x460] sm:$0xff] }
 0xef2   : > { %9841 = vmatmul.mubr.f32.gmra.mrb[246].mxu0 %v13301_v34  ;;  %v13402_v34 = vld [vmem:[%s23425_s16 + $0x478] sm:$0xff] }
 0xef3   : > { %13345 = vmatprep.mubr.msk.f32.mxu0 %vm9574_vm1, %v13304_v1 }
 0xef6   : > { %9846 = vmatmul.mubr.f32.gmra.mrb[248].mxu0 %v13303_v6 }
 0xef7   : > { %13346 = vmatprep.mubr.msk.f32.mxu0 %vm9574_vm1, %v13306_v60  ;;  %v13401_v60 = vld [vmem:[%s23425_s16 + $0x470] sm:$0xff] }
 0xefa   : > { %9851 = vmatmul.mubr.f32.gmra.mrb[250].mxu0 %v13305_v15  ;;  %v13404_v15 = vld [vmem:[%s23425_s16 + $0x488] sm:$0xff] }
 0xefb   : > { %13347 = vmatprep.mubr.msk.f32.mxu0 %vm9574_vm1, %v13308_v30 }
 0xefc   : > { %v22158_v43 = vpop.f32.mrb[84].mxu1 }
 0xefd   : > { %v10060_v20 = vpop.f32.mrb[85].mxu1 }
 0xefe   : > { %9856 = vmatmul.mubr.f32.gmra.mrb[252].mxu0 %v13307_v58  ;;  %v13406_v20 = vld [vmem:[%s23425_s16 + $0x498] sm:$0xff] }
 0xeff   : > { %13348 = vmatprep.mubr.msk.f32.mxu0 %vm9574_vm1, %v13310_v11  ;;  %v13403_v11 = vld [vmem:[%s23425_s16 + $0x480] sm:$0xff] }
 0xf00   : > { %v22167_v19 = vpop.f32.mrb[86].mxu1 }
 0xf01   : > { %v10065_v28 = vpop.f32.mrb[87].mxu1 }
 0xf02   : > { %9861 = vmatmul.mubr.f32.gmra.mrb[254].mxu0 %v13309_v36  ;;  %v13405_v28 = vld [vmem:[%s23425_s16 + $0x490] sm:$0xff] }
 0xf03   : > { %13349 = vmatprep.mubr.msk.f32.mxu0 %vm9574_vm1, %v13312_v61 }
 0xf04   : > { %v22176_v0 = vpop.f32.mrb[88].mxu1 }
 0xf05   : > { %v10070_v25 = vpop.f32.mrb[89].mxu1 }
 0xf06   : > { %9866 = vmatmul.mubr.f32.gmra.mrb[0].mxu0 %v13311_v47  ;;  %v13408_v47 = vld [vmem:[%s23425_s16 + $0x4a8] sm:$0xff] }
 0xf07   : > { %13350 = vmatprep.mubr.msk.f32.mxu0 %vm9574_vm1, %v13314_v53 }
 0xf08   : > { %v22185_v40 = vpop.f32.mrb[90].mxu1 }
 0xf09   : > { %v10075_v2 = vpop.f32.mrb[91].mxu1 }
 0xf0a   : > { %9871 = vmatmul.mubr.f32.gmra.mrb[2].mxu0 %v13313_v17  ;;  %v13407_v17 = vld [vmem:[%s23425_s16 + $0x4a0] sm:$0xff] }
 0xf0b   : > { %13351 = vmatprep.mubr.msk.f32.mxu0 %vm9574_vm1, %v13316_v16  ;;  %v13410_v16 = vld [vmem:[%s23425_s16 + $0x4b8] sm:$0xff] }
 0xf0c   : > { %v22194_v55 = vpop.f32.mrb[92].mxu1 }
 0xf0d   : > { %v10080_v42 = vpop.f32.mrb[93].mxu1 }
 0xf0e   : > { %9876 = vmatmul.mubr.f32.gmra.mrb[4].mxu0 %v13315_v4  ;;  %v13412_v42 = vld [vmem:[%s23425_s16 + $0x4c8] sm:$0xff] }
 0xf0f   : > { %13352 = vmatprep.mubr.msk.f32.mxu0 %vm9574_vm1, %v13318_v24  ;;  %v13409_v24 = vld [vmem:[%s23425_s16 + $0x4b0] sm:$0xff] }
 0xf10   : > { %v22203_v27 = vpop.f32.mrb[94].mxu1 }
 0xf11   : > { %v10085_v41 = vpop.f32.mrb[95].mxu1 }
 0xf12   : > { %9881 = vmatmul.mubr.f32.gmra.mrb[6].mxu0 %v13317_v49  ;;  %v13411_v41 = vld [vmem:[%s23425_s16 + $0x4c0] sm:$0xff] }
 0xf13   : > { %13353 = vmatprep.mubr.msk.f32.mxu0 %vm9574_vm1, %v13320_v48 }
 0xf14   : > { %v22212_v62 = vpop.f32.mrb[96].mxu1 }
 0xf15   : > { %v10090_v56 = vpop.f32.mrb[97].mxu1 }
 0xf16   : > { %9886 = vmatmul.mubr.f32.gmra.mrb[8].mxu0 %v13319_v29  ;;  %v13414_v29 = vld [vmem:[%s23425_s16 + $0x4d8] sm:$0xff] }
 0xf17   : > { %13354 = vmatprep.mubr.msk.f32.mxu0 %vm9574_vm1, %v13322_v21 }
 0xf18   : > { %v22221_v50 = vpop.f32.mrb[98].mxu1 }
 0xf19   : > { %v10095_v46 = vpop.f32.mrb[99].mxu1 }
 0xf1a   : > { %9891 = vmatmul.mubr.f32.gmra.mrb[10].mxu0 %v13321_v31  ;;  %v13413_v31 = vld [vmem:[%s23425_s16 + $0x4d0] sm:$0xff] }
 0xf1b   : > { %13451 = vmatprep.mubr.msk.f32.mxu0 %vm9574_vm1, %v13388_v35  ;;  %v13416_v35 = vld [vmem:[%s23425_s16 + $0x4e8] sm:$0xff] }
 0xf1c   : > { %v22230_v22 = vpop.f32.mrb[100].mxu1 }
 0xf1d   : > { %v10100_v38 = vpop.f32.mrb[101].mxu1 }
 0xf1e   : > { %10503 = vmatmul.mubr.f32.vlgmr.msra.gmra.mrb[12].mxu0 %v13387_v32  ;;  %v13418_v38 = vld [vmem:[%s23425_s16 + $0x4f8] sm:$0xff] }
 0xf1f   : > { %13452 = vmatprep.mubr.msk.f32.mxu0 %vm9574_vm1, %v13390_v63  ;;  %v13415_v63 = vld [vmem:[%s23425_s16 + $0x4e0] sm:$0xff] }
 0xf20   : > { %v22239_v57 = vpop.f32.mrb[102].mxu1 }
 0xf21   : > { %v10105_v33 = vpop.f32.mrb[103].mxu1 }
 0xf22   : > { %10508 = vmatmul.mubr.f32.gmra.mrb[14].mxu0 %v13389_v51  ;;  %v13417_v33 = vld [vmem:[%s23425_s16 + $0x4f0] sm:$0xff] }
 0xf23   : > { %13453 = vmatprep.mubr.msk.f32.mxu0 %vm9574_vm1, %v13392_v8 }
 0xf24   : > { %v22248_v10 = vpop.f32.mrb[104].mxu1 }
 0xf25   : > { %v10110_v37 = vpop.f32.mrb[105].mxu1 }
 0xf26   : > { %10513 = vmatmul.mubr.f32.gmra.mrb[16].mxu0 %v13391_v54  ;;  %v13420_v54 = vld [vmem:[%s23425_s16 + $0x508] sm:$0xff] }
 0xf27   : > { %13454 = vmatprep.mubr.msk.f32.mxu0 %vm9574_vm1, %v13394_v23 }
 0xf28   : > { %v22257_v9 = vpop.f32.mrb[106].mxu1 }
 0xf29   : > { %v10115_v39 = vpop.f32.mrb[107].mxu1 }
 0xf2a   : > { %10518 = vmatmul.mubr.f32.gmra.mrb[18].mxu0 %v13393_v52  ;;  %v13419_v52 = vld [vmem:[%s23425_s16 + $0x500] sm:$0xff] }
 0xf2b   : > { %13455 = vmatprep.mubr.msk.f32.mxu0 %vm9574_vm1, %v13396_v5  ;;  %v13422_v5 = vld [vmem:[%s23425_s16 + $0x518] sm:$0xff] }
 0xf2c   : > { %v22266_v59 = vpop.f32.mrb[108].mxu1 }
 0xf2d   : > { %v10120_v12 = vpop.f32.mrb[109].mxu1 }
 0xf2e   : > { %10523 = vmatmul.mubr.f32.gmra.mrb[20].mxu0 %v13395_v14  ;;  %v13424_v12 = vld [vmem:[%s23425_s16 + $0x528] sm:$0xff] }
 0xf2f   : > { %13456 = vmatprep.mubr.msk.f32.mxu0 %vm9574_vm1, %v13398_v3  ;;  %v13421_v3 = vld [vmem:[%s23425_s16 + $0x510] sm:$0xff] }
 0xf30   : > { %v22275_v7 = vpop.f32.mrb[110].mxu1 }
 0xf31   : > { %v10125_v45 = vpop.f32.mrb[111].mxu1 }
 0xf32   : > { %10528 = vmatmul.mubr.f32.gmra.mrb[22].mxu0 %v13397_v44  ;;  %v13423_v45 = vld [vmem:[%s23425_s16 + $0x520] sm:$0xff] }
 0xf33   : > { %13457 = vmatprep.mubr.msk.f32.mxu0 %vm9574_vm1, %v13400_v18 }
 0xf34   : > { %v22284_v1 = vpop.f32.mrb[112].mxu1 }
 0xf35   : > { %v10130_v6 = vpop.f32.mrb[113].mxu1 }
 0xf36   : > { %10533 = vmatmul.mubr.f32.gmra.mrb[24].mxu0 %v13399_v26  ;;  %v13426_v26 = vld [vmem:[%s23425_s16 + $0x538] sm:$0xff] }
 0xf37   : > { %13458 = vmatprep.mubr.msk.f32.mxu0 %vm9574_vm1, %v13402_v34 }
 0xf38   : > { %v22293_v30 = vpop.f32.mrb[114].mxu1 }
 0xf39   : > { %v10135_v58 = vpop.f32.mrb[115].mxu1 }
 0xf3a   : > { %10538 = vmatmul.mubr.f32.gmra.mrb[26].mxu0 %v13401_v60  ;;  %v13425_v60 = vld [vmem:[%s23425_s16 + $0x530] sm:$0xff] }
 0xf3b   : > { %13459 = vmatprep.mubr.msk.f32.mxu0 %vm9574_vm1, %v13404_v15  ;;  %v13428_v15 = vld [vmem:[%s23425_s16 + $0x548] sm:$0xff] }
 0xf3c   : > { %v22302_v36 = vpop.f32.mrb[116].mxu1 }
 0xf3d   : > { %v10140_v61 = vpop.f32.mrb[117].mxu1 }
 0xf3e   : > { %10543 = vmatmul.mubr.f32.gmra.mrb[28].mxu0 %v13403_v11  ;;  %v13430_v61 = vld [vmem:[%s23425_s16 + $0x558] sm:$0xff] }
 0xf3f   : > { %13460 = vmatprep.mubr.msk.f32.mxu0 %vm9574_vm1, %v13406_v20  ;;  %v13427_v20 = vld [vmem:[%s23425_s16 + $0x540] sm:$0xff] }
 0xf40   : > { %v22311_v53 = vpop.f32.mrb[118].mxu1 }
 0xf41   : > { %v10145_v25 = vpop.f32.mrb[119].mxu1 }
 0xf42   : > { %10548 = vmatmul.mubr.f32.gmra.mrb[30].mxu0 %v13405_v28  ;;  %v13429_v25 = vld [vmem:[%s23425_s16 + $0x550] sm:$0xff] }
 0xf43   : > { %13461 = vmatprep.mubr.msk.f32.mxu0 %vm9574_vm1, %v13408_v47 }
 0xf44   : > { %v22320_v2 = vpop.f32.mrb[120].mxu1 }
 0xf45   : > { %v10150_v4 = vpop.f32.mrb[121].mxu1 }
 0xf46   : > { %10553 = vmatmul.mubr.f32.gmra.mrb[32].mxu0 %v13407_v17  ;;  %v13432_v17 = vld [vmem:[%s23425_s16 + $0x568] sm:$0xff] }
 0xf47   : > { %13462 = vmatprep.mubr.msk.f32.mxu0 %vm9574_vm1, %v13410_v16 }
 0xf48   : > { %v22329_v49 = vpop.f32.mrb[122].mxu1 }
 0xf49   : > { %v10155_v48 = vpop.f32.mrb[123].mxu1 }
 0xf4a   : > { %10558 = vmatmul.mubr.f32.gmra.mrb[34].mxu0 %v13409_v24 }
 0xf4b   : > { %13463 = vmatprep.mubr.msk.f32.mxu0 %vm9574_vm1, %v13412_v42 }
 0xf4c   : > { %v22338_v21 = vpop.f32.mrb[124].mxu1 }
 0xf4d   : > { %v10160_v56 = vpop.f32.mrb[125].mxu1 }
 0xf4e   : > { %10563 = vmatmul.mubr.f32.gmra.mrb[36].mxu0 %v13411_v41  ;;  %v13431_v41 = vld [vmem:[%s23425_s16 + $0x560] sm:$0xff] }
 0xf4f   : > { %13464 = vmatprep.mubr.msk.f32.mxu0 %vm9574_vm1, %v13414_v29  ;;  %v13434_v29 = vld [vmem:[%s23425_s16 + $0x578] sm:$0xff] }
 0xf50   : > { %v22347_v46 = vpop.f32.mrb[126].mxu1 }
 0xf51   : > { %v10165_v32 = vpop.f32.mrb[127].mxu1 }
 0xf52   : > { %10568 = vmatmul.mubr.f32.gmra.mrb[38].mxu0 %v13413_v31 }
 0xf53   : > { %13465 = vmatprep.mubr.msk.f32.mxu0 %vm9574_vm1, %v13416_v35 }
 0xf54   : > { %v22356_v51 = vpop.f32.mrb[128].mxu1 }
 0xf55   : > { %v10170_v8 = vpop.f32.mrb[129].mxu1 }
 0xf56   : > { %10573 = vmatmul.mubr.f32.gmra.mrb[40].mxu0 %v13415_v63 }
 0xf57   : > { %13466 = vmatprep.mubr.msk.f32.mxu0 %vm9574_vm1, %v13418_v38  ;;  %v13436_v38 = vld [vmem:[%s23425_s16 + $0x588] sm:$0xff] }
 0xf58   : > { %v22365_v23 = vpop.f32.mrb[130].mxu1 }
 0xf59   : > { %v10175_v37 = vpop.f32.mrb[131].mxu1 }
 0xf5a   : > { %10578 = vmatmul.mubr.f32.gmra.mrb[42].mxu0 %v13417_v33 }
 0xf5b   : > { %13467 = vmatprep.mubr.msk.f32.mxu0 %vm9574_vm1, %v13420_v54 }
 0xf5c   : > { %v22374_v39 = vpop.f32.mrb[132].mxu1 }
 0xf5d   : > { %v10180_v14 = vpop.f32.mrb[133].mxu1 }
 0xf5e   : > { %10583 = vmatmul.mubr.f32.gmra.mrb[44].mxu0 %v13419_v52 }
 0xf5f   : > { %13468 = vmatprep.mubr.msk.f32.mxu0 %vm9574_vm1, %v13422_v5  ;;  %v13438_v5 = vld [vmem:[%s23425_s16 + $0x598] sm:$0xff] }
 0xf60   : > { %v22383_v44 = vpop.f32.mrb[134].mxu1 }
 0xf61   : > { %v10185_v18 = vpop.f32.mrb[135].mxu1 }
 0xf62   : > { %10588 = vmatmul.mubr.f32.gmra.mrb[46].mxu0 %v13421_v3  ;;  %v13440_v18 = vld [vmem:[%s23425_s16 + $0x5a8] sm:$0xff] }
 0xf63   : > { %13469 = vmatprep.mubr.msk.f32.mxu0 %vm9574_vm1, %v13424_v12 }
 0xf64   : > { %v22392_v34 = vpop.f32.mrb[136].mxu1 }
 0xf65   : > { %v10190_v6 = vpop.f32.mrb[137].mxu1 }
 0xf66   : > { %10593 = vmatmul.mubr.f32.gmra.mrb[48].mxu0 %v13423_v45 }
 0xf67   : > { %13470 = vmatprep.mubr.msk.f32.mxu0 %vm9574_vm1, %v13426_v26 }
 0xf68   : > { %v22401_v58 = vpop.f32.mrb[138].mxu1 }
 0xf69   : > { %v10195_v11 = vpop.f32.mrb[139].mxu1 }
 0xf6a   : > { %10598 = vmatmul.mubr.f32.gmra.mrb[50].mxu0 %v13425_v60  ;;  %v13442_v60 = vld [vmem:[%s23425_s16 + $0x5b8] sm:$0xff] }
 0xf6b   : > { %13471 = vmatprep.mubr.msk.f32.mxu0 %vm9574_vm1, %v13428_v15 }
 0xf6c   : > { %v22410_v28 = vpop.f32.mrb[140].mxu1 }
 0xf6d   : > { %v10200_v47 = vpop.f32.mrb[141].mxu1 }
 0xf6e   : > { %10603 = vmatmul.mubr.f32.gmra.mrb[52].mxu0 %v13427_v20 }
 0xf6f   : > { %13472 = vmatprep.mubr.msk.f32.mxu0 %vm9574_vm1, %v13430_v61  ;;  %v13444_v61 = vld [vmem:[%s23425_s16 + $0x5c8] sm:$0xff] }
 0xf70   : > { %v22419_v16 = vpop.f32.mrb[142].mxu1 }
 0xf71   : > { %v9737_v4 = vpop.f32.mrb[204].mxu0  ;;  %v10205_v24 = vpop.f32.mrb[143].mxu1 }
 0xf72   : > { %10608 = vmatmul.mubr.f32.gmra.mrb[54].mxu0 %v13429_v25  ;;  %v9739_v42 = vpop.f32.mrb[205].mxu0  ;;  %v22422_v48 = vadd.f32 %v22158_v43, %v9737_v4  ;;  %v13433_v43 = vld [vmem:[%s23425_s16 + $0x570] sm:$0xff]  ;;  %v13446_v4 = vld [vmem:[%s23425_s16 + $0x5d8] sm:$0xff] }
 0xf73   : > { %13473 = vmatprep.mubr.msk.f32.mxu0 %vm9574_vm1, %v13432_v17 }
 0xf74   : > { %v22431_v56 = vpop.f32.mrb[144].mxu1 }
 0xf75   : > { %v9742_v31 = vpop.f32.mrb[206].mxu0  ;;  %v10210_v35 = vpop.f32.mrb[145].mxu1 }
 0xf76   : > { %10613 = vmatmul.mubr.f32.gmra.mrb[56].mxu0 %v13431_v41  ;;  %v9744_v32 = vpop.f32.mrb[207].mxu0  ;;  %v22434_v63 = vadd.f32 %v22167_v19, %v9742_v31  ;;  %v13435_v19 = vld [vmem:[%s23425_s16 + $0x580] sm:$0xff] }
 0xf77   : > { %13474 = vmatprep.mubr.msk.f32.mxu0 %vm9574_vm1, %v13434_v29  ;;  %v13448_v29 = vld [vmem:[%s23425_s16 + $0x5e8] sm:$0xff] }
 0xf78   : > { %v22443_v8 = vpop.f32.mrb[146].mxu1 }
 0xf79   : > { %v9747_v33 = vpop.f32.mrb[208].mxu0  ;;  %v10215_v54 = vpop.f32.mrb[147].mxu1 }
 0xf7a   : > { %10618 = vmatmul.mubr.f32.gmra.mrb[58].mxu0 %v13433_v43  ;;  %v9749_v37 = vpop.f32.mrb[209].mxu0  ;;  %v22446_v52 = vadd.f32 %v22176_v0, %v9747_v33  ;;  %v13437_v0 = vld [vmem:[%s23425_s16 + $0x590] sm:$0xff]  ;;  %v13450_v43 = vld [vmem:[%s23425_s16 + $0x5f8] sm:$0xff] }
 0xf7b   : > { %13475 = vmatprep.mubr.msk.f32.mxu0 %vm9574_vm1, %v13436_v38 }
 0xf7d   : > { %v9752_v14 = vpop.f32.mrb[210].mxu0 }
 0xf7e   : > { %10623 = vmatmul.mubr.f32.gmra.mrb[60].mxu0 %v13435_v19  ;;  %v9754_v3 = vpop.f32.mrb[211].mxu0  ;;  %v22456_v12 = vadd.f32 %v22185_v40, %v9752_v14  ;;  %v13439_v40 = vld [vmem:[%s23425_s16 + $0x5a0] sm:$0xff] }
 0xf7f   : > { %13476 = vmatprep.mubr.msk.f32.mxu0 %vm9574_vm1, %v13438_v5 }
 0xf81   : > { %v9757_v45 = vpop.f32.mrb[212].mxu0 }
 0xf82   : > { %10628 = vmatmul.mubr.f32.gmra.mrb[62].mxu0 %v13437_v0  ;;  %v9759_v26 = vpop.f32.mrb[213].mxu0  ;;  %v22466_v6 = vadd.f32 %v22194_v55, %v9757_v45  ;;  %v13441_v55 = vld [vmem:[%s23425_s16 + $0x5b0] sm:$0xff] }
 0xf83   : > { %13477 = vmatprep.mubr.msk.f32.mxu0 %vm9574_vm1, %v13440_v18 }
 0xf85   : > { %v9762_v15 = vpop.f32.mrb[214].mxu0 }
 0xf86   : > { %10633 = vmatmul.mubr.f32.gmra.mrb[64].mxu0 %v13439_v40  ;;  %v9764_v11 = vpop.f32.mrb[215].mxu0  ;;  %v22476_v20 = vadd.f32 %v22203_v27, %v9762_v15  ;;  %v13443_v27 = vld [vmem:[%s23425_s16 + $0x5c0] sm:$0xff] }
 0xf87   : > { %13478 = vmatprep.mubr.msk.f32.mxu0 %vm9574_vm1, %v13442_v60 }
 0xf89   : > { %v9767_v47 = vpop.f32.mrb[216].mxu0 }
 0xf8a   : > { %10638 = vmatmul.mubr.f32.gmra.mrb[66].mxu0 %v13441_v55  ;;  %v9769_v25 = vpop.f32.mrb[217].mxu0  ;;  %v22486_v17 = vadd.f32 %v22212_v62, %v9767_v47  ;;  %v13445_v62 = vld [vmem:[%s23425_s16 + $0x5d0] sm:$0xff] }
 0xf8b   : > { %13479 = vmatprep.mubr.msk.f32.mxu0 %vm9574_vm1, %v13444_v61 }
 0xf8d   : > { %v9772_v24 = vpop.f32.mrb[218].mxu0 }
 0xf8e   : > { %10643 = vmatmul.mubr.f32.gmra.mrb[68].mxu0 %v13443_v27  ;;  %v9774_v42 = vpop.f32.mrb[219].mxu0  ;;  %v22496_v41 = vadd.f32 %v22221_v50, %v9772_v24  ;;  %v13447_v50 = vld [vmem:[%s23425_s16 + $0x5e0] sm:$0xff] }
 0xf8f   : > { %13480 = vmatprep.mubr.msk.f32.mxu0 %vm9574_vm1, %v13446_v4 }
 0xf91   : > { %v9777_v31 = vpop.f32.mrb[220].mxu0 }
 0xf92   : > { %10648 = vmatmul.mubr.f32.gmra.mrb[70].mxu0 %v13445_v62  ;;  %v9779_v35 = vpop.f32.mrb[221].mxu0  ;;  %v22506_v32 = vadd.f32 %v22230_v22, %v9777_v31  ;;  %v13449_v22 = vld [vmem:[%s23425_s16 + $0x5f0] sm:$0xff] }
 0xf93   : > { %13481 = vmatprep.mubr.msk.f32.mxu0 %vm9574_vm1, %v13448_v29 }
 0xf95   : > { %v9782_v38 = vpop.f32.mrb[222].mxu0 }
 0xf96   : > { %10653 = vmatmul.mubr.f32.gmra.mrb[72].mxu0 %v13447_v50  ;;  %v9784_v33 = vpop.f32.mrb[223].mxu0  ;;  %v22516_v54 = vadd.f32 %v22239_v57, %v9782_v38 }
 0xf97   : > { %13482 = vmatprep.mubr.msk.f32.mxu0 %vm9574_vm1, %v13450_v43 }
 0xf99   : > { %v9787_v37 = vpop.f32.mrb[224].mxu0 }
 0xf9a   : > { %10658 = vmatmul.mubr.f32.gmra.mrb[74].mxu0 %v13449_v22  ;;  %v9789_v19 = vpop.f32.mrb[225].mxu0  ;;  %v22523_v5 = vadd.f32 %v22248_v10, %v9787_v37 }
 0xf9d   : > { %v9792_v14 = vpop.f32.mrb[226].mxu0 }
 0xf9e   : > { %v9794_v3 = vpop.f32.mrb[227].mxu0  ;;  %v22526_v0 = vadd.f32 %v22257_v9, %v9792_v14 }
 0xf9f   : > { %v22567_v3 = vpop.permute.xlu1 %10809 }
 0xfa1   : > { %v9797_v18 = vpop.f32.mrb[228].mxu0 }
 0xfa2   : > { %v9799_v57 = vpop.f32.mrb[229].mxu0  ;;  %v22529_v45 = vadd.f32 %v22266_v59, %v9797_v18  ;;  %v22569_v18 = vpop.permute.xlu0 %10814 }
 0xfa5   : > { %v9802_v26 = vpop.f32.mrb[230].mxu0 }
 0xfa6   : > { %v9804_v40 = vpop.f32.mrb[231].mxu0  ;;  %v22532_v60 = vadd.f32 %v22275_v7, %v9802_v26 }
 0xfa9   : > { %v9807_v15 = vpop.f32.mrb[232].mxu0 }
 0xfaa   : > { %v9809_v11 = vpop.f32.mrb[233].mxu0  ;;  %v22535_v10 = vadd.f32 %v22284_v1, %v9807_v15 }
 0xfab   : > { %v10735_v11 = vpop.permute.xlu0 %10734 }
 0xfad   : > { %v9812_v55 = vpop.f32.mrb[234].mxu0 }
 0xfae   : > { %v9814_v61 = vpop.f32.mrb[235].mxu0  ;;  %v22538_v9 = vadd.f32 %v22293_v30, %v9812_v55 }
 0xfb1   : > { %v9817_v47 = vpop.f32.mrb[236].mxu0 }
 0xfb2   : > { %v9819_v25 = vpop.f32.mrb[237].mxu0  ;;  %v22541_v59 = vadd.f32 %v22302_v36, %v9817_v47 }
 0xfb3   : > { %v22582_v25 = vpop.permute.xlu0 %10824 }
 0xfb5   : > { %v9822_v27 = vpop.f32.mrb[238].mxu0 }
 0xfb6   : > { %v9824_v4 = vpop.f32.mrb[239].mxu0  ;;  %v22544_v7 = vadd.f32 %v22311_v53, %v9822_v27 }
 0xfb9   : > { %v9827_v24 = vpop.f32.mrb[240].mxu0 }
 0xfba   : > { %v9829_v42 = vpop.f32.mrb[241].mxu0  ;;  %v22547_v1 = vadd.f32 %v22320_v2, %v9827_v24 }
 0xfbd   : > { %v9832_v62 = vpop.f32.mrb[242].mxu0 }
 0xfbe   : > { %v9834_v29 = vpop.f32.mrb[243].mxu0  ;;  %v22550_v30 = vadd.f32 %v22329_v49, %v9832_v62 }
 0xfbf   : > { %v10745_v29 = vpop.permute.xlu0 %10744 }
 0xfc1   : > { %v9837_v31 = vpop.f32.mrb[244].mxu0 }
 0xfc2   : > { %v9839_v35 = vpop.f32.mrb[245].mxu0  ;;  %v22553_v36 = vadd.f32 %v22338_v21, %v9837_v31 }
 0xfc5   : > { %v9842_v50 = vpop.f32.mrb[246].mxu0 }
 0xfc6   : > { %v9844_v43 = vpop.f32.mrb[247].mxu0  ;;  %v22556_v53 = vadd.f32 %v22347_v46, %v9842_v50 }
 0xfc7   : > { %v22595_v43 = vpop.permute.xlu0 %10834 }
 0xfc9   : > { %v9847_v38 = vpop.f32.mrb[248].mxu0 }
 0xfca   : > { %v9849_v33 = vpop.f32.mrb[249].mxu0  ;;  %v22559_v2 = vadd.f32 %v22356_v51, %v9847_v38  ;;  %v10730_v51 = vpop.permute.xlu1 %10729 }
 0xfcd   : > { %v9852_v22 = vpop.f32.mrb[250].mxu0 }
 0xfce   : > { %v9854_v37 = vpop.f32.mrb[251].mxu0  ;;  %v22562_v49 = vadd.f32 %v22365_v23, %v9852_v22  ;;  %v22580_v47 = vpop.permute.xlu1 %10819 }
 0xfd1   : > { %v9857_v19 = vpop.f32.mrb[252].mxu0 }
 0xfd2   : > { %v9859_v14 = vpop.f32.mrb[253].mxu0  ;;  %v22565_v21 = vadd.f32 %v22374_v39, %v9857_v19  ;;  %v10740_v24 = vpop.permute.xlu1 %10739 }
 0xfd3   : > { %v10755_v14 = vpop.permute.xlu0 %10754 }
 0xfd5   : > { %v9862_v46 = vpop.f32.mrb[254].mxu0 }
 0xfd6   : > { %v9864_v57 = vpop.f32.mrb[255].mxu0  ;;  %v22572_v26 = vadd.f32 %v22383_v44, %v9862_v46  ;;  %v22593_v50 = vpop.permute.xlu1 %10829 }
 0xfd9   : > { %v9867_v40 = vpop.f32.mrb[0].mxu0 }
 0xfda   : > { %v9869_v15 = vpop.f32.mrb[1].mxu0  ;;  %v22575_v23 = vadd.f32 %v22392_v34, %v9867_v40  ;;  %v10750_v22 = vpop.permute.xlu1 %10749 }
 0xfdd   : > { %v9872_v55 = vpop.f32.mrb[2].mxu0 }
 0xfde   : > { %v9874_v61 = vpop.f32.mrb[3].mxu0  ;;  %v22578_v39 = vadd.f32 %v22401_v58, %v9872_v55  ;;  %v22602_v15 = vpop.permute.xlu1 %10839  ;;  %v10952_v55 = vld [vmem:[%s23427_s18 + $0x8] sm:$0xff] }
 0xfdf   : > { %11047 = vmatprep.mubr.f32.mxu1 %v10952_v55 }
 0xfe1   : > { %v9877_v27 = vpop.f32.mrb[4].mxu0 }
 0xfe2   : > { %v9879_v4 = vpop.f32.mrb[5].mxu0  ;;  %v22585_v44 = vadd.f32 %v22410_v28, %v9877_v27 }
 0xfe5   : > { %v9882_v42 = vpop.f32.mrb[6].mxu0 }
 0xfe6   : > { %v9884_v62 = vpop.f32.mrb[7].mxu0  ;;  %v22588_v34 = vadd.f32 %v22419_v16, %v9882_v42 }
 0xfe9   : > { %v9887_v31 = vpop.f32.mrb[8].mxu0 }
 0xfea   : > { %v9889_v35 = vpop.f32.mrb[9].mxu0  ;;  %v22591_v58 = vadd.f32 %v22431_v56, %v9887_v31 }
 0xfed   : > { %v9892_v38 = vpop.f32.mrb[10].mxu0 }
 0xfee   : > { %v9894_v33 = vpop.f32.mrb[11].mxu0  ;;  %v22598_v28 = vadd.f32 %v22443_v8, %v9892_v38  ;;  %v22607_v8 = vpop.permute.xlu0 %10844 }
 0xff1   : > { %v10504_v37 = vpop.f32.mrb[12].mxu0 }
 0xff2   : > { %v10663_v16 = vadd.f32 %v10504_v37, %v22422_v48  ;;  %v10506_v19 = vpop.f32.mrb[13].mxu0  ;;  %v10765_v37 = vpop.permute.xlu0 %10764 }
 0xff4   : > { %v10887_v57 = vadd.f32 %v10730_v51, %v10663_v16 }
 0xff5   : > { %v10509_v46 = vpop.f32.mrb[14].mxu0 }
 0xff6   : > { %v10664_v56 = vadd.f32 %v10509_v46, %v22434_v63  ;;  %v10511_v40 = vpop.f32.mrb[15].mxu0  ;;  %v10919_v4 = vmax.f32 %v10887_v57, 0.0  ;;  %v10760_v63 = vpop.permute.xlu1 %10759 }
 0xff7   : > { %v22618_v55 = vpop.permute.xlu0 %10854 }
 0xff8   : > { %v10888_v61 = vadd.f32 %v10735_v11, %v10664_v56 }
 0xff9   : > { %v10514_v27 = vpop.f32.mrb[16].mxu0 }
 0xffa   : > { %v10920_v48 = vmax.f32 %v10888_v61, 0.0  ;;  %v10665_v42 = vadd.f32 %v10514_v27, %v22446_v52  ;;  %v10516_v62 = vpop.f32.mrb[17].mxu0  ;;  %v22614_v40 = vpop.permute.xlu1 %10849 }
 0xffc   : > { %v22610_v51 = vpack.c.bf16 %v10920_v48, %v10919_v4  ;;  %v10889_v35 = vadd.f32 %v10740_v24, %v10665_v42 }
 0xffd   : > { %v10519_v31 = vpop.f32.mrb[18].mxu0 }
 0xffe   : > { %v10666_v38 = vadd.f32 %v10519_v31, %v22456_v12  ;;  %v10521_v33 = vpop.f32.mrb[19].mxu0  ;;  %v10921_v19 = vmax.f32 %v10889_v35, 0.0  ;;  %v10770_v48 = vpop.permute.xlu1 %10769 }
 0xfff   : > { %v10775_v35 = vpop.permute.xlu0 %10774 }
0x1000   : > { %v10890_v16 = vadd.f32 %v10745_v29, %v10666_v38 }
0x1001   : > { %v10524_v11 = vpop.f32.mrb[20].mxu0 }
0x1002   : > { %v10922_v46 = vmax.f32 %v10890_v16, 0.0  ;;  %v10667_v56 = vadd.f32 %v10524_v11, %v22466_v6  ;;  %v10526_v57 = vpop.f32.mrb[21].mxu0 }
0x1004   : > { %v22616_v52 = vpack.c.bf16 %v10922_v46, %v10921_v19  ;;  %v10891_v27 = vadd.f32 %v10750_v22, %v10667_v56  ;;  %v22625_v22 = vpop.permute.xlu1 %10859  ;;  %v22627_v46 = vpop.permute.xlu0 %10864 }
0x1005   : > { %v10529_v61 = vpop.f32.mrb[22].mxu0 }
0x1006   : > { %v10668_v24 = vadd.f32 %v10529_v61, %v22476_v20  ;;  %v10531_v12 = vpop.f32.mrb[23].mxu0  ;;  %v10923_v42 = vmax.f32 %v10891_v27, 0.0 }
0x1008   : > { %v10892_v4 = vadd.f32 %v10755_v14, %v10668_v24  ;;  %v10780_v24 = vpop.permute.xlu1 %10779 }
0x1009   : > { %v10534_v29 = vpop.f32.mrb[24].mxu0 }
0x100a   : > { %v10924_v62 = vmax.f32 %v10892_v4, 0.0  ;;  %v10669_v31 = vadd.f32 %v10534_v29, %v22486_v17  ;;  %v10536_v6 = vpop.f32.mrb[25].mxu0  ;;  %v10785_v29 = vpop.permute.xlu0 %10784 }
0x100c   : > { %v22622_v38 = vpack.c.bf16 %v10924_v62, %v10923_v42  ;;  %v10893_v16 = vadd.f32 %v10760_v63, %v10669_v31 }
0x100d   : > { %v10539_v33 = vpop.f32.mrb[26].mxu0 }
0x100e   : > { %v10670_v11 = vadd.f32 %v10539_v33, %v22496_v41  ;;  %v10541_v19 = vpop.f32.mrb[27].mxu0  ;;  %v10925_v56 = vmax.f32 %v10893_v16, 0.0  ;;  %v22634_v16 = vpop.permute.xlu1 %10869 }
0x1010   : > { %v10894_v20 = vadd.f32 %v10765_v37, %v10670_v11  ;;  %v22638_v11 = vpop.permute.xlu0 %10874 }
0x1011   : > { %v10544_v14 = vpop.f32.mrb[28].mxu0 }
0x1012   : > { %v10926_v57 = vmax.f32 %v10894_v20, 0.0  ;;  %v10671_v61 = vadd.f32 %v10544_v14, %v22506_v32  ;;  %v10546_v17 = vpop.f32.mrb[29].mxu0 }
0x1014   : > { %v22630_v27 = vpack.c.bf16 %v10926_v57, %v10925_v56  ;;  %v10895_v4 = vadd.f32 %v10770_v48, %v10671_v61  ;;  %v10790_v56 = vpop.permute.xlu1 %10789 }
0x1015   : > { %v10549_v12 = vpop.f32.mrb[30].mxu0 }
0x1016   : > { %v10672_v63 = vadd.f32 %v10549_v12, %v22516_v54  ;;  %v10551_v41 = vpop.f32.mrb[31].mxu0  ;;  %v10927_v37 = vmax.f32 %v10895_v4, 0.0  ;;  %v10795_v12 = vpop.permute.xlu0 %10794 }
0x1018   : > { %v10896_v42 = vadd.f32 %v10775_v35, %v10672_v63 }
0x1019   : > { %v10554_v62 = vpop.f32.mrb[32].mxu0 }
0x101a   : > { %v10928_v31 = vmax.f32 %v10896_v42, 0.0  ;;  %v10673_v6 = vadd.f32 %v10554_v62, %v22523_v5  ;;  %v10556_v33 = vpop.f32.mrb[33].mxu0 }
0x101c   : > { %v22636_v32 = vpack.c.bf16 %v10928_v31, %v10927_v37  ;;  %v10897_v20 = vadd.f32 %v10780_v24, %v10673_v6  ;;  %v22645_v24 = vpop.permute.xlu1 %10879  ;;  %v22647_v37 = vpop.permute.xlu0 %10884 }
0x101d   : > { %v10559_v19 = vpop.f32.mrb[34].mxu0 }
0x101e   : > { %v10674_v48 = vadd.f32 %v10559_v19, %v22526_v0  ;;  %v10561_v54 = vpop.f32.mrb[35].mxu0  ;;  %v10929_v57 = vmax.f32 %v10897_v20, 0.0 }
0x1020   : > { %v10898_v14 = vadd.f32 %v10785_v29, %v10674_v48  ;;  %v10800_v20 = vpop.permute.xlu1 %10799 }
0x1021   : > { %v10564_v35 = vpop.f32.mrb[36].mxu0 }
0x1022   : > { %v10930_v61 = vmax.f32 %v10898_v14, 0.0  ;;  %v10675_v17 = vadd.f32 %v10564_v35, %v22529_v45  ;;  %v10566_v5 = vpop.f32.mrb[37].mxu0 }
0x1024   : > { %v22642_v4 = vpack.c.bf16 %v10930_v61, %v10929_v57  ;;  %v10899_v41 = vadd.f32 %v10790_v56, %v10675_v17  ;;  %v10805_v56 = vpop.permute.xlu0 %10804 }
0x1025   : > { %v10569_v63 = vpop.f32.mrb[38].mxu0 }
0x1026   : > { %v10676_v42 = vadd.f32 %v10569_v63, %v22532_v60  ;;  %v10571_v62 = vpop.f32.mrb[39].mxu0  ;;  %v10931_v31 = vmax.f32 %v10899_v41, 0.0 }
0x1028   : > { %v10900_v0 = vadd.f32 %v10795_v12, %v10676_v42 }
0x1029   : > { %v10574_v29 = vpop.f32.mrb[40].mxu0 }
0x102a   : > { %v10932_v6 = vmax.f32 %v10900_v0, 0.0  ;;  %v10677_v33 = vadd.f32 %v10574_v29, %v22535_v10  ;;  %v10576_v45 = vpop.f32.mrb[41].mxu0 }
0x102c   : > { %v22650_v19 = vpack.c.bf16 %v10932_v6, %v10931_v31  ;;  %v10901_v54 = vadd.f32 %v10800_v20, %v10677_v33 }
0x102d   : > { %v10579_v48 = vpop.f32.mrb[42].mxu0 }
0x102e   : > { %v10678_v14 = vadd.f32 %v10579_v48, %v22538_v9  ;;  %v10581_v60 = vpop.f32.mrb[43].mxu0  ;;  %v10933_v61 = vmax.f32 %v10901_v54, 0.0 }
0x1030   : > { %v10902_v35 = vadd.f32 %v10805_v56, %v10678_v14 }
0x1031   : > { %v10584_v57 = vpop.f32.mrb[44].mxu0 }
0x1032   : > { %v10934_v17 = vmax.f32 %v10902_v35, 0.0  ;;  %v10679_v5 = vadd.f32 %v10584_v57, %v22541_v59  ;;  %v10586_v12 = vpop.f32.mrb[45].mxu0 }
0x1034   : > { %v22654_v63 = vpack.c.bf16 %v10934_v17, %v10933_v61  ;;  %v10903_v41 = vadd.f32 %v22567_v3, %v10679_v5 }
0x1035   : > { %v10589_v10 = vpop.f32.mrb[46].mxu0 }
0x1036   : > { %v10680_v42 = vadd.f32 %v10589_v10, %v22544_v7  ;;  %v10591_v62 = vpop.f32.mrb[47].mxu0  ;;  %v10935_v29 = vmax.f32 %v10903_v41, 0.0 }
0x1038   : > { %v10904_v0 = vadd.f32 %v22569_v18, %v10680_v42 }
0x1039   : > { %v10594_v9 = vpop.f32.mrb[48].mxu0 }
0x103a   : > { %v10936_v31 = vmax.f32 %v10904_v0, 0.0  ;;  %v10681_v6 = vadd.f32 %v10594_v9, %v22547_v1  ;;  %v10596_v33 = vpop.f32.mrb[49].mxu0 }
0x103c   : > { %v15452_v45 = vpack.c.bf16 %v10936_v31, %v10935_v29  ;;  %v10905_v59 = vadd.f32 %v22580_v47, %v10681_v6 }
0x103d   : > { %v10599_v20 = vpop.f32.mrb[50].mxu0 }
0x103e   : > { %v10682_v48 = vadd.f32 %v10599_v20, %v22550_v30  ;;  %15453 = vmatprep.subr.bf16.mxu1 %v15452_v45  ;;  %v10601_v54 = vpop.f32.mrb[51].mxu0  ;;  %v10937_v18 = vmax.f32 %v10905_v59, 0.0 }
0x103f   : > { %15455 = vmatpush3.bf16.msra.mxu1 %v22610_v51 }
0x1040   : > { %v10906_v7 = vadd.f32 %v22582_v25, %v10682_v48 }
0x1041   : > { %v10604_v3 = vpop.f32.mrb[52].mxu0 }
0x1042   : > { %v10938_v14 = vmax.f32 %v10906_v7, 0.0  ;;  %v10683_v60 = vadd.f32 %v10604_v3, %v22553_v36  ;;  %v10606_v56 = vpop.f32.mrb[53].mxu0 }
0x1044   : > { %v15456_v1 = vpack.c.bf16 %v10938_v14, %v10937_v18  ;;  %v10907_v57 = vadd.f32 %v22593_v50, %v10683_v60 }
0x1045   : > { %v10609_v35 = vpop.f32.mrb[54].mxu0 }
0x1046   : > { %v10684_v47 = vadd.f32 %v10609_v35, %v22556_v53  ;;  %15457 = vmatprep.subr.bf16.mxu1 %v15456_v1  ;;  %v10611_v30 = vpop.f32.mrb[55].mxu0  ;;  %v10939_v25 = vmax.f32 %v10907_v57, 0.0 }
0x1047   : > { %15459 = vmatpush3.bf16.msra.mxu1 %v22616_v52 }
0x1048   : > { %v10908_v51 = vadd.f32 %v22595_v43, %v10684_v47 }
0x1049   : > { %v10614_v61 = vpop.f32.mrb[56].mxu0 }
0x104a   : > { %v10940_v17 = vmax.f32 %v10908_v51, 0.0  ;;  %v10685_v5 = vadd.f32 %v10614_v61, %v22559_v2  ;;  %v10616_v12 = vpop.f32.mrb[57].mxu0 }
0x104b   : > { %v10962_v12 = vld [vmem:[%s23427_s18 + $0x58] sm:$0xff] }
0x104c   : > { %v15460_v36 = vpack.c.bf16 %v10940_v17, %v10939_v25  ;;  %v10909_v41 = vadd.f32 %v22602_v15, %v10685_v5  ;;  %v10957_v25 = vld [vmem:[%s23427_s18 + $0x30] sm:$0xff]  ;;  %v10960_v17 = vld [vmem:[%s23427_s18 + $0x48] sm:$0xff]  ;;  %v10959_v5 = vld [vmem:[%s23427_s18 + $0x40] sm:$0xff] }
0x104d   : > { %v10619_v10 = vpop.f32.mrb[58].mxu0 }
0x104e   : > { %v10686_v50 = vadd.f32 %v10619_v10, %v22562_v49  ;;  %15461 = vmatprep.subr.bf16.mxu1 %v15460_v36  ;;  %v10621_v53 = vpop.f32.mrb[59].mxu0  ;;  %v10941_v43 = vmax.f32 %v10909_v41, 0.0  ;;  %v10961_v36 = vld [vmem:[%s23427_s18 + $0x50] sm:$0xff]  ;;  %v10964_v10 = vld [vmem:[%s23427_s18 + $0x68] sm:$0xff]  ;;  %v10963_v41 = vld [vmem:[%s23427_s18 + $0x60] sm:$0xff] }
0x104f   : > { %15463 = vmatpush3.bf16.msra.mxu1 %v22622_v38  ;;  %v10965_v53 = vld [vmem:[%s23427_s18 + $0x70] sm:$0xff] }
0x1050   : > { %v10910_v52 = vadd.f32 %v22607_v8, %v10686_v50  ;;  %v10966_v50 = vld [vmem:[%s23427_s18 + $0x78] sm:$0xff] }
0x1051   : > { %v10624_v42 = vpop.f32.mrb[60].mxu0 }
0x1052   : > { %v10942_v62 = vmax.f32 %v10910_v52, 0.0  ;;  %v10687_v0 = vadd.f32 %v10624_v42, %v22565_v21  ;;  %v10626_v9 = vpop.f32.mrb[61].mxu0  ;;  %v10968_v52 = vld [vmem:[%s23427_s18 + $0x88] sm:$0xff]  ;;  %v10967_v42 = vld [vmem:[%s23427_s18 + $0x80] sm:$0xff] }
0x1053   : > { %v10971_v9 = vld [vmem:[%s23427_s18 + $0xa0] sm:$0xff] }
0x1054   : > { %v15464_v2 = vpack.c.bf16 %v10942_v62, %v10941_v43  ;;  %v10911_v31 = vadd.f32 %v22614_v40, %v10687_v0  ;;  %v10970_v43 = vld [vmem:[%s23427_s18 + $0x98] sm:$0xff]  ;;  %v10969_v62 = vld [vmem:[%s23427_s18 + $0x90] sm:$0xff]  ;;  %v10972_v0 = vld [vmem:[%s23427_s18 + $0xa8] sm:$0xff] }
0x1055   : > { %v10629_v29 = vpop.f32.mrb[62].mxu0 }
0x1056   : > { %v10688_v15 = vadd.f32 %v10629_v29, %v22572_v26  ;;  %15465 = vmatprep.subr.bf16.mxu1 %v15464_v2  ;;  %v10631_v49 = vpop.f32.mrb[63].mxu0  ;;  %v10943_v8 = vmax.f32 %v10911_v31, 0.0  ;;  %v10974_v2 = vld [vmem:[%s23427_s18 + $0xb8] sm:$0xff]  ;;  %v10973_v29 = vld [vmem:[%s23427_s18 + $0xb0] sm:$0xff]  ;;  %v10976_v31 = vld [vmem:[%s23427_s18 + $0xc8] sm:$0xff] }
0x1057   : > { %15467 = vmatpush3.bf16.msra.mxu1 %v22630_v27  ;;  %v10978_v49 = vld [vmem:[%s23427_s18 + $0xd8] sm:$0xff] }
0x1058   : > { %v10912_v38 = vadd.f32 %v22618_v55, %v10688_v15  ;;  %v10975_v15 = vld [vmem:[%s23427_s18 + $0xc0] sm:$0xff] }
0x1059   : > { %v10634_v6 = vpop.f32.mrb[64].mxu0 }
0x105a   : > { %v10944_v33 = vmax.f32 %v10912_v38, 0.0  ;;  %v10689_v45 = vadd.f32 %v10634_v6, %v22575_v23  ;;  %v10636_v20 = vpop.f32.mrb[65].mxu0  ;;  %v10977_v38 = vld [vmem:[%s23427_s18 + $0xd0] sm:$0xff]  ;;  %v10980_v6 = vld [vmem:[%s23427_s18 + $0xe8] sm:$0xff] }
0x105b   : > { %v11128_v20 = vld [vmem:[%s23428_s19] sm:$0xff] }
0x105c   : > { %v15468_v21 = vpack.c.bf16 %v10944_v33, %v10943_v8  ;;  %v10913_v48 = vadd.f32 %v22625_v22, %v10689_v45  ;;  %v10979_v8 = vld [vmem:[%s23427_s18 + $0xe0] sm:$0xff]  ;;  %v10982_v33 = vld [vmem:[%s23427_s18 + $0xf8] sm:$0xff]  ;;  %v10981_v45 = vld [vmem:[%s23427_s18 + $0xf0] sm:$0xff] }
0x105d   : > { %v10639_v59 = vpop.f32.mrb[66].mxu0 }
0x105e   : > { %v10690_v40 = vadd.f32 %v10639_v59, %v22578_v39  ;;  %15469 = vmatprep.subr.bf16.mxu1 %v15468_v21  ;;  %v10641_v26 = vpop.f32.mrb[67].mxu0  ;;  %v10945_v55 = vmax.f32 %v10913_v48, 0.0 }
0x105f   : > { %15471 = vmatpush3.bf16.msra.mxu1 %v22636_v32 }
0x1060   : > { %v10914_v27 = vadd.f32 %v22627_v46, %v10690_v40 }
0x1061   : > { %v10644_v54 = vpop.f32.mrb[68].mxu0 }
0x1062   : > { %v10946_v7 = vmax.f32 %v10914_v27, 0.0  ;;  %v10691_v3 = vadd.f32 %v10644_v54, %v22585_v44  ;;  %v10646_v18 = vpop.f32.mrb[69].mxu0 }
0x1064   : > { %v15472_v23 = vpack.c.bf16 %v10946_v7, %v10945_v55  ;;  %v10915_v60 = vadd.f32 %v22634_v16, %v10691_v3 }
0x1065   : > { %v10649_v14 = vpop.f32.mrb[70].mxu0 }
0x1066   : > { %v10692_v22 = vadd.f32 %v10649_v14, %v22588_v34  ;;  %15473 = vmatprep.subr.bf16.mxu1 %v15472_v23  ;;  %v10651_v39 = vpop.f32.mrb[71].mxu0  ;;  %v10947_v46 = vmax.f32 %v10915_v60, 0.0 }
0x1067   : > { %15475 = vmatpush3.bf16.msra.mxu1 %v22642_v4 }
0x1068   : > { %v10916_v32 = vadd.f32 %v22638_v11, %v10692_v22 }
0x1069   : > { %v10654_v56 = vpop.f32.mrb[72].mxu0 }
0x106a   : > { %v10948_v1 = vmax.f32 %v10916_v32, 0.0  ;;  %v10693_v35 = vadd.f32 %v10654_v56, %v22591_v58  ;;  %v10656_v57 = vpop.f32.mrb[73].mxu0  ;;  %v10951_v58 = vld [vmem:[%s23427_s18] sm:$0xff] }
0x106c   : > { %v15476_v44 = vpack.c.bf16 %v10948_v1, %v10947_v46  ;;  %v10917_v30 = vadd.f32 %v22645_v24, %v10693_v35  ;;  %v10953_v24 = vld [vmem:[%s23427_s18 + $0x10] sm:$0xff] }
0x106d   : > { %v10659_v47 = vpop.f32.mrb[74].mxu0 }
0x106e   : > { %v10694_v16 = vadd.f32 %v10659_v47, %v22598_v28  ;;  %15477 = vmatprep.subr.bf16.mxu1 %v15476_v44  ;;  %v10661_v34 = vpop.f32.mrb[75].mxu0  ;;  %v10949_v51 = vmax.f32 %v10917_v30, 0.0  ;;  %v10954_v28 = vld [vmem:[%s23427_s18 + $0x18] sm:$0xff] }
0x106f   : > { %15479 = vmatpush3.bf16.msra.mxu1 %v22650_v19  ;;  %v10955_v19 = vld [vmem:[%s23427_s18 + $0x20] sm:$0xff] }
0x1070   : > { %v10918_v4 = vadd.f32 %v22647_v37, %v10694_v16  ;;  %v10956_v37 = vld [vmem:[%s23427_s18 + $0x28] sm:$0xff] }
0x1072   : > { %v10950_v11 = vmax.f32 %v10918_v4, 0.0 }
0x1074   : > { %v15480_v61 = vpack.c.bf16 %v10950_v11, %v10949_v51 }
0x1076   : > { %15481 = vmatprep.subr.bf16.mxu1 %v15480_v61 }
0x1077   : > { %15483 = vmatpush3.bf16.msra.mxu1 %v22654_v63  ;;  %v10958_v63 = vld [vmem:[%s23427_s18 + $0x38] sm:$0xff] }
0x1078   : > { %14816 = vmatprep.subr.mxu1 %v11128_v20 }
0x107a   : > { %11048 = vmatmul.mubr.f32.vlgmr.msra.gmra.mrb[148].mxu1 %v10951_v58 }
0x107b   : > { %11052 = vmatprep.mubr.f32.mxu1 %v10954_v28  ;;  %14817 = vmatpush3.msra.mxu1 %v11128_v20 }
0x107e   : > { %11053 = vmatmul.mubr.f32.gmra.mrb[150].mxu1 %v10953_v24 }
0x107f   : > { %11057 = vmatprep.mubr.f32.mxu1 %v10956_v37 }
0x1082   : > { %11058 = vmatmul.mubr.f32.gmra.mrb[152].mxu1 %v10955_v19 }
0x1083   : > { %11062 = vmatprep.mubr.f32.mxu1 %v10958_v63 }
0x1086   : > { %11063 = vmatmul.mubr.f32.gmra.mrb[154].mxu1 %v10957_v25 }
0x1087   : > { %11067 = vmatprep.mubr.f32.mxu1 %v10960_v17 }
0x108a   : > { %11068 = vmatmul.mubr.f32.gmra.mrb[156].mxu1 %v10959_v5 }
0x108b   : > { %11072 = vmatprep.mubr.f32.mxu1 %v10962_v12 }
0x108e   : > { %11073 = vmatmul.mubr.f32.gmra.mrb[158].mxu1 %v10961_v36 }
0x108f   : > { %11077 = vmatprep.mubr.f32.mxu1 %v10964_v10 }
0x1092   : > { %11078 = vmatmul.mubr.f32.gmra.mrb[160].mxu1 %v10963_v41 }
0x1093   : > { %11082 = vmatprep.mubr.f32.mxu1 %v10966_v50 }
0x1096   : > { %11083 = vmatmul.mubr.f32.gmra.mrb[162].mxu1 %v10965_v53 }
0x1097   : > { %11087 = vmatprep.mubr.f32.mxu1 %v10968_v52 }
0x109a   : > { %11088 = vmatmul.mubr.f32.gmra.mrb[164].mxu1 %v10967_v42 }
0x109b   : > { %11092 = vmatprep.mubr.f32.mxu1 %v10970_v43 }
0x109e   : > { %11093 = vmatmul.mubr.f32.gmra.mrb[166].mxu1 %v10969_v62 }
0x109f   : > { %11097 = vmatprep.mubr.f32.mxu1 %v10972_v0 }
0x10a2   : > { %11098 = vmatmul.mubr.f32.gmra.mrb[168].mxu1 %v10971_v9 }
0x10a3   : > { %11102 = vmatprep.mubr.f32.mxu1 %v10974_v2 }
0x10a6   : > { %11103 = vmatmul.mubr.f32.gmra.mrb[170].mxu1 %v10973_v29 }
0x10a7   : > { %11107 = vmatprep.mubr.f32.mxu1 %v10976_v31 }
0x10aa   : > { %11108 = vmatmul.mubr.f32.gmra.mrb[172].mxu1 %v10975_v15 }
0x10ab   : > { %11112 = vmatprep.mubr.f32.mxu1 %v10978_v49 }
0x10ae   : > { %11113 = vmatmul.mubr.f32.gmra.mrb[174].mxu1 %v10977_v38 }
0x10af   : > { %11117 = vmatprep.mubr.f32.mxu1 %v10980_v6 }
0x10b2   : > { %11118 = vmatmul.mubr.f32.gmra.mrb[176].mxu1 %v10979_v8 }
0x10b3   : > { %11122 = vmatprep.mubr.f32.mxu1 %v10982_v33 }
0x10b6   : > { %11123 = vmatmul.mubr.f32.gmra.mrb[178].mxu1 %v10981_v45 }
0x114d   : > { %v13900_v21 = vpop.f32.mrb[148].mxu1 }
0x114e   : > { %v13901_v59 = vpop.f32.mrb[149].mxu1 }
0x114f   : > { %v13902_v48 = vadd.f32 %v13901_v59, %v13900_v21 }
0x1151   : > { %v13903_v40 = vpop.f32.mrb[150].mxu1  ;;  %14818 = vmatprep.mubr.msk.f32.mxu1 %vm11129_vm2, %v13902_v48 }
0x1152   : > { %v13904_v26 = vpop.f32.mrb[151].mxu1 }
0x1153   : > { %v13905_v27 = vadd.f32 %v13904_v26, %v13903_v40 }
0x1155   : > { %v13906_v54 = vpop.f32.mrb[152].mxu1  ;;  %14819 = vmatmul.mubr.msk.f32.vlgmr.msra.gmra.mrb[180].mxu1 %vm11129_vm2, %v13905_v27 }
0x1156   : > { %v13907_v55 = vpop.f32.mrb[153].mxu1 }
0x1157   : > { %v13908_v7 = vadd.f32 %v13907_v55, %v13906_v54 }
0x1159   : > { %v13909_v3 = vpop.f32.mrb[154].mxu1  ;;  %14821 = vmatprep.mubr.msk.f32.mxu1 %vm11129_vm2, %v13908_v7 }
0x115a   : > { %v13910_v18 = vpop.f32.mrb[155].mxu1 }
0x115b   : > { %v13911_v23 = vadd.f32 %v13910_v18, %v13909_v3 }
0x115d   : > { %v13912_v14 = vpop.f32.mrb[156].mxu1  ;;  %14822 = vmatmul.mubr.msk.f32.gmra.mrb[182].mxu1 %vm11129_vm2, %v13911_v23 }
0x115e   : > { %v13913_v60 = vpop.f32.mrb[157].mxu1 }
0x115f   : > { %v13914_v22 = vadd.f32 %v13913_v60, %v13912_v14  ;;  %v11484_v60 = vld [vmem:[%s23429_s20 + $0x8] sm:$0xff] }
0x1160   : > { %11707 = vmatprep.mubr.f32.mxu0 %v11484_v60 }
0x1161   : > { %v13915_v39 = vpop.f32.mrb[158].mxu1  ;;  %14824 = vmatprep.mubr.msk.f32.mxu1 %vm11129_vm2, %v13914_v22 }
0x1162   : > { %v13916_v32 = vpop.f32.mrb[159].mxu1 }
0x1163   : > { %v13917_v56 = vadd.f32 %v13916_v32, %v13915_v39 }
0x1165   : > { %v13918_v46 = vpop.f32.mrb[160].mxu1  ;;  %14825 = vmatmul.mubr.msk.f32.gmra.mrb[184].mxu1 %vm11129_vm2, %v13917_v56 }
0x1166   : > { %v13919_v1 = vpop.f32.mrb[161].mxu1 }
0x1167   : > { %v13920_v35 = vadd.f32 %v13919_v1, %v13918_v46 }
0x1169   : > { %v13921_v57 = vpop.f32.mrb[162].mxu1  ;;  %14827 = vmatprep.mubr.msk.f32.mxu1 %vm11129_vm2, %v13920_v35 }
0x116a   : > { %v13922_v44 = vpop.f32.mrb[163].mxu1 }
0x116b   : > { %v13923_v47 = vadd.f32 %v13922_v44, %v13921_v57 }
0x116d   : > { %v13924_v30 = vpop.f32.mrb[164].mxu1  ;;  %14828 = vmatmul.mubr.msk.f32.gmra.mrb[186].mxu1 %vm11129_vm2, %v13923_v47 }
0x116e   : > { %v13925_v16 = vpop.f32.mrb[165].mxu1 }
0x116f   : > { %v13926_v34 = vadd.f32 %v13925_v16, %v13924_v30 }
0x1171   : > { %v13927_v4 = vpop.f32.mrb[166].mxu1  ;;  %14830 = vmatprep.mubr.msk.f32.mxu1 %vm11129_vm2, %v13926_v34 }
0x1172   : > { %v13928_v51 = vpop.f32.mrb[167].mxu1 }
0x1173   : > { %v13929_v11 = vadd.f32 %v13928_v51, %v13927_v4 }
0x1175   : > { %v13930_v61 = vpop.f32.mrb[168].mxu1  ;;  %14831 = vmatmul.mubr.msk.f32.gmra.mrb[188].mxu1 %vm11129_vm2, %v13929_v11 }
0x1176   : > { %v13931_v58 = vpop.f32.mrb[169].mxu1 }
0x1177   : > { %v13932_v28 = vadd.f32 %v13931_v58, %v13930_v61 }
0x1179   : > { %v13933_v24 = vpop.f32.mrb[170].mxu1  ;;  %14833 = vmatprep.mubr.msk.f32.mxu1 %vm11129_vm2, %v13932_v28 }
0x117a   : > { %v13934_v37 = vpop.f32.mrb[171].mxu1 }
0x117b   : > { %v13935_v19 = vadd.f32 %v13934_v37, %v13933_v24 }
0x117d   : > { %v13936_v63 = vpop.f32.mrb[172].mxu1  ;;  %14834 = vmatmul.mubr.msk.f32.gmra.mrb[190].mxu1 %vm11129_vm2, %v13935_v19 }
0x117e   : > { %v13937_v25 = vpop.f32.mrb[173].mxu1 }
0x117f   : > { %v13938_v17 = vadd.f32 %v13937_v25, %v13936_v63 }
0x1181   : > { %v13939_v5 = vpop.f32.mrb[174].mxu1  ;;  %14836 = vmatprep.mubr.msk.f32.mxu1 %vm11129_vm2, %v13938_v17 }
0x1182   : > { %v13940_v12 = vpop.f32.mrb[175].mxu1 }
0x1183   : > { %v13941_v36 = vadd.f32 %v13940_v12, %v13939_v5 }
0x1185   : > { %v13942_v10 = vpop.f32.mrb[176].mxu1  ;;  %14837 = vmatmul.mubr.msk.f32.gmra.mrb[192].mxu1 %vm11129_vm2, %v13941_v36 }
0x1186   : > { %v13943_v41 = vpop.f32.mrb[177].mxu1 }
0x1187   : > { %v13944_v50 = vadd.f32 %v13943_v41, %v13942_v10 }
0x1189   : > { %v13945_v53 = vpop.f32.mrb[178].mxu1  ;;  %14839 = vmatprep.mubr.msk.f32.mxu1 %vm11129_vm2, %v13944_v50 }
0x118a   : > { %v13946_v52 = vpop.f32.mrb[179].mxu1 }
0x118b   : > { %v13947_v42 = vadd.f32 %v13946_v52, %v13945_v53 }
0x118d   : > { %14840 = vmatmul.mubr.msk.f32.gmra.mrb[194].mxu1 %vm11129_vm2, %v13947_v42 }
0x1228   : > { %v14820_v43 = vpop.f32.mrb[180].mxu1 }
0x1229   : > { %v11244_v62 = vpop.f32.mrb[181].mxu1 }
0x122a   : > { %v22807_v0 = vpack.i.bf16 %v14820_v43, %v11244_v62  ;;  %v15485_v9 = vpack.c.bf16 %v14820_v43, %v11244_v62 }
0x122c   : > { %16130 = vrot.lane.b32.xlu1 %v22807_v0, %s23517_s28  ;;  %15486 = vmatpush1.bf16.msra.mxu0 %v15485_v9 }
0x122d   : > { %15487 = vmatprep.subr.bf16.mxu0 %v23492_v13 }
0x1230   : > { %v14823_v2 = vpop.f32.mrb[182].mxu1 }
0x1231   : > { %v11254_v29 = vpop.f32.mrb[183].mxu1 }
0x1232   : > { %v16214_v31 = vpack.i.bf16 %v14823_v2, %v11254_v29  ;;  %v15488_v15 = vpack.c.bf16 %v14823_v2, %v11254_v29 }
0x1234   : > { %16135 = vrot.lane.b32.xlu0 %v16214_v31, %s23517_s28  ;;  %15489 = vmatpush1.bf16.msra.mxu0 %v15488_v15  ;;  %v11488_v15 = vld [vmem:[%s23429_s20 + $0x28] sm:$0xff] }
0x1235   : > { %15490 = vmatprep.subr.bf16.mxu0 %v23492_v13 }
0x1238   : > { %v14826_v49 = vpop.f32.mrb[184].mxu1 }
0x1239   : > { %v11264_v38 = vpop.f32.mrb[185].mxu1 }
0x123a   : > { %v16219_v6 = vpack.i.bf16 %v14826_v49, %v11264_v38  ;;  %v15491_v8 = vpack.c.bf16 %v14826_v49, %v11264_v38 }
0x123c   : > { %16140 = vrot.lane.b32.xlu1 %v16219_v6, %s23517_s28  ;;  %15492 = vmatpush1.bf16.msra.mxu0 %v15491_v8 }
0x123d   : > { %15493 = vmatprep.subr.bf16.mxu0 %v23492_v13 }
0x1240   : > { %v14829_v33 = vpop.f32.mrb[186].mxu1 }
0x1241   : > { %v11274_v45 = vpop.f32.mrb[187].mxu1 }
0x1242   : > { %v16224_v20 = vpack.i.bf16 %v14829_v33, %v11274_v45  ;;  %v15494_v21 = vpack.c.bf16 %v14829_v33, %v11274_v45  ;;  %v11487_v33 = vld [vmem:[%s23429_s20 + $0x20] sm:$0xff]  ;;  %v11492_v45 = vld [vmem:[%s23429_s20 + $0x48] sm:$0xff] }
0x1244   : > { %16145 = vrot.lane.b32.xlu0 %v16224_v20, %s23517_s28  ;;  %15495 = vmatpush1.bf16.msra.mxu0 %v15494_v21 }
0x1245   : > { %15496 = vmatprep.subr.bf16.mxu0 %v23492_v13 }
0x1248   : > { %v14832_v59 = vpop.f32.mrb[188].mxu1 }
0x1249   : > { %v11284_v48 = vpop.f32.mrb[189].mxu1 }
0x124a   : > { %v16229_v40 = vpack.i.bf16 %v14832_v59, %v11284_v48  ;;  %v15497_v26 = vpack.c.bf16 %v14832_v59, %v11284_v48 }
0x124c   : > { %16150 = vrot.lane.b32.xlu1 %v16229_v40, %s23517_s28  ;;  %15498 = vmatpush1.bf16.msra.mxu0 %v15497_v26  ;;  %v11496_v26 = vld [vmem:[%s23429_s20 + $0x68] sm:$0xff] }
0x124d   : > { %15499 = vmatprep.subr.bf16.mxu0 %v23492_v13 }
0x1250   : > { %v14835_v27 = vpop.f32.mrb[190].mxu1 }
0x1251   : > { %v11294_v54 = vpop.f32.mrb[191].mxu1 }
0x1252   : > { %v16234_v55 = vpack.i.bf16 %v14835_v27, %v11294_v54  ;;  %v15500_v7 = vpack.c.bf16 %v14835_v27, %v11294_v54 }
0x1254   : > { %16155 = vrot.lane.b32.xlu0 %v16234_v55, %s23517_s28  ;;  %15501 = vmatpush1.bf16.msra.mxu0 %v15500_v7 }
0x1255   : > { %15502 = vmatprep.subr.bf16.mxu0 %v23492_v13 }
0x1258   : > { %v14838_v3 = vpop.f32.mrb[192].mxu1 }
0x1259   : > { %v11304_v18 = vpop.f32.mrb[193].mxu1 }
0x125a   : > { %v16239_v23 = vpack.i.bf16 %v14838_v3, %v11304_v18  ;;  %v15503_v14 = vpack.c.bf16 %v14838_v3, %v11304_v18  ;;  %v11495_v3 = vld [vmem:[%s23429_s20 + $0x60] sm:$0xff]  ;;  %v11500_v18 = vld [vmem:[%s23429_s20 + $0x88] sm:$0xff] }
0x125c   : > { %16160 = vrot.lane.b32.xlu1 %v16239_v23, %s23517_s28  ;;  %15504 = vmatpush1.bf16.msra.mxu0 %v15503_v14 }
0x125d   : > { %15505 = vmatprep.subr.bf16.mxu0 %v23492_v13 }
0x1260   : > { %v14841_v22 = vpop.f32.mrb[194].mxu1  ;;  %16170 = vrot.lane.b32.xlu1 %v22807_v0, %s23521_s1 }
0x1261   : > { %v11314_v39 = vpop.f32.mrb[195].mxu1 }
0x1262   : > { %v16244_v32 = vpack.i.bf16 %v14841_v22, %v11314_v39  ;;  %v15506_v56 = vpack.c.bf16 %v14841_v22, %v11314_v39  ;;  %v11499_v39 = vld [vmem:[%s23429_s20 + $0x80] sm:$0xff] }
0x1264   : > { %16165 = vrot.lane.b32.xlu0 %v16244_v32, %s23517_s28  ;;  %16180 = vrot.lane.b32.xlu1 %v16219_v6, %s23521_s1 }
0x1265   : > { %15507 = vmatpush1.bf16.msra.mxu0 %v15506_v56 }
0x1266   : > { %15508 = vmatprep.subr.bf16.mxu0 %v23492_v13 }
0x1268   : > { %16175 = vrot.lane.b32.xlu0 %v16214_v31, %s23521_s1  ;;  %16190 = vrot.lane.b32.xlu1 %v16229_v40, %s23521_s1 }
0x126c   : > { %16185 = vrot.lane.b32.xlu0 %v16224_v20, %s23521_s1  ;;  %16200 = vrot.lane.b32.xlu1 %v16239_v23, %s23521_s1 }
0x1270   : > { %16195 = vrot.lane.b32.xlu0 %v16234_v55, %s23521_s1  ;;  %16210 = vrot.lane.b32.xlu1 %v22807_v0, %s16264_s8 }
0x1274   : > { %16205 = vrot.lane.b32.xlu0 %v16244_v32, %s23521_s1  ;;  %16220 = vrot.lane.b32.xlu1 %v16219_v6, %s16264_s8 }
0x1278   : > { %16215 = vrot.lane.b32.xlu0 %v16214_v31, %s16264_s8  ;;  %16230 = vrot.lane.b32.xlu1 %v16229_v40, %s16264_s8  ;;  %v11483_v31 = vld [vmem:[%s23429_s20] sm:$0xff] }
0x1279   : > { %v11491_v40 = vld [vmem:[%s23429_s20 + $0x40] sm:$0xff] }
0x127c   : > { %16225 = vrot.lane.b32.xlu0 %v16224_v20, %s16264_s8  ;;  %16240 = vrot.lane.b32.xlu1 %v16239_v23, %s16264_s8 }
0x1280   : > { %16235 = vrot.lane.b32.xlu0 %v16234_v55, %s16264_s8 }
0x1284   : > { %16245 = vrot.lane.b32.xlu0 %v16244_v32, %s16264_s8  ;;  %v11504_v32 = vld [vmem:[%s23429_s20 + $0xa8] sm:$0xff] }
0x129e   : > { %v16131_v46 = vpop.permute.xlu1 %16130 }
0x129f   : > { %v16133_v1 = vunpack.i.h.bf16 %v16131_v46  ;;  %v16132_v35 = vunpack.i.l.bf16 %v16131_v46 }
0x12a1   : > { %v15509_v57 = vpack.c.bf16 %v16133_v1, %v16132_v35 }
0x12a3   : > { %15510 = vmatpush1.bf16.msra.mxu0 %v15509_v57  ;;  %v11503_v57 = vld [vmem:[%s23429_s20 + $0xa0] sm:$0xff] }
0x12a4   : > { %15511 = vmatprep.subr.bf16.mxu0 %v23492_v13 }
0x12a6   : > { %v16136_v44 = vpop.permute.xlu0 %16135 }
0x12a7   : > { %v16138_v47 = vunpack.i.h.bf16 %v16136_v44  ;;  %v16137_v30 = vunpack.i.l.bf16 %v16136_v44  ;;  %v11508_v44 = vld [vmem:[%s23429_s20 + $0xc8] sm:$0xff] }
0x12a9   : > { %v15512_v16 = vpack.c.bf16 %v16138_v47, %v16137_v30 }
0x12ab   : > { %15513 = vmatpush1.bf16.msra.mxu0 %v15512_v16 }
0x12ac   : > { %15514 = vmatprep.subr.bf16.mxu0 %v23492_v13 }
0x12ae   : > { %v16141_v34 = vpop.permute.xlu1 %16140 }
0x12af   : > { %v16143_v4 = vunpack.i.h.bf16 %v16141_v34  ;;  %v16142_v51 = vunpack.i.l.bf16 %v16141_v34 }
0x12b1   : > { %v15515_v11 = vpack.c.bf16 %v16143_v4, %v16142_v51  ;;  %v11507_v4 = vld [vmem:[%s23429_s20 + $0xc0] sm:$0xff]  ;;  %v11512_v51 = vld [vmem:[%s23429_s20 + $0xe8] sm:$0xff] }
0x12b3   : > { %15516 = vmatpush1.bf16.msra.mxu0 %v15515_v11 }
0x12b4   : > { %15517 = vmatprep.subr.bf16.mxu0 %v23492_v13 }
0x12b6   : > { %v16146_v61 = vpop.permute.xlu0 %16145 }
0x12b7   : > { %v16148_v58 = vunpack.i.h.bf16 %v16146_v61  ;;  %v16147_v28 = vunpack.i.l.bf16 %v16146_v61 }
0x12b9   : > { %v15518_v24 = vpack.c.bf16 %v16148_v58, %v16147_v28 }
0x12bb   : > { %15519 = vmatpush1.bf16.msra.mxu0 %v15518_v24  ;;  %v11511_v24 = vld [vmem:[%s23429_s20 + $0xe0] sm:$0xff] }
0x12bc   : > { %15520 = vmatprep.subr.bf16.mxu0 %v23492_v13 }
0x12be   : > { %v16151_v37 = vpop.permute.xlu1 %16150 }
0x12bf   : > { %v16153_v19 = vunpack.i.h.bf16 %v16151_v37  ;;  %v16152_v63 = vunpack.i.l.bf16 %v16151_v37  ;;  %v11516_v37 = vld [vmem:[%s23429_s20 + $0x108] sm:$0xff] }
0x12c1   : > { %v15521_v25 = vpack.c.bf16 %v16153_v19, %v16152_v63 }
0x12c3   : > { %15522 = vmatpush1.bf16.msra.mxu0 %v15521_v25 }
0x12c4   : > { %15523 = vmatprep.subr.bf16.mxu0 %v23492_v13 }
0x12c6   : > { %v16156_v17 = vpop.permute.xlu0 %16155 }
0x12c7   : > { %v16158_v5 = vunpack.i.h.bf16 %v16156_v17  ;;  %v16157_v12 = vunpack.i.l.bf16 %v16156_v17 }
0x12c9   : > { %v15524_v36 = vpack.c.bf16 %v16158_v5, %v16157_v12  ;;  %v11515_v5 = vld [vmem:[%s23429_s20 + $0x100] sm:$0xff]  ;;  %v11520_v12 = vld [vmem:[%s23429_s20 + $0x128] sm:$0xff] }
0x12cb   : > { %15525 = vmatpush1.bf16.msra.mxu0 %v15524_v36 }
0x12cc   : > { %15526 = vmatprep.subr.bf16.mxu0 %v23492_v13 }
0x12ce   : > { %v16161_v10 = vpop.permute.xlu1 %16160 }
0x12cf   : > { %v16163_v41 = vunpack.i.h.bf16 %v16161_v10  ;;  %v16162_v50 = vunpack.i.l.bf16 %v16161_v10 }
0x12d1   : > { %v15527_v53 = vpack.c.bf16 %v16163_v41, %v16162_v50 }
0x12d2   : > { %v16171_v42 = vpop.permute.xlu1 %16170 }
0x12d3   : > { %15528 = vmatpush1.bf16.msra.mxu0 %v15527_v53  ;;  %v16173_v9 = vunpack.i.h.bf16 %v16171_v42  ;;  %v16172_v2 = vunpack.i.l.bf16 %v16171_v42  ;;  %v11519_v53 = vld [vmem:[%s23429_s20 + $0x120] sm:$0xff] }
0x12d4   : > { %15529 = vmatprep.subr.bf16.mxu0 %v23492_v13 }
0x12d5   : > { %v15533_v49 = vpack.c.bf16 %v16173_v9, %v16172_v2  ;;  %v11523_v9 = vld [vmem:[%s23429_s20 + $0x140] sm:$0xff]  ;;  %v11528_v2 = vld [vmem:[%s23429_s20 + $0x168] sm:$0xff] }
0x12d6   : > { %v16166_v52 = vpop.permute.xlu0 %16165  ;;  %v16181_v8 = vpop.permute.xlu1 %16180 }
0x12d7   : > { %v16168_v43 = vunpack.i.h.bf16 %v16166_v52  ;;  %v16167_v62 = vunpack.i.l.bf16 %v16166_v52  ;;  %v16183_v21 = vunpack.i.h.bf16 %v16181_v8  ;;  %v16182_v59 = vunpack.i.l.bf16 %v16181_v8  ;;  %v11524_v52 = vld [vmem:[%s23429_s20 + $0x148] sm:$0xff] }
0x12d9   : > { %v15530_v0 = vpack.c.bf16 %v16168_v43, %v16167_v62  ;;  %v15539_v27 = vpack.c.bf16 %v16183_v21, %v16182_v59  ;;  %v11531_v21 = vld [vmem:[%s23429_s20 + $0x180] sm:$0xff]  ;;  %v11536_v59 = vld [vmem:[%s23429_s20 + $0x1a8] sm:$0xff] }
0x12da   : > { %v16176_v29 = vpop.permute.xlu0 %16175  ;;  %v16191_v7 = vpop.permute.xlu1 %16190 }
0x12db   : > { %15531 = vmatpush1.bf16.msra.mxu0 %v15530_v0  ;;  %v16178_v38 = vunpack.i.h.bf16 %v16176_v29  ;;  %v16177_v6 = vunpack.i.l.bf16 %v16176_v29  ;;  %v16193_v14 = vunpack.i.h.bf16 %v16191_v7  ;;  %v16192_v60 = vunpack.i.l.bf16 %v16191_v7 }
0x12dc   : > { %15532 = vmatprep.subr.bf16.mxu0 %v23492_v13 }
0x12dd   : > { %v15536_v20 = vpack.c.bf16 %v16178_v38, %v16177_v6  ;;  %v15545_v56 = vpack.c.bf16 %v16193_v14, %v16192_v60  ;;  %v11527_v38 = vld [vmem:[%s23429_s20 + $0x160] sm:$0xff]  ;;  %v11532_v6 = vld [vmem:[%s23429_s20 + $0x188] sm:$0xff] }
0x12de   : > { %11708 = vmatmul.mubr.f32.vlgmr.msra.gmra.mrb[76].mxu0 %v11483_v31  ;;  %v16186_v48 = vpop.permute.xlu0 %16185  ;;  %v16201_v35 = vpop.permute.xlu1 %16200  ;;  %v11539_v14 = vld [vmem:[%s23429_s20 + $0x1c0] sm:$0xff]  ;;  %v11544_v60 = vld [vmem:[%s23429_s20 + $0x1e8] sm:$0xff] }
0x12df   : > { %11712 = vmatprep.mubr.f32.mxu0 %v11488_v15  ;;  %15534 = vmatpush1.bf16.msra.mxu0 %v15533_v49  ;;  %v16188_v54 = vunpack.i.h.bf16 %v16186_v48  ;;  %v16187_v55 = vunpack.i.l.bf16 %v16186_v48  ;;  %v16203_v30 = vunpack.i.h.bf16 %v16201_v35  ;;  %v16202_v16 = vunpack.i.l.bf16 %v16201_v35  ;;  %v11547_v35 = vld [vmem:[%s23429_s20 + $0x200] sm:$0xff] }
0x12e0   : > { %15535 = vmatprep.subr.bf16.mxu0 %v23492_v13 }
0x12e1   : > { %v15542_v23 = vpack.c.bf16 %v16188_v54, %v16187_v55  ;;  %v15551_v11 = vpack.c.bf16 %v16203_v30, %v16202_v16  ;;  %v11535_v54 = vld [vmem:[%s23429_s20 + $0x1a0] sm:$0xff]  ;;  %v11540_v55 = vld [vmem:[%s23429_s20 + $0x1c8] sm:$0xff] }
0x12e2   : > { %11713 = vmatmul.mubr.f32.gmra.mrb[78].mxu0 %v11487_v33  ;;  %v16196_v22 = vpop.permute.xlu0 %16195  ;;  %v16211_v28 = vpop.permute.xlu1 %16210  ;;  %v11560_v30 = vld [vmem:[%s23429_s20 + $0x268] sm:$0xff]  ;;  %v11559_v16 = vld [vmem:[%s23429_s20 + $0x260] sm:$0xff] }
0x12e3   : > { %11717 = vmatprep.mubr.f32.mxu0 %v11492_v45  ;;  %15537 = vmatpush1.bf16.msra.mxu0 %v15536_v20  ;;  %v16198_v46 = vunpack.i.h.bf16 %v16196_v22  ;;  %v16197_v1 = vunpack.i.l.bf16 %v16196_v22  ;;  %v16213_v63 = vunpack.i.h.bf16 %v16211_v28  ;;  %v16212_v25 = vunpack.i.l.bf16 %v16211_v28  ;;  %v11576_v28 = vld [vmem:[%s23429_s20 + $0x2e8] sm:$0xff] }
0x12e4   : > { %15538 = vmatprep.subr.bf16.mxu0 %v23492_v13 }
0x12e5   : > { %v15548_v47 = vpack.c.bf16 %v16198_v46, %v16197_v1  ;;  %v15557_v36 = vpack.c.bf16 %v16213_v63, %v16212_v25  ;;  %v11548_v46 = vld [vmem:[%s23429_s20 + $0x208] sm:$0xff]  ;;  %v11583_v25 = vld [vmem:[%s23429_s20 + $0x320] sm:$0xff] }
0x12e6   : > { %11718 = vmatmul.mubr.f32.gmra.mrb[80].mxu0 %v11491_v40  ;;  %v16206_v34 = vpop.permute.xlu0 %16205  ;;  %v16221_v50 = vpop.permute.xlu1 %16220  ;;  %v11584_v63 = vld [vmem:[%s23429_s20 + $0x328] sm:$0xff] }
0x12e7   : > { %11722 = vmatprep.mubr.f32.mxu0 %v11496_v26  ;;  %15540 = vmatpush1.bf16.msra.mxu0 %v15539_v27  ;;  %v16208_v61 = vunpack.i.h.bf16 %v16206_v34  ;;  %v16207_v58 = vunpack.i.l.bf16 %v16206_v34  ;;  %v16223_v43 = vunpack.i.h.bf16 %v16221_v50  ;;  %v16222_v62 = vunpack.i.l.bf16 %v16221_v50  ;;  %v11564_v34 = vld [vmem:[%s23429_s20 + $0x288] sm:$0xff] }
0x12e8   : > { %15541 = vmatprep.subr.bf16.mxu0 %v23492_v13  ;;  %v11600_v50 = vld [vmem:[%s23429_s20 + $0x3a8] sm:$0xff] }
0x12e9   : > { %v15554_v19 = vpack.c.bf16 %v16208_v61, %v16207_v58  ;;  %v15563_v29 = vpack.c.bf16 %v16223_v43, %v16222_v62  ;;  %v11572_v61 = vld [vmem:[%s23429_s20 + $0x2c8] sm:$0xff]  ;;  %v11571_v58 = vld [vmem:[%s23429_s20 + $0x2c0] sm:$0xff] }
0x12ea   : > { %11723 = vmatmul.mubr.f32.gmra.mrb[82].mxu0 %v11495_v3  ;;  %v16216_v17 = vpop.permute.xlu0 %16215  ;;  %v16231_v49 = vpop.permute.xlu1 %16230  ;;  %v11608_v43 = vld [vmem:[%s23429_s20 + $0x3e8] sm:$0xff]  ;;  %v11607_v62 = vld [vmem:[%s23429_s20 + $0x3e0] sm:$0xff] }
0x12eb   : > { %11727 = vmatprep.mubr.f32.mxu0 %v11500_v18  ;;  %15543 = vmatpush1.bf16.msra.mxu0 %v15542_v23  ;;  %v16218_v10 = vunpack.i.h.bf16 %v16216_v17  ;;  %v16217_v41 = vunpack.i.l.bf16 %v16216_v17  ;;  %v16233_v33 = vunpack.i.h.bf16 %v16231_v49  ;;  %v16232_v45 = vunpack.i.l.bf16 %v16231_v49  ;;  %v11588_v17 = vld [vmem:[%s23429_s20 + $0x348] sm:$0xff]  ;;  %v11498_v49 = vld [vmem:[%s23429_s20 + $0x78] sm:$0xff] }
0x12ec   : > { %15544 = vmatprep.subr.bf16.mxu0 %v23492_v13 }
0x12ed   : > { %v15560_v42 = vpack.c.bf16 %v16218_v10, %v16217_v41  ;;  %v15569_v48 = vpack.c.bf16 %v16233_v33, %v16232_v45  ;;  %v11596_v10 = vld [vmem:[%s23429_s20 + $0x388] sm:$0xff]  ;;  %v11595_v41 = vld [vmem:[%s23429_s20 + $0x380] sm:$0xff]  ;;  %v11506_v33 = vld [vmem:[%s23429_s20 + $0xb8] sm:$0xff] }
0x12ee   : > { %11728 = vmatmul.mubr.f32.gmra.mrb[84].mxu0 %v11499_v39  ;;  %v16226_v0 = vpop.permute.xlu0 %16225  ;;  %v16241_v27 = vpop.permute.xlu1 %16240  ;;  %v11505_v45 = vld [vmem:[%s23429_s20 + $0xb0] sm:$0xff] }
0x12ef   : > { %11732 = vmatprep.mubr.f32.mxu0 %v11504_v32  ;;  %15546 = vmatpush1.bf16.msra.mxu0 %v15545_v56  ;;  %v16228_v31 = vunpack.i.h.bf16 %v16226_v0  ;;  %v16227_v15 = vunpack.i.l.bf16 %v16226_v0  ;;  %v16243_v3 = vunpack.i.h.bf16 %v16241_v27  ;;  %v16242_v18 = vunpack.i.l.bf16 %v16241_v27  ;;  %v11543_v56 = vld [vmem:[%s23429_s20 + $0x1e0] sm:$0xff]  ;;  %v11486_v0 = vld [vmem:[%s23429_s20 + $0x18] sm:$0xff] }
0x12f0   : > { %15547 = vmatprep.subr.bf16.mxu0 %v23492_v13  ;;  %v11522_v27 = vld [vmem:[%s23429_s20 + $0x138] sm:$0xff] }
0x12f1   : > { %v15566_v8 = vpack.c.bf16 %v16228_v31, %v16227_v15  ;;  %v15575_v22 = vpack.c.bf16 %v16243_v3, %v16242_v18  ;;  %v11494_v31 = vld [vmem:[%s23429_s20 + $0x58] sm:$0xff]  ;;  %v11493_v15 = vld [vmem:[%s23429_s20 + $0x50] sm:$0xff] }
0x12f2   : > { %11733 = vmatmul.mubr.f32.gmra.mrb[86].mxu0 %v11503_v57  ;;  %v16236_v20 = vpop.permute.xlu0 %16235  ;;  %v11552_v57 = vld [vmem:[%s23429_s20 + $0x228] sm:$0xff]  ;;  %v11530_v3 = vld [vmem:[%s23429_s20 + $0x178] sm:$0xff]  ;;  %v11529_v18 = vld [vmem:[%s23429_s20 + $0x170] sm:$0xff] }
0x12f3   : > { %11737 = vmatprep.mubr.f32.mxu0 %v11508_v44  ;;  %15549 = vmatpush1.bf16.msra.mxu0 %v15548_v47  ;;  %v16238_v40 = vunpack.i.h.bf16 %v16236_v20  ;;  %v16237_v26 = vunpack.i.l.bf16 %v16236_v20  ;;  %v11551_v44 = vld [vmem:[%s23429_s20 + $0x220] sm:$0xff]  ;;  %v11510_v20 = vld [vmem:[%s23429_s20 + $0xd8] sm:$0xff] }
0x12f4   : > { %15550 = vmatprep.subr.bf16.mxu0 %v23492_v13  ;;  %v11555_v47 = vld [vmem:[%s23429_s20 + $0x240] sm:$0xff] }
0x12f5   : > { %v15572_v7 = vpack.c.bf16 %v16238_v40, %v16237_v26  ;;  %v11518_v40 = vld [vmem:[%s23429_s20 + $0x118] sm:$0xff]  ;;  %v11517_v26 = vld [vmem:[%s23429_s20 + $0x110] sm:$0xff] }
0x12f6   : > { %11738 = vmatmul.mubr.f32.gmra.mrb[88].mxu0 %v11507_v4  ;;  %v16246_v23 = vpop.permute.xlu0 %16245  ;;  %v11563_v4 = vld [vmem:[%s23429_s20 + $0x280] sm:$0xff] }
0x12f7   : > { %11742 = vmatprep.mubr.f32.mxu0 %v11512_v51  ;;  %15552 = vmatpush1.bf16.msra.mxu0 %v15551_v11  ;;  %v16248_v39 = vunpack.i.h.bf16 %v16246_v23  ;;  %v16247_v32 = vunpack.i.l.bf16 %v16246_v23  ;;  %v11568_v51 = vld [vmem:[%s23429_s20 + $0x2a8] sm:$0xff]  ;;  %v11567_v11 = vld [vmem:[%s23429_s20 + $0x2a0] sm:$0xff]  ;;  %v11534_v23 = vld [vmem:[%s23429_s20 + $0x198] sm:$0xff] }
0x12f8   : > { %15553 = vmatprep.subr.bf16.mxu0 %v23492_v13 }
0x12f9   : > { %v15578_v1 = vpack.c.bf16 %v16248_v39, %v16247_v32  ;;  %v11542_v39 = vld [vmem:[%s23429_s20 + $0x1d8] sm:$0xff]  ;;  %v11541_v32 = vld [vmem:[%s23429_s20 + $0x1d0] sm:$0xff] }
0x12fa   : > { %11743 = vmatmul.mubr.f32.gmra.mrb[90].mxu0 %v11511_v24  ;;  %v11575_v24 = vld [vmem:[%s23429_s20 + $0x2e0] sm:$0xff] }
0x12fb   : > { %11747 = vmatprep.mubr.f32.mxu0 %v11516_v37  ;;  %15555 = vmatpush1.bf16.msra.mxu0 %v15554_v19  ;;  %v11580_v37 = vld [vmem:[%s23429_s20 + $0x308] sm:$0xff]  ;;  %v11579_v19 = vld [vmem:[%s23429_s20 + $0x300] sm:$0xff] }
0x12fc   : > { %15556 = vmatprep.subr.bf16.mxu0 %v23492_v13 }
0x12fe   : > { %11748 = vmatmul.mubr.f32.gmra.mrb[92].mxu0 %v11515_v5  ;;  %v11587_v5 = vld [vmem:[%s23429_s20 + $0x340] sm:$0xff] }
0x12ff   : > { %11752 = vmatprep.mubr.f32.mxu0 %v11520_v12  ;;  %15558 = vmatpush1.bf16.msra.mxu0 %v15557_v36  ;;  %v11592_v12 = vld [vmem:[%s23429_s20 + $0x368] sm:$0xff]  ;;  %v11591_v36 = vld [vmem:[%s23429_s20 + $0x360] sm:$0xff] }
0x1300   : > { %15559 = vmatprep.subr.bf16.mxu0 %v23492_v13 }
0x1302   : > { %11753 = vmatmul.mubr.f32.gmra.mrb[94].mxu0 %v11519_v53  ;;  %v11599_v53 = vld [vmem:[%s23429_s20 + $0x3a0] sm:$0xff] }
0x1303   : > { %11757 = vmatprep.mubr.f32.mxu0 %v11524_v52  ;;  %15561 = vmatpush1.bf16.msra.mxu0 %v15560_v42  ;;  %v11604_v52 = vld [vmem:[%s23429_s20 + $0x3c8] sm:$0xff]  ;;  %v11603_v42 = vld [vmem:[%s23429_s20 + $0x3c0] sm:$0xff] }
0x1304   : > { %15562 = vmatprep.subr.bf16.mxu0 %v23492_v13 }
0x1306   : > { %11758 = vmatmul.mubr.f32.gmra.mrb[96].mxu0 %v11523_v9  ;;  %v11485_v9 = vld [vmem:[%s23429_s20 + $0x10] sm:$0xff] }
0x1307   : > { %11762 = vmatprep.mubr.f32.mxu0 %v11528_v2  ;;  %15564 = vmatpush1.bf16.msra.mxu0 %v15563_v29  ;;  %v11490_v2 = vld [vmem:[%s23429_s20 + $0x38] sm:$0xff]  ;;  %v11489_v29 = vld [vmem:[%s23429_s20 + $0x30] sm:$0xff] }
0x1308   : > { %15565 = vmatprep.subr.bf16.mxu0 %v23492_v13 }
0x130a   : > { %11763 = vmatmul.mubr.f32.gmra.mrb[98].mxu0 %v11527_v38  ;;  %v11497_v38 = vld [vmem:[%s23429_s20 + $0x70] sm:$0xff] }
0x130b   : > { %11767 = vmatprep.mubr.f32.mxu0 %v11532_v6  ;;  %15567 = vmatpush1.bf16.msra.mxu0 %v15566_v8  ;;  %v11502_v6 = vld [vmem:[%s23429_s20 + $0x98] sm:$0xff]  ;;  %v11501_v8 = vld [vmem:[%s23429_s20 + $0x90] sm:$0xff] }
0x130c   : > { %15568 = vmatprep.subr.bf16.mxu0 %v23492_v13 }
0x130e   : > { %11768 = vmatmul.mubr.f32.gmra.mrb[100].mxu0 %v11531_v21  ;;  %v11509_v21 = vld [vmem:[%s23429_s20 + $0xd0] sm:$0xff] }
0x130f   : > { %11772 = vmatprep.mubr.f32.mxu0 %v11536_v59  ;;  %15570 = vmatpush1.bf16.msra.mxu0 %v15569_v48  ;;  %v11514_v59 = vld [vmem:[%s23429_s20 + $0xf8] sm:$0xff]  ;;  %v11513_v48 = vld [vmem:[%s23429_s20 + $0xf0] sm:$0xff] }
0x1310   : > { %15571 = vmatprep.subr.bf16.mxu0 %v23492_v13 }
0x1312   : > { %11773 = vmatmul.mubr.f32.gmra.mrb[102].mxu0 %v11535_v54  ;;  %v11521_v54 = vld [vmem:[%s23429_s20 + $0x130] sm:$0xff] }
0x1313   : > { %11777 = vmatprep.mubr.f32.mxu0 %v11540_v55  ;;  %15573 = vmatpush1.bf16.msra.mxu0 %v15572_v7  ;;  %v11526_v55 = vld [vmem:[%s23429_s20 + $0x158] sm:$0xff]  ;;  %v11525_v7 = vld [vmem:[%s23429_s20 + $0x150] sm:$0xff] }
0x1314   : > { %15574 = vmatprep.subr.bf16.mxu0 %v23492_v13 }
0x1316   : > { %11778 = vmatmul.mubr.f32.gmra.mrb[104].mxu0 %v11539_v14  ;;  %v11533_v14 = vld [vmem:[%s23429_s20 + $0x190] sm:$0xff] }
0x1317   : > { %11782 = vmatprep.mubr.f32.mxu0 %v11544_v60  ;;  %15576 = vmatpush1.bf16.msra.mxu0 %v15575_v22  ;;  %v11538_v60 = vld [vmem:[%s23429_s20 + $0x1b8] sm:$0xff]  ;;  %v11537_v22 = vld [vmem:[%s23429_s20 + $0x1b0] sm:$0xff] }
0x1318   : > { %15577 = vmatprep.subr.bf16.mxu0 %v23492_v13  ;;  %v11556_v13 = vld [vmem:[%s23429_s20 + $0x248] sm:$0xff] }
0x131a   : > { %11783 = vmatmul.mubr.f32.gmra.mrb[106].mxu0 %v11543_v56  ;;  %v11546_v56 = vld [vmem:[%s23429_s20 + $0x1f8] sm:$0xff] }
0x131b   : > { %11787 = vmatprep.mubr.f32.mxu0 %v11548_v46  ;;  %15579 = vmatpush1.bf16.msra.mxu0 %v15578_v1  ;;  %v11545_v46 = vld [vmem:[%s23429_s20 + $0x1f0] sm:$0xff]  ;;  %v11550_v1 = vld [vmem:[%s23429_s20 + $0x218] sm:$0xff] }
0x131e   : > { %11788 = vmatmul.mubr.f32.gmra.mrb[108].mxu0 %v11547_v35  ;;  %v11549_v35 = vld [vmem:[%s23429_s20 + $0x210] sm:$0xff] }
0x131f   : > { %11792 = vmatprep.mubr.f32.mxu0 %v11552_v57  ;;  %v11554_v57 = vld [vmem:[%s23429_s20 + $0x238] sm:$0xff] }
0x1322   : > { %11793 = vmatmul.mubr.f32.gmra.mrb[110].mxu0 %v11551_v44  ;;  %v11553_v44 = vld [vmem:[%s23429_s20 + $0x230] sm:$0xff] }
0x1323   : > { %11797 = vmatprep.mubr.f32.mxu0 %v11556_v13  ;;  %v11558_v13 = vld [vmem:[%s23429_s20 + $0x258] sm:$0xff] }
0x1326   : > { %11798 = vmatmul.mubr.f32.gmra.mrb[112].mxu0 %v11555_v47  ;;  %v11557_v47 = vld [vmem:[%s23429_s20 + $0x250] sm:$0xff] }
0x1327   : > { %11802 = vmatprep.mubr.f32.mxu0 %v11560_v30  ;;  %v11562_v30 = vld [vmem:[%s23429_s20 + $0x278] sm:$0xff] }
0x132a   : > { %11803 = vmatmul.mubr.f32.gmra.mrb[114].mxu0 %v11559_v16  ;;  %v11561_v16 = vld [vmem:[%s23429_s20 + $0x270] sm:$0xff] }
0x132b   : > { %11807 = vmatprep.mubr.f32.mxu0 %v11564_v34  ;;  %v11566_v34 = vld [vmem:[%s23429_s20 + $0x298] sm:$0xff] }
0x132e   : > { %11808 = vmatmul.mubr.f32.gmra.mrb[116].mxu0 %v11563_v4  ;;  %v11565_v4 = vld [vmem:[%s23429_s20 + $0x290] sm:$0xff] }
0x132f   : > { %11812 = vmatprep.mubr.f32.mxu0 %v11568_v51  ;;  %v11570_v51 = vld [vmem:[%s23429_s20 + $0x2b8] sm:$0xff] }
0x1332   : > { %11813 = vmatmul.mubr.f32.gmra.mrb[118].mxu0 %v11567_v11  ;;  %v11569_v11 = vld [vmem:[%s23429_s20 + $0x2b0] sm:$0xff] }
0x1333   : > { %11817 = vmatprep.mubr.f32.mxu0 %v11572_v61  ;;  %v11574_v61 = vld [vmem:[%s23429_s20 + $0x2d8] sm:$0xff] }
0x1336   : > { %11818 = vmatmul.mubr.f32.gmra.mrb[120].mxu0 %v11571_v58  ;;  %v11573_v58 = vld [vmem:[%s23429_s20 + $0x2d0] sm:$0xff] }
0x1337   : > { %11822 = vmatprep.mubr.f32.mxu0 %v11576_v28  ;;  %v11578_v28 = vld [vmem:[%s23429_s20 + $0x2f8] sm:$0xff] }
0x133a   : > { %11823 = vmatmul.mubr.f32.gmra.mrb[122].mxu0 %v11575_v24  ;;  %v11577_v24 = vld [vmem:[%s23429_s20 + $0x2f0] sm:$0xff] }
0x133b   : > { %11827 = vmatprep.mubr.f32.mxu0 %v11580_v37  ;;  %v11582_v37 = vld [vmem:[%s23429_s20 + $0x318] sm:$0xff] }
0x133e   : > { %11828 = vmatmul.mubr.f32.gmra.mrb[124].mxu0 %v11579_v19  ;;  %v11581_v19 = vld [vmem:[%s23429_s20 + $0x310] sm:$0xff] }
0x133f   : > { %11832 = vmatprep.mubr.f32.mxu0 %v11584_v63  ;;  %v11586_v63 = vld [vmem:[%s23429_s20 + $0x338] sm:$0xff] }
0x1342   : > { %11833 = vmatmul.mubr.f32.gmra.mrb[126].mxu0 %v11583_v25  ;;  %v11585_v25 = vld [vmem:[%s23429_s20 + $0x330] sm:$0xff] }
0x1343   : > { %11837 = vmatprep.mubr.f32.mxu0 %v11588_v17  ;;  %v11590_v17 = vld [vmem:[%s23429_s20 + $0x358] sm:$0xff] }
0x1346   : > { %11838 = vmatmul.mubr.f32.gmra.mrb[128].mxu0 %v11587_v5  ;;  %v11589_v5 = vld [vmem:[%s23429_s20 + $0x350] sm:$0xff] }
0x1347   : > { %11842 = vmatprep.mubr.f32.mxu0 %v11592_v12  ;;  %v11594_v12 = vld [vmem:[%s23429_s20 + $0x378] sm:$0xff] }
0x134a   : > { %11843 = vmatmul.mubr.f32.gmra.mrb[130].mxu0 %v11591_v36  ;;  %v11593_v36 = vld [vmem:[%s23429_s20 + $0x370] sm:$0xff] }
0x134b   : > { %11847 = vmatprep.mubr.f32.mxu0 %v11596_v10  ;;  %v11598_v10 = vld [vmem:[%s23429_s20 + $0x398] sm:$0xff] }
0x134e   : > { %11848 = vmatmul.mubr.f32.gmra.mrb[132].mxu0 %v11595_v41  ;;  %v11597_v41 = vld [vmem:[%s23429_s20 + $0x390] sm:$0xff] }
0x134f   : > { %11852 = vmatprep.mubr.f32.mxu0 %v11600_v50  ;;  %v11602_v50 = vld [vmem:[%s23429_s20 + $0x3b8] sm:$0xff] }
0x1352   : > { %11853 = vmatmul.mubr.f32.gmra.mrb[134].mxu0 %v11599_v53  ;;  %v11601_v53 = vld [vmem:[%s23429_s20 + $0x3b0] sm:$0xff] }
0x1353   : > { %11857 = vmatprep.mubr.f32.mxu0 %v11604_v52  ;;  %v11606_v52 = vld [vmem:[%s23429_s20 + $0x3d8] sm:$0xff] }
0x1356   : > { %11858 = vmatmul.mubr.f32.gmra.mrb[136].mxu0 %v11603_v42  ;;  %v11605_v42 = vld [vmem:[%s23429_s20 + $0x3d0] sm:$0xff] }
0x1357   : > { %11862 = vmatprep.mubr.f32.mxu0 %v11608_v43  ;;  %v11610_v43 = vld [vmem:[%s23429_s20 + $0x3f8] sm:$0xff] }
0x135a   : > { %11863 = vmatmul.mubr.f32.gmra.mrb[138].mxu0 %v11607_v62  ;;  %v11609_v62 = vld [vmem:[%s23429_s20 + $0x3f0] sm:$0xff] }
0x135b   : > { %11932 = vmatprep.mubr.f32.mxu0 %v11486_v0  ;;  %v11611_v0 = vld [vmem:[%s23430_s21] sm:$0xff] }
0x135e   : > { %11933 = vmatmul.mubr.f32.vlgmr.msra.gmra.mrb[76].mxu0 %v11485_v9 }
0x135f   : > { %11937 = vmatprep.mubr.f32.mxu0 %v11490_v2 }
0x1362   : > { %11938 = vmatmul.mubr.f32.gmra.mrb[78].mxu0 %v11489_v29  ;;  %v11612_v29 = vld [vmem:[%s23430_s21 + $0x8] sm:$0xff] }
0x1363   : > { %11942 = vmatprep.mubr.f32.mxu0 %v11494_v31 }
0x1366   : > { %11943 = vmatmul.mubr.f32.gmra.mrb[80].mxu0 %v11493_v15 }
0x1367   : > { %11947 = vmatprep.mubr.f32.mxu0 %v11498_v49  ;;  %v12126_v49 = vld [vmem:[%s23431_s22 + $0x8] sm:$0xff] }
0x1368   : > { %12201 = vmatprep.mubr.f32.mxu1 %v12126_v49  ;;  %v11624_v49 = vld [vmem:[%s23430_s21 + $0x68] sm:$0xff] }
0x136a   : > { %11948 = vmatmul.mubr.f32.gmra.mrb[82].mxu0 %v11497_v38 }
0x136b   : > { %11952 = vmatprep.mubr.f32.mxu0 %v11502_v6 }
0x136e   : > { %11953 = vmatmul.mubr.f32.gmra.mrb[84].mxu0 %v11501_v8 }
0x136f   : > { %11957 = vmatprep.mubr.f32.mxu0 %v11506_v33 }
0x1372   : > { %11958 = vmatmul.mubr.f32.gmra.mrb[86].mxu0 %v11505_v45  ;;  %v11613_v45 = vld [vmem:[%s23430_s21 + $0x10] sm:$0xff] }
0x1373   : > { %11962 = vmatprep.mubr.f32.mxu0 %v11510_v20 }
0x1376   : > { %11963 = vmatmul.mubr.f32.gmra.mrb[88].mxu0 %v11509_v21 }
0x1377   : > { %11967 = vmatprep.mubr.f32.mxu0 %v11514_v59 }
0x137a   : > { %11968 = vmatmul.mubr.f32.gmra.mrb[90].mxu0 %v11513_v48  ;;  %v11614_v48 = vld [vmem:[%s23430_s21 + $0x18] sm:$0xff] }
0x137b   : > { %11972 = vmatprep.mubr.f32.mxu0 %v11518_v40 }
0x137e   : > { %11973 = vmatmul.mubr.f32.gmra.mrb[92].mxu0 %v11517_v26 }
0x137f   : > { %11977 = vmatprep.mubr.f32.mxu0 %v11522_v27 }
0x1382   : > { %11978 = vmatmul.mubr.f32.gmra.mrb[94].mxu0 %v11521_v54 }
0x1383   : > { %11982 = vmatprep.mubr.f32.mxu0 %v11526_v55 }
0x1386   : > { %11983 = vmatmul.mubr.f32.gmra.mrb[96].mxu0 %v11525_v7 }
0x1387   : > { %11987 = vmatprep.mubr.f32.mxu0 %v11530_v3  ;;  %v11615_v3 = vld [vmem:[%s23430_s21 + $0x20] sm:$0xff] }
0x138a   : > { %11988 = vmatmul.mubr.f32.gmra.mrb[98].mxu0 %v11529_v18 }
0x138b   : > { %11992 = vmatprep.mubr.f32.mxu0 %v11534_v23 }
0x138e   : > { %11993 = vmatmul.mubr.f32.gmra.mrb[100].mxu0 %v11533_v14 }
0x138f   : > { %11997 = vmatprep.mubr.f32.mxu0 %v11538_v60  ;;  %v11616_v60 = vld [vmem:[%s23430_s21 + $0x28] sm:$0xff] }
0x1392   : > { %11998 = vmatmul.mubr.f32.gmra.mrb[102].mxu0 %v11537_v22 }
0x1393   : > { %12002 = vmatprep.mubr.f32.mxu0 %v11542_v39 }
0x1396   : > { %12003 = vmatmul.mubr.f32.gmra.mrb[104].mxu0 %v11541_v32 }
0x1397   : > { %12007 = vmatprep.mubr.f32.mxu0 %v11546_v56 }
0x139a   : > { %12008 = vmatmul.mubr.f32.gmra.mrb[106].mxu0 %v11545_v46 }
0x139b   : > { %12012 = vmatprep.mubr.f32.mxu0 %v11550_v1 }
0x139e   : > { %12013 = vmatmul.mubr.f32.gmra.mrb[108].mxu0 %v11549_v35  ;;  %v11617_v35 = vld [vmem:[%s23430_s21 + $0x30] sm:$0xff] }
0x139f   : > { %12017 = vmatprep.mubr.f32.mxu0 %v11554_v57 }
0x13a2   : > { %12018 = vmatmul.mubr.f32.gmra.mrb[110].mxu0 %v11553_v44 }
0x13a3   : > { %12022 = vmatprep.mubr.f32.mxu0 %v11558_v13 }
0x13a6   : > { %12023 = vmatmul.mubr.f32.gmra.mrb[112].mxu0 %v11557_v47  ;;  %v11618_v47 = vld [vmem:[%s23430_s21 + $0x38] sm:$0xff] }
0x13a7   : > { %12027 = vmatprep.mubr.f32.mxu0 %v11562_v30 }
0x13aa   : > { %12028 = vmatmul.mubr.f32.gmra.mrb[114].mxu0 %v11561_v16 }
0x13ab   : > { %12032 = vmatprep.mubr.f32.mxu0 %v11566_v34 }
0x13ae   : > { %12033 = vmatmul.mubr.f32.gmra.mrb[116].mxu0 %v11565_v4 }
0x13af   : > { %12037 = vmatprep.mubr.f32.mxu0 %v11570_v51 }
0x13b2   : > { %12038 = vmatmul.mubr.f32.gmra.mrb[118].mxu0 %v11569_v11 }
0x13b3   : > { %12042 = vmatprep.mubr.f32.mxu0 %v11574_v61  ;;  %v11619_v61 = vld [vmem:[%s23430_s21 + $0x40] sm:$0xff] }
0x13b6   : > { %12043 = vmatmul.mubr.f32.gmra.mrb[120].mxu0 %v11573_v58 }
0x13b7   : > { %12047 = vmatprep.mubr.f32.mxu0 %v11578_v28 }
0x13ba   : > { %12048 = vmatmul.mubr.f32.gmra.mrb[122].mxu0 %v11577_v24 }
0x13bb   : > { %12052 = vmatprep.mubr.f32.mxu0 %v11582_v37  ;;  %v11620_v37 = vld [vmem:[%s23430_s21 + $0x48] sm:$0xff] }
0x13be   : > { %12053 = vmatmul.mubr.f32.gmra.mrb[124].mxu0 %v11581_v19 }
0x13bf   : > { %12057 = vmatprep.mubr.f32.mxu0 %v11586_v63 }
0x13c2   : > { %12058 = vmatmul.mubr.f32.gmra.mrb[126].mxu0 %v11585_v25 }
0x13c3   : > { %12062 = vmatprep.mubr.f32.mxu0 %v11590_v17 }
0x13c6   : > { %12063 = vmatmul.mubr.f32.gmra.mrb[128].mxu0 %v11589_v5 }
0x13c7   : > { %12067 = vmatprep.mubr.f32.mxu0 %v11594_v12 }
0x13ca   : > { %12068 = vmatmul.mubr.f32.gmra.mrb[130].mxu0 %v11593_v36  ;;  %v11621_v36 = vld [vmem:[%s23430_s21 + $0x50] sm:$0xff] }
0x13cb   : > { %12072 = vmatprep.mubr.f32.mxu0 %v11598_v10 }
0x13ce   : > { %12073 = vmatmul.mubr.f32.gmra.mrb[132].mxu0 %v11597_v41 }
0x13cf   : > { %12077 = vmatprep.mubr.f32.mxu0 %v11602_v50 }
0x13d2   : > { %12078 = vmatmul.mubr.f32.gmra.mrb[134].mxu0 %v11601_v53  ;;  %v11622_v53 = vld [vmem:[%s23430_s21 + $0x58] sm:$0xff] }
0x13d3   : > { %12082 = vmatprep.mubr.f32.mxu0 %v11606_v52 }
0x13d6   : > { %12083 = vmatmul.mubr.f32.gmra.mrb[136].mxu0 %v11605_v42 }
0x13d7   : > { %12087 = vmatprep.mubr.f32.mxu0 %v11610_v43 }
0x13da   : > { %12088 = vmatmul.mubr.f32.gmra.mrb[138].mxu0 %v11609_v62 }
0x1431   : > { %v11934_v9 = vpop.f32.mrb[76].mxu0 }
0x1432   : > { %v11936_v2 = vpop.f32.mrb[77].mxu0  ;;  %v15624_v31 = vadd.f32 %v11934_v9, %v11611_v0 }
0x1433   : > { %v11623_v2 = vld [vmem:[%s23430_s21 + $0x60] sm:$0xff] }
0x1434   : > { %v12093_v8 = vmax.f32 %v15624_v31, 0.0 }
0x1435   : > { %v11939_v15 = vpop.f32.mrb[78].mxu0 }
0x1436   : > { %v15625_v38 = vadd.f32 %v11939_v15, %v11612_v29  ;;  %v11941_v6 = vpop.f32.mrb[79].mxu0 }
0x1438   : > { %v12094_v33 = vmax.f32 %v15625_v38, 0.0 }
0x1439   : > { %v11944_v20 = vpop.f32.mrb[80].mxu0 }
0x143a   : > { %v23255_v21 = vpack.c.bf16 %v12094_v33, %v12093_v8  ;;  %v11946_v59 = vpop.f32.mrb[81].mxu0  ;;  %v15626_v40 = vadd.f32 %v11944_v20, %v11613_v45 }
0x143b   : > { %v11625_v59 = vld [vmem:[%s23430_s21 + $0x70] sm:$0xff] }
0x143c   : > { %v12095_v55 = vmax.f32 %v15626_v40, 0.0 }
0x143d   : > { %v11949_v26 = vpop.f32.mrb[82].mxu0 }
0x143e   : > { %v15627_v27 = vadd.f32 %v11949_v26, %v11614_v48  ;;  %v11951_v54 = vpop.f32.mrb[83].mxu0 }
0x1440   : > { %v12096_v7 = vmax.f32 %v15627_v27, 0.0  ;;  %v11626_v27 = vld [vmem:[%s23430_s21 + $0x78] sm:$0xff] }
0x1441   : > { %v11954_v18 = vpop.f32.mrb[84].mxu0 }
0x1442   : > { %v23263_v23 = vpack.c.bf16 %v12096_v7, %v12095_v55  ;;  %v11956_v14 = vpop.f32.mrb[85].mxu0  ;;  %v15628_v22 = vadd.f32 %v11954_v18, %v11615_v3 }
0x1444   : > { %v12097_v46 = vmax.f32 %v15628_v22, 0.0 }
0x1445   : > { %v11959_v39 = vpop.f32.mrb[86].mxu0 }
0x1446   : > { %v15629_v32 = vadd.f32 %v11959_v39, %v11616_v60  ;;  %v11961_v56 = vpop.f32.mrb[87].mxu0  ;;  %v11627_v60 = vld [vmem:[%s23430_s21 + $0x80] sm:$0xff] }
0x1447   : > { %v11628_v56 = vld [vmem:[%s23430_s21 + $0x88] sm:$0xff] }
0x1448   : > { %v12098_v1 = vmax.f32 %v15629_v32, 0.0 }
0x1449   : > { %v11964_v57 = vpop.f32.mrb[88].mxu0 }
0x144a   : > { %v23271_v44 = vpack.c.bf16 %v12098_v1, %v12097_v46  ;;  %v11966_v13 = vpop.f32.mrb[89].mxu0  ;;  %v15630_v30 = vadd.f32 %v11964_v57, %v11617_v35 }
0x144c   : > { %v12099_v51 = vmax.f32 %v15630_v30, 0.0  ;;  %v11629_v30 = vld [vmem:[%s23430_s21 + $0x90] sm:$0xff] }
0x144d   : > { %v11969_v16 = vpop.f32.mrb[90].mxu0 }
0x144e   : > { %v15631_v34 = vadd.f32 %v11969_v16, %v11618_v47  ;;  %v11971_v4 = vpop.f32.mrb[91].mxu0 }
0x1450   : > { %v12100_v11 = vmax.f32 %v15631_v34, 0.0 }
0x1451   : > { %v11974_v58 = vpop.f32.mrb[92].mxu0 }
0x1452   : > { %v23279_v28 = vpack.c.bf16 %v12100_v11, %v12099_v51  ;;  %v11976_v24 = vpop.f32.mrb[93].mxu0  ;;  %v15632_v19 = vadd.f32 %v11974_v58, %v11619_v61  ;;  %v11630_v51 = vld [vmem:[%s23430_s21 + $0x98] sm:$0xff] }
0x1454   : > { %v12101_v5 = vmax.f32 %v15632_v19, 0.0 }
0x1455   : > { %v11979_v63 = vpop.f32.mrb[94].mxu0 }
0x1456   : > { %v15633_v25 = vadd.f32 %v11979_v63, %v11620_v37  ;;  %v11981_v17 = vpop.f32.mrb[95].mxu0  ;;  %v11631_v63 = vld [vmem:[%s23430_s21 + $0xa0] sm:$0xff] }
0x1458   : > { %v12102_v12 = vmax.f32 %v15633_v25, 0.0 }
0x1459   : > { %v11984_v10 = vpop.f32.mrb[96].mxu0 }
0x145a   : > { %v23287_v41 = vpack.c.bf16 %v12102_v12, %v12101_v5  ;;  %v11986_v50 = vpop.f32.mrb[97].mxu0  ;;  %v15634_v52 = vadd.f32 %v11984_v10, %v11621_v36  ;;  %v11632_v12 = vld [vmem:[%s23430_s21 + $0xa8] sm:$0xff] }
0x145c   : > { %v12103_v0 = vmax.f32 %v15634_v52, 0.0 }
0x145d   : > { %v11989_v42 = vpop.f32.mrb[98].mxu0 }
0x145e   : > { %v15635_v43 = vadd.f32 %v11989_v42, %v11622_v53  ;;  %v11991_v62 = vpop.f32.mrb[99].mxu0  ;;  %v11633_v42 = vld [vmem:[%s23430_s21 + $0xb0] sm:$0xff] }
0x1460   : > { %v12104_v9 = vmax.f32 %v15635_v43, 0.0 }
0x1461   : > { %v11994_v29 = vpop.f32.mrb[100].mxu0 }
0x1462   : > { %v23295_v31 = vpack.c.bf16 %v12104_v9, %v12103_v0  ;;  %v11996_v15 = vpop.f32.mrb[101].mxu0  ;;  %v15636_v38 = vadd.f32 %v11994_v29, %v11623_v2  ;;  %v11634_v9 = vld [vmem:[%s23430_s21 + $0xb8] sm:$0xff] }
0x1464   : > { %v12105_v45 = vmax.f32 %v15636_v38, 0.0 }
0x1465   : > { %v11999_v6 = vpop.f32.mrb[102].mxu0 }
0x1466   : > { %v15637_v8 = vadd.f32 %v11999_v6, %v11624_v49  ;;  %v12001_v33 = vpop.f32.mrb[103].mxu0  ;;  %v11635_v6 = vld [vmem:[%s23430_s21 + $0xc0] sm:$0xff] }
0x1468   : > { %v12106_v20 = vmax.f32 %v15637_v8, 0.0 }
0x1469   : > { %v12004_v48 = vpop.f32.mrb[104].mxu0 }
0x146a   : > { %v23303_v40 = vpack.c.bf16 %v12106_v20, %v12105_v45  ;;  %v12006_v26 = vpop.f32.mrb[105].mxu0  ;;  %v15638_v54 = vadd.f32 %v12004_v48, %v11625_v59  ;;  %v11636_v20 = vld [vmem:[%s23430_s21 + $0xc8] sm:$0xff] }
0x146c   : > { %v12107_v18 = vmax.f32 %v15638_v54, 0.0 }
0x146d   : > { %v12009_v55 = vpop.f32.mrb[106].mxu0 }
0x146e   : > { %v15639_v7 = vadd.f32 %v12009_v55, %v11626_v27  ;;  %v12011_v3 = vpop.f32.mrb[107].mxu0  ;;  %v11637_v55 = vld [vmem:[%s23430_s21 + $0xd0] sm:$0xff] }
0x1470   : > { %v12108_v14 = vmax.f32 %v15639_v7, 0.0 }
0x1471   : > { %v12014_v22 = vpop.f32.mrb[108].mxu0 }
0x1472   : > { %v23311_v39 = vpack.c.bf16 %v12108_v14, %v12107_v18  ;;  %v12016_v32 = vpop.f32.mrb[109].mxu0  ;;  %v15640_v46 = vadd.f32 %v12014_v22, %v11627_v60  ;;  %v11638_v14 = vld [vmem:[%s23430_s21 + $0xd8] sm:$0xff] }
0x1474   : > { %v12109_v13 = vmax.f32 %v15640_v46, 0.0 }
0x1475   : > { %v12019_v1 = vpop.f32.mrb[110].mxu0 }
0x1476   : > { %v15641_v35 = vadd.f32 %v12019_v1, %v11628_v56  ;;  %v12021_v57 = vpop.f32.mrb[111].mxu0  ;;  %v11639_v1 = vld [vmem:[%s23430_s21 + $0xe0] sm:$0xff] }
0x1478   : > { %v12110_v47 = vmax.f32 %v15641_v35, 0.0 }
0x1479   : > { %v12024_v16 = vpop.f32.mrb[112].mxu0 }
0x147a   : > { %v15580_v34 = vpack.c.bf16 %v12110_v47, %v12109_v13  ;;  %v12026_v4 = vpop.f32.mrb[113].mxu0  ;;  %v15642_v11 = vadd.f32 %v12024_v16, %v11629_v30  ;;  %v11640_v47 = vld [vmem:[%s23430_s21 + $0xe8] sm:$0xff] }
0x147c   : > { %15581 = vmatprep.subr.bf16.mxu1 %v15580_v34  ;;  %v12111_v37 = vmax.f32 %v15642_v11, 0.0  ;;  %v11641_v11 = vld [vmem:[%s23430_s21 + $0xf0] sm:$0xff] }
0x147d   : > { %v12029_v61 = vpop.f32.mrb[114].mxu0  ;;  %15583 = vmatpush3.bf16.msra.mxu1 %v23255_v21 }
0x147e   : > { %v15643_v58 = vadd.f32 %v12029_v61, %v11630_v51  ;;  %v12031_v24 = vpop.f32.mrb[115].mxu0 }
0x1480   : > { %v12112_v19 = vmax.f32 %v15643_v58, 0.0 }
0x1481   : > { %v12034_v25 = vpop.f32.mrb[116].mxu0 }
0x1482   : > { %v15584_v17 = vpack.c.bf16 %v12112_v19, %v12111_v37  ;;  %v12036_v5 = vpop.f32.mrb[117].mxu0  ;;  %v15644_v36 = vadd.f32 %v12034_v25, %v11631_v63  ;;  %v11642_v37 = vld [vmem:[%s23430_s21 + $0xf8] sm:$0xff] }
0x1484   : > { %15585 = vmatprep.subr.bf16.mxu1 %v15584_v17  ;;  %v12113_v53 = vmax.f32 %v15644_v36, 0.0  ;;  %v12125_v36 = vld [vmem:[%s23431_s22] sm:$0xff] }
0x1485   : > { %v12039_v10 = vpop.f32.mrb[118].mxu0  ;;  %15587 = vmatpush3.bf16.msra.mxu1 %v23263_v23 }
0x1486   : > { %v15645_v21 = vadd.f32 %v12039_v10, %v11632_v12  ;;  %v12041_v50 = vpop.f32.mrb[119].mxu0  ;;  %v12128_v10 = vld [vmem:[%s23431_s22 + $0x18] sm:$0xff] }
0x1487   : > { %v12132_v50 = vld [vmem:[%s23431_s22 + $0x38] sm:$0xf] }
0x1488   : > { %v12114_v52 = vmax.f32 %v15645_v21, 0.0  ;;  %v12130_v21 = vld [vmem:[%s23431_s22 + $0x28] sm:$0xff] }
0x1489   : > { %v12044_v43 = vpop.f32.mrb[120].mxu0 }
0x148a   : > { %v15588_v62 = vpack.c.bf16 %v12114_v52, %v12113_v53  ;;  %v12046_v0 = vpop.f32.mrb[121].mxu0  ;;  %v15646_v2 = vadd.f32 %v12044_v43, %v11633_v42  ;;  %v12131_v53 = vld [vmem:[%s23431_s22 + $0x30] sm:$0xf]  ;;  %v12133_v42 = vld [vmem:[%s23432_s23] sm:$0xff] }
0x148c   : > { %15589 = vmatprep.subr.bf16.mxu1 %v15588_v62  ;;  %v12115_v49 = vmax.f32 %v15646_v2, 0.0  ;;  %v12134_v2 = vld [vmem:[%s23432_s23 + $0x8] sm:$0xff] }
0x148d   : > { %v12049_v29 = vpop.f32.mrb[122].mxu0  ;;  %15591 = vmatpush3.bf16.msra.mxu1 %v23271_v44 }
0x148e   : > { %v15647_v23 = vadd.f32 %v12049_v29, %v11634_v9  ;;  %v12051_v15 = vpop.f32.mrb[123].mxu0 }
0x1490   : > { %v12116_v38 = vmax.f32 %v15647_v23, 0.0 }
0x1491   : > { %v12054_v8 = vpop.f32.mrb[124].mxu0 }
0x1492   : > { %v15592_v33 = vpack.c.bf16 %v12116_v38, %v12115_v49  ;;  %v12056_v45 = vpop.f32.mrb[125].mxu0  ;;  %v15648_v59 = vadd.f32 %v12054_v8, %v11635_v6  ;;  %v12135_v38 = vld [vmem:[%s23432_s23 + $0x10] sm:$0xff] }
0x1494   : > { %15593 = vmatprep.subr.bf16.mxu1 %v15592_v33  ;;  %v12117_v27 = vmax.f32 %v15648_v59, 0.0 }
0x1495   : > { %v12059_v48 = vpop.f32.mrb[126].mxu0  ;;  %15595 = vmatpush3.bf16.msra.mxu1 %v23279_v28 }
0x1496   : > { %v15649_v44 = vadd.f32 %v12059_v48, %v11636_v20  ;;  %v12061_v26 = vpop.f32.mrb[127].mxu0  ;;  %v12136_v20 = vld [vmem:[%s23432_s23 + $0x18] sm:$0xf] }
0x1498   : > { %v12118_v54 = vmax.f32 %v15649_v44, 0.0 }
0x1499   : > { %v12064_v7 = vpop.f32.mrb[128].mxu0 }
0x149a   : > { %v15596_v3 = vpack.c.bf16 %v12118_v54, %v12117_v27  ;;  %v12066_v18 = vpop.f32.mrb[129].mxu0  ;;  %v15650_v60 = vadd.f32 %v12064_v7, %v11637_v55 }
0x149c   : > { %15597 = vmatprep.subr.bf16.mxu1 %v15596_v3  ;;  %v12119_v56 = vmax.f32 %v15650_v60, 0.0 }
0x149d   : > { %v12069_v22 = vpop.f32.mrb[130].mxu0  ;;  %15599 = vmatpush3.bf16.msra.mxu1 %v23287_v41 }
0x149e   : > { %v15651_v28 = vadd.f32 %v12069_v22, %v11638_v14  ;;  %v12071_v32 = vpop.f32.mrb[131].mxu0 }
0x14a0   : > { %v12120_v46 = vmax.f32 %v15651_v28, 0.0 }
0x14a1   : > { %v12074_v35 = vpop.f32.mrb[132].mxu0 }
0x14a2   : > { %v15600_v57 = vpack.c.bf16 %v12120_v46, %v12119_v56  ;;  %v12076_v13 = vpop.f32.mrb[133].mxu0  ;;  %v15652_v30 = vadd.f32 %v12074_v35, %v11639_v1 }
0x14a4   : > { %15601 = vmatprep.subr.bf16.mxu1 %v15600_v57  ;;  %v12121_v4 = vmax.f32 %v15652_v30, 0.0 }
0x14a5   : > { %v12079_v16 = vpop.f32.mrb[134].mxu0  ;;  %15603 = vmatpush3.bf16.msra.mxu1 %v23295_v31 }
0x14a6   : > { %v15653_v41 = vadd.f32 %v12079_v16, %v11640_v47  ;;  %v12081_v34 = vpop.f32.mrb[135].mxu0 }
0x14a8   : > { %v12122_v51 = vmax.f32 %v15653_v41, 0.0 }
0x14a9   : > { %v12084_v61 = vpop.f32.mrb[136].mxu0 }
0x14aa   : > { %v15604_v58 = vpack.c.bf16 %v12122_v51, %v12121_v4  ;;  %v12086_v24 = vpop.f32.mrb[137].mxu0  ;;  %v15654_v19 = vadd.f32 %v12084_v61, %v11641_v11 }
0x14ac   : > { %15605 = vmatprep.subr.bf16.mxu1 %v15604_v58  ;;  %v12123_v17 = vmax.f32 %v15654_v19, 0.0 }
0x14ad   : > { %v12089_v63 = vpop.f32.mrb[138].mxu0  ;;  %15607 = vmatpush3.bf16.msra.mxu1 %v23303_v40  ;;  %v12127_v40 = vld [vmem:[%s23431_s22 + $0x10] sm:$0xff] }
0x14ae   : > { %v15655_v31 = vadd.f32 %v12089_v63, %v11642_v37  ;;  %v12091_v25 = vpop.f32.mrb[139].mxu0 }
0x14b0   : > { %v12124_v5 = vmax.f32 %v15655_v31, 0.0 }
0x14b2   : > { %v15608_v12 = vpack.c.bf16 %v12124_v5, %v12123_v17 }
0x14b4   : > { %15609 = vmatprep.subr.bf16.mxu1 %v15608_v12 }
0x14b5   : > { %15611 = vmatpush3.bf16.msra.mxu1 %v23311_v39  ;;  %v12129_v39 = vld [vmem:[%s23431_s22 + $0x20] sm:$0xff] }
0x14b8   : > { %12202 = vmatmul.mubr.f32.vlgmr.msra.gmra.mrb[196].mxu1 %v12125_v36 }
0x14b9   : > { %12206 = vmatprep.mubr.f32.mxu1 %v12128_v10 }
0x14bc   : > { %12207 = vmatmul.mubr.f32.gmra.mrb[198].mxu1 %v12127_v40 }
0x14bd   : > { %12211 = vmatprep.mubr.f32.mxu1 %v12130_v21 }
0x14c0   : > { %12212 = vmatmul.mubr.f32.gmra.mrb[200].mxu1 %v12129_v39 }
0x14c1   : > { %12216 = vmatprep.mubr.f32.mxu1 %v12132_v50 }
0x14c4   : > { %12217 = vmatmul.mubr.f32.gmra.mrb[202].mxu1 %v12131_v53 }
0x158b   : > { %v13997_v52 = vpop.f32.mrb[196].mxu1 }
0x158c   : > { %v13998_v43 = vpop.f32.mrb[197].mxu1 }
0x158d   : > { %v13999_v62 = vadd.f32 %v13998_v43, %v13997_v52 }
0x158f   : > { %v12204_v0 = vadd.f32 %v13999_v62, %v12133_v42  ;;  %v14000_v9 = vpop.f32.mrb[198].mxu1 }
0x1590   : > { %v14001_v29 = vpop.f32.mrb[199].mxu1 }
0x1591   : > { %12223 = vst.msk [vmem:[%s737_s30] sm:$0xff] %vm12222_vm3, %v12204_v0  ;;  %v14002_v23 = vadd.f32 %v14001_v29, %v14000_v9 }
0x1593   : > { %v12209_v15 = vadd.f32 %v14002_v23, %v12134_v2  ;;  %v14003_v49 = vpop.f32.mrb[200].mxu1 }
0x1594   : > { %v14004_v6 = vpop.f32.mrb[201].mxu1 }
0x1595   : > { %12224 = vst.msk [vmem:[%s737_s30 + $0x8] sm:$0xff] %vm12222_vm3, %v12209_v15  ;;  %v14005_v8 = vadd.f32 %v14004_v6, %v14003_v49 }
0x1597   : > { %v12214_v33 = vadd.f32 %v14005_v8, %v12135_v38  ;;  %v14006_v45 = vpop.f32.mrb[202].mxu1 }
0x1598   : > { %v14007_v59 = vpop.f32.mrb[203].mxu1 }
0x1599   : > { %12225 = vst.msk [vmem:[%s737_s30 + $0x10] sm:$0xff] %vm12222_vm3, %v12214_v33  ;;  %v14008_v48 = vadd.f32 %v14007_v59, %v14006_v45 }
0x159b   : > { %v12219_v44 = vadd.f32 %v14008_v48, %v12136_v20 }
0x159d   : > { %12227 = vst.msk [vmem:[%s737_s30 + $0x18] sm:$0xf] %vm12226_vm4, %v12219_v44 }
0x159e PF: > { %s34_s5 = sadd.s32 1, %s16255_s5  }
0x159f   : > { %p31_p4 = scmp.ge.s32.totalorder %s34_s5, 4  }
0x15a1   :  { %33 = sbr.rel (!%p31_p4) target bundleno = 10 (0xa), region = 154 }

</bundles_post_ra>
